<compile_context>
chip_gen: v5e
topology: v5e:2x2
jax: 0.10.0
libtpu: 0.0.40
codegen_flags: <defaults>
</compile_context>

<pallas_src>
import jax
import jax.numpy as jnp
from jax.experimental import pallas as pl
from jax.experimental.pallas import tpu as pltpu


def _round_up(n: int, m: int) -> int:
    return ((n + m - 1) // m) * m


def _default_compute_dtype():
    """bf16 matmuls on v5e (bf16-native MXU; f32 matmul is multi-pass there)."""
    try:
        kind = jax.devices()[0].device_kind.lower()
    except Exception:
        return jnp.float32
    if "v5 lite" in kind or "v5e" in kind or "v5litepod" in kind:
        return jnp.bfloat16
    return jnp.float32


def _choose_tile(B: int) -> int:
    if B <= 128:
        return _round_up(max(B, 8), 8)
    # Keep >= 2 grid steps (megacore / v7x dual-TC both participate); grow the
    # tile for large batches to amortize per-step fixed overhead.
    tile = 128
    for cand in (512, 256):
        if B >= 2 * cand:
            tile = cand
            break
    return tile


def _make_qfn_kernel(compute_dtype, out_via_vpu):
    mm_precision = (jax.lax.Precision.HIGHEST
                    if jnp.dtype(compute_dtype) == jnp.dtype(jnp.float32)
                    else jax.lax.Precision.DEFAULT)

    def kernel(obs_ref, act_ref, w1o_ref, w1a_ref, b1_ref, w2_ref, b2_ref,
               w3_ref, b3_ref, o_ref):
        # Layer 1: fused concat -> two MXU dots, f32 accumulation + f32 epilogue.
        h = jnp.dot(obs_ref[...].astype(compute_dtype), w1o_ref[...],
                    preferred_element_type=jnp.float32, precision=mm_precision)
        h = h + jnp.dot(act_ref[...].astype(compute_dtype), w1a_ref[...],
                        preferred_element_type=jnp.float32, precision=mm_precision)
        h = jnp.maximum(h + b1_ref[...], 0.0)
        # Layer 2: Linear + ReLU.
        h = jnp.dot(h.astype(compute_dtype), w2_ref[...],
                    preferred_element_type=jnp.float32, precision=mm_precision)
        h = jnp.maximum(h + b2_ref[...], 0.0)
        # Layer 3 (output, no activation).
        if out_via_vpu:
            # out_dim == 1: VPU multiply + lane reduce (w3 kept in f32; MXU idle).
            q = jnp.sum(h * w3_ref[...], axis=-1, keepdims=True) + b3_ref[...]
        else:
            q = jnp.dot(h.astype(compute_dtype), w3_ref[...],
                        preferred_element_type=jnp.float32,
                        precision=mm_precision) + b3_ref[...]
        o_ref[...] = q.astype(o_ref.dtype)

    return kernel


def sacae_q_forward(obs, action, params, *, tile_b=None, compute_dtype=None):
    """Fused Q(obs, action) = MLP(concat([obs, action], -1)) forward.

    obs: [B, obs_dim], action: [B, act_dim] (same float dtype).
    params: w1 [obs_dim+act_dim, H], b1 [1, H], w2 [H, H], b2 [1, H],
            w3 [H, out_dim], b3 [1, out_dim].
    Returns [B, out_dim] in obs.dtype.
    """
    assert obs.dtype == action.dtype
    if compute_dtype is None:
        compute_dtype = _default_compute_dtype()

    B, obs_dim = obs.shape
    _, act_dim = action.shape
    hidden = params["w1"].shape[1]
    out_dim = params["w3"].shape[1]
    dtype = obs.dtype

    tile = tile_b if tile_b is not None else _choose_tile(B)
    tile = min(tile, _round_up(max(B, 8), 8))
    b_pad = _round_up(B, tile)
    grid = (b_pad // tile,)

    if b_pad != B:  # only for ragged batches; no-op on the common path
        pad = b_pad - B
        obs = jnp.pad(obs, ((0, pad), (0, 0)))
        action = jnp.pad(action, ((0, pad), (0, 0)))

    # Weight preparation: tiny tensors only (no batch-sized wrapper traffic).
    w1o = params["w1"][:obs_dim].astype(compute_dtype)
    w1a = params["w1"][obs_dim:].astype(compute_dtype)
    w2 = params["w2"].astype(compute_dtype)
    b1 = params["b1"].astype(jnp.float32)
    b2 = params["b2"].astype(jnp.float32)
    b3 = params["b3"].astype(jnp.float32)
    out_via_vpu = (out_dim == 1)
    if out_via_vpu:
        w3 = params["w3"].reshape(1, hidden).astype(jnp.float32)  # row form for VPU reduce
    else:
        w3 = params["w3"].astype(compute_dtype)

    # Explicit VMEM budget: double-buffered blocks + intermediate activations, 4x headroom.
    act_bytes = jnp.dtype(dtype).itemsize
    w_bytes = jnp.dtype(compute_dtype).itemsize
    per_block = (tile * (obs_dim + act_dim) * act_bytes
                 + (obs_dim + act_dim) * hidden * w_bytes
                 + hidden * hidden * w_bytes
                 + hidden * max(out_dim, 1) * 4
                 + (2 * hidden + out_dim) * 4
                 + tile * out_dim * 4)
    live = 2 * per_block + 3 * tile * hidden * 4
    vmem_limit = int(min(max(4 * live, 8 << 20), 48 << 20))

    out = pl.pallas_call(
        _make_qfn_kernel(compute_dtype, out_via_vpu),
        out_shape=jax.ShapeDtypeStruct((b_pad, out_dim), dtype),
        grid_spec=pltpu.PrefetchScalarGridSpec(
            num_scalar_prefetch=0,
            grid=grid,
            in_specs=[
                pl.BlockSpec((tile, obs_dim), lambda i: (i, 0)),     # obs tile
                pl.BlockSpec((tile, act_dim), lambda i: (i, 0)),     # action tile
                pl.BlockSpec((obs_dim, hidden), lambda i: (0, 0)),   # w1[:obs_dim] (grid-invariant)
                pl.BlockSpec((act_dim, hidden), lambda i: (0, 0)),   # w1[obs_dim:]
                pl.BlockSpec((1, hidden), lambda i: (0, 0)),         # b1
                pl.BlockSpec((hidden, hidden), lambda i: (0, 0)),    # w2
                pl.BlockSpec((1, hidden), lambda i: (0, 0)),         # b2
                pl.BlockSpec(w3.shape, lambda i: (0, 0)),            # w3 (row or [H, out])
                pl.BlockSpec((1, out_dim), lambda i: (0, 0)),        # b3
            ],
            out_specs=pl.BlockSpec((tile, out_dim), lambda i: (i, 0)),
        ),
        compiler_params=pltpu.CompilerParams(
            dimension_semantics=("parallel",),
            vmem_limit_bytes=vmem_limit,
        ),
    )(obs, action, w1o, w1a, b1, w2, b2, w3, b3)

    return out[:B] if b_pad != B else out


def init_params(key, in_dim, hidden_size=256, output_dim=1, dtype=jnp.float32):
    """Synthetic torch.nn.Linear-style init (uniform +-1/sqrt(fan_in))."""
    dims = [in_dim, hidden_size, hidden_size, output_dim]
    params = {}
    keys = jax.random.split(key, 6)
    for layer in range(3):
        fan_in = dims[layer]
        bound = 1.0 / (fan_in ** 0.5)
        params[f"w{layer + 1}"] = jax.random.uniform(
            keys[2 * layer], (dims[layer], dims[layer + 1]), dtype, -bound, bound)
        params[f"b{layer + 1}"] = jax.random.uniform(
            keys[2 * layer + 1], (1, dims[layer + 1]), dtype, -bound, bound)
    return params


def reference_forward(obs, action, params):
    hi = jax.lax.Precision.HIGHEST
    x = jnp.concatenate([obs, action], axis=-1)
    h = jnp.maximum(jnp.dot(x, params["w1"], precision=hi) + params["b1"], 0.0)
    h = jnp.maximum(jnp.dot(h, params["w2"], precision=hi) + params["b2"], 0.0)
    return jnp.dot(h, params["w3"], precision=hi) + params["b3"]


if __name__ == "__main__":
    key = jax.random.PRNGKey(0)
    k_obs, k_act, k_par = jax.random.split(key, 3)

    # Shapes consistent with SACAEQFunction: encoder features + action vector,
    # hidden_size=256 (module default), output_dim=1.
    batch, obs_dim, action_dim, hidden = 256, 50, 6, 256
    obs = jax.random.normal(k_obs, (batch, obs_dim), jnp.float32)
    action = jax.random.normal(k_act, (batch, action_dim), jnp.float32)
    params = init_params(k_par, obs_dim + action_dim, hidden_size=hidden, output_dim=1)

    ref = reference_forward(obs, action, params)

    # f32 path (HIGHEST-precision MXU dots -> matches the fp32 reference closely).
    out = jax.block_until_ready(
        sacae_q_forward(obs, action, params, compute_dtype=jnp.float32))
    assert out.shape == (batch, 1)
    assert jnp.allclose(out, ref, atol=1e-4, rtol=1e-4), "f32 kernel mismatch vs reference"

    # bf16-matmul / f32-accumulation fast path (default on v5e; layer 3 stays f32).
    out_bf16 = jax.block_until_ready(
        sacae_q_forward(obs, action, params, compute_dtype=jnp.bfloat16))
    assert out_bf16.shape == (batch, 1)
    assert jnp.allclose(out_bf16, ref, atol=5e-2, rtol=5e-2), "bf16 kernel mismatch vs reference"

    # Ragged batch exercises the row-padding / single-block path.
    out_small = jax.block_until_ready(
        sacae_q_forward(obs[:100], action[:100], params, compute_dtype=jnp.float32))
    assert out_small.shape == (100, 1)
    assert jnp.allclose(out_small, ref[:100], atol=1e-4, rtol=1e-4), "ragged-batch mismatch"

    print("KERNEL_OK")
</pallas_src>

<mosaic_0001>
module attributes {stable_mosaic.version = 11 : i64} {
  func.func @kernel(%arg0: i32, %arg1: memref<128x50xf32, #tpu.memory_space<vmem>>, %arg2: memref<128x6xf32, #tpu.memory_space<vmem>>, %arg3: memref<50x256xf32, #tpu.memory_space<vmem>>, %arg4: memref<6x256xf32, #tpu.memory_space<vmem>>, %arg5: memref<1x256xf32, #tpu.memory_space<vmem>>, %arg6: memref<256x256xf32, #tpu.memory_space<vmem>>, %arg7: memref<1x256xf32, #tpu.memory_space<vmem>>, %arg8: memref<1x256xf32, #tpu.memory_space<vmem>>, %arg9: memref<1x1xf32, #tpu.memory_space<vmem>>, %arg10: memref<128x1xf32, #tpu.memory_space<vmem>>) attributes {dimension_semantics = [#tpu.dimension_semantics<parallel>], iteration_bounds = array<i64: 2>, scalar_prefetch = 0 : i64, scratch_operands = 0 : i64, tpu.core_type = #tpu.core_type<tc>, window_params = [{transform_indices = @transform_0, window_bounds = array<i64: 128, 50>}, {transform_indices = @transform_1, window_bounds = array<i64: 128, 6>}, {pipeline_mode = #tpu.pipeline_mode<synchronous>, transform_indices = @transform_2, window_bounds = array<i64: 50, 256>}, {pipeline_mode = #tpu.pipeline_mode<synchronous>, transform_indices = @transform_3, window_bounds = array<i64: 6, 256>}, {pipeline_mode = #tpu.pipeline_mode<synchronous>, transform_indices = @transform_4, window_bounds = array<i64: 1, 256>}, {pipeline_mode = #tpu.pipeline_mode<synchronous>, transform_indices = @transform_5, window_bounds = array<i64: 256, 256>}, {pipeline_mode = #tpu.pipeline_mode<synchronous>, transform_indices = @transform_6, window_bounds = array<i64: 1, 256>}, {pipeline_mode = #tpu.pipeline_mode<synchronous>, transform_indices = @transform_7, window_bounds = array<i64: 1, 256>}, {pipeline_mode = #tpu.pipeline_mode<synchronous>, transform_indices = @transform_8, window_bounds = array<i64: 1, 1>}, {transform_indices = @transform_9, window_bounds = array<i64: 128, 1>}]} {
    %c0 = arith.constant 0 : index
    %c0_0 = arith.constant 0 : index
    %0 = vector.load %arg1[%c0, %c0_0] : memref<128x50xf32, #tpu.memory_space<vmem>>, vector<128x50xf32>
    %c0_1 = arith.constant 0 : index
    %c0_2 = arith.constant 0 : index
    %1 = vector.load %arg3[%c0_1, %c0_2] : memref<50x256xf32, #tpu.memory_space<vmem>>, vector<50x256xf32>
    %cst = arith.constant dense<0.000000e+00> : vector<128x256xf32>
    %2 = tpu.matmul %0, %1, %cst {dimension_numbers = #tpu.dot_dimension_numbers<[1], [0], [0], [1], [0, 0, 1, 1], [], []>, precision = #tpu.contract_precision<fp32>} : vector<128x50xf32>, vector<50x256xf32>, vector<128x256xf32> -> vector<128x256xf32>
    %c0_3 = arith.constant 0 : index
    %c0_4 = arith.constant 0 : index
    %3 = vector.load %arg2[%c0_3, %c0_4] : memref<128x6xf32, #tpu.memory_space<vmem>>, vector<128x6xf32>
    %c0_5 = arith.constant 0 : index
    %c0_6 = arith.constant 0 : index
    %4 = vector.load %arg4[%c0_5, %c0_6] : memref<6x256xf32, #tpu.memory_space<vmem>>, vector<6x256xf32>
    %cst_7 = arith.constant dense<0.000000e+00> : vector<128x256xf32>
    %5 = tpu.matmul %3, %4, %cst_7 {dimension_numbers = #tpu.dot_dimension_numbers<[1], [0], [0], [1], [0, 0, 1, 1], [], []>, precision = #tpu.contract_precision<fp32>} : vector<128x6xf32>, vector<6x256xf32>, vector<128x256xf32> -> vector<128x256xf32>
    %6 = arith.addf %2, %5 : vector<128x256xf32>
    %c0_8 = arith.constant 0 : index
    %c0_9 = arith.constant 0 : index
    %7 = vector.load %arg5[%c0_8, %c0_9] : memref<1x256xf32, #tpu.memory_space<vmem>>, vector<1x256xf32>
    %8 = vector.broadcast %7 : vector<1x256xf32> to vector<128x256xf32>
    %9 = arith.addf %6, %8 : vector<128x256xf32>
    %cst_10 = arith.constant 0.000000e+00 : f32
    %10 = vector.broadcast %cst_10 : f32 to vector<128x256xf32>
    %11 = arith.maximumf %9, %10 : vector<128x256xf32>
    %c0_11 = arith.constant 0 : index
    %c0_12 = arith.constant 0 : index
    %12 = vector.load %arg6[%c0_11, %c0_12] : memref<256x256xf32, #tpu.memory_space<vmem>>, vector<256x256xf32>
    %cst_13 = arith.constant dense<0.000000e+00> : vector<128x256xf32>
    %13 = tpu.matmul %11, %12, %cst_13 {dimension_numbers = #tpu.dot_dimension_numbers<[1], [0], [0], [1], [0, 0, 1, 1], [], []>, precision = #tpu.contract_precision<fp32>} : vector<128x256xf32>, vector<256x256xf32>, vector<128x256xf32> -> vector<128x256xf32>
    %c0_14 = arith.constant 0 : index
    %c0_15 = arith.constant 0 : index
    %14 = vector.load %arg7[%c0_14, %c0_15] : memref<1x256xf32, #tpu.memory_space<vmem>>, vector<1x256xf32>
    %15 = vector.broadcast %14 : vector<1x256xf32> to vector<128x256xf32>
    %16 = arith.addf %13, %15 : vector<128x256xf32>
    %cst_16 = arith.constant 0.000000e+00 : f32
    %17 = vector.broadcast %cst_16 : f32 to vector<128x256xf32>
    %18 = arith.maximumf %16, %17 : vector<128x256xf32>
    %c0_17 = arith.constant 0 : index
    %c0_18 = arith.constant 0 : index
    %19 = vector.load %arg8[%c0_17, %c0_18] : memref<1x256xf32, #tpu.memory_space<vmem>>, vector<1x256xf32>
    %20 = vector.broadcast %19 : vector<1x256xf32> to vector<128x256xf32>
    %21 = arith.mulf %18, %20 : vector<128x256xf32>
    %cst_19 = arith.constant dense<0.000000e+00> : vector<128xf32>
    %22 = vector.multi_reduction <add>, %21, %cst_19 [1] : vector<128x256xf32> to vector<128xf32>
    %23 = vector.shape_cast %22 : vector<128xf32> to vector<128x1xf32>
    %c0_20 = arith.constant 0 : index
    %c0_21 = arith.constant 0 : index
    %24 = vector.load %arg9[%c0_20, %c0_21] : memref<1x1xf32, #tpu.memory_space<vmem>>, vector<1x1xf32>
    %25 = vector.broadcast %24 : vector<1x1xf32> to vector<128x1xf32>
    %26 = arith.addf %23, %25 : vector<128x1xf32>
    %c0_22 = arith.constant 0 : index
    %c0_23 = arith.constant 0 : index
    %27 = vector.load %arg10[%c0_22, %c0_23] : memref<128x1xf32, #tpu.memory_space<vmem>>, vector<128x1xf32>
    tpu.vector_store %arg10[%c0_22, %c0_23], %26 {strides = array<i32>} : memref<128x1xf32, #tpu.memory_space<vmem>>, vector<128x1xf32>,
    return
  }
  func.func @transform_0(%arg0: i32) -> (i32, i32) {
    %c0_i32 = arith.constant 0 : i32
    %c0_i32_0 = arith.constant 0 : i32
    return %arg0, %c0_i32 : i32, i32
  }
  func.func @transform_1(%arg0: i32) -> (i32, i32) {
    %c0_i32 = arith.constant 0 : i32
    %c0_i32_0 = arith.constant 0 : i32
    return %arg0, %c0_i32 : i32, i32
  }
  func.func @transform_2(%arg0: i32) -> (i32, i32) {
    %c0_i32 = arith.constant 0 : i32
    %c0_i32_0 = arith.constant 0 : i32
    %c0_i32_1 = arith.constant 0 : i32
    return %c0_i32, %c0_i32_0 : i32, i32
  }
  func.func @transform_3(%arg0: i32) -> (i32, i32) {
    %c0_i32 = arith.constant 0 : i32
    %c0_i32_0 = arith.constant 0 : i32
    %c0_i32_1 = arith.constant 0 : i32
    return %c0_i32, %c0_i32_0 : i32, i32
  }
  func.func @transform_4(%arg0: i32) -> (i32, i32) {
    %c0_i32 = arith.constant 0 : i32
    %c0_i32_0 = arith.constant 0 : i32
    %c0_i32_1 = arith.constant 0 : i32
    return %c0_i32, %c0_i32_0 : i32, i32
  }
  func.func @transform_5(%arg0: i32) -> (i32, i32) {
    %c0_i32 = arith.constant 0 : i32
    %c0_i32_0 = arith.constant 0 : i32
    %c0_i32_1 = arith.constant 0 : i32
    return %c0_i32, %c0_i32_0 : i32, i32
  }
  func.func @transform_6(%arg0: i32) -> (i32, i32) {
    %c0_i32 = arith.constant 0 : i32
    %c0_i32_0 = arith.constant 0 : i32
    %c0_i32_1 = arith.constant 0 : i32
    return %c0_i32, %c0_i32_0 : i32, i32
  }
  func.func @transform_7(%arg0: i32) -> (i32, i32) {
    %c0_i32 = arith.constant 0 : i32
    %c0_i32_0 = arith.constant 0 : i32
    %c0_i32_1 = arith.constant 0 : i32
    return %c0_i32, %c0_i32_0 : i32, i32
  }
  func.func @transform_8(%arg0: i32) -> (i32, i32) {
    %c0_i32 = arith.constant 0 : i32
    %c0_i32_0 = arith.constant 0 : i32
    %c0_i32_1 = arith.constant 0 : i32
    return %c0_i32, %c0_i32_0 : i32, i32
  }
  func.func @transform_9(%arg0: i32) -> (i32, i32) {
    %c0_i32 = arith.constant 0 : i32
    %c0_i32_0 = arith.constant 0 : i32
    return %arg0, %c0_i32 : i32, i32
  }
}

</mosaic_0001>

<bundles_post_ra>
// kernel: tpu_custom_call.1
= control target key start
LH: loop header
LB: loop body
LE: loop exit
PB: predicated region body
PF: predicated region fallthrough
CT: control target
= control target key end

     0   :  { %s10851_s0 = inlined_call_operand.vmem [shape: f32[256,50], index: 0, kind: input, shape index: {}]   ;;  %s10852_s1 = inlined_call_operand.vmem [shape: f32[256,6], index: 1, kind: input, shape index: {}]   ;;  %s10853_s2 = inlined_call_operand.vmem [shape: f32[50,256], index: 2, kind: input, shape index: {}]   ;;  %s10854_s3 = inlined_call_operand.hbm [shape: f32[6,256], index: 3, kind: input, shape index: {}]   ;;  %s10855_s4 = inlined_call_operand.hbm [shape: f32[1,256], index: 4, kind: input, shape index: {}]   ;;  %s10856_s5 = inlined_call_operand.vmem [shape: f32[256,256], index: 5, kind: input, shape index: {}]   ;;  %s10857_s6 = inlined_call_operand.vmem [shape: f32[1,256], index: 6, kind: input, shape index: {}]   ;;  %s10858_s7 = inlined_call_operand.vmem [shape: f32[1,256], index: 7, kind: input, shape index: {}]   ;;  %s10859_s8 = inlined_call_operand.<no memory space> [shape: f32[1,1], index: 8, kind: input, shape index: {}]   ;;  %s10860_s9 = inlined_call_operand.vmem [shape: f32[256,1], index: 9, kind: output, shape index: {}]  }
   0x1   :  { %v14_v0 = vstv %s10859_s8 }
   0x2   :  { %15 = vst [vmem:[#allocation2] sm:$0x1] %v14_v0 }
   0x3   :  { %16 = vsyncpa [#allocation4], 0 }
   0x4   :  { %17 = vsyncpa [#allocation6], 0  ;;  %s6938_s11 = smov 0  }
   0x5 LB: > { %s268_s14 = sshll.u32 %s10854_s3, 4  ;;  %s6759_s15 = sadd.s32 4294967295, %s6881_s11   ;;  %s6881_s11 = sphi %s6938_s11, %s23_s11   ;;  %s269_s14 = int_to_ptr.hbm [resolvable:$true] %s268_s14 }
   0x6   : > { %p6761_p0 = scmp.ge.s32.totalorder %s6881_s11, 1  ;;  %p253_p1 = scmp.lt.s32.totalorder %s6881_s11, 3 }
   0x7   : > { %p6949_p2 = scmp.eq.s32.totalorder %s6759_s15, 0  ;;  %s6883_s17 = smov [#allocation3]  }
   0x8   : > { %p6953_p3 = pnand %p6761_p0, %p253_p1  ;;  %s270_s18 = sshll.u32 %s6883_s17, 4  ;;  %s271_s18 = int_to_ptr.vmem [resolvable:$true] %s270_s18 }
   0x9   : > { %s280_s21 = sshll.u32 %s10855_s4, 4  ;;  %s6884_s22 = smov [#allocation5]   ;;  %s281_s21 = int_to_ptr.hbm [resolvable:$true] %s280_s21 }
   0xa   : > { %p6784_p4 = pneg %p6953_p3  ;;  %s282_s23 = sshll.u32 %s6884_s22, 4  ;;  %s283_s23 = int_to_ptr.vmem [resolvable:$true] %s282_s23 }
   0xb   : > { %325 = sbr.rel (%p6953_p3) target bundleno = 1824 (0x720), region = 56 }
   0xc   : > { %p6785_p5 = pnand %p6949_p2, %p6784_p4 }
   0xe   : > { %6787 = dma.hbm_to_vmem [thread:$0]  (!%p6785_p5), %s269_s14, 256, %s271_s18, [#allocation4]  }
   0xf   : > { %6790 = dma.hbm_to_vmem [thread:$0]  (!%p6785_p5), %s281_s21, 32, %s283_s23, [#allocation6]  }
  0x10   : > { %6872 = dma.done.wait (%p6949_p2), [#allocation4], 256  }
  0x11   : > { %6874 = vsyncadd (%p6949_p2), [#allocation4], 4294967040 }
  0x12   : > { %6876 = dma.done.wait (%p6949_p2), [#allocation6], 32  }
  0x13   : > { %6878 = vsyncadd (%p6949_p2), [#allocation6], 4294967264  ;;  %s6768_s24 = sshll.u32 %s6759_s15, 4  ;;  %vm487_vm0 = vcmask 1045504   ;;  %vm438_vm1 = vcmask 48128   ;;  %vm1765_vm2 = vcmask 1041408  }
  0x14   : > { %p373_p6 = scmp.lt.s32.totalorder %s6768_s24, 31  ;;  %v436_v1 = vld [vmem:[#allocation3] sm:$0x3f]  ;;  %v437_v2 = vld [vmem:[#allocation3 + $0x8] sm:$0x3f]  ;;  %vm1716_vm3 = vcmask 408576  }
  0x15   : > { %v489_v4 = vsel %vm487_vm0, %v436_v1, 0  ;;  %v492_v5 = vsel %vm487_vm0, %v437_v2, 0  ;;  %vm6652_vm4 = vcmask 7168  }
  0x16   : > { %s11845_s24 = smov (!%p373_p6, %s6768_s24), 31  ;;  %v509_v9 = vand.u32 4294901760, %v489_v4  ;;  %v1120_v11 = vand.u32 4294901760, %v492_v5 }
  0x17   : > { %s6974_s25 = sshll.u32 %s11845_s24, 3 }
  0x18   : > { %s6980_s28 = scalar_lea.vmem %s10852_s1, %s6974_s25  ;;  %v656_v14 = vsub.f32 %v489_v4, %v509_v9  ;;  %841 = vmatpush.msra.mxu3 %v509_v9  ;;  %510 = vmatpush.msra.mxu0 %v509_v9  ;;  %v1267_v16 = vsub.f32 %v492_v5, %v1120_v11  ;;  %s7612_s27 = scalar_lea.vmem %s10851_s0, %s6974_s25 }
  0x19   : > { %v420_v3 = vld [vmem:[%s6980_s28] sm:$0xff]  ;;  %v421_v7 = vld [vmem:[%s6980_s28 + $0x8] sm:$0xff]  ;;  %v422_v8 = vld [vmem:[%s6980_s28 + $0x10] sm:$0xff]  ;;  %s10812_s8 = scalar_lea.vmem %s10860_s9, %s6974_s25 }
  0x1a   : > { %v440_v6 = vsel %vm438_vm1, %v420_v3, 0  ;;  %v443_v12 = vsel %vm438_vm1, %v421_v7, 0  ;;  %v446_v17 = vsel %vm438_vm1, %v422_v8, 0  ;;  %743 = vmatpush.msra.mxu2 %v656_v14  ;;  %v657_v20 = vand.u32 4294901760, %v656_v14  ;;  %v423_v30 = vld [vmem:[%s6980_s28 + $0x18] sm:$0xff]  ;;  %v424_v37 = vld [vmem:[%s6980_s28 + $0x20] sm:$0xff] }
  0x1b   : > { %v6986_v10 = vand.u32 4294901760, %v440_v6  ;;  %v6989_v13 = vand.u32 4294901760, %v443_v12  ;;  %v1268_v21 = vand.u32 4294901760, %v1267_v16  ;;  %v7002_v22 = vand.u32 4294901760, %v446_v17  ;;  %v425_v44 = vld [vmem:[%s6980_s28 + $0x28] sm:$0xff]  ;;  %v426_v51 = vld [vmem:[%s6980_s28 + $0x30] sm:$0xff] }
  0x1c   : > { %1121 = vmatpush.msrb.mxu2 %v1120_v11  ;;  %v658_v24 = vsub.f32 %v656_v14, %v657_v20  ;;  %957 = vmatpush.msrb.mxu0 %v657_v20  ;;  %v449_v33 = vsel %vm438_vm1, %v423_v30, 0  ;;  %v452_v40 = vsel %vm438_vm1, %v424_v37, 0  ;;  %v455_v47 = vsel %vm438_vm1, %v425_v44, 0  ;;  %v427_v58 = vld [vmem:[%s6980_s28 + $0x38] sm:$0xff]  ;;  %v428_v1 = vld [vmem:[%s6980_s28 + $0x40] sm:$0xff]  ;;  %v429_v8 = vld [vmem:[%s6980_s28 + $0x48] sm:$0xff] }
  0x1d   : > { %v6992_v15 = vsub.f32 %v440_v6, %v6986_v10  ;;  %v6996_v18 = vsub.f32 %v443_v12, %v6989_v13  ;;  %v1269_v25 = vsub.f32 %v1267_v16, %v1268_v21  ;;  %v7017_v32 = vsub.f32 %v446_v17, %v7002_v22  ;;  %v430_v20 = vld [vmem:[%s6980_s28 + $0x50] sm:$0xff]  ;;  %v431_v30 = vld [vmem:[%s6980_s28 + $0x58] sm:$0xff] }
  0x1e   : > { %v659_v28 = vand.u32 4294901760, %v658_v24  ;;  %v7028_v36 = vand.u32 4294901760, %v449_v33  ;;  %v7046_v43 = vand.u32 4294901760, %v452_v40  ;;  %v7064_v50 = vand.u32 4294901760, %v455_v47 }
  0x1f   : > { %v6999_v19 = vand.u32 4294901760, %v6992_v15  ;;  %746 = vmatmul.f32.vlgmr.msra.gmra.mxu2 %v6992_v15  ;;  %v7008_v26 = vand.u32 4294901760, %v6996_v18  ;;  %v1270_v29 = vand.u32 4294901760, %v1269_v25  ;;  %v7026_v35 = vand.u32 4294901760, %v7017_v32 }
  0x20   : > { %1568 = vmatpush.msra.mxu2 %v1268_v21  ;;  %660 = vmatpush.msra.mxu1 %v659_v28  ;;  %v7035_v39 = vsub.f32 %v449_v33, %v7028_v36  ;;  %v7053_v46 = vsub.f32 %v452_v40, %v7046_v43  ;;  %v7071_v53 = vsub.f32 %v455_v47, %v7064_v50  ;;  %v458_v54 = vsel %vm438_vm1, %v426_v51, 0 }
  0x21   : > { %845 = vmatmul.f32.vlgmr.msra.gmra.mxu3 %v6999_v19  ;;  %v514_v23 = vsub.f32 %v6992_v15, %v6999_v19  ;;  %v522_v31 = vsub.f32 %v6996_v18, %v7008_v26  ;;  %662 = vmatmul.f32.vlgmr.msra.gmra.mxu1 %v6986_v10  ;;  %v530_v38 = vsub.f32 %v7017_v32, %v7026_v35  ;;  %v7082_v57 = vand.u32 4294901760, %v458_v54 }
  0x22   : > { %1271 = vmatpush.msrb.mxu3 %v1270_v29  ;;  %1039 = vmatpush.msrb.mxu1 %v509_v9  ;;  %v7044_v42 = vand.u32 4294901760, %v7035_v39  ;;  %v7062_v49 = vand.u32 4294901760, %v7053_v46  ;;  %v7080_v56 = vand.u32 4294901760, %v7071_v53  ;;  %v461_v61 = vsel %vm438_vm1, %v427_v58, 0 }
  0x23   : > { %v7010_v27 = vand.u32 4294901760, %v514_v23  ;;  %v7023_v34 = vand.u32 4294901760, %v522_v31  ;;  %v7041_v41 = vand.u32 4294901760, %v530_v38  ;;  %v7089_v60 = vsub.f32 %v458_v54, %v7082_v57 }
  0x24   : > { %1650 = vmatpush.msra.mxu3 %v1120_v11  ;;  %1452 = vmatpush.msra.mxu1 %v1120_v11  ;;  %v538_v45 = vsub.f32 %v7035_v39, %v7044_v42  ;;  %v546_v52 = vsub.f32 %v7053_v46, %v7062_v49  ;;  %v554_v59 = vsub.f32 %v7071_v53, %v7080_v56  ;;  %v7100_v0 = vand.u32 4294901760, %v461_v61 }
  0x25   : > { %516 = vmatmul.f32.vlgmr.msra.gmra.mxu0 %v7010_v27  ;;  %v7098_v63 = vand.u32 4294901760, %v7089_v60  ;;  %v464_v4 = vsel %vm438_vm1, %v428_v1, 0  ;;  %v467_v12 = vsel %vm438_vm1, %v429_v8, 0  ;;  %v470_v24 = vsel %vm438_vm1, %v430_v20, 0  ;;  %v434_v20 = vld [vmem:[%s6980_s28 + $0x70] sm:$0xff] }
  0x26   : > { %1354 = vmatpush.msra.mxu0 %v1267_v16  ;;  %v7059_v48 = vand.u32 4294901760, %v538_v45  ;;  %v7077_v55 = vand.u32 4294901760, %v546_v52  ;;  %v7095_v62 = vand.u32 4294901760, %v554_v59  ;;  %v7107_v3 = vsub.f32 %v461_v61, %v7100_v0  ;;  %v432_v45 = vld [vmem:[%s6980_s28 + $0x60] sm:$0xff]  ;;  %v433_v61 = vld [vmem:[%s6980_s28 + $0x68] sm:$0xff] }
  0x27   : > { %751 = vmatmul.f32.gmra.mxu2 %v6996_v18  ;;  %v562_v2 = vsub.f32 %v7089_v60, %v7098_v63  ;;  %v7118_v7 = vand.u32 4294901760, %v464_v4  ;;  %v7136_v17 = vand.u32 4294901760, %v467_v12  ;;  %v7154_v29 = vand.u32 4294901760, %v470_v24 }
  0x28   : > { %v7116_v6 = vand.u32 4294901760, %v7107_v3  ;;  %v473_v37 = vsel %vm438_vm1, %v431_v30, 0  ;;  %v476_v52 = vsel %vm438_vm1, %v432_v45, 0  ;;  %v482_v30 = vsel %vm438_vm1, %v434_v20, 0 }
  0x29   : > { %851 = vmatmul.f32.gmra.mxu3 %v7008_v26  ;;  %666 = vmatmul.f32.gmra.mxu1 %v6989_v13  ;;  %v7113_v5 = vand.u32 4294901760, %v562_v2  ;;  %v7125_v11 = vsub.f32 %v464_v4, %v7118_v7  ;;  %v7143_v23 = vsub.f32 %v467_v12, %v7136_v17  ;;  %v7161_v33 = vsub.f32 %v470_v24, %v7154_v29 }
  0x2a   : > { %v570_v9 = vsub.f32 %v7107_v3, %v7116_v6  ;;  %v7172_v44 = vand.u32 4294901760, %v473_v37  ;;  %v7190_v59 = vand.u32 4294901760, %v476_v52  ;;  %v479_v4 = vsel %vm438_vm1, %v433_v61, 0 }
  0x2b   : > { %v7134_v16 = vand.u32 4294901760, %v7125_v11  ;;  %v7152_v28 = vand.u32 4294901760, %v7143_v23  ;;  %v7170_v40 = vand.u32 4294901760, %v7161_v33  ;;  %v7208_v12 = vand.u32 4294901760, %v479_v4 }
  0x2c   : > { %v7131_v14 = vand.u32 4294901760, %v570_v9  ;;  %v7179_v51 = vsub.f32 %v473_v37, %v7172_v44  ;;  %v7197_v2 = vsub.f32 %v476_v52, %v7190_v59  ;;  %v7226_v45 = vand.u32 4294901760, %v482_v30 }
  0x2d   : > { %524 = vmatmul.f32.gmra.mxu0 %v7023_v34  ;;  %v578_v21 = vsub.f32 %v7125_v11, %v7134_v16  ;;  %v586_v31 = vsub.f32 %v7143_v23, %v7152_v28  ;;  %11179 = vst [vmem:[#allocation9_spill] sm:$0xff] %v7170_v40  ;;  %v594_v47 = vsub.f32 %v7161_v33, %v7170_v40 }
  0x2e   : > { %11180 = vst [vmem:[#allocation10_spill] sm:$0xff] %v7179_v51  ;;  %v7188_v58 = vand.u32 4294901760, %v7179_v51  ;;  %v7206_v9 = vand.u32 4294901760, %v7197_v2  ;;  %v7215_v24 = vsub.f32 %v479_v4, %v7208_v12  ;;  %v7233_v61 = vsub.f32 %v482_v30, %v7226_v45 }
  0x2f   : > { %756 = vmatmul.f32.gmra.mxu2 %v7017_v32  ;;  %v7149_v25 = vand.u32 4294901760, %v578_v21  ;;  %v7167_v38 = vand.u32 4294901760, %v586_v31  ;;  %v7185_v54 = vand.u32 4294901760, %v594_v47  ;;  %11182 = vst [vmem:[#allocation12_spill] sm:$0xff] %v7197_v2  ;;  %v435_v47 = vld [vmem:[%s6980_s28 + $0x78] sm:$0xff] }
  0x30   : > { %11181 = vst [vmem:[#allocation11_spill] sm:$0xff] %v7188_v58  ;;  %v602_v1 = vsub.f32 %v7179_v51, %v7188_v58  ;;  %v610_v21 = vsub.f32 %v7197_v2, %v7206_v9  ;;  %v7224_v37 = vand.u32 4294901760, %v7215_v24  ;;  %v7242_v20 = vand.u32 4294901760, %v7233_v61 }
  0x31   : > { %857 = vmatmul.f32.gmra.mxu3 %v7026_v35  ;;  %670 = vmatmul.f32.gmra.mxu1 %v7002_v22  ;;  %11183 = vst [vmem:[#allocation13_spill] sm:$0xff] %v7206_v9 }
  0x32   : > { %v7203_v8 = vand.u32 4294901760, %v602_v1  ;;  %11184 = vst [vmem:[#allocation14_spill] sm:$0xff] %v7215_v24  ;;  %v7221_v31 = vand.u32 4294901760, %v610_v21  ;;  %v618_v52 = vsub.f32 %v7215_v24, %v7224_v37  ;;  %v485_v1 = vsel %vm438_vm1, %v435_v47, 0 }
  0x33   : > { %11185 = vst [vmem:[#allocation15_spill] sm:$0xff] %v7224_v37  ;;  %v7244_v21 = vand.u32 4294901760, %v485_v1  ;;  %v626_v30 = vsub.f32 %v7233_v61, %v7242_v20 }
  0x34   : > { %11186 = vst [vmem:[#allocation16_spill] sm:$0xff] %v7233_v61  ;;  %v7239_v4 = vand.u32 4294901760, %v618_v52 }
  0x35   : > { %532 = vmatmul.f32.gmra.mxu0 %v7041_v41  ;;  %11187 = vst [vmem:[#allocation17_spill] sm:$0xff] %v7242_v20  ;;  %v7255_v47 = vand.u32 4294901760, %v626_v30 }
  0x37   : > { %761 = vmatmul.f32.gmra.mxu2 %v7035_v39 }
  0x39   : > { %863 = vmatmul.f32.gmra.mxu3 %v7044_v42  ;;  %674 = vmatmul.f32.gmra.mxu1 %v7028_v36 }
  0x3d   : > { %540 = vmatmul.f32.gmra.mxu0 %v7059_v48 }
  0x3f   : > { %766 = vmatmul.f32.gmra.mxu2 %v7053_v46 }
  0x41   : > { %869 = vmatmul.f32.gmra.mxu3 %v7062_v49  ;;  %678 = vmatmul.f32.gmra.mxu1 %v7046_v43 }
  0x45   : > { %548 = vmatmul.f32.gmra.mxu0 %v7077_v55 }
  0x47   : > { %771 = vmatmul.f32.gmra.mxu2 %v7071_v53 }
  0x49   : > { %875 = vmatmul.f32.gmra.mxu3 %v7080_v56  ;;  %682 = vmatmul.f32.gmra.mxu1 %v7064_v50 }
  0x4d   : > { %556 = vmatmul.f32.gmra.mxu0 %v7095_v62 }
  0x4f   : > { %776 = vmatmul.f32.gmra.mxu2 %v7089_v60 }
  0x51   : > { %881 = vmatmul.f32.gmra.mxu3 %v7098_v63  ;;  %686 = vmatmul.f32.gmra.mxu1 %v7082_v57 }
  0x55   : > { %564 = vmatmul.f32.gmra.mxu0 %v7113_v5 }
  0x57   : > { %781 = vmatmul.f32.gmra.mxu2 %v7107_v3 }
  0x59   : > { %887 = vmatmul.f32.gmra.mxu3 %v7116_v6  ;;  %690 = vmatmul.f32.gmra.mxu1 %v7100_v0 }
  0x5d   : > { %572 = vmatmul.f32.gmra.mxu0 %v7131_v14 }
  0x5f   : > { %786 = vmatmul.f32.gmra.mxu2 %v7125_v11 }
  0x61   : > { %893 = vmatmul.f32.gmra.mxu3 %v7134_v16  ;;  %694 = vmatmul.f32.gmra.mxu1 %v7118_v7 }
  0x65   : > { %580 = vmatmul.f32.gmra.mxu0 %v7149_v25 }
  0x67   : > { %791 = vmatmul.f32.gmra.mxu2 %v7143_v23 }
  0x69   : > { %899 = vmatmul.f32.gmra.mxu3 %v7152_v28  ;;  %698 = vmatmul.f32.gmra.mxu1 %v7136_v17 }
  0x6d   : > { %588 = vmatmul.f32.gmra.mxu0 %v7167_v38 }
  0x6f   : > { %796 = vmatmul.f32.gmra.mxu2 %v7161_v33 }
  0x71   : > { %905 = vmatmul.f32.gmra.mxu3 %v7170_v40  ;;  %702 = vmatmul.f32.gmra.mxu1 %v7154_v29 }
  0x75   : > { %596 = vmatmul.f32.gmra.mxu0 %v7185_v54 }
  0x77   : > { %801 = vmatmul.f32.gmra.mxu2 %v7179_v51 }
  0x79   : > { %911 = vmatmul.f32.gmra.mxu3 %v7188_v58  ;;  %706 = vmatmul.f32.gmra.mxu1 %v7172_v44 }
  0x7d   : > { %604 = vmatmul.f32.gmra.mxu0 %v7203_v8 }
  0x7f   : > { %806 = vmatmul.f32.gmra.mxu2 %v7197_v2 }
  0x81   : > { %917 = vmatmul.f32.gmra.mxu3 %v7206_v9  ;;  %710 = vmatmul.f32.gmra.mxu1 %v7190_v59  ;;  %v7250_v9 = vsub.f32 %v485_v1, %v7244_v21 }
  0x83   : > { %11188 = vst [vmem:[#allocation18_spill] sm:$0xff] %v7250_v9  ;;  %v7258_v52 = vand.u32 4294901760, %v7250_v9 }
  0x85   : > { %612 = vmatmul.f32.gmra.mxu0 %v7221_v31  ;;  %11189 = vst [vmem:[#allocation19_spill] sm:$0xff] %v7258_v52 }
  0x87   : > { %811 = vmatmul.f32.gmra.mxu2 %v7215_v24 }
  0x89   : > { %923 = vmatmul.f32.gmra.mxu3 %v7224_v37  ;;  %714 = vmatmul.f32.gmra.mxu1 %v7208_v12  ;;  %v634_v37 = vsub.f32 %v7250_v9, %v7258_v52 }
  0x8b   : > { %v7266_v1 = vand.u32 4294901760, %v634_v37 }
  0x8d   : > { %620 = vmatmul.f32.gmra.mxu0 %v7239_v4 }
  0x8f   : > { %816 = vmatmul.f32.gmra.mxu2 %v7233_v61 }
  0x91   : > { %929 = vmatmul.f32.gmra.mxu3 %v7242_v20  ;;  %718 = vmatmul.f32.gmra.mxu1 %v7226_v45 }
  0x95   : > { %628 = vmatmul.f32.gmra.mxu0 %v7255_v47 }
  0x97   : > { %821 = vmatmul.f32.gmra.mxu2 %v7250_v9 }
  0x99   : > { %935 = vmatmul.f32.gmra.mxu3 %v7258_v52  ;;  %722 = vmatmul.f32.gmra.mxu1 %v7244_v21 }
  0x9d   : > { %636 = vmatmul.f32.gmra.mxu0 %v7266_v1 }
  0x9e   : > { %v663_v20 = vpop.f32.mrf.mxu1 }
  0x9f   : > { %1127 = vmatmul.f32.vlgmr.msrb.gmra.mxu2 %v7010_v27 }
  0xa1   : > { %1273 = vmatmul.f32.vlgmr.msrb.gmra.mxu3 %v6986_v10  ;;  %1041 = vmatmul.f32.vlgmr.msrb.gmra.mxu1 %v6986_v10 }
  0xa2   : > { %v517_v30 = vpop.f32.mrf.mxu0  ;;  %v747_v61 = vpop.f32.mrf.mxu2 }
  0xa3   : > { %v664_v24 = vadd.f32 %v663_v20, %v517_v30 }
  0xa4   : > { %v846_v2 = vpop.f32.mrf.mxu3 }
  0xa5   : > { %959 = vmatmul.f32.vlgmr.msrb.gmra.mxu0 %v6986_v10  ;;  %v748_v9 = vadd.f32 %v747_v61, %v664_v24 }
  0xa6   : > { %v667_v27 = vpop.f32.mrf.mxu1 }
  0xa7   : > { %v7274_v37 = vadd.f32 %v846_v2, %v748_v9  ;;  %1135 = vmatmul.f32.gmra.mxu2 %v7023_v34 }
  0xa9   : > { %1277 = vmatmul.f32.gmra.mxu3 %v6989_v13  ;;  %1045 = vmatmul.f32.gmra.mxu1 %v6989_v13 }
  0xaa   : > { %v525_v52 = vpop.f32.mrf.mxu0  ;;  %v752_v58 = vpop.f32.mrf.mxu2 }
  0xab   : > { %v668_v51 = vadd.f32 %v667_v27, %v525_v52 }
  0xac   : > { %v852_v40 = vpop.f32.mrf.mxu3 }
  0xad   : > { %963 = vmatmul.f32.gmra.mxu0 %v6989_v13  ;;  %v753_v20 = vadd.f32 %v752_v58, %v668_v51 }
  0xae   : > { %v671_v34 = vpop.f32.mrf.mxu1 }
  0xaf   : > { %v7280_v30 = vadd.f32 %v852_v40, %v753_v20  ;;  %1143 = vmatmul.f32.gmra.mxu2 %v7041_v41 }
  0xb1   : > { %1281 = vmatmul.f32.gmra.mxu3 %v7002_v22  ;;  %1049 = vmatmul.f32.gmra.mxu1 %v7002_v22 }
  0xb2   : > { %v533_v2 = vpop.f32.mrf.mxu0  ;;  %v757_v9 = vpop.f32.mrf.mxu2 }
  0xb3   : > { %v672_v24 = vadd.f32 %v671_v34, %v533_v2 }
  0xb4   : > { %v858_v61 = vpop.f32.mrf.mxu3 }
  0xb5   : > { %967 = vmatmul.f32.gmra.mxu0 %v7002_v22  ;;  %v758_v52 = vadd.f32 %v757_v9, %v672_v24 }
  0xb6   : > { %v675_v41 = vpop.f32.mrf.mxu1 }
  0xb7   : > { %v7286_v27 = vadd.f32 %v858_v61, %v758_v52  ;;  %1151 = vmatmul.f32.gmra.mxu2 %v7059_v48 }
  0xb9   : > { %1285 = vmatmul.f32.gmra.mxu3 %v7028_v36  ;;  %1053 = vmatmul.f32.gmra.mxu1 %v7028_v36 }
  0xba   : > { %v541_v40 = vpop.f32.mrf.mxu0  ;;  %v762_v51 = vpop.f32.mrf.mxu2 }
  0xbb   : > { %v676_v58 = vadd.f32 %v675_v41, %v541_v40 }
  0xbc   : > { %v864_v20 = vpop.f32.mrf.mxu3 }
  0xbd   : > { %971 = vmatmul.f32.gmra.mxu0 %v7028_v36  ;;  %v763_v2 = vadd.f32 %v762_v51, %v676_v58 }
  0xbe   : > { %v679_v48 = vpop.f32.mrf.mxu1 }
  0xbf   : > { %v7292_v34 = vadd.f32 %v864_v20, %v763_v2  ;;  %1159 = vmatmul.f32.gmra.mxu2 %v7077_v55 }
  0xc1   : > { %1289 = vmatmul.f32.gmra.mxu3 %v7046_v43  ;;  %1057 = vmatmul.f32.gmra.mxu1 %v7046_v43 }
  0xc2   : > { %v549_v9 = vpop.f32.mrf.mxu0  ;;  %v767_v24 = vpop.f32.mrf.mxu2 }
  0xc3   : > { %v680_v61 = vadd.f32 %v679_v48, %v549_v9 }
  0xc4   : > { %v870_v52 = vpop.f32.mrf.mxu3 }
  0xc5   : > { %975 = vmatmul.f32.gmra.mxu0 %v7046_v43  ;;  %v768_v40 = vadd.f32 %v767_v24, %v680_v61 }
  0xc6   : > { %v683_v55 = vpop.f32.mrf.mxu1 }
  0xc7   : > { %v7298_v41 = vadd.f32 %v870_v52, %v768_v40  ;;  %1167 = vmatmul.f32.gmra.mxu2 %v7095_v62 }
  0xc9   : > { %1293 = vmatmul.f32.gmra.mxu3 %v7064_v50  ;;  %1061 = vmatmul.f32.gmra.mxu1 %v7064_v50 }
  0xca   : > { %v557_v51 = vpop.f32.mrf.mxu0  ;;  %v772_v58 = vpop.f32.mrf.mxu2 }
  0xcb   : > { %v684_v20 = vadd.f32 %v683_v55, %v557_v51 }
  0xcc   : > { %v876_v2 = vpop.f32.mrf.mxu3 }
  0xcd   : > { %979 = vmatmul.f32.gmra.mxu0 %v7064_v50  ;;  %v773_v9 = vadd.f32 %v772_v58, %v684_v20 }
  0xce   : > { %v687_v62 = vpop.f32.mrf.mxu1 }
  0xcf   : > { %v7304_v48 = vadd.f32 %v876_v2, %v773_v9  ;;  %1175 = vmatmul.f32.gmra.mxu2 %v7113_v5 }
  0xd1   : > { %11190 = vst [vmem:[#allocation20_spill] sm:$0xff] %v7304_v48  ;;  %1297 = vmatmul.f32.gmra.mxu3 %v7082_v57  ;;  %1065 = vmatmul.f32.gmra.mxu1 %v7082_v57 }
  0xd2   : > { %v565_v24 = vpop.f32.mrf.mxu0  ;;  %v777_v61 = vpop.f32.mrf.mxu2 }
  0xd3   : > { %v688_v52 = vadd.f32 %v687_v62, %v565_v24 }
  0xd4   : > { %v882_v40 = vpop.f32.mrf.mxu3 }
  0xd5   : > { %983 = vmatmul.f32.gmra.mxu0 %v7082_v57  ;;  %v778_v51 = vadd.f32 %v777_v61, %v688_v52 }
  0xd6   : > { %v691_v5 = vpop.f32.mrf.mxu1 }
  0xd7   : > { %v7310_v55 = vadd.f32 %v882_v40, %v778_v51  ;;  %1183 = vmatmul.f32.gmra.mxu2 %v7131_v14 }
  0xd9   : > { %11191 = vst [vmem:[#allocation21_spill] sm:$0xff] %v7310_v55  ;;  %1301 = vmatmul.f32.gmra.mxu3 %v7100_v0  ;;  %1069 = vmatmul.f32.gmra.mxu1 %v7100_v0 }
  0xda   : > { %v573_v58 = vpop.f32.mrf.mxu0  ;;  %v782_v20 = vpop.f32.mrf.mxu2 }
  0xdb   : > { %v692_v2 = vadd.f32 %v691_v5, %v573_v58 }
  0xdc   : > { %v888_v9 = vpop.f32.mrf.mxu3 }
  0xdd   : > { %987 = vmatmul.f32.gmra.mxu0 %v7100_v0  ;;  %v783_v24 = vadd.f32 %v782_v20, %v692_v2 }
  0xde   : > { %v695_v14 = vpop.f32.mrf.mxu1 }
  0xdf   : > { %v7316_v62 = vadd.f32 %v888_v9, %v783_v24  ;;  %1191 = vmatmul.f32.gmra.mxu2 %v7149_v25 }
  0xe1   : > { %11192 = vst [vmem:[#allocation22_spill] sm:$0xff] %v7316_v62  ;;  %1305 = vmatmul.f32.gmra.mxu3 %v7118_v7  ;;  %1073 = vmatmul.f32.gmra.mxu1 %v7118_v7 }
  0xe2   : > { %v581_v61 = vpop.f32.mrf.mxu0  ;;  %v787_v52 = vpop.f32.mrf.mxu2 }
  0xe3   : > { %v696_v40 = vadd.f32 %v695_v14, %v581_v61 }
  0xe4   : > { %v894_v51 = vpop.f32.mrf.mxu3 }
  0xe5   : > { %991 = vmatmul.f32.gmra.mxu0 %v7118_v7  ;;  %v788_v58 = vadd.f32 %v787_v52, %v696_v40 }
  0xe6   : > { %v699_v25 = vpop.f32.mrf.mxu1 }
  0xe7   : > { %v7322_v5 = vadd.f32 %v894_v51, %v788_v58  ;;  %1199 = vmatmul.f32.gmra.mxu2 %v7167_v38 }
  0xe9   : > { %11193 = vst [vmem:[#allocation23_spill] sm:$0xff] %v7322_v5  ;;  %1309 = vmatmul.f32.gmra.mxu3 %v7136_v17  ;;  %1077 = vmatmul.f32.gmra.mxu1 %v7136_v17 }
  0xea   : > { %v589_v20 = vpop.f32.mrf.mxu0  ;;  %v792_v2 = vpop.f32.mrf.mxu2 }
  0xeb   : > { %v700_v9 = vadd.f32 %v699_v25, %v589_v20 }
  0xec   : > { %v900_v24 = vpop.f32.mrf.mxu3 }
  0xed   : > { %995 = vmatmul.f32.gmra.mxu0 %v7136_v17  ;;  %v793_v61 = vadd.f32 %v792_v2, %v700_v9 }
  0xee   : > { %v703_v38 = vpop.f32.mrf.mxu1 }
  0xef   : > { %v7328_v14 = vadd.f32 %v900_v24, %v793_v61  ;;  %1207 = vmatmul.f32.gmra.mxu2 %v7185_v54 }
  0xf1   : > { %11194 = vst [vmem:[#allocation24_spill] sm:$0xff] %v7328_v14  ;;  %1313 = vmatmul.f32.gmra.mxu3 %v7154_v29  ;;  %1081 = vmatmul.f32.gmra.mxu1 %v7154_v29 }
  0xf2   : > { %v597_v52 = vpop.f32.mrf.mxu0  ;;  %v797_v40 = vpop.f32.mrf.mxu2 }
  0xf3   : > { %v704_v51 = vadd.f32 %v703_v38, %v597_v52 }
  0xf4   : > { %v906_v58 = vpop.f32.mrf.mxu3 }
  0xf5   : > { %999 = vmatmul.f32.gmra.mxu0 %v7154_v29  ;;  %v798_v20 = vadd.f32 %v797_v40, %v704_v51 }
  0xf6   : > { %v707_v54 = vpop.f32.mrf.mxu1 }
  0xf7   : > { %v7334_v25 = vadd.f32 %v906_v58, %v798_v20  ;;  %1215 = vmatmul.f32.gmra.mxu2 %v7203_v8 }
  0xf9   : > { %11195 = vst [vmem:[#allocation25_spill] sm:$0xff] %v7334_v25  ;;  %1317 = vmatmul.f32.gmra.mxu3 %v7172_v44  ;;  %1085 = vmatmul.f32.gmra.mxu1 %v7172_v44 }
  0xfa   : > { %v605_v2 = vpop.f32.mrf.mxu0  ;;  %v802_v9 = vpop.f32.mrf.mxu2 }
  0xfb   : > { %v708_v24 = vadd.f32 %v707_v54, %v605_v2  ;;  %v418_v2 = vld [vmem:[%s10853_s2 + $0x60] sm:$0x3] }
  0xfc   : > { %v912_v61 = vpop.f32.mrf.mxu3 }
  0xfd   : > { %1003 = vmatmul.f32.gmra.mxu0 %v7172_v44  ;;  %v803_v52 = vadd.f32 %v802_v9, %v708_v24  ;;  %v1767_v9 = vsel %vm1765_vm2, %v418_v2, 0 }
  0xfe   : > { %v711_v8 = vpop.f32.mrf.mxu1 }
  0xff   : > { %v7340_v38 = vadd.f32 %v912_v61, %v803_v52  ;;  %1223 = vmatmul.f32.gmra.mxu2 %v7221_v31  ;;  %v7350_v31 = vand.u32 4294901760, %v1767_v9 }
 0x101   : > { %11196 = vst [vmem:[#allocation26_spill] sm:$0xff] %v7340_v38  ;;  %1321 = vmatmul.f32.gmra.mxu3 %v7190_v59  ;;  %1089 = vmatmul.f32.gmra.mxu1 %v7190_v59  ;;  %v7357_v61 = vsub.f32 %v1767_v9, %v7350_v31 }
 0x102   : > { %v613_v40 = vpop.f32.mrf.mxu0  ;;  %v807_v51 = vpop.f32.mrf.mxu2  ;;  %1782 = vmatpush.msrb.mxu0 %v7350_v31  ;;  %2161 = vmatpush.msrb.mxu3 %v7350_v31 }
 0x103   : > { %v712_v58 = vadd.f32 %v711_v8, %v613_v40  ;;  %2051 = vmatpush.msrb.mxu2 %v7357_v61 }
 0x104   : > { %v918_v20 = vpop.f32.mrf.mxu3 }
 0x105   : > { %1007 = vmatmul.f32.gmra.mxu0 %v7190_v59  ;;  %v808_v54 = vadd.f32 %v807_v51, %v712_v58  ;;  %v10872_v51 = vand.u32 4294901760, %v7357_v61 }
 0x106   : > { %v715_v40 = vpop.f32.mrf.mxu1 }
 0x107   : > { %v7352_v24 = vadd.f32 %v918_v20, %v808_v54  ;;  %1231 = vmatmul.f32.gmra.mxu2 %v7239_v4  ;;  %v1936_v4 = vsub.f32 %v7357_v61, %v10872_v51 }
 0x109   : > { %11197 = vst [vmem:[#allocation27_spill] sm:$0xff] %v7352_v24  ;;  %1325 = vmatmul.f32.gmra.mxu3 %v7208_v12  ;;  %1093 = vmatmul.f32.gmra.mxu1 %v7208_v12  ;;  %v1937_v54 = vand.u32 4294901760, %v1936_v4 }
 0x10a   : > { %v621_v52 = vpop.f32.mrf.mxu0  ;;  %v812_v8 = vpop.f32.mrf.mxu2 }
 0x10b   : > { %v716_v58 = vadd.f32 %v715_v40, %v621_v52  ;;  %1938 = vmatpush.msrb.mxu1 %v1937_v54 }
 0x10c   : > { %v924_v20 = vpop.f32.mrf.mxu3 }
 0x10d   : > { %1011 = vmatmul.f32.gmra.mxu0 %v7208_v12  ;;  %v813_v2 = vadd.f32 %v812_v8, %v716_v58  ;;  %v416_v8 = vld [vmem:[%s10853_s2 + $0x50] sm:$0xff] }
 0x10e   : > { %v719_v52 = vpop.f32.mrf.mxu1  ;;  %v7377_v58 = vand.u32 4294901760, %v416_v8 }
 0x10f   : > { %v7368_v9 = vadd.f32 %v924_v20, %v813_v2  ;;  %1239 = vmatmul.f32.gmra.mxu2 %v7255_v47 }
 0x110   : > { %1784 = vmatpush.msrb.mxu0 %v7377_v58  ;;  %2163 = vmatpush.msrb.mxu3 %v7377_v58 }
 0x111   : > { %11198 = vst [vmem:[#allocation28_spill] sm:$0xff] %v7368_v9  ;;  %1329 = vmatmul.f32.gmra.mxu3 %v7226_v45  ;;  %1097 = vmatmul.f32.gmra.mxu1 %v7226_v45 }
 0x112   : > { %v629_v24 = vpop.f32.mrf.mxu0  ;;  %v817_v40 = vpop.f32.mrf.mxu2 }
 0x113   : > { %v720_v38 = vadd.f32 %v719_v52, %v629_v24  ;;  %v7384_v24 = vsub.f32 %v416_v8, %v7377_v58 }
 0x114   : > { %v930_v25 = vpop.f32.mrf.mxu3 }
 0x115   : > { %1015 = vmatmul.f32.gmra.mxu0 %v7226_v45  ;;  %v818_v14 = vadd.f32 %v817_v40, %v720_v38  ;;  %2054 = vmatpush.msrb.mxu2 %v7384_v24  ;;  %v10874_v2 = vand.u32 4294901760, %v7384_v24 }
 0x116   : > { %v723_v20 = vpop.f32.mrf.mxu1 }
 0x117   : > { %v7379_v47 = vadd.f32 %v930_v25, %v818_v14  ;;  %1247 = vmatmul.f32.gmra.mxu2 %v7266_v1  ;;  %v1942_v1 = vsub.f32 %v7384_v24, %v10874_v2 }
 0x119   : > { %11199 = vst [vmem:[#allocation29_spill] sm:$0xff] %v7379_v47  ;;  %1333 = vmatmul.f32.gmra.mxu3 %v7244_v21  ;;  %1101 = vmatmul.f32.gmra.mxu1 %v7244_v21  ;;  %v1943_v52 = vand.u32 4294901760, %v1942_v1 }
 0x11a   : > { %v637_v38 = vpop.f32.mrf.mxu0  ;;  %v822_v4 = vpop.f32.mrf.mxu2 }
 0x11b   : > { %v724_v14 = vadd.f32 %v723_v20, %v637_v38  ;;  %1944 = vmatpush.msrb.mxu1 %v1943_v52 }
 0x11c   : > { %v936_v25 = vpop.f32.mrf.mxu3 }
 0x11d   : > { %1019 = vmatmul.f32.gmra.mxu0 %v7244_v21  ;;  %v823_v54 = vadd.f32 %v822_v4, %v724_v14  ;;  %v414_v4 = vld [vmem:[%s10853_s2 + $0x40] sm:$0xff] }
 0x11e   : > { %v7401_v38 = vpop.f32.mrf.mxu1 }
 0x11f   : > { %v7395_v40 = vadd.f32 %v936_v25, %v823_v54  ;;  %1570 = vmatmul.f32.vlgmr.msra.gmra.mxu2 %v6986_v10 }
 0x121   : > { %11200 = vst [vmem:[#allocation30_spill] sm:$0xff] %v7395_v40  ;;  %1652 = vmatmul.f32.vlgmr.msra.gmra.mxu3 %v6986_v10  ;;  %1456 = vmatmul.f32.vlgmr.msra.gmra.mxu1 %v6999_v19  ;;  %v7412_v10 = vand.u32 4294901760, %v414_v4 }
 0x122   : > { %v7399_v8 = vpop.f32.mrf.mxu0  ;;  %v1128_v20 = vpop.f32.mrf.mxu2 }
 0x123   : > { %v7419_v1 = vsub.f32 %v414_v4, %v7412_v10  ;;  %1786 = vmatpush.msrb.mxu0 %v7412_v10  ;;  %2165 = vmatpush.msrb.mxu3 %v7412_v10 }
 0x124   : > { %v1274_v51 = vpop.f32.mrf.mxu3 }
 0x125   : > { %v7403_v47 = vadd.f32 %v1274_v51, %v1128_v20  ;;  %1357 = vmatmul.f32.vlgmr.msra.gmra.mxu0 %v6992_v15  ;;  %2057 = vmatpush.msrb.mxu2 %v7419_v1 }
 0x126   : > { %v7416_v25 = vpop.f32.mrf.mxu1 }
 0x127   : > { %1574 = vmatmul.f32.gmra.mxu2 %v6989_v13 }
 0x129   : > { %1656 = vmatmul.f32.gmra.mxu3 %v6989_v13  ;;  %v10873_v13 = vand.u32 4294901760, %v7419_v1  ;;  %1462 = vmatmul.f32.gmra.mxu1 %v7008_v26 }
 0x12a   : > { %v7414_v14 = vpop.f32.mrf.mxu0  ;;  %v1136_v51 = vpop.f32.mrf.mxu2 }
 0x12b   : > { %v1948_v54 = vsub.f32 %v7419_v1, %v10873_v13 }
 0x12c   : > { %v1278_v15 = vpop.f32.mrf.mxu3 }
 0x12d   : > { %v7423_v19 = vadd.f32 %v1278_v15, %v1136_v51  ;;  %1362 = vmatmul.f32.gmra.mxu0 %v6996_v18  ;;  %v1949_v52 = vand.u32 4294901760, %v1948_v54 }
 0x12e   : > { %v7436_v4 = vpop.f32.mrf.mxu1 }
 0x12f   : > { %1578 = vmatmul.f32.gmra.mxu2 %v7002_v22  ;;  %1950 = vmatpush.msrb.mxu1 %v1949_v52  ;;  %v412_v52 = vld [vmem:[%s10853_s2 + $0x30] sm:$0xff] }
 0x131   : > { %1660 = vmatmul.f32.gmra.mxu3 %v7002_v22  ;;  %1468 = vmatmul.f32.gmra.mxu1 %v7026_v35 }
 0x132   : > { %v7434_v20 = vpop.f32.mrf.mxu0  ;;  %v1144_v18 = vpop.f32.mrf.mxu2 }
 0x134   : > { %v1282_v51 = vpop.f32.mrf.mxu3 }
 0x135   : > { %v7438_v15 = vadd.f32 %v1282_v51, %v1144_v18  ;;  %1367 = vmatmul.f32.gmra.mxu0 %v7017_v32  ;;  %v7451_v18 = vand.u32 4294901760, %v412_v52 }
 0x136   : > { %v7446_v22 = vpop.f32.mrf.mxu1 }
 0x137   : > { %1582 = vmatmul.f32.gmra.mxu2 %v7028_v36  ;;  %v7458_v32 = vsub.f32 %v412_v52, %v7451_v18  ;;  %1788 = vmatpush.msrb.mxu0 %v7451_v18 }
 0x138   : > { %2167 = vmatpush.msrb.mxu3 %v7451_v18 }
 0x139   : > { %1664 = vmatmul.f32.gmra.mxu3 %v7028_v36  ;;  %1474 = vmatmul.f32.gmra.mxu1 %v7044_v42  ;;  %v10875_v35 = vand.u32 4294901760, %v7458_v32 }
 0x13a   : > { %v7444_v26 = vpop.f32.mrf.mxu0  ;;  %v1152_v54 = vpop.f32.mrf.mxu2  ;;  %2060 = vmatpush.msrb.mxu2 %v7458_v32 }
 0x13c   : > { %v1286_v13 = vpop.f32.mrf.mxu3 }
 0x13d   : > { %v7453_v51 = vadd.f32 %v1286_v13, %v1152_v54  ;;  %1372 = vmatmul.f32.gmra.mxu0 %v7035_v39  ;;  %v1954_v39 = vsub.f32 %v7458_v32, %v10875_v35 }
 0x13e   : > { %v7471_v42 = vpop.f32.mrf.mxu1 }
 0x13f   : > { %1586 = vmatmul.f32.gmra.mxu2 %v7046_v43  ;;  %11201 = vst [vmem:[#allocation31_spill] sm:$0xff] %v7471_v42  ;;  %v1955_v52 = vand.u32 4294901760, %v1954_v39 }
 0x141   : > { %1668 = vmatmul.f32.gmra.mxu3 %v7046_v43  ;;  %1480 = vmatmul.f32.gmra.mxu1 %v7062_v49 }
 0x142   : > { %v7466_v36 = vpop.f32.mrf.mxu0  ;;  %v1160_v13 = vpop.f32.mrf.mxu2  ;;  %1956 = vmatpush.msrb.mxu1 %v1955_v52 }
 0x144   : > { %v1290_v54 = vpop.f32.mrf.mxu3 }
 0x145   : > { %v7473_v2 = vadd.f32 %v1290_v54, %v1160_v13  ;;  %1377 = vmatmul.f32.gmra.mxu0 %v7053_v46  ;;  %v410_v46 = vld [vmem:[%s10853_s2 + $0x20] sm:$0xff] }
 0x146   : > { %v7481_v40 = vpop.f32.mrf.mxu1  ;;  %v7490_v49 = vand.u32 4294901760, %v410_v46 }
 0x147   : > { %1590 = vmatmul.f32.gmra.mxu2 %v7064_v50  ;;  %11203 = vst [vmem:[#allocation33_spill] sm:$0xff] %v7481_v40 }
 0x148   : > { %1790 = vmatpush.msrb.mxu0 %v7490_v49  ;;  %2169 = vmatpush.msrb.mxu3 %v7490_v49 }
 0x149   : > { %1672 = vmatmul.f32.gmra.mxu3 %v7064_v50  ;;  %1486 = vmatmul.f32.gmra.mxu1 %v7080_v56  ;;  %v7494_v50 = vsub.f32 %v410_v46, %v7490_v49 }
 0x14a   : > { %v7479_v43 = vpop.f32.mrf.mxu0  ;;  %v1168_v35 = vpop.f32.mrf.mxu2 }
 0x14b   : > { %11202 = vst [vmem:[#allocation32_spill] sm:$0xff] %v7479_v43  ;;  %2063 = vmatpush.msrb.mxu2 %v7494_v50 }
 0x14c   : > { %v1294_v9 = vpop.f32.mrf.mxu3 }
 0x14d   : > { %v7483_v5 = vadd.f32 %v1294_v9, %v1168_v35  ;;  %1382 = vmatmul.f32.gmra.mxu0 %v7071_v53  ;;  %v10876_v53 = vand.u32 4294901760, %v7494_v50 }
 0x14e   : > { %v7503_v56 = vpop.f32.mrf.mxu1 }
 0x14f   : > { %1594 = vmatmul.f32.gmra.mxu2 %v7082_v57  ;;  %11205 = vst [vmem:[#allocation35_spill] sm:$0xff] %v7503_v56  ;;  %v1960_v13 = vsub.f32 %v7494_v50, %v10876_v53 }
 0x151   : > { %1676 = vmatmul.f32.gmra.mxu3 %v7082_v57  ;;  %1492 = vmatmul.f32.gmra.mxu1 %v7098_v63  ;;  %v1961_v57 = vand.u32 4294901760, %v1960_v13 }
 0x152   : > { %v7498_v9 = vpop.f32.mrf.mxu0  ;;  %v1176_v35 = vpop.f32.mrf.mxu2 }
 0x153   : > { %11204 = vst [vmem:[#allocation34_spill] sm:$0xff] %v7498_v9  ;;  %1962 = vmatpush.msrb.mxu1 %v1961_v57 }
 0x154   : > { %v1298_v39 = vpop.f32.mrf.mxu3 }
 0x155   : > { %v7508_v54 = vadd.f32 %v1298_v39, %v1176_v35  ;;  %1387 = vmatmul.f32.gmra.mxu0 %v7089_v60  ;;  %v408_v60 = vld [vmem:[%s10853_s2 + $0x10] sm:$0xff] }
 0x156   : > { %v7516_v46 = vpop.f32.mrf.mxu1  ;;  %v7525_v63 = vand.u32 4294901760, %v408_v60 }
 0x157   : > { %1598 = vmatmul.f32.gmra.mxu2 %v7100_v0  ;;  %11207 = vst [vmem:[#allocation37_spill] sm:$0xff] %v7516_v46  ;;  %v395_v46 = vld [vmem:[%s7612_s27 + $0x28] sm:$0xff] }
 0x158   : > { %1792 = vmatpush.msrb.mxu0 %v7525_v63  ;;  %2171 = vmatpush.msrb.mxu3 %v7525_v63 }
 0x159   : > { %1680 = vmatmul.f32.gmra.mxu3 %v7100_v0  ;;  %1498 = vmatmul.f32.gmra.mxu1 %v7116_v6  ;;  %v7530_v0 = vsub.f32 %v408_v60, %v7525_v63 }
 0x15a   : > { %v7514_v52 = vpop.f32.mrf.mxu0  ;;  %v1184_v62 = vpop.f32.mrf.mxu2 }
 0x15b   : > { %11206 = vst [vmem:[#allocation36_spill] sm:$0xff] %v7514_v52  ;;  %2066 = vmatpush.msrb.mxu2 %v7530_v0 }
 0x15c   : > { %v1302_v56 = vpop.f32.mrf.mxu3 }
 0x15d   : > { %v7518_v9 = vadd.f32 %v1302_v56, %v1184_v62  ;;  %1392 = vmatmul.f32.gmra.mxu0 %v7107_v3 }
 0x15e   : > { %v7536_v3 = vpop.f32.mrf.mxu1 }
 0x15f   : > { %1602 = vmatmul.f32.gmra.mxu2 %v7118_v7  ;;  %11209 = vst [vmem:[#allocation39_spill] sm:$0xff] %v7536_v3 }
 0x161   : > { %1684 = vmatmul.f32.gmra.mxu3 %v7118_v7  ;;  %v1965_v7 = vand.u32 4294901760, %v7530_v0  ;;  %1504 = vmatmul.f32.gmra.mxu1 %v7134_v16 }
 0x162   : > { %v7533_v62 = vpop.f32.mrf.mxu0  ;;  %v1192_v6 = vpop.f32.mrf.mxu2 }
 0x163   : > { %11208 = vst [vmem:[#allocation38_spill] sm:$0xff] %v7533_v62  ;;  %v1966_v39 = vsub.f32 %v7530_v0, %v1965_v7 }
 0x164   : > { %v1306_v56 = vpop.f32.mrf.mxu3 }
 0x165   : > { %v7539_v35 = vadd.f32 %v1306_v56, %v1192_v6  ;;  %1397 = vmatmul.f32.gmra.mxu0 %v7125_v11  ;;  %v1967_v13 = vand.u32 4294901760, %v1966_v39  ;;  %v406_v11 = vld [vmem:[%s10853_s2] sm:$0xff] }
 0x166   : > { %v7549_v60 = vpop.f32.mrf.mxu1 }
 0x167   : > { %1606 = vmatmul.f32.gmra.mxu2 %v7136_v17  ;;  %11211 = vst [vmem:[#allocation41_spill] sm:$0xff] %v7549_v60  ;;  %1968 = vmatpush.msrb.mxu1 %v1967_v13 }
 0x169   : > { %1688 = vmatmul.f32.gmra.mxu3 %v7136_v17  ;;  %1510 = vmatmul.f32.gmra.mxu1 %v7152_v28  ;;  %v1793_v17 = vand.u32 4294901760, %v406_v11  ;;  %v11214_v28 = vld [vmem:[#allocation9_spill] sm:$0xff] }
 0x16a   : > { %v7547_v57 = vpop.f32.mrf.mxu0  ;;  %v1200_v53 = vpop.f32.mrf.mxu2 }
 0x16b   : > { %11210 = vst [vmem:[#allocation40_spill] sm:$0xff] %v7547_v57  ;;  %v1970_v13 = vsub.f32 %v406_v11, %v1793_v17  ;;  %1794 = vmatpush.msrb.mxu0 %v1793_v17  ;;  %2173 = vmatpush.msrb.mxu3 %v1793_v17  ;;  %v11216_v11 = vand.u32 4294901760, %v7384_v24  ;;  %v11222_v24 = vand.u32 4294901760, %v7458_v32 }
 0x16c   : > { %v1310_v6 = vpop.f32.mrf.mxu3 }
 0x16d   : > { %v7551_v56 = vadd.f32 %v1310_v6, %v1200_v53  ;;  %1402 = vmatmul.f32.gmra.mxu0 %v7143_v23  ;;  %2069 = vmatpush.msrb.mxu2 %v1970_v13  ;;  %v11215_v6 = vand.u32 4294901760, %v7357_v61 }
 0x16e   : > { %v7562_v0 = vpop.f32.mrf.mxu1 }
 0x16f   : > { %1610 = vmatmul.f32.gmra.mxu2 %v7154_v29  ;;  %11213 = vst [vmem:[#allocation43_spill] sm:$0xff] %v7562_v0  ;;  %2283 = vmatpush.msra.mxu0 %v11215_v6  ;;  %v11220_v6 = vld [vmem:[#allocation10_spill] sm:$0xff] }
 0x171   : > { %1692 = vmatmul.f32.gmra.mxu3 %v7154_v29  ;;  %1516 = vmatmul.f32.gmra.mxu1 %v11214_v28  ;;  %v1971_v29 = vand.u32 4294901760, %v1970_v13  ;;  %v11219_v28 = vand.u32 4294901760, %v7419_v1  ;;  %v11223_v1 = vand.u32 4294901760, %v7494_v50 }
 0x172   : > { %v7560_v16 = vpop.f32.mrf.mxu0  ;;  %v1208_v39 = vpop.f32.mrf.mxu2  ;;  %2287 = vmatpush.msra.mxu0 %v11216_v11 }
 0x173   : > { %11212 = vst [vmem:[#allocation42_spill] sm:$0xff] %v7560_v16  ;;  %v1972_v16 = vsub.f32 %v1970_v13, %v1971_v29  ;;  %v11226_v13 = vld [vmem:[#allocation12_spill] sm:$0xff] }
 0x174   : > { %v1314_v53 = vpop.f32.mrf.mxu3  ;;  %2291 = vmatpush.msra.mxu0 %v11219_v28  ;;  %v11231_v28 = vld [vmem:[#allocation15_spill] sm:$0xff] }
 0x175   : > { %v7564_v23 = vadd.f32 %v1314_v53, %v1208_v39  ;;  %1407 = vmatmul.f32.gmra.mxu0 %v7161_v33  ;;  %v1973_v39 = vand.u32 4294901760, %v1972_v16 }
 0x176   : > { %v7576_v53 = vpop.f32.mrf.mxu1  ;;  %2295 = vmatpush.msra.mxu0 %v11222_v24 }
 0x177   : > { %1614 = vmatmul.f32.gmra.mxu2 %v7172_v44  ;;  %11218 = vst [vmem:[#allocation44_spill] sm:$0xff] %v7576_v53  ;;  %1974 = vmatpush.msrb.mxu1 %v1973_v39 }
 0x178   : > { %2299 = vmatpush.msra.mxu0 %v11223_v1 }
 0x179   : > { %1696 = vmatmul.f32.gmra.mxu3 %v7172_v44  ;;  %2383 = vmatpush.msra.mxu1 %v7350_v31  ;;  %v11221_v44 = vld [vmem:[#allocation11_spill] sm:$0xff] }
 0x17a   : > { %v7574_v0 = vpop.f32.mrf.mxu0  ;;  %v1216_v33 = vpop.f32.mrf.mxu2  ;;  %1522 = vmatmul.f32.gmra.mxu1 %v11221_v44  ;;  %2303 = vmatpush.msra.mxu0 %v1965_v7 }
 0x17b   : > { %11217 = vst [vmem:[#allocation9_spill] sm:$0xff] %v7574_v0  ;;  %2385 = vmatpush.msra.mxu1 %v7377_v58 }
 0x17c   : > { %v1318_v60 = vpop.f32.mrf.mxu3  ;;  %2307 = vmatpush.msra.mxu0 %v1971_v29  ;;  %v390_v29 = vld [vmem:[%s7612_s27] sm:$0xff] }
 0x17d   : > { %v7580_v61 = vadd.f32 %v1318_v60, %v1216_v33  ;;  %1412 = vmatmul.f32.gmra.mxu0 %v11220_v6  ;;  %2387 = vmatpush.msra.mxu1 %v7412_v10  ;;  %v419_v10 = vld [vmem:[%s10853_s2 + $0x68] sm:$0x3]  ;;  %v1718_v6 = vsel %vm1716_vm3, %v390_v29, 0 }
 0x17e   : > { %v7595_v31 = vpop.f32.mrf.mxu1  ;;  %v7638_v24 = vand.u32 4294901760, %v1718_v6 }
 0x17f   : > { %1618 = vmatmul.f32.gmra.mxu2 %v7190_v59  ;;  %11225 = vst [vmem:[#allocation11_spill] sm:$0xff] %v7595_v31  ;;  %2389 = vmatpush.msra.mxu1 %v7451_v18  ;;  %v1770_v18 = vsel %vm1765_vm2, %v419_v10, 0 }
 0x180   : > { %v7649_v29 = vsub.f32 %v1718_v6, %v7638_v24 }
 0x181   : > { %1700 = vmatmul.f32.gmra.mxu3 %v7190_v59  ;;  %2391 = vmatpush.msra.mxu1 %v7490_v49  ;;  %v11227_v59 = vld [vmem:[#allocation13_spill] sm:$0xff]  ;;  %v7616_v49 = vand.u32 4294901760, %v1770_v18 }
 0x182   : > { %v7593_v60 = vpop.f32.mrf.mxu0  ;;  %v1224_v16 = vpop.f32.mrf.mxu2  ;;  %1528 = vmatmul.f32.gmra.mxu1 %v11227_v59  ;;  %v391_v59 = vld [vmem:[%s7612_s27 + $0x8] sm:$0xff] }
 0x183   : > { %11224 = vst [vmem:[#allocation10_spill] sm:$0xff] %v7593_v60  ;;  %2393 = vmatpush.msra.mxu1 %v7525_v63  ;;  %2471 = vmatpush.msra.mxu2 %v7616_v49  ;;  %v7625_v11 = vsub.f32 %v1770_v18, %v7616_v49 }
 0x184   : > { %v1322_v32 = vpop.f32.mrf.mxu3 }
 0x185   : > { %v7598_v58 = vadd.f32 %v1322_v32, %v1224_v16  ;;  %1417 = vmatmul.f32.gmra.mxu0 %v11226_v13  ;;  %2395 = vmatpush.msra.mxu1 %v1793_v17  ;;  %v10877_v17 = vand.u32 4294901760, %v7625_v11 }
 0x186   : > { %v7620_v7 = vpop.f32.mrf.mxu1 }
 0x187   : > { %1622 = vmatmul.f32.gmra.mxu2 %v7208_v12  ;;  %11229 = vst [vmem:[#allocation13_spill] sm:$0xff] %v7620_v7  ;;  %v2625_v44 = vsub.f32 %v7625_v11, %v10877_v17  ;;  %v11240_v17 = vld [vmem:[#allocation18_spill] sm:$0xff] }
 0x189   : > { %1704 = vmatmul.f32.gmra.mxu3 %v7208_v12  ;;  %v11230_v12 = vld [vmem:[#allocation14_spill] sm:$0xff]  ;;  %v2626_v1 = vand.u32 4294901760, %v2625_v44 }
 0x18a   : > { %v7618_v50 = vpop.f32.mrf.mxu0  ;;  %v1232_v63 = vpop.f32.mrf.mxu2  ;;  %1534 = vmatmul.f32.gmra.mxu1 %v11231_v28  ;;  %v417_v44 = vld [vmem:[%s10853_s2 + $0x58] sm:$0xff] }
 0x18b   : > { %11228 = vst [vmem:[#allocation12_spill] sm:$0xff] %v7618_v50  ;;  %2627 = vmatpush.msra.mxu3 %v2626_v1  ;;  %v7665_v6 = vand.u32 4294901760, %v417_v44 }
 0x18c   : > { %v1326_v39 = vpop.f32.mrf.mxu3 }
 0x18d   : > { %v7627_v33 = vadd.f32 %v1326_v39, %v1232_v63  ;;  %1422 = vmatmul.f32.gmra.mxu0 %v11230_v12  ;;  %v11234_v63 = vld [vmem:[#allocation16_spill] sm:$0xff]  ;;  %v1721_v39 = vsel %vm1716_vm3, %v391_v59, 0  ;;  %v7656_v12 = vand.u32 4294901760, %v7649_v29  ;;  %2473 = vmatpush.msra.mxu2 %v7665_v6 }
 0x18e   : > { %v7642_v32 = vpop.f32.mrf.mxu1  ;;  %11235 = vst [vmem:[#allocation16_spill] sm:$0xff] %v7649_v29  ;;  %v7658_v28 = vand.u32 4294901760, %v1721_v39 }
 0x18f   : > { %1626 = vmatmul.f32.gmra.mxu2 %v7226_v45  ;;  %11233 = vst [vmem:[#allocation15_spill] sm:$0xff] %v7642_v32  ;;  %v1798_v32 = vsub.f32 %v7649_v29, %v7656_v12 }
 0x191   : > { %1708 = vmatmul.f32.gmra.mxu3 %v7226_v45  ;;  %v11236_v45 = vld [vmem:[#allocation17_spill] sm:$0xff] }
 0x192   : > { %v7640_v16 = vpop.f32.mrf.mxu0  ;;  %v1240_v13 = vpop.f32.mrf.mxu2  ;;  %1540 = vmatmul.f32.gmra.mxu1 %v11236_v45  ;;  %11237 = vst [vmem:[#allocation17_spill] sm:$0xff] %v7656_v12 }
 0x193   : > { %11232 = vst [vmem:[#allocation14_spill] sm:$0xff] %v7640_v16 }
 0x194   : > { %v1330_v10 = vpop.f32.mrf.mxu3 }
 0x195   : > { %v7645_v18 = vadd.f32 %v1330_v10, %v1240_v13  ;;  %1427 = vmatmul.f32.gmra.mxu0 %v11234_v63  ;;  %v392_v10 = vld [vmem:[%s7612_s27 + $0x10] sm:$0xff] }
 0x196   : > { %v7667_v13 = vpop.f32.mrf.mxu1  ;;  %v1724_v16 = vsel %vm1716_vm3, %v392_v10, 0 }
 0x197   : > { %1630 = vmatmul.f32.gmra.mxu2 %v7244_v21  ;;  %11239 = vst [vmem:[#allocation46_spill] sm:$0xff] %v7667_v13  ;;  %v11242_v13 = vld [vmem:[#allocation19_spill] sm:$0xff] }
 0x199   : > { %1712 = vmatmul.f32.gmra.mxu3 %v7244_v21  ;;  %v7672_v21 = vsub.f32 %v417_v44, %v7665_v6 }
 0x19a   : > { %v7663_v1 = vpop.f32.mrf.mxu0  ;;  %v1248_v59 = vpop.f32.mrf.mxu2  ;;  %1546 = vmatmul.f32.gmra.mxu1 %v11242_v13 }
 0x19b   : > { %11238 = vst [vmem:[#allocation45_spill] sm:$0xff] %v7663_v1  ;;  %v7680_v1 = vsub.f32 %v1721_v39, %v7658_v28  ;;  %v10879_v7 = vand.u32 4294901760, %v7672_v21  ;;  %v7695_v39 = vand.u32 4294901760, %v1724_v16 }
 0x19c   : > { %v1334_v63 = vpop.f32.mrf.mxu3 }
 0x19d   : > { %v7674_v45 = vadd.f32 %v1334_v63, %v1248_v59  ;;  %1432 = vmatmul.f32.gmra.mxu0 %v11240_v17  ;;  %11241 = vst [vmem:[#allocation18_spill] sm:$0xff] %v7680_v1  ;;  %v2631_v44 = vsub.f32 %v7672_v21, %v10879_v7  ;;  %v7690_v17 = vand.u32 4294901760, %v1798_v32  ;;  %v7693_v59 = vand.u32 4294901760, %v7680_v1 }
 0x19e   : > { %v1457_v50 = vpop.f32.mrf.mxu1  ;;  %v7703_v7 = vsub.f32 %v1724_v16, %v7695_v39 }
 0x19f   : > { %2072 = vmatmul.f32.vlgmr.msrb.gmra.mxu2 %v7649_v29  ;;  %11243 = vst [vmem:[#allocation19_spill] sm:$0xff] %v7693_v59  ;;  %v2632_v63 = vand.u32 4294901760, %v2631_v44  ;;  %v393_v29 = vld [vmem:[%s7612_s27 + $0x18] sm:$0xff]  ;;  %v1806_v32 = vsub.f32 %v7680_v1, %v7693_v59 }
 0x1a0   : > { %11244 = vst [vmem:[#allocation47_spill] sm:$0xff] %v7703_v7  ;;  %v1727_v44 = vsel %vm1716_vm3, %v393_v29, 0  ;;  %v394_v29 = vld [vmem:[%s7612_s27 + $0x20] sm:$0xff] }
 0x1a1   : > { %2177 = vmatmul.f32.vlgmr.msrb.gmra.mxu3 %v7656_v12  ;;  %v7714_v16 = vand.u32 4294901760, %v1806_v32 }
 0x1a2   : > { %v1358_v13 = vpop.f32.mrf.mxu0  ;;  %v1571_v31 = vpop.f32.mrf.mxu2  ;;  %2633 = vmatpush.msra.mxu3 %v2632_v63  ;;  %1976 = vmatmul.f32.vlgmr.msrb.gmra.mxu1 %v7638_v24  ;;  %v7719_v63 = vand.u32 4294901760, %v1727_v44 }
 0x1a3   : > { %v1359_v10 = vadd.f32 %v1358_v13, %v7403_v47  ;;  %2850 = vmatpush.msrb.mxu1 %v7616_v49  ;;  %v7717_v13 = vand.u32 4294901760, %v7703_v7 }
 0x1a4   : > { %v1653_v60 = vpop.f32.mrf.mxu3  ;;  %v7738_v0 = vsub.f32 %v1727_v44, %v7719_v63 }
 0x1a5   : > { %v1458_v53 = vadd.f32 %v1457_v50, %v1359_v10  ;;  %1800 = vmatmul.f32.vlgmr.msrb.gmra.mxu0 %v7690_v17  ;;  %11246 = vst [vmem:[#allocation49_spill] sm:$0xff] %v7717_v13  ;;  %2852 = vmatpush.msrb.mxu1 %v7665_v6 }
 0x1a6   : > { %2740 = vmatpush.msrb.mxu0 %v7625_v11  ;;  %11247 = vst [vmem:[#allocation50_spill] sm:$0xff] %v7738_v0  ;;  %v7756_v57 = vand.u32 4294901760, %v7738_v0 }
 0x1a7   : > { %v1572_v47 = vadd.f32 %v1571_v31, %v1458_v53  ;;  %2077 = vmatmul.f32.gmra.mxu2 %v7680_v1  ;;  %v415_v53 = vld [vmem:[%s10853_s2 + $0x48] sm:$0xff] }
 0x1a8   : > { %2743 = vmatpush.msrb.mxu0 %v7672_v21  ;;  %v7726_v10 = vand.u32 4294901760, %v415_v53  ;;  %11250 = vst [vmem:[#allocation53_spill] sm:$0xff] %v7756_v57 }
 0x1a9   : > { %v7711_v50 = vadd.f32 %v1653_v60, %v1572_v47  ;;  %2183 = vmatmul.f32.gmra.mxu3 %v7693_v59  ;;  %v1463_v47 = vpop.f32.mrf.mxu1 }
 0x1aa   : > { %v1363_v31 = vpop.f32.mrf.mxu0  ;;  %v1575_v32 = vpop.f32.mrf.mxu2  ;;  %2475 = vmatpush.msra.mxu2 %v7726_v10  ;;  %v7731_v1 = vsub.f32 %v415_v53, %v7726_v10  ;;  %2854 = vmatpush.msrb.mxu1 %v7726_v10 }
 0x1ab   : > { %11245 = vst [vmem:[#allocation48_spill] sm:$0xff] %v7711_v50  ;;  %v1364_v60 = vadd.f32 %v1363_v31, %v7423_v19  ;;  %v1814_v50 = vsub.f32 %v7703_v7, %v7717_v13  ;;  %v1730_v19 = vsel %vm1716_vm3, %v394_v29, 0  ;;  %1980 = vmatmul.f32.gmra.mxu1 %v7658_v28 }
 0x1ac   : > { %v1657_v59 = vpop.f32.mrf.mxu3  ;;  %v10884_v31 = vand.u32 4294901760, %v7731_v1  ;;  %2746 = vmatpush.msrb.mxu0 %v7731_v1 }
 0x1ad   : > { %v1464_v12 = vadd.f32 %v1463_v47, %v1364_v60  ;;  %1808 = vmatmul.f32.gmra.mxu0 %v7714_v16  ;;  %v7745_v60 = vand.u32 4294901760, %v1730_v19  ;;  %v7753_v29 = vand.u32 4294901760, %v1814_v50  ;;  %v1822_v50 = vsub.f32 %v7738_v0, %v7756_v57 }
 0x1ae   : > { %v2637_v47 = vsub.f32 %v7731_v1, %v10884_v31 }
 0x1af   : > { %v1576_v53 = vadd.f32 %v1575_v32, %v1464_v12  ;;  %2082 = vmatmul.f32.gmra.mxu2 %v7703_v7  ;;  %11248 = vst [vmem:[#allocation51_spill] sm:$0xff] %v7745_v60  ;;  %v7761_v55 = vsub.f32 %v1730_v19, %v7745_v60 }
 0x1b0   : > { %v2638_v62 = vand.u32 4294901760, %v2637_v47 }
 0x1b1   : > { %v7750_v44 = vadd.f32 %v1657_v59, %v1576_v53  ;;  %2189 = vmatmul.f32.gmra.mxu3 %v7717_v13  ;;  %v1469_v32 = vpop.f32.mrf.mxu1  ;;  %11251 = vst [vmem:[#allocation54_spill] sm:$0xff] %v7761_v55  ;;  %v1733_v53 = vsel %vm1716_vm3, %v395_v46, 0  ;;  %v396_v46 = vld [vmem:[%s7612_s27 + $0x30] sm:$0xff] }
 0x1b2   : > { %v1368_v3 = vpop.f32.mrf.mxu0  ;;  %v1579_v7 = vpop.f32.mrf.mxu2  ;;  %2639 = vmatpush.msra.mxu3 %v2638_v62  ;;  %v7775_v62 = vand.u32 4294901760, %v1822_v50  ;;  %v7777_v47 = vand.u32 4294901760, %v1733_v53 }
 0x1b3   : > { %11249 = vst [vmem:[#allocation52_spill] sm:$0xff] %v7750_v44  ;;  %v1369_v12 = vadd.f32 %v1368_v3, %v7438_v15  ;;  %1984 = vmatmul.f32.gmra.mxu1 %v7695_v39  ;;  %v7770_v3 = vand.u32 4294901760, %v7761_v55 }
 0x1b4   : > { %v1661_v52 = vpop.f32.mrf.mxu3  ;;  %11254 = vst [vmem:[#allocation57_spill] sm:$0xff] %v7777_v47 }
 0x1b5   : > { %v1470_v59 = vadd.f32 %v1469_v32, %v1369_v12  ;;  %1816 = vmatmul.f32.gmra.mxu0 %v7753_v29  ;;  %11252 = vst [vmem:[#allocation55_spill] sm:$0xff] %v7770_v3 }
 0x1b7   : > { %v1580_v15 = vadd.f32 %v1579_v7, %v1470_v59  ;;  %2087 = vmatmul.f32.gmra.mxu2 %v7738_v0  ;;  %v413_v7 = vld [vmem:[%s10853_s2 + $0x38] sm:$0xff] }
 0x1b9   : > { %v7772_v19 = vadd.f32 %v1661_v52, %v1580_v15  ;;  %2195 = vmatmul.f32.gmra.mxu3 %v7756_v57  ;;  %v1475_v31 = vpop.f32.mrf.mxu1  ;;  %v1830_v52 = vsub.f32 %v7761_v55, %v7770_v3  ;;  %v7786_v15 = vand.u32 4294901760, %v413_v7  ;;  %v7790_v57 = vsub.f32 %v1733_v53, %v7777_v47 }
 0x1ba   : > { %v1373_v12 = vpop.f32.mrf.mxu0  ;;  %v1583_v13 = vpop.f32.mrf.mxu2 }
 0x1bb   : > { %11253 = vst [vmem:[#allocation56_spill] sm:$0xff] %v7772_v19  ;;  %v1374_v32 = vadd.f32 %v1373_v12, %v7453_v51  ;;  %1988 = vmatmul.f32.gmra.mxu1 %v7719_v63  ;;  %v1736_v51 = vsel %vm1716_vm3, %v396_v46, 0  ;;  %2477 = vmatpush.msra.mxu2 %v7786_v15  ;;  %v7797_v0 = vand.u32 4294901760, %v1830_v52  ;;  %v7803_v53 = vand.u32 4294901760, %v7790_v57 }
 0x1bc   : > { %v1665_v59 = vpop.f32.mrf.mxu3  ;;  %11255 = vst [vmem:[#allocation58_spill] sm:$0xff] %v7790_v57  ;;  %2856 = vmatpush.msrb.mxu1 %v7786_v15  ;;  %v7808_v46 = vsub.f32 %v413_v7, %v7786_v15 }
 0x1bd   : > { %v1476_v50 = vadd.f32 %v1475_v31, %v1374_v32  ;;  %1824 = vmatmul.f32.gmra.mxu0 %v7775_v62  ;;  %11257 = vst [vmem:[#allocation60_spill] sm:$0xff] %v7803_v53  ;;  %v7805_v32 = vand.u32 4294901760, %v1736_v51 }
 0x1be   : > { %v10890_v52 = vand.u32 4294901760, %v7808_v46  ;;  %2749 = vmatpush.msrb.mxu0 %v7808_v46 }
 0x1bf   : > { %v1584_v12 = vadd.f32 %v1583_v13, %v1476_v50  ;;  %2092 = vmatmul.f32.gmra.mxu2 %v7761_v55  ;;  %11258 = vst [vmem:[#allocation61_spill] sm:$0xff] %v7805_v32  ;;  %v397_v55 = vld [vmem:[%s7612_s27 + $0x38] sm:$0xff]  ;;  %v7818_v7 = vsub.f32 %v1736_v51, %v7805_v32 }
 0x1c1   : > { %v7799_v31 = vadd.f32 %v1665_v59, %v1584_v12  ;;  %2201 = vmatmul.f32.gmra.mxu3 %v7770_v3  ;;  %v1481_v50 = vpop.f32.mrf.mxu1  ;;  %v1838_v3 = vsub.f32 %v7790_v57, %v7803_v53  ;;  %11259 = vst [vmem:[#allocation62_spill] sm:$0xff] %v7818_v7  ;;  %v7832_v51 = vand.u32 4294901760, %v7818_v7 }
 0x1c2   : > { %v1378_v19 = vpop.f32.mrf.mxu0  ;;  %v1587_v44 = vpop.f32.mrf.mxu2 }
 0x1c3   : > { %11256 = vst [vmem:[#allocation59_spill] sm:$0xff] %v7799_v31  ;;  %v1379_v13 = vadd.f32 %v1378_v19, %v7473_v2  ;;  %v2643_v2 = vsub.f32 %v7808_v46, %v10890_v52  ;;  %1992 = vmatmul.f32.gmra.mxu1 %v7745_v60  ;;  %v1739_v19 = vsel %vm1716_vm3, %v397_v55, 0 }
 0x1c4   : > { %v1669_v59 = vpop.f32.mrf.mxu3  ;;  %11262 = vst [vmem:[#allocation65_spill] sm:$0xff] %v7832_v51  ;;  %v7834_v43 = vand.u32 4294901760, %v1739_v19 }
 0x1c5   : > { %v1482_v12 = vadd.f32 %v1481_v50, %v1379_v13  ;;  %1832 = vmatmul.f32.gmra.mxu0 %v7797_v0  ;;  %v2644_v40 = vand.u32 4294901760, %v2643_v2  ;;  %v7829_v50 = vand.u32 4294901760, %v1838_v3  ;;  %v1846_v3 = vsub.f32 %v7818_v7, %v7832_v51 }
 0x1c6   : > { %11263 = vst [vmem:[#allocation66_spill] sm:$0xff] %v7834_v43 }
 0x1c7   : > { %v1588_v31 = vadd.f32 %v1587_v44, %v1482_v12  ;;  %2097 = vmatmul.f32.gmra.mxu2 %v7790_v57  ;;  %11261 = vst [vmem:[#allocation64_spill] sm:$0xff] %v7829_v50  ;;  %2645 = vmatpush.msra.mxu3 %v2644_v40  ;;  %v398_v12 = vld [vmem:[%s7612_s27 + $0x40] sm:$0xff] }
 0x1c8   : > { %v1742_v40 = vsel %vm1716_vm3, %v398_v12, 0 }
 0x1c9   : > { %v7826_v13 = vadd.f32 %v1669_v59, %v1588_v31  ;;  %2207 = vmatmul.f32.gmra.mxu3 %v7803_v53  ;;  %v1487_v55 = vpop.f32.mrf.mxu1  ;;  %v7842_v31 = vsub.f32 %v1739_v19, %v7834_v43  ;;  %v411_v19 = vld [vmem:[%s10853_s2 + $0x28] sm:$0xff] }
 0x1ca   : > { %v1383_v52 = vpop.f32.mrf.mxu0  ;;  %v1591_v44 = vpop.f32.mrf.mxu2  ;;  %v7860_v12 = vand.u32 4294901760, %v411_v19 }
 0x1cb   : > { %11260 = vst [vmem:[#allocation63_spill] sm:$0xff] %v7826_v13  ;;  %v1384_v48 = vadd.f32 %v1383_v52, %v7483_v5  ;;  %1996 = vmatmul.f32.gmra.mxu1 %v7777_v47  ;;  %v7853_v52 = vand.u32 4294901760, %v7842_v31 }
 0x1cc   : > { %v1673_v2 = vpop.f32.mrf.mxu3  ;;  %11264 = vst [vmem:[#allocation67_spill] sm:$0xff] %v7842_v31  ;;  %2479 = vmatpush.msra.mxu2 %v7860_v12  ;;  %2858 = vmatpush.msrb.mxu1 %v7860_v12 }
 0x1cd   : > { %v1488_v57 = vadd.f32 %v1487_v55, %v1384_v48  ;;  %1840 = vmatmul.f32.gmra.mxu0 %v7829_v50  ;;  %v7850_v48 = vand.u32 4294901760, %v1846_v3  ;;  %11267 = vst [vmem:[#allocation70_spill] sm:$0xff] %v7853_v52  ;;  %v7855_v55 = vand.u32 4294901760, %v1742_v40  ;;  %v7866_v3 = vsub.f32 %v411_v19, %v7860_v12  ;;  %v400_v50 = vld [vmem:[%s7612_s27 + $0x50] sm:$0xff] }
 0x1cf   : > { %v1592_v59 = vadd.f32 %v1591_v44, %v1488_v57  ;;  %2102 = vmatmul.f32.gmra.mxu2 %v7818_v7  ;;  %11266 = vst [vmem:[#allocation69_spill] sm:$0xff] %v7850_v48  ;;  %v7873_v13 = vsub.f32 %v1742_v40, %v7855_v55  ;;  %2752 = vmatpush.msrb.mxu0 %v7866_v3 }
 0x1d0   : > { %11268 = vst [vmem:[#allocation71_spill] sm:$0xff] %v7855_v55 }
 0x1d1   : > { %v7847_v5 = vadd.f32 %v1673_v2, %v1592_v59  ;;  %2213 = vmatmul.f32.gmra.mxu3 %v7832_v51  ;;  %v1493_v44 = vpop.f32.mrf.mxu1  ;;  %v399_v59 = vld [vmem:[%s7612_s27 + $0x48] sm:$0xff]  ;;  %11269 = vst [vmem:[#allocation72_spill] sm:$0xff] %v7873_v13 }
 0x1d2   : > { %v1388_v53 = vpop.f32.mrf.mxu0  ;;  %v1595_v2 = vpop.f32.mrf.mxu2 }
 0x1d3   : > { %11265 = vst [vmem:[#allocation68_spill] sm:$0xff] %v7847_v5  ;;  %v1389_v57 = vadd.f32 %v1388_v53, %v7508_v54  ;;  %v1854_v5 = vsub.f32 %v7842_v31, %v7853_v52  ;;  %2000 = vmatmul.f32.gmra.mxu1 %v7805_v32  ;;  %v1745_v54 = vsel %vm1716_vm3, %v399_v59, 0  ;;  %v10904_v53 = vand.u32 4294901760, %v7866_v3 }
 0x1d4   : > { %v1677_v51 = vpop.f32.mrf.mxu3  ;;  %v7889_v59 = vand.u32 4294901760, %v7873_v13  ;;  %v7891_v32 = vand.u32 4294901760, %v1745_v54 }
 0x1d5   : > { %v1494_v7 = vadd.f32 %v1493_v44, %v1389_v57  ;;  %1848 = vmatmul.f32.gmra.mxu0 %v7850_v48  ;;  %v2649_v57 = vsub.f32 %v7866_v3, %v10904_v53  ;;  %v7886_v40 = vand.u32 4294901760, %v1854_v5 }
 0x1d6   : > { %11272 = vst [vmem:[#allocation75_spill] sm:$0xff] %v7889_v59  ;;  %v1862_v5 = vsub.f32 %v7873_v13, %v7889_v59 }
 0x1d7   : > { %v1596_v19 = vadd.f32 %v1595_v2, %v1494_v7  ;;  %2107 = vmatmul.f32.gmra.mxu2 %v7842_v31  ;;  %11271 = vst [vmem:[#allocation74_spill] sm:$0xff] %v7886_v40  ;;  %v2650_v47 = vand.u32 4294901760, %v2649_v57  ;;  %v1748_v57 = vsel %vm1716_vm3, %v400_v50, 0  ;;  %v401_v50 = vld [vmem:[%s7612_s27 + $0x58] sm:$0xff] }
 0x1d9   : > { %v7883_v44 = vadd.f32 %v1677_v51, %v1596_v19  ;;  %2219 = vmatmul.f32.gmra.mxu3 %v7853_v52  ;;  %v1499_v2 = vpop.f32.mrf.mxu1  ;;  %v7899_v19 = vsub.f32 %v1745_v54, %v7891_v32  ;;  %v409_v54 = vld [vmem:[%s10853_s2 + $0x18] sm:$0xff] }
 0x1da   : > { %v1393_v48 = vpop.f32.mrf.mxu0  ;;  %v1599_v31 = vpop.f32.mrf.mxu2  ;;  %2651 = vmatpush.msra.mxu3 %v2650_v47  ;;  %v7907_v47 = vand.u32 4294901760, %v1862_v5 }
 0x1db   : > { %11270 = vst [vmem:[#allocation73_spill] sm:$0xff] %v7883_v44  ;;  %v1394_v7 = vadd.f32 %v1393_v48, %v7518_v9  ;;  %2004 = vmatmul.f32.gmra.mxu1 %v7834_v43  ;;  %v402_v43 = vld [vmem:[%s7612_s27 + $0x60] sm:$0xff] }
 0x1dc   : > { %v1681_v60 = vpop.f32.mrf.mxu3  ;;  %11273 = vst [vmem:[#allocation76_spill] sm:$0xff] %v7899_v19 }
 0x1dd   : > { %v1500_v51 = vadd.f32 %v1499_v2, %v1394_v7  ;;  %1856 = vmatmul.f32.gmra.mxu0 %v7886_v40  ;;  %11275 = vst [vmem:[#allocation78_spill] sm:$0xff] %v7907_v47  ;;  %v7910_v7 = vand.u32 4294901760, %v7899_v19  ;;  %v7912_v2 = vand.u32 4294901760, %v1748_v57 }
 0x1df   : > { %v1600_v9 = vadd.f32 %v1599_v31, %v1500_v51  ;;  %2112 = vmatmul.f32.gmra.mxu2 %v7873_v13  ;;  %11276 = vst [vmem:[#allocation79_spill] sm:$0xff] %v7910_v7  ;;  %v7918_v31 = vand.u32 4294901760, %v409_v54  ;;  %v1870_v52 = vsub.f32 %v7899_v19, %v7910_v7 }
 0x1e1   : > { %v7904_v48 = vadd.f32 %v1681_v60, %v1600_v9  ;;  %2225 = vmatmul.f32.gmra.mxu3 %v7889_v59  ;;  %v1505_v51 = vpop.f32.mrf.mxu1  ;;  %2481 = vmatpush.msra.mxu2 %v7918_v31  ;;  %v7923_v5 = vsub.f32 %v409_v54, %v7918_v31 }
 0x1e2   : > { %v1398_v53 = vpop.f32.mrf.mxu0  ;;  %v1603_v9 = vpop.f32.mrf.mxu2  ;;  %2860 = vmatpush.msrb.mxu1 %v7918_v31 }
 0x1e3   : > { %11274 = vst [vmem:[#allocation77_spill] sm:$0xff] %v7904_v48  ;;  %v1399_v60 = vadd.f32 %v1398_v53, %v7539_v35  ;;  %v7930_v48 = vsub.f32 %v1748_v57, %v7912_v2  ;;  %v1751_v35 = vsel %vm1716_vm3, %v401_v50, 0  ;;  %2008 = vmatmul.f32.gmra.mxu1 %v7855_v55  ;;  %v10915_v53 = vand.u32 4294901760, %v7923_v5  ;;  %2755 = vmatpush.msrb.mxu0 %v7923_v5 }
 0x1e4   : > { %v1685_v59 = vpop.f32.mrf.mxu3  ;;  %v7945_v50 = vand.u32 4294901760, %v1870_v52 }
 0x1e5   : > { %v1506_v13 = vadd.f32 %v1505_v51, %v1399_v60  ;;  %1864 = vmatmul.f32.gmra.mxu0 %v7907_v47  ;;  %11277 = vst [vmem:[#allocation80_spill] sm:$0xff] %v7930_v48  ;;  %v7937_v60 = vand.u32 4294901760, %v1751_v35  ;;  %v2655_v51 = vsub.f32 %v7923_v5, %v10915_v53  ;;  %v7948_v44 = vand.u32 4294901760, %v7930_v48 }
 0x1e7   : > { %v1604_v54 = vadd.f32 %v1603_v9, %v1506_v13  ;;  %2117 = vmatmul.f32.gmra.mxu2 %v7899_v19  ;;  %11279 = vst [vmem:[#allocation82_spill] sm:$0xff] %v7948_v44  ;;  %v2656_v47 = vand.u32 4294901760, %v2655_v51  ;;  %v7953_v42 = vsub.f32 %v1751_v35, %v7937_v60  ;;  %v1878_v52 = vsub.f32 %v7930_v48, %v7948_v44 }
 0x1e9   : > { %v7942_v57 = vadd.f32 %v1685_v59, %v1604_v54  ;;  %2231 = vmatmul.f32.gmra.mxu3 %v7910_v7  ;;  %v1511_v9 = vpop.f32.mrf.mxu1  ;;  %11280 = vst [vmem:[#allocation83_spill] sm:$0xff] %v7953_v42  ;;  %v1754_v54 = vsel %vm1716_vm3, %v402_v43, 0  ;;  %v11283_v7 = vand.u32 4294901760, %v7625_v11 }
 0x1ea   : > { %v1403_v55 = vpop.f32.mrf.mxu0  ;;  %v1607_v19 = vpop.f32.mrf.mxu2  ;;  %2657 = vmatpush.msra.mxu3 %v2656_v47  ;;  %v7967_v47 = vand.u32 4294901760, %v1878_v52  ;;  %v7969_v51 = vand.u32 4294901760, %v1754_v54 }
 0x1eb   : > { %11278 = vst [vmem:[#allocation81_spill] sm:$0xff] %v7942_v57  ;;  %v1404_v13 = vadd.f32 %v1403_v55, %v7551_v56  ;;  %2012 = vmatmul.f32.gmra.mxu1 %v7891_v32  ;;  %v7962_v55 = vand.u32 4294901760, %v7953_v42  ;;  %v11284_v57 = vand.u32 4294901760, %v7672_v21 }
 0x1ec   : > { %v1689_v40 = vpop.f32.mrf.mxu3 }
 0x1ed   : > { %v1512_v59 = vadd.f32 %v1511_v9, %v1404_v13  ;;  %1872 = vmatmul.f32.gmra.mxu0 %v7945_v50  ;;  %11281 = vst [vmem:[#allocation84_spill] sm:$0xff] %v7962_v55  ;;  %v407_v13 = vld [vmem:[%s10853_s2 + $0x8] sm:$0xff] }
 0x1ee   : > { %v7974_v43 = vand.u32 4294901760, %v407_v13 }
 0x1ef   : > { %v1608_v56 = vadd.f32 %v1607_v19, %v1512_v59  ;;  %2122 = vmatmul.f32.gmra.mxu2 %v7930_v48  ;;  %v403_v48 = vld [vmem:[%s7612_s27 + $0x68] sm:$0xff] }
 0x1f0   : > { %2483 = vmatpush.msra.mxu2 %v7974_v43  ;;  %2862 = vmatpush.msrb.mxu1 %v7974_v43 }
 0x1f1   : > { %v7964_v35 = vadd.f32 %v1689_v40, %v1608_v56  ;;  %2237 = vmatmul.f32.gmra.mxu3 %v7948_v44  ;;  %v1517_v59 = vpop.f32.mrf.mxu1  ;;  %v1886_v56 = vsub.f32 %v7953_v42, %v7962_v55  ;;  %v7984_v44 = vsub.f32 %v1754_v54, %v7969_v51 }
 0x1f2   : > { %v1408_v9 = vpop.f32.mrf.mxu0  ;;  %v1611_v53 = vpop.f32.mrf.mxu2  ;;  %2972 = vmatpush.msrb.mxu2 %v11283_v7 }
 0x1f3   : > { %11282 = vst [vmem:[#allocation85_spill] sm:$0xff] %v7964_v35  ;;  %v1409_v19 = vadd.f32 %v1408_v9, %v7564_v23  ;;  %2016 = vmatmul.f32.gmra.mxu1 %v7912_v2  ;;  %v1757_v23 = vsel %vm1716_vm3, %v403_v48, 0  ;;  %v2659_v35 = vsub.f32 %v407_v13, %v7974_v43  ;;  %v8000_v11 = vand.u32 4294901760, %v7984_v44 }
 0x1f4   : > { %v1693_v40 = vpop.f32.mrf.mxu3  ;;  %2976 = vmatpush.msrb.mxu2 %v11284_v57  ;;  %v8002_v7 = vand.u32 4294901760, %v1757_v23 }
 0x1f5   : > { %v1518_v52 = vadd.f32 %v1517_v59, %v1409_v19  ;;  %1880 = vmatmul.f32.gmra.mxu0 %v7967_v47  ;;  %v7994_v19 = vand.u32 4294901760, %v1886_v56  ;;  %v2660_v48 = vand.u32 4294901760, %v2659_v35  ;;  %v404_v56 = vld [vmem:[%s7612_s27 + $0x70] sm:$0xff] }
 0x1f6   : > { %2758 = vmatpush.msrb.mxu0 %v2659_v35 }
 0x1f7   : > { %v1612_v9 = vadd.f32 %v1611_v53, %v1518_v52  ;;  %2127 = vmatmul.f32.gmra.mxu2 %v7953_v42  ;;  %v11285_v53 = vand.u32 4294901760, %v7731_v1  ;;  %v11286_v52 = vand.u32 4294901760, %v7808_v46  ;;  %v1894_v42 = vsub.f32 %v7984_v44, %v8000_v11 }
 0x1f8   : > { %v8014_v1 = vsub.f32 %v1757_v23, %v8002_v7 }
 0x1f9   : > { %v7996_v54 = vadd.f32 %v1693_v40, %v1612_v9  ;;  %2243 = vmatmul.f32.gmra.mxu3 %v7962_v55  ;;  %2980 = vmatpush.msrb.mxu2 %v11285_v53  ;;  %v1523_v57 = vpop.f32.mrf.mxu1  ;;  %v2661_v40 = vsub.f32 %v2659_v35, %v2660_v48  ;;  %v1760_v35 = vsel %vm1716_vm3, %v404_v56, 0 }
 0x1fa   : > { %v1413_v13 = vpop.f32.mrf.mxu0  ;;  %v1615_v59 = vpop.f32.mrf.mxu2 }
 0x1fb   : > { %v1414_v21 = vadd.f32 %v1413_v13, %v7580_v61  ;;  %2984 = vmatpush.msrb.mxu2 %v11286_v52  ;;  %v2662_v53 = vand.u32 4294901760, %v2661_v40  ;;  %v11287_v61 = vand.u32 4294901760, %v7866_v3  ;;  %2020 = vmatmul.f32.gmra.mxu1 %v7937_v60  ;;  %v11288_v13 = vand.u32 4294901760, %v7923_v5 }
 0x1fc   : > { %v1697_v9 = vpop.f32.mrf.mxu3  ;;  %v8027_v3 = vand.u32 4294901760, %v1894_v42 }
 0x1fd   : > { %v1524_v55 = vadd.f32 %v1523_v57, %v1414_v21  ;;  %1888 = vmatmul.f32.gmra.mxu0 %v7994_v19  ;;  %2988 = vmatpush.msrb.mxu2 %v11287_v61  ;;  %v8030_v21 = vand.u32 4294901760, %v8014_v1  ;;  %v8032_v57 = vand.u32 4294901760, %v1760_v35 }
 0x1fe   : > { %2663 = vmatpush.msra.mxu3 %v2662_v53 }
 0x1ff   : > { %v1616_v46 = vadd.f32 %v1615_v59, %v1524_v55  ;;  %2992 = vmatpush.msrb.mxu2 %v11288_v13  ;;  %v1902_v42 = vsub.f32 %v8014_v1, %v8030_v21 }
 0x200   : > { %2132 = vmatmul.f32.gmra.mxu2 %v7984_v44  ;;  %3072 = vmatpush.msrb.mxu3 %v7616_v49  ;;  %v405_v49 = vld [vmem:[%s7612_s27 + $0x78] sm:$0xff] }
 0x201   : > { %v8024_v23 = vadd.f32 %v1697_v9, %v1616_v46  ;;  %2249 = vmatmul.f32.gmra.mxu3 %v8000_v11  ;;  %2996 = vmatpush.msrb.mxu2 %v2660_v48  ;;  %v1529_v59 = vpop.f32.mrf.mxu1  ;;  %v8042_v9 = vsub.f32 %v1760_v35, %v8032_v57  ;;  %v8052_v48 = vand.u32 4294901760, %v1902_v42 }
 0x202   : > { %v1418_v55 = vpop.f32.mrf.mxu0  ;;  %3074 = vmatpush.msrb.mxu3 %v7665_v6  ;;  %v1619_v56 = vpop.f32.mrf.mxu2  ;;  %v1763_v6 = vsel %vm1716_vm3, %v405_v49, 0 }
 0x203   : > { %v1419_v5 = vadd.f32 %v1418_v55, %v7598_v58  ;;  %2024 = vmatmul.f32.gmra.mxu1 %v7969_v51  ;;  %v8055_v53 = vand.u32 4294901760, %v8042_v9  ;;  %v8057_v61 = vand.u32 4294901760, %v1763_v6 }
 0x204   : > { %v1701_v40 = vpop.f32.mrf.mxu3  ;;  %3076 = vmatpush.msrb.mxu3 %v7726_v10 }
 0x205   : > { %v1530_v52 = vadd.f32 %v1529_v59, %v1419_v5  ;;  %1896 = vmatmul.f32.gmra.mxu0 %v8027_v3  ;;  %v1910_v5 = vsub.f32 %v8042_v9, %v8055_v53  ;;  %v8066_v59 = vsub.f32 %v1763_v6, %v8057_v61 }
 0x206   : > { %3078 = vmatpush.msrb.mxu3 %v7786_v15 }
 0x207   : > { %v1620_v58 = vadd.f32 %v1619_v56, %v1530_v52  ;;  %11289 = vst [vmem:[#allocation86_spill] sm:$0xff] %v8066_v59 }
 0x208   : > { %2137 = vmatmul.f32.gmra.mxu2 %v8014_v1  ;;  %3080 = vmatpush.msrb.mxu3 %v7860_v12 }
 0x209   : > { %v8049_v10 = vadd.f32 %v1701_v40, %v1620_v58  ;;  %2255 = vmatmul.f32.gmra.mxu3 %v8030_v21  ;;  %v1535_v46 = vpop.f32.mrf.mxu1 }
 0x20a   : > { %v1423_v35 = vpop.f32.mrf.mxu0  ;;  %3082 = vmatpush.msrb.mxu3 %v7918_v31  ;;  %v1623_v13 = vpop.f32.mrf.mxu2  ;;  %v8073_v31 = vand.u32 4294901760, %v1910_v5 }
 0x20b   : > { %v1424_v15 = vadd.f32 %v1423_v35, %v7627_v33  ;;  %2028 = vmatmul.f32.gmra.mxu1 %v8002_v7 }
 0x20c   : > { %v1705_v55 = vpop.f32.mrf.mxu3  ;;  %3084 = vmatpush.msrb.mxu3 %v7974_v43  ;;  %v8076_v43 = vand.u32 4294901760, %v8066_v59 }
 0x20d   : > { %v1536_v12 = vadd.f32 %v1535_v46, %v1424_v15  ;;  %1904 = vmatmul.f32.gmra.mxu0 %v8052_v48 }
 0x20e   : > { %11290 = vst [vmem:[#allocation87_spill] sm:$0xff] %v8076_v43  ;;  %v1918_v35 = vsub.f32 %v8066_v59, %v8076_v43 }
 0x20f   : > { %v1624_v56 = vadd.f32 %v1623_v13, %v1536_v12 }
 0x210   : > { %2142 = vmatmul.f32.gmra.mxu2 %v8042_v9  ;;  %v8087_v13 = vand.u32 4294901760, %v1918_v35 }
 0x211   : > { %v8070_v33 = vadd.f32 %v1705_v55, %v1624_v56  ;;  %2261 = vmatmul.f32.gmra.mxu3 %v8055_v53  ;;  %v1541_v52 = vpop.f32.mrf.mxu1 }
 0x212   : > { %v1428_v49 = vpop.f32.mrf.mxu0  ;;  %v1627_v42 = vpop.f32.mrf.mxu2 }
 0x213   : > { %v1429_v40 = vadd.f32 %v1428_v49, %v7645_v18  ;;  %2032 = vmatmul.f32.gmra.mxu1 %v8032_v57  ;;  %v961_v49 = vadd.f32 %v7399_v8, %v7274_v37  ;;  %v965_v37 = vadd.f32 %v7414_v14, %v7280_v30  ;;  %v969_v30 = vadd.f32 %v7434_v20, %v7286_v27 }
 0x214   : > { %v1709_v6 = vpop.f32.mrf.mxu3  ;;  %v973_v27 = vadd.f32 %v7444_v26, %v7292_v34  ;;  %v977_v34 = vadd.f32 %v7466_v36, %v7298_v41  ;;  %v11293_v41 = vld [vmem:[#allocation20_spill] sm:$0xff] }
 0x215   : > { %v1542_v58 = vadd.f32 %v1541_v52, %v1429_v40  ;;  %1912 = vmatmul.f32.gmra.mxu0 %v8073_v31  ;;  %v11294_v36 = vld [vmem:[#allocation32_spill] sm:$0xff] }
 0x217   : > { %v1628_v15 = vadd.f32 %v1627_v42, %v1542_v58  ;;  %v1043_v42 = vadd.f32 %v7401_v38, %v961_v49  ;;  %v1047_v38 = vadd.f32 %v7416_v25, %v965_v37  ;;  %v1051_v25 = vadd.f32 %v7436_v4, %v969_v30 }
 0x218   : > { %2147 = vmatmul.f32.gmra.mxu2 %v8066_v59  ;;  %v1055_v4 = vadd.f32 %v7446_v22, %v973_v27  ;;  %v11291_v22 = vld [vmem:[#allocation31_spill] sm:$0xff] }
 0x219   : > { %v8084_v46 = vadd.f32 %v1709_v6, %v1628_v15  ;;  %2267 = vmatmul.f32.gmra.mxu3 %v8076_v43  ;;  %v1547_v12 = vpop.f32.mrf.mxu1 }
 0x21a   : > { %v1433_v18 = vpop.f32.mrf.mxu0  ;;  %v1631_v5 = vpop.f32.mrf.mxu2 }
 0x21b   : > { %v1434_v55 = vadd.f32 %v1433_v18, %v7674_v45  ;;  %2036 = vmatmul.f32.gmra.mxu1 %v8057_v61 }
 0x21c   : > { %v1713_v56 = vpop.f32.mrf.mxu3 }
 0x21d   : > { %v1548_v40 = vadd.f32 %v1547_v12, %v1434_v55  ;;  %1920 = vmatmul.f32.gmra.mxu0 %v8087_v13 }
 0x21f   : > { %v1632_v52 = vadd.f32 %v1631_v5, %v1548_v40 }
 0x220   : > { %2489 = vmatmul.f32.vlgmr.msra.gmra.mxu2 %v7690_v17 }
 0x221   : > { %v8096_v6 = vadd.f32 %v1713_v56, %v1632_v52  ;;  %2665 = vmatmul.f32.vlgmr.msra.gmra.mxu3 %v7638_v24  ;;  %v1977_v35 = vpop.f32.mrf.mxu1 }
 0x222   : > { %v1801_v45 = vpop.f32.mrf.mxu0  ;;  %v2073_v15 = vpop.f32.mrf.mxu2 }
 0x223   : > { %v1802_v58 = vadd.f32 %v1801_v45, %v1043_v42  ;;  %2397 = vmatmul.f32.vlgmr.msra.gmra.mxu1 %v7638_v24 }
 0x224   : > { %v2178_v18 = vpop.f32.mrf.mxu3 }
 0x225   : > { %v1978_v8 = vadd.f32 %v1977_v35, %v1802_v58  ;;  %2309 = vmatmul.f32.vlgmr.msra.gmra.mxu0 %v7638_v24 }
 0x227   : > { %v2074_v17 = vadd.f32 %v2073_v15, %v1978_v8 }
 0x228   : > { %2497 = vmatmul.f32.gmra.mxu2 %v7714_v16 }
 0x229   : > { %v8105_v55 = vadd.f32 %v2178_v18, %v2074_v17  ;;  %2669 = vmatmul.f32.gmra.mxu3 %v7658_v28  ;;  %v1981_v56 = vpop.f32.mrf.mxu1 }
 0x22a   : > { %v1809_v12 = vpop.f32.mrf.mxu0  ;;  %v2078_v49 = vpop.f32.mrf.mxu2 }
 0x22b   : > { %v1810_v5 = vadd.f32 %v1809_v12, %v1047_v38  ;;  %2401 = vmatmul.f32.gmra.mxu1 %v7658_v28 }
 0x22c   : > { %v2184_v40 = vpop.f32.mrf.mxu3 }
 0x22d   : > { %v1982_v14 = vadd.f32 %v1981_v56, %v1810_v5  ;;  %2313 = vmatmul.f32.gmra.mxu0 %v7658_v28  ;;  %v1059_v5 = vadd.f32 %v11291_v22, %v977_v34  ;;  %v11301_v22 = vld [vmem:[#allocation69_spill] sm:$0xff] }
 0x22f   : > { %v2079_v16 = vadd.f32 %v2078_v49, %v1982_v14  ;;  %v11292_v49 = vld [vmem:[#allocation51_spill] sm:$0xff] }
 0x230   : > { %2505 = vmatmul.f32.gmra.mxu2 %v7753_v29 }
 0x231   : > { %v8114_v52 = vadd.f32 %v2184_v40, %v2079_v16  ;;  %2673 = vmatmul.f32.gmra.mxu3 %v7695_v39  ;;  %v1985_v58 = vpop.f32.mrf.mxu1 }
 0x232   : > { %v1817_v42 = vpop.f32.mrf.mxu0  ;;  %v2083_v35 = vpop.f32.mrf.mxu2 }
 0x233   : > { %v1818_v45 = vadd.f32 %v1817_v42, %v1051_v25  ;;  %2405 = vmatmul.f32.gmra.mxu1 %v7695_v39  ;;  %v981_v42 = vadd.f32 %v11294_v36, %v11293_v41 }
 0x234   : > { %v2190_v15 = vpop.f32.mrf.mxu3 }
 0x235   : > { %v1986_v20 = vadd.f32 %v1985_v58, %v1818_v45  ;;  %2317 = vmatmul.f32.gmra.mxu0 %v7695_v39  ;;  %v11295_v58 = vld [vmem:[#allocation64_spill] sm:$0xff] }
 0x237   : > { %v2084_v29 = vadd.f32 %v2083_v35, %v1986_v20  ;;  %v11296_v35 = vld [vmem:[#allocation33_spill] sm:$0xff] }
 0x238   : > { %2513 = vmatmul.f32.gmra.mxu2 %v7775_v62  ;;  %v11298_v20 = vld [vmem:[#allocation57_spill] sm:$0xff] }
 0x239   : > { %v8123_v18 = vadd.f32 %v2190_v15, %v2084_v29  ;;  %2677 = vmatmul.f32.gmra.mxu3 %v7719_v63  ;;  %v1989_v17 = vpop.f32.mrf.mxu1  ;;  %v1063_v15 = vadd.f32 %v11296_v35, %v981_v42 }
 0x23a   : > { %v1825_v37 = vpop.f32.mrf.mxu0  ;;  %v2088_v38 = vpop.f32.mrf.mxu2 }
 0x23b   : > { %v1826_v8 = vadd.f32 %v1825_v37, %v1055_v4  ;;  %2409 = vmatmul.f32.gmra.mxu1 %v7719_v63 }
 0x23c   : > { %v2196_v12 = vpop.f32.mrf.mxu3 }
 0x23d   : > { %v1990_v26 = vadd.f32 %v1989_v17, %v1826_v8  ;;  %2321 = vmatmul.f32.gmra.mxu0 %v7719_v63 }
 0x23f   : > { %v2089_v62 = vadd.f32 %v2088_v38, %v1990_v26  ;;  %v11299_v38 = vld [vmem:[#allocation21_spill] sm:$0xff] }
 0x240   : > { %2521 = vmatmul.f32.gmra.mxu2 %v7797_v0 }
 0x241   : > { %v8132_v56 = vadd.f32 %v2196_v12, %v2089_v62  ;;  %2681 = vmatmul.f32.gmra.mxu3 %v11292_v49  ;;  %v1993_v14 = vpop.f32.mrf.mxu1  ;;  %v11300_v12 = vld [vmem:[#allocation34_spill] sm:$0xff] }
 0x242   : > { %v1833_v40 = vpop.f32.mrf.mxu0  ;;  %v2093_v16 = vpop.f32.mrf.mxu2  ;;  %v985_v34 = vadd.f32 %v11300_v12, %v11299_v38 }
 0x243   : > { %v1834_v30 = vadd.f32 %v1833_v40, %v1059_v5  ;;  %2413 = vmatmul.f32.gmra.mxu1 %v11292_v49  ;;  %v11302_v5 = vld [vmem:[#allocation35_spill] sm:$0xff] }
 0x244   : > { %v2202_v25 = vpop.f32.mrf.mxu3  ;;  %v1067_v40 = vadd.f32 %v11302_v5, %v985_v34  ;;  %v11312_v5 = vld [vmem:[#allocation38_spill] sm:$0xff] }
 0x245   : > { %v1994_v45 = vadd.f32 %v1993_v14, %v1834_v30  ;;  %2325 = vmatmul.f32.gmra.mxu0 %v11292_v49  ;;  %v11304_v14 = vld [vmem:[#allocation61_spill] sm:$0xff] }
 0x247   : > { %v2094_v0 = vadd.f32 %v2093_v16, %v1994_v45  ;;  %v11305_v45 = vld [vmem:[#allocation22_spill] sm:$0xff] }
 0x248   : > { %2529 = vmatmul.f32.gmra.mxu2 %v11295_v58 }
 0x249   : > { %v8141_v27 = vadd.f32 %v2202_v25, %v2094_v0  ;;  %2685 = vmatmul.f32.gmra.mxu3 %v11298_v20  ;;  %v1997_v37 = vpop.f32.mrf.mxu1  ;;  %v11306_v0 = vld [vmem:[#allocation36_spill] sm:$0xff] }
 0x24a   : > { %v1841_v29 = vpop.f32.mrf.mxu0  ;;  %v2098_v8 = vpop.f32.mrf.mxu2  ;;  %v989_v58 = vadd.f32 %v11306_v0, %v11305_v45  ;;  %v11316_v0 = vld [vmem:[#allocation71_spill] sm:$0xff] }
 0x24b   : > { %11297 = vst [vmem:[#allocation31_spill] sm:$0xff] %v8141_v27  ;;  %v1842_v4 = vadd.f32 %v1841_v29, %v1063_v15  ;;  %2417 = vmatmul.f32.gmra.mxu1 %v11298_v20  ;;  %v11307_v29 = vld [vmem:[#allocation74_spill] sm:$0xff] }
 0x24c   : > { %v2208_v17 = vpop.f32.mrf.mxu3 }
 0x24d   : > { %v1998_v26 = vadd.f32 %v1997_v37, %v1842_v4  ;;  %2329 = vmatmul.f32.gmra.mxu0 %v11298_v20  ;;  %v11308_v4 = vld [vmem:[#allocation37_spill] sm:$0xff] }
 0x24e   : > { %v1071_v37 = vadd.f32 %v11308_v4, %v989_v58 }
 0x24f   : > { %v2099_v62 = vadd.f32 %v2098_v8, %v1998_v26 }
 0x250   : > { %2537 = vmatmul.f32.gmra.mxu2 %v11301_v22  ;;  %v11311_v22 = vld [vmem:[#allocation23_spill] sm:$0xff] }
 0x251   : > { %v8150_v30 = vadd.f32 %v2208_v17, %v2099_v62  ;;  %2689 = vmatmul.f32.gmra.mxu3 %v11304_v14  ;;  %v2001_v41 = vpop.f32.mrf.mxu1  ;;  %v11310_v17 = vld [vmem:[#allocation66_spill] sm:$0xff] }
 0x252   : > { %v1849_v16 = vpop.f32.mrf.mxu0  ;;  %v2103_v36 = vpop.f32.mrf.mxu2 }
 0x253   : > { %11303 = vst [vmem:[#allocation51_spill] sm:$0xff] %v8150_v30  ;;  %v1850_v25 = vadd.f32 %v1849_v16, %v1067_v40  ;;  %2421 = vmatmul.f32.gmra.mxu1 %v11304_v14  ;;  %v993_v40 = vadd.f32 %v11312_v5, %v11311_v22 }
 0x254   : > { %v2214_v42 = vpop.f32.mrf.mxu3 }
 0x255   : > { %v2002_v35 = vadd.f32 %v2001_v41, %v1850_v25  ;;  %2333 = vmatmul.f32.gmra.mxu0 %v11304_v14  ;;  %v11313_v41 = vld [vmem:[#allocation78_spill] sm:$0xff] }
 0x257   : > { %v2104_v15 = vadd.f32 %v2103_v36, %v2002_v35  ;;  %v11314_v36 = vld [vmem:[#allocation39_spill] sm:$0xff] }
 0x258   : > { %2545 = vmatmul.f32.gmra.mxu2 %v11307_v29 }
 0x259   : > { %v8159_v8 = vadd.f32 %v2214_v42, %v2104_v15  ;;  %2693 = vmatmul.f32.gmra.mxu3 %v11310_v17  ;;  %v2005_v34 = vpop.f32.mrf.mxu1  ;;  %v1075_v42 = vadd.f32 %v11314_v36, %v993_v40 }
 0x25a   : > { %v1857_v38 = vpop.f32.mrf.mxu0  ;;  %v2108_v26 = vpop.f32.mrf.mxu2 }
 0x25b   : > { %11309 = vst [vmem:[#allocation20_spill] sm:$0xff] %v8159_v8  ;;  %v1858_v12 = vadd.f32 %v1857_v38, %v1071_v37  ;;  %2425 = vmatmul.f32.gmra.mxu1 %v11310_v17  ;;  %v11317_v37 = vld [vmem:[#allocation24_spill] sm:$0xff]  ;;  %v11362_v8 = vld [vmem:[#allocation53_spill] sm:$0xff] }
 0x25c   : > { %v2220_v62 = vpop.f32.mrf.mxu3  ;;  %v11318_v38 = vld [vmem:[#allocation40_spill] sm:$0xff] }
 0x25d   : > { %v2006_v16 = vadd.f32 %v2005_v34, %v1858_v12  ;;  %2337 = vmatmul.f32.gmra.mxu0 %v11310_v17  ;;  %v997_v12 = vadd.f32 %v11318_v38, %v11317_v37 }
 0x25f   : > { %v2109_v25 = vadd.f32 %v2108_v26, %v2006_v16 }
 0x260   : > { %2553 = vmatmul.f32.gmra.mxu2 %v11313_v41 }
 0x261   : > { %v8168_v45 = vadd.f32 %v2220_v62, %v2109_v25  ;;  %2697 = vmatmul.f32.gmra.mxu3 %v11316_v0  ;;  %v2009_v15 = vpop.f32.mrf.mxu1  ;;  %v11319_v62 = vld [vmem:[#allocation41_spill] sm:$0xff] }
 0x262   : > { %v1865_v58 = vpop.f32.mrf.mxu0  ;;  %v2113_v29 = vpop.f32.mrf.mxu2  ;;  %v1079_v22 = vadd.f32 %v11319_v62, %v997_v12 }
 0x263   : > { %11315 = vst [vmem:[#allocation32_spill] sm:$0xff] %v8168_v45  ;;  %v1866_v35 = vadd.f32 %v1865_v58, %v1075_v42  ;;  %2429 = vmatmul.f32.gmra.mxu1 %v11316_v0  ;;  %v11321_v42 = vld [vmem:[#allocation25_spill] sm:$0xff]  ;;  %v11322_v58 = vld [vmem:[#allocation42_spill] sm:$0xff] }
 0x264   : > { %v2226_v4 = vpop.f32.mrf.mxu3 }
 0x265   : > { %v2010_v34 = vadd.f32 %v2009_v15, %v1866_v35  ;;  %2341 = vmatmul.f32.gmra.mxu0 %v11316_v0  ;;  %v1001_v35 = vadd.f32 %v11322_v58, %v11321_v42 }
 0x267   : > { %v2114_v26 = vadd.f32 %v2113_v29, %v2010_v34  ;;  %v11323_v29 = vld [vmem:[#allocation43_spill] sm:$0xff] }
 0x268   : > { %2561 = vmatmul.f32.gmra.mxu2 %v7945_v50 }
 0x269   : > { %v8177_v5 = vadd.f32 %v2226_v4, %v2114_v26  ;;  %2701 = vmatmul.f32.gmra.mxu3 %v7891_v32  ;;  %v2013_v25 = vpop.f32.mrf.mxu1  ;;  %v1083_v4 = vadd.f32 %v11323_v29, %v1001_v35 }
 0x26a   : > { %v1873_v40 = vpop.f32.mrf.mxu0  ;;  %v2118_v41 = vpop.f32.mrf.mxu2 }
 0x26b   : > { %11320 = vst [vmem:[#allocation64_spill] sm:$0xff] %v8177_v5  ;;  %v1874_v16 = vadd.f32 %v1873_v40, %v1079_v22  ;;  %2433 = vmatmul.f32.gmra.mxu1 %v7891_v32  ;;  %v11325_v22 = vld [vmem:[#allocation26_spill] sm:$0xff]  ;;  %v11326_v40 = vld [vmem:[#allocation9_spill] sm:$0xff] }
 0x26c   : > { %v2232_v36 = vpop.f32.mrf.mxu3 }
 0x26d   : > { %v2014_v15 = vadd.f32 %v2013_v25, %v1874_v16  ;;  %2345 = vmatmul.f32.gmra.mxu0 %v7891_v32  ;;  %v1005_v16 = vadd.f32 %v11326_v40, %v11325_v22 }
 0x26f   : > { %v2119_v50 = vadd.f32 %v2118_v41, %v2014_v15  ;;  %v11327_v41 = vld [vmem:[#allocation44_spill] sm:$0xff] }
 0x270   : > { %2569 = vmatmul.f32.gmra.mxu2 %v7967_v47 }
 0x271   : > { %v8186_v37 = vadd.f32 %v2232_v36, %v2119_v50  ;;  %2705 = vmatmul.f32.gmra.mxu3 %v7912_v2  ;;  %v2017_v34 = vpop.f32.mrf.mxu1  ;;  %v1087_v36 = vadd.f32 %v11327_v41, %v1005_v16 }
 0x272   : > { %v1881_v38 = vpop.f32.mrf.mxu0  ;;  %v2123_v26 = vpop.f32.mrf.mxu2 }
 0x273   : > { %11324 = vst [vmem:[#allocation33_spill] sm:$0xff] %v8186_v37  ;;  %v1882_v12 = vadd.f32 %v1881_v38, %v1083_v4  ;;  %2437 = vmatmul.f32.gmra.mxu1 %v7912_v2  ;;  %v11329_v4 = vld [vmem:[#allocation27_spill] sm:$0xff]  ;;  %v11330_v38 = vld [vmem:[#allocation10_spill] sm:$0xff]  ;;  %v11357_v37 = vld [vmem:[#allocation49_spill] sm:$0xff] }
 0x274   : > { %v2238_v62 = vpop.f32.mrf.mxu3 }
 0x275   : > { %v2018_v25 = vadd.f32 %v2017_v34, %v1882_v12  ;;  %2349 = vmatmul.f32.gmra.mxu0 %v7912_v2  ;;  %v1009_v12 = vadd.f32 %v11330_v38, %v11329_v4 }
 0x277   : > { %v2124_v47 = vadd.f32 %v2123_v26, %v2018_v25  ;;  %v11331_v26 = vld [vmem:[#allocation11_spill] sm:$0xff] }
 0x278   : > { %2577 = vmatmul.f32.gmra.mxu2 %v7994_v19 }
 0x279   : > { %v8195_v42 = vadd.f32 %v2238_v62, %v2124_v47  ;;  %2709 = vmatmul.f32.gmra.mxu3 %v7937_v60  ;;  %v2021_v15 = vpop.f32.mrf.mxu1  ;;  %v1091_v62 = vadd.f32 %v11331_v26, %v1009_v12 }
 0x27a   : > { %v1889_v58 = vpop.f32.mrf.mxu0  ;;  %v2128_v50 = vpop.f32.mrf.mxu2 }
 0x27b   : > { %11328 = vst [vmem:[#allocation57_spill] sm:$0xff] %v8195_v42  ;;  %v1890_v35 = vadd.f32 %v1889_v58, %v1087_v36  ;;  %2441 = vmatmul.f32.gmra.mxu1 %v7937_v60  ;;  %v11333_v36 = vld [vmem:[#allocation28_spill] sm:$0xff] }
 0x27c   : > { %v2244_v29 = vpop.f32.mrf.mxu3  ;;  %v11334_v58 = vld [vmem:[#allocation12_spill] sm:$0xff] }
 0x27d   : > { %v2022_v34 = vadd.f32 %v2021_v15, %v1890_v35  ;;  %2353 = vmatmul.f32.gmra.mxu0 %v7937_v60  ;;  %v1013_v35 = vadd.f32 %v11334_v58, %v11333_v36  ;;  %v11339_v58 = vld [vmem:[#allocation15_spill] sm:$0xff] }
 0x27f   : > { %v2129_v19 = vadd.f32 %v2128_v50, %v2022_v34  ;;  %v11335_v50 = vld [vmem:[#allocation13_spill] sm:$0xff] }
 0x280   : > { %2585 = vmatmul.f32.gmra.mxu2 %v8027_v3 }
 0x281   : > { %v8204_v22 = vadd.f32 %v2244_v29, %v2129_v19  ;;  %2713 = vmatmul.f32.gmra.mxu3 %v7969_v51  ;;  %v2025_v25 = vpop.f32.mrf.mxu1  ;;  %v1095_v29 = vadd.f32 %v11335_v50, %v1013_v35 }
 0x282   : > { %v1897_v40 = vpop.f32.mrf.mxu0 }
 0x283   : > { %11332 = vst [vmem:[#allocation21_spill] sm:$0xff] %v8204_v22  ;;  %v1898_v16 = vadd.f32 %v1897_v40, %v1091_v62  ;;  %v2133_v47 = vpop.f32.mrf.mxu2  ;;  %2445 = vmatmul.f32.gmra.mxu1 %v7969_v51  ;;  %v11337_v62 = vld [vmem:[#allocation29_spill] sm:$0xff]  ;;  %v11338_v40 = vld [vmem:[#allocation14_spill] sm:$0xff] }
 0x284   : > { %v2250_v41 = vpop.f32.mrf.mxu3 }
 0x285   : > { %v2026_v15 = vadd.f32 %v2025_v25, %v1898_v16  ;;  %2357 = vmatmul.f32.gmra.mxu0 %v7969_v51  ;;  %v1017_v16 = vadd.f32 %v11338_v40, %v11337_v62 }
 0x287   : > { %v2134_v3 = vadd.f32 %v2133_v47, %v2026_v15  ;;  %v1099_v35 = vadd.f32 %v11339_v58, %v1017_v16  ;;  %v3248_v16 = vld [vmem:[%s10856_s5 + $0xe0] sm:$0xff] }
 0x288   : > { %2593 = vmatmul.f32.gmra.mxu2 %v8052_v48  ;;  %v3250_v48 = vld [vmem:[%s10856_s5 + $0xf0] sm:$0xff] }
 0x289   : > { %v8213_v4 = vadd.f32 %v2250_v41, %v2134_v3  ;;  %2717 = vmatmul.f32.gmra.mxu3 %v8002_v7  ;;  %v2029_v34 = vpop.f32.mrf.mxu1  ;;  %v8223_v47 = vand.u32 4294901760, %v3250_v48 }
 0x28a   : > { %v1905_v38 = vpop.f32.mrf.mxu0 }
 0x28b   : > { %11336 = vst [vmem:[#allocation34_spill] sm:$0xff] %v8213_v4  ;;  %v1906_v12 = vadd.f32 %v1905_v38, %v1095_v29  ;;  %v2138_v19 = vpop.f32.mrf.mxu2  ;;  %2449 = vmatmul.f32.gmra.mxu1 %v8002_v7  ;;  %v8227_v36 = vsub.f32 %v3250_v48, %v8223_v47  ;;  %3291 = vmatpush.msra.mxu0 %v8223_v47  ;;  %v8247_v48 = vand.u32 4294901760, %v3248_v16 }
 0x28c   : > { %v2256_v26 = vpop.f32.mrf.mxu3  ;;  %3742 = vmatpush.msra.mxu3 %v8223_v47 }
 0x28d   : > { %v2030_v25 = vadd.f32 %v2029_v34, %v1906_v12  ;;  %2361 = vmatmul.f32.gmra.mxu0 %v8002_v7  ;;  %3614 = vmatpush.msra.mxu2 %v8227_v36  ;;  %v10922_v50 = vand.u32 4294901760, %v8227_v36  ;;  %v8251_v58 = vsub.f32 %v3248_v16, %v8247_v48 }
 0x28e   : > { %3293 = vmatpush.msra.mxu0 %v8247_v48  ;;  %3744 = vmatpush.msra.mxu3 %v8247_v48 }
 0x28f   : > { %v2139_v41 = vadd.f32 %v2138_v19, %v2030_v25  ;;  %v3454_v34 = vsub.f32 %v8227_v36, %v10922_v50  ;;  %v11341_v19 = vld [vmem:[#allocation30_spill] sm:$0xff]  ;;  %3617 = vmatpush.msra.mxu2 %v8251_v58 }
 0x290   : > { %2601 = vmatmul.f32.gmra.mxu2 %v8073_v31 }
 0x291   : > { %v8231_v15 = vadd.f32 %v2256_v26, %v2139_v41  ;;  %2721 = vmatmul.f32.gmra.mxu3 %v8032_v57  ;;  %v2033_v31 = vpop.f32.mrf.mxu1  ;;  %v11342_v26 = vld [vmem:[#allocation45_spill] sm:$0xff]  ;;  %v3455_v25 = vand.u32 4294901760, %v3454_v34 }
 0x292   : > { %v1913_v3 = vpop.f32.mrf.mxu0  ;;  %v1021_v62 = vadd.f32 %v11342_v26, %v11341_v19 }
 0x293   : > { %11340 = vst [vmem:[#allocation69_spill] sm:$0xff] %v8231_v15  ;;  %v1914_v29 = vadd.f32 %v1913_v3, %v1099_v35  ;;  %v2143_v38 = vpop.f32.mrf.mxu2  ;;  %2453 = vmatmul.f32.gmra.mxu1 %v8032_v57  ;;  %v11343_v35 = vld [vmem:[#allocation46_spill] sm:$0xff]  ;;  %v11353_v15 = vld [vmem:[#allocation19_spill] sm:$0xff] }
 0x294   : > { %v2262_v12 = vpop.f32.mrf.mxu3  ;;  %3456 = vmatpush.msra.mxu1 %v3455_v25  ;;  %v1103_v3 = vadd.f32 %v11343_v35, %v1021_v62 }
 0x295   : > { %v2034_v40 = vadd.f32 %v2033_v31, %v1914_v29  ;;  %2365 = vmatmul.f32.gmra.mxu0 %v8032_v57 }
 0x297   : > { %v2144_v41 = vadd.f32 %v2143_v38, %v2034_v40  ;;  %v10921_v38 = vand.u32 4294901760, %v8251_v58  ;;  %v3246_v40 = vld [vmem:[%s10856_s5 + $0xd0] sm:$0xff] }
 0x298   : > { %2609 = vmatmul.f32.gmra.mxu2 %v8087_v13  ;;  %v8269_v25 = vand.u32 4294901760, %v3246_v40 }
 0x299   : > { %v8254_v29 = vadd.f32 %v2262_v12, %v2144_v41  ;;  %2725 = vmatmul.f32.gmra.mxu3 %v8057_v61  ;;  %v2037_v34 = vpop.f32.mrf.mxu1  ;;  %v3460_v12 = vsub.f32 %v8251_v58, %v10921_v38  ;;  %v11349_v38 = vld [vmem:[#allocation17_spill] sm:$0xff] }
 0x29a   : > { %v1921_v31 = vpop.f32.mrf.mxu0  ;;  %v8273_v35 = vsub.f32 %v3246_v40, %v8269_v25  ;;  %3295 = vmatpush.msra.mxu0 %v8269_v25  ;;  %3746 = vmatpush.msra.mxu3 %v8269_v25 }
 0x29b   : > { %11344 = vst [vmem:[#allocation35_spill] sm:$0xff] %v8254_v29  ;;  %v1922_v13 = vadd.f32 %v1921_v31, %v1103_v3  ;;  %v2148_v19 = vpop.f32.mrf.mxu2  ;;  %2457 = vmatmul.f32.gmra.mxu1 %v8057_v61  ;;  %v3461_v16 = vand.u32 4294901760, %v3460_v12  ;;  %v11346_v12 = vld [vmem:[#allocation48_spill] sm:$0xff] }
 0x29c   : > { %v2268_v26 = vpop.f32.mrf.mxu3  ;;  %3620 = vmatpush.msra.mxu2 %v8273_v35 }
 0x29d   : > { %v2038_v62 = vadd.f32 %v2037_v34, %v1922_v13  ;;  %2369 = vmatmul.f32.gmra.mxu0 %v8057_v61  ;;  %3462 = vmatpush.msra.mxu1 %v3461_v16  ;;  %v10923_v13 = vand.u32 4294901760, %v8273_v35  ;;  %v3244_v16 = vld [vmem:[%s10856_s5 + $0xc0] sm:$0xff] }
 0x29f   : > { %v2149_v41 = vadd.f32 %v2148_v19, %v2038_v62 }
 0x2a0   : > { %2998 = vmatmul.f32.vlgmr.msrb.gmra.mxu2 %v7638_v24 }
 0x2a1   : > { %v8275_v3 = vadd.f32 %v2268_v26, %v2149_v41  ;;  %3086 = vmatmul.f32.vlgmr.msrb.gmra.mxu3 %v7638_v24  ;;  %v8284_v34 = vpop.f32.mrf.mxu1  ;;  %v3466_v24 = vsub.f32 %v8273_v35, %v10923_v13  ;;  %v11347_v26 = vld [vmem:[#allocation16_spill] sm:$0xff] }
 0x2a2   : > { %v8279_v31 = vpop.f32.mrf.mxu0  ;;  %v3242_v13 = vld [vmem:[%s10856_s5 + $0xb0] sm:$0xff] }
 0x2a3   : > { %11345 = vst [vmem:[#allocation61_spill] sm:$0xff] %v8275_v3  ;;  %v2490_v19 = vpop.f32.mrf.mxu2  ;;  %2866 = vmatmul.f32.vlgmr.msrb.gmra.mxu1 %v11349_v38  ;;  %v3467_v50 = vand.u32 4294901760, %v3466_v24  ;;  %v8297_v3 = vand.u32 4294901760, %v3244_v16  ;;  %v11350_v24 = vld [vmem:[#allocation52_spill] sm:$0xff]  ;;  %v8323_v22 = vand.u32 4294901760, %v3242_v13 }
 0x2a4   : > { %v2491_v62 = vadd.f32 %v2490_v19, %v11346_v12  ;;  %v2666_v40 = vpop.f32.mrf.mxu3 }
 0x2a5   : > { %2761 = vmatmul.f32.vlgmr.msrb.gmra.mxu0 %v11347_v26  ;;  %3468 = vmatpush.msra.mxu1 %v3467_v50  ;;  %v8301_v19 = vsub.f32 %v3244_v16, %v8297_v3  ;;  %v11351_v16 = vld [vmem:[#allocation18_spill] sm:$0xff] }
 0x2a6   : > { %v8294_v41 = vadd.f32 %v2666_v40, %v2491_v62  ;;  %3297 = vmatpush.msra.mxu0 %v8297_v3  ;;  %3748 = vmatpush.msra.mxu3 %v8297_v3 }
 0x2a7   : > { %3623 = vmatpush.msra.mxu2 %v8301_v19  ;;  %v10924_v38 = vand.u32 4294901760, %v8301_v19 }
 0x2a8   : > { %11348 = vst [vmem:[#allocation22_spill] sm:$0xff] %v8294_v41  ;;  %3002 = vmatmul.f32.gmra.mxu2 %v7658_v28  ;;  %3299 = vmatpush.msra.mxu0 %v8323_v22  ;;  %v11368_v41 = vld [vmem:[#allocation55_spill] sm:$0xff] }
 0x2a9   : > { %3090 = vmatmul.f32.gmra.mxu3 %v7658_v28  ;;  %v8310_v62 = vpop.f32.mrf.mxu1  ;;  %v3472_v28 = vsub.f32 %v8301_v19, %v10924_v38  ;;  %v3240_v38 = vld [vmem:[%s10856_s5 + $0xa0] sm:$0xff] }
 0x2aa   : > { %v8305_v12 = vpop.f32.mrf.mxu0  ;;  %3750 = vmatpush.msra.mxu3 %v8323_v22  ;;  %v8349_v45 = vand.u32 4294901760, %v3240_v38 }
 0x2ab   : > { %v2498_v40 = vpop.f32.mrf.mxu2  ;;  %2872 = vmatmul.f32.gmra.mxu1 %v11353_v15  ;;  %v3473_v4 = vand.u32 4294901760, %v3472_v28  ;;  %v11354_v28 = vld [vmem:[#allocation56_spill] sm:$0xff] }
 0x2ac   : > { %v2499_v50 = vadd.f32 %v2498_v40, %v11350_v24  ;;  %v2670_v26 = vpop.f32.mrf.mxu3  ;;  %v8327_v40 = vsub.f32 %v3242_v13, %v8323_v22  ;;  %v11355_v13 = vld [vmem:[#allocation47_spill] sm:$0xff]  ;;  %3301 = vmatpush.msra.mxu0 %v8349_v45  ;;  %3752 = vmatpush.msra.mxu3 %v8349_v45 }
 0x2ad   : > { %2766 = vmatmul.f32.gmra.mxu0 %v11351_v16  ;;  %3474 = vmatpush.msra.mxu1 %v3473_v4 }
 0x2ae   : > { %v8320_v29 = vadd.f32 %v2670_v26, %v2499_v50  ;;  %3626 = vmatpush.msra.mxu2 %v8327_v40  ;;  %v10925_v15 = vand.u32 4294901760, %v8327_v40 }
 0x2b0   : > { %11352 = vst [vmem:[#allocation36_spill] sm:$0xff] %v8320_v29  ;;  %3006 = vmatmul.f32.gmra.mxu2 %v7695_v39 }
 0x2b1   : > { %3094 = vmatmul.f32.gmra.mxu3 %v7695_v39  ;;  %v8336_v50 = vpop.f32.mrf.mxu1  ;;  %v3478_v39 = vsub.f32 %v8327_v40, %v10925_v15  ;;  %v3238_v15 = vld [vmem:[%s10856_s5 + $0x90] sm:$0xff] }
 0x2b2   : > { %v8331_v24 = vpop.f32.mrf.mxu0  ;;  %v8375_v30 = vand.u32 4294901760, %v3238_v15 }
 0x2b3   : > { %v2506_v26 = vpop.f32.mrf.mxu2  ;;  %2878 = vmatmul.f32.gmra.mxu1 %v11357_v37  ;;  %v3479_v5 = vand.u32 4294901760, %v3478_v39  ;;  %v11359_v39 = vld [vmem:[#allocation59_spill] sm:$0xff] }
 0x2b4   : > { %v2507_v4 = vadd.f32 %v2506_v26, %v11354_v28  ;;  %v2674_v16 = vpop.f32.mrf.mxu3  ;;  %v8353_v26 = vsub.f32 %v3240_v38, %v8349_v45  ;;  %v11360_v38 = vld [vmem:[#allocation50_spill] sm:$0xff]  ;;  %3303 = vmatpush.msra.mxu0 %v8375_v30  ;;  %3754 = vmatpush.msra.mxu3 %v8375_v30 }
 0x2b5   : > { %2771 = vmatmul.f32.gmra.mxu0 %v11355_v13  ;;  %3480 = vmatpush.msra.mxu1 %v3479_v5 }
 0x2b6   : > { %v8346_v42 = vadd.f32 %v2674_v16, %v2507_v4  ;;  %3629 = vmatpush.msra.mxu2 %v8353_v26  ;;  %v10926_v37 = vand.u32 4294901760, %v8353_v26 }
 0x2b8   : > { %11356 = vst [vmem:[#allocation74_spill] sm:$0xff] %v8346_v42  ;;  %3010 = vmatmul.f32.gmra.mxu2 %v7719_v63 }
 0x2b9   : > { %3098 = vmatmul.f32.gmra.mxu3 %v7719_v63  ;;  %v8362_v4 = vpop.f32.mrf.mxu1  ;;  %v3484_v63 = vsub.f32 %v8353_v26, %v10926_v37  ;;  %v3236_v37 = vld [vmem:[%s10856_s5 + $0x80] sm:$0xff] }
 0x2ba   : > { %v8357_v28 = vpop.f32.mrf.mxu0  ;;  %11358 = vst [vmem:[#allocation37_spill] sm:$0xff] %v8362_v4 }
 0x2bb   : > { %v2514_v16 = vpop.f32.mrf.mxu2  ;;  %2884 = vmatmul.f32.gmra.mxu1 %v11362_v8  ;;  %v3485_v29 = vand.u32 4294901760, %v3484_v63  ;;  %v11365_v63 = vld [vmem:[#allocation63_spill] sm:$0xff] }
 0x2bc   : > { %v2515_v5 = vadd.f32 %v2514_v16, %v11359_v39  ;;  %v2678_v13 = vpop.f32.mrf.mxu3  ;;  %v8379_v16 = vsub.f32 %v3238_v15, %v8375_v30  ;;  %v11366_v15 = vld [vmem:[#allocation54_spill] sm:$0xff] }
 0x2bd   : > { %2776 = vmatmul.f32.gmra.mxu0 %v11360_v38  ;;  %3486 = vmatpush.msra.mxu1 %v3485_v29 }
 0x2be   : > { %v8372_v42 = vadd.f32 %v2678_v13, %v2515_v5  ;;  %3632 = vmatpush.msra.mxu2 %v8379_v16  ;;  %v10927_v8 = vand.u32 4294901760, %v8379_v16 }
 0x2c0   : > { %11361 = vst [vmem:[#allocation66_spill] sm:$0xff] %v8372_v42  ;;  %3014 = vmatmul.f32.gmra.mxu2 %v11292_v49 }
 0x2c1   : > { %3102 = vmatmul.f32.gmra.mxu3 %v11292_v49  ;;  %v8388_v5 = vpop.f32.mrf.mxu1  ;;  %v3490_v49 = vsub.f32 %v8379_v16, %v10927_v8  ;;  %v3234_v8 = vld [vmem:[%s10856_s5 + $0x70] sm:$0xff] }
 0x2c2   : > { %v8383_v39 = vpop.f32.mrf.mxu0  ;;  %11364 = vst [vmem:[#allocation38_spill] sm:$0xff] %v8388_v5  ;;  %v8401_v5 = vand.u32 4294901760, %v3236_v37 }
 0x2c3   : > { %11363 = vst [vmem:[#allocation23_spill] sm:$0xff] %v8383_v39  ;;  %v2522_v13 = vpop.f32.mrf.mxu2  ;;  %2890 = vmatmul.f32.gmra.mxu1 %v11368_v41  ;;  %v3491_v39 = vand.u32 4294901760, %v3490_v49  ;;  %v11371_v49 = vld [vmem:[#allocation68_spill] sm:$0xff] }
 0x2c4   : > { %v2523_v29 = vadd.f32 %v2522_v13, %v11365_v63  ;;  %v2682_v38 = vpop.f32.mrf.mxu3  ;;  %v8405_v13 = vsub.f32 %v3236_v37, %v8401_v5  ;;  %3305 = vmatpush.msra.mxu0 %v8401_v5  ;;  %3756 = vmatpush.msra.mxu3 %v8401_v5  ;;  %v11372_v37 = vld [vmem:[#allocation58_spill] sm:$0xff] }
 0x2c5   : > { %2781 = vmatmul.f32.gmra.mxu0 %v11366_v15  ;;  %3492 = vmatpush.msra.mxu1 %v3491_v39 }
 0x2c6   : > { %v8398_v42 = vadd.f32 %v2682_v38, %v2523_v29  ;;  %3635 = vmatpush.msra.mxu2 %v8405_v13  ;;  %v10928_v41 = vand.u32 4294901760, %v8405_v13 }
 0x2c8   : > { %11367 = vst [vmem:[#allocation78_spill] sm:$0xff] %v8398_v42  ;;  %3018 = vmatmul.f32.gmra.mxu2 %v11298_v20 }
 0x2c9   : > { %3106 = vmatmul.f32.gmra.mxu3 %v11298_v20  ;;  %v8414_v29 = vpop.f32.mrf.mxu1  ;;  %v3496_v20 = vsub.f32 %v8405_v13, %v10928_v41  ;;  %v3232_v41 = vld [vmem:[%s10856_s5 + $0x60] sm:$0xff] }
 0x2ca   : > { %v8409_v63 = vpop.f32.mrf.mxu0  ;;  %11370 = vst [vmem:[#allocation71_spill] sm:$0xff] %v8414_v29  ;;  %v8427_v29 = vand.u32 4294901760, %v3234_v8 }
 0x2cb   : > { %11369 = vst [vmem:[#allocation39_spill] sm:$0xff] %v8409_v63  ;;  %v2530_v38 = vpop.f32.mrf.mxu2  ;;  %v11374_v63 = vld [vmem:[#allocation60_spill] sm:$0xff]  ;;  %v3497_v27 = vand.u32 4294901760, %v3496_v20  ;;  %v11377_v20 = vld [vmem:[#allocation73_spill] sm:$0xff] }
 0x2cc   : > { %v2531_v39 = vadd.f32 %v2530_v38, %v11371_v49  ;;  %v2686_v15 = vpop.f32.mrf.mxu3  ;;  %2896 = vmatmul.f32.gmra.mxu1 %v11374_v63  ;;  %v8431_v38 = vsub.f32 %v3234_v8, %v8427_v29  ;;  %3307 = vmatpush.msra.mxu0 %v8427_v29  ;;  %v11378_v8 = vld [vmem:[#allocation62_spill] sm:$0xff] }
 0x2cd   : > { %2786 = vmatmul.f32.gmra.mxu0 %v11372_v37  ;;  %3498 = vmatpush.msra.mxu1 %v3497_v27 }
 0x2ce   : > { %v8424_v42 = vadd.f32 %v2686_v15, %v2531_v39  ;;  %3638 = vmatpush.msra.mxu2 %v8431_v38  ;;  %3758 = vmatpush.msra.mxu3 %v8427_v29  ;;  %v10930_v63 = vand.u32 4294901760, %v8431_v38 }
 0x2d0   : > { %11373 = vst [vmem:[#allocation24_spill] sm:$0xff] %v8424_v42  ;;  %3022 = vmatmul.f32.gmra.mxu2 %v11304_v14 }
 0x2d1   : > { %3110 = vmatmul.f32.gmra.mxu3 %v11304_v14  ;;  %v8440_v39 = vpop.f32.mrf.mxu1  ;;  %v3502_v14 = vsub.f32 %v8431_v38, %v10930_v63  ;;  %v3230_v63 = vld [vmem:[%s10856_s5 + $0x50] sm:$0xff] }
 0x2d2   : > { %v8435_v49 = vpop.f32.mrf.mxu0  ;;  %11376 = vst [vmem:[#allocation41_spill] sm:$0xff] %v8440_v39  ;;  %v8453_v39 = vand.u32 4294901760, %v3232_v41 }
 0x2d3   : > { %11375 = vst [vmem:[#allocation40_spill] sm:$0xff] %v8435_v49  ;;  %v2538_v15 = vpop.f32.mrf.mxu2  ;;  %v11380_v49 = vld [vmem:[#allocation65_spill] sm:$0xff]  ;;  %v3503_v43 = vand.u32 4294901760, %v3502_v14 }
 0x2d4   : > { %v2539_v27 = vadd.f32 %v2538_v15, %v11377_v20  ;;  %v2690_v37 = vpop.f32.mrf.mxu3  ;;  %2902 = vmatmul.f32.gmra.mxu1 %v11380_v49  ;;  %v8457_v15 = vsub.f32 %v3232_v41, %v8453_v39  ;;  %3309 = vmatpush.msra.mxu0 %v8453_v39  ;;  %v11383_v14 = vld [vmem:[#allocation77_spill] sm:$0xff]  ;;  %v11384_v41 = vld [vmem:[#allocation67_spill] sm:$0xff] }
 0x2d5   : > { %2791 = vmatmul.f32.gmra.mxu0 %v11378_v8  ;;  %3504 = vmatpush.msra.mxu1 %v3503_v43 }
 0x2d6   : > { %v8450_v42 = vadd.f32 %v2690_v37, %v2539_v27  ;;  %3641 = vmatpush.msra.mxu2 %v8457_v15  ;;  %3760 = vmatpush.msra.mxu3 %v8453_v39  ;;  %v10931_v49 = vand.u32 4294901760, %v8457_v15 }
 0x2d8   : > { %11379 = vst [vmem:[#allocation25_spill] sm:$0xff] %v8450_v42  ;;  %3026 = vmatmul.f32.gmra.mxu2 %v11310_v17 }
 0x2d9   : > { %3114 = vmatmul.f32.gmra.mxu3 %v11310_v17  ;;  %v8466_v27 = vpop.f32.mrf.mxu1  ;;  %v3508_v17 = vsub.f32 %v8457_v15, %v10931_v49  ;;  %v3228_v49 = vld [vmem:[%s10856_s5 + $0x40] sm:$0xff] }
 0x2da   : > { %v8461_v20 = vpop.f32.mrf.mxu0  ;;  %11382 = vst [vmem:[#allocation43_spill] sm:$0xff] %v8466_v27  ;;  %v8479_v27 = vand.u32 4294901760, %v3230_v63 }
 0x2db   : > { %11381 = vst [vmem:[#allocation42_spill] sm:$0xff] %v8461_v20  ;;  %v2546_v37 = vpop.f32.mrf.mxu2  ;;  %v11386_v20 = vld [vmem:[#allocation70_spill] sm:$0xff]  ;;  %v3509_v4 = vand.u32 4294901760, %v3508_v17  ;;  %v11389_v17 = vld [vmem:[#allocation81_spill] sm:$0xff] }
 0x2dc   : > { %v2547_v43 = vadd.f32 %v2546_v37, %v11383_v14  ;;  %v2694_v8 = vpop.f32.mrf.mxu3  ;;  %2908 = vmatmul.f32.gmra.mxu1 %v11386_v20  ;;  %v8483_v37 = vsub.f32 %v3230_v63, %v8479_v27  ;;  %3311 = vmatpush.msra.mxu0 %v8479_v27  ;;  %v11390_v63 = vld [vmem:[#allocation72_spill] sm:$0xff] }
 0x2dd   : > { %2796 = vmatmul.f32.gmra.mxu0 %v11384_v41  ;;  %3510 = vmatpush.msra.mxu1 %v3509_v4 }
 0x2de   : > { %v8476_v42 = vadd.f32 %v2694_v8, %v2547_v43  ;;  %3644 = vmatpush.msra.mxu2 %v8483_v37  ;;  %3762 = vmatpush.msra.mxu3 %v8479_v27  ;;  %v10933_v20 = vand.u32 4294901760, %v8483_v37 }
 0x2e0   : > { %11385 = vst [vmem:[#allocation26_spill] sm:$0xff] %v8476_v42  ;;  %3030 = vmatmul.f32.gmra.mxu2 %v11316_v0 }
 0x2e1   : > { %3118 = vmatmul.f32.gmra.mxu3 %v11316_v0  ;;  %v8492_v43 = vpop.f32.mrf.mxu1  ;;  %v3514_v0 = vsub.f32 %v8483_v37, %v10933_v20  ;;  %v3226_v20 = vld [vmem:[%s10856_s5 + $0x30] sm:$0xff] }
 0x2e2   : > { %v8487_v14 = vpop.f32.mrf.mxu0  ;;  %11388 = vst [vmem:[#allocation44_spill] sm:$0xff] %v8492_v43  ;;  %v8505_v43 = vand.u32 4294901760, %v3228_v49 }
 0x2e3   : > { %11387 = vst [vmem:[#allocation9_spill] sm:$0xff] %v8487_v14  ;;  %v2554_v8 = vpop.f32.mrf.mxu2  ;;  %v11392_v14 = vld [vmem:[#allocation75_spill] sm:$0xff]  ;;  %v3515_v59 = vand.u32 4294901760, %v3514_v0  ;;  %v11396_v0 = vld [vmem:[#allocation85_spill] sm:$0xff] }
 0x2e4   : > { %v2555_v4 = vadd.f32 %v2554_v8, %v11389_v17  ;;  %v2698_v41 = vpop.f32.mrf.mxu3  ;;  %2914 = vmatmul.f32.gmra.mxu1 %v11392_v14  ;;  %11393 = vst [vmem:[#allocation10_spill] sm:$0xff] %v8505_v43  ;;  %v8509_v8 = vsub.f32 %v3228_v49, %v8505_v43  ;;  %3313 = vmatpush.msra.mxu0 %v8505_v43  ;;  %v11397_v49 = vld [vmem:[#allocation76_spill] sm:$0xff] }
 0x2e5   : > { %2801 = vmatmul.f32.gmra.mxu0 %v11390_v63  ;;  %3516 = vmatpush.msra.mxu1 %v3515_v59 }
 0x2e6   : > { %v8502_v42 = vadd.f32 %v2698_v41, %v2555_v4  ;;  %3647 = vmatpush.msra.mxu2 %v8509_v8  ;;  %3764 = vmatpush.msra.mxu3 %v8505_v43  ;;  %v10935_v14 = vand.u32 4294901760, %v8509_v8 }
 0x2e8   : > { %11391 = vst [vmem:[#allocation27_spill] sm:$0xff] %v8502_v42  ;;  %3034 = vmatmul.f32.gmra.mxu2 %v7891_v32 }
 0x2e9   : > { %3122 = vmatmul.f32.gmra.mxu3 %v7891_v32  ;;  %v8518_v4 = vpop.f32.mrf.mxu1  ;;  %v3520_v32 = vsub.f32 %v8509_v8, %v10935_v14 }
 0x2ea   : > { %v8513_v17 = vpop.f32.mrf.mxu0  ;;  %11395 = vst [vmem:[#allocation28_spill] sm:$0xff] %v8518_v4  ;;  %v8531_v4 = vand.u32 4294901760, %v3226_v20 }
 0x2eb   : > { %11394 = vst [vmem:[#allocation11_spill] sm:$0xff] %v8513_v17  ;;  %v2562_v41 = vpop.f32.mrf.mxu2  ;;  %v11399_v17 = vld [vmem:[#allocation79_spill] sm:$0xff]  ;;  %v3521_v43 = vand.u32 4294901760, %v3520_v32 }
 0x2ec   : > { %v2563_v59 = vadd.f32 %v2562_v41, %v11396_v0  ;;  %v2702_v63 = vpop.f32.mrf.mxu3  ;;  %2920 = vmatmul.f32.gmra.mxu1 %v11399_v17  ;;  %11400 = vst [vmem:[#allocation13_spill] sm:$0xff] %v8531_v4  ;;  %v8535_v41 = vsub.f32 %v3226_v20, %v8531_v4  ;;  %3315 = vmatpush.msra.mxu0 %v8531_v4  ;;  %v11404_v20 = vld [vmem:[#allocation80_spill] sm:$0xff] }
 0x2ed   : > { %2806 = vmatmul.f32.gmra.mxu0 %v11397_v49  ;;  %3522 = vmatpush.msra.mxu1 %v3521_v43  ;;  %v3224_v49 = vld [vmem:[%s10856_s5 + $0x20] sm:$0xff] }
 0x2ee   : > { %v8528_v42 = vadd.f32 %v2702_v63, %v2563_v59  ;;  %11401 = vst [vmem:[#allocation29_spill] sm:$0xff] %v8535_v41  ;;  %3650 = vmatpush.msra.mxu2 %v8535_v41  ;;  %3766 = vmatpush.msra.mxu3 %v8531_v4  ;;  %v10936_v17 = vand.u32 4294901760, %v8535_v41 }
 0x2f0   : > { %11398 = vst [vmem:[#allocation12_spill] sm:$0xff] %v8528_v42  ;;  %3038 = vmatmul.f32.gmra.mxu2 %v7912_v2  ;;  %v11406_v42 = vld [vmem:[#allocation82_spill] sm:$0xff] }
 0x2f1   : > { %3126 = vmatmul.f32.gmra.mxu3 %v7912_v2  ;;  %v8544_v59 = vpop.f32.mrf.mxu1  ;;  %v3526_v2 = vsub.f32 %v8535_v41, %v10936_v17  ;;  %v11412_v41 = vld [vmem:[#allocation84_spill] sm:$0xff] }
 0x2f2   : > { %v8539_v0 = vpop.f32.mrf.mxu0  ;;  %11403 = vst [vmem:[#allocation15_spill] sm:$0xff] %v8544_v59  ;;  %v8557_v59 = vand.u32 4294901760, %v3224_v49 }
 0x2f3   : > { %11402 = vst [vmem:[#allocation14_spill] sm:$0xff] %v8539_v0  ;;  %v2570_v63 = vpop.f32.mrf.mxu2  ;;  %v3527_v0 = vand.u32 4294901760, %v3526_v2 }
 0x2f4   : > { %v2571_v43 = vadd.f32 %v2570_v63, %v7996_v54  ;;  %v2706_v32 = vpop.f32.mrf.mxu3  ;;  %2926 = vmatmul.f32.gmra.mxu1 %v11406_v42  ;;  %11407 = vst [vmem:[#allocation45_spill] sm:$0xff] %v8557_v59  ;;  %v8561_v54 = vsub.f32 %v3224_v49, %v8557_v59  ;;  %v3222_v63 = vld [vmem:[%s10856_s5 + $0x10] sm:$0xff]  ;;  %3317 = vmatpush.msra.mxu0 %v8557_v59 }
 0x2f5   : > { %2811 = vmatmul.f32.gmra.mxu0 %v11404_v20  ;;  %3528 = vmatpush.msra.mxu1 %v3527_v0 }
 0x2f6   : > { %v8554_v14 = vadd.f32 %v2706_v32, %v2571_v43  ;;  %v8568_v43 = vand.u32 4294901760, %v3222_v63  ;;  %3653 = vmatpush.msra.mxu2 %v8561_v54  ;;  %3768 = vmatpush.msra.mxu3 %v8557_v59  ;;  %v10941_v0 = vand.u32 4294901760, %v8561_v54  ;;  %v3220_v32 = vld [vmem:[%s10856_s5] sm:$0xff] }
 0x2f7   : > { %v8584_v49 = vand.u32 4294901760, %v3220_v32  ;;  %v11410_v59 = vld [vmem:[#allocation83_spill] sm:$0xff] }
 0x2f8   : > { %11405 = vst [vmem:[#allocation30_spill] sm:$0xff] %v8554_v14  ;;  %3042 = vmatmul.f32.gmra.mxu2 %v7937_v60  ;;  %3319 = vmatpush.msra.mxu0 %v8568_v43 }
 0x2f9   : > { %3130 = vmatmul.f32.gmra.mxu3 %v7937_v60  ;;  %v8578_v2 = vpop.f32.mrf.mxu1  ;;  %v8581_v60 = vsub.f32 %v3222_v63, %v8568_v43 }
 0x2fa   : > { %v8570_v42 = vpop.f32.mrf.mxu0  ;;  %11409 = vst [vmem:[#allocation48_spill] sm:$0xff] %v8578_v2  ;;  %3770 = vmatpush.msra.mxu3 %v8568_v43  ;;  %v8595_v2 = vsub.f32 %v3220_v32, %v8584_v49  ;;  %3321 = vmatpush.msra.mxu0 %v8584_v49  ;;  %v2311_v32 = vadd.f32 %v8279_v31, %v8105_v55  ;;  %v11415_v55 = vand.u32 4294901760, %v8273_v35 }
 0x2fb   : > { %11408 = vst [vmem:[#allocation46_spill] sm:$0xff] %v8570_v42  ;;  %v2578_v20 = vpop.f32.mrf.mxu2  ;;  %v3532_v42 = vsub.f32 %v8561_v54, %v10941_v0  ;;  %3656 = vmatpush.msra.mxu2 %v8581_v60  ;;  %v10940_v63 = vand.u32 4294901760, %v8581_v60  ;;  %v2315_v35 = vadd.f32 %v8305_v12, %v8114_v52 }
 0x2fc   : > { %v2579_v17 = vadd.f32 %v2578_v20, %v8024_v23  ;;  %v2710_v14 = vpop.f32.mrf.mxu3  ;;  %2932 = vmatmul.f32.gmra.mxu1 %v11412_v41  ;;  %3772 = vmatpush.msra.mxu3 %v8584_v49  ;;  %v2399_v31 = vadd.f32 %v8284_v34, %v2311_v32 }
 0x2fd   : > { %2816 = vmatmul.f32.gmra.mxu0 %v11410_v59  ;;  %v3533_v23 = vand.u32 4294901760, %v3532_v42  ;;  %v3538_v20 = vsub.f32 %v8581_v60, %v10940_v63  ;;  %3659 = vmatpush.msra.mxu2 %v8595_v2  ;;  %v10942_v59 = vand.u32 4294901760, %v8595_v2  ;;  %v2403_v52 = vadd.f32 %v8310_v62, %v2315_v35 }
 0x2fe   : > { %v8597_v4 = vadd.f32 %v2710_v14, %v2579_v17  ;;  %v11413_v17 = vand.u32 4294901760, %v8227_v36 }
 0x2ff   : > { %3534 = vmatpush.msra.mxu1 %v3533_v23  ;;  %v3539_v14 = vand.u32 4294901760, %v3538_v20  ;;  %v3544_v41 = vsub.f32 %v8595_v2, %v10942_v59  ;;  %v8622_v20 = vld [vmem:[#allocation5] sm:$0x3] }
 0x300   : > { %11411 = vst [vmem:[#allocation16_spill] sm:$0xff] %v8597_v4  ;;  %3046 = vmatmul.f32.gmra.mxu2 %v7969_v51  ;;  %3873 = vmatpush.msrb.mxu0 %v11413_v17 }
 0x301   : > { %3134 = vmatmul.f32.gmra.mxu3 %v7969_v51  ;;  %v8618_v63 = vpop.f32.mrf.mxu1  ;;  %3540 = vmatpush.msra.mxu1 %v3539_v14  ;;  %v3545_v23 = vand.u32 4294901760, %v3544_v41  ;;  %v11414_v51 = vand.u32 4294901760, %v8251_v58  ;;  %v8633_v58 = vperm.slane %v8622_v20, 0 }
 0x302   : > { %v8614_v42 = vpop.f32.mrf.mxu0 }
 0x303   : > { %v2586_v0 = vpop.f32.mrf.mxu2  ;;  %3877 = vmatpush.msrb.mxu0 %v11414_v51  ;;  %3546 = vmatpush.msra.mxu1 %v3545_v23  ;;  %v11427_v51 = vand.u32 4294901760, %v8509_v8  ;;  %v11431_v8 = vld [vmem:[#allocation86_spill] sm:$0xff] }
 0x304   : > { %v2587_v59 = vadd.f32 %v2586_v0, %v8049_v10  ;;  %v2714_v4 = vpop.f32.mrf.mxu3  ;;  %2938 = vmatmul.f32.gmra.mxu1 %v8000_v11  ;;  %v3282_v10 = vld [vmem:[%s10856_s5 + $0x1f0] sm:$0xff]  ;;  %v11416_v11 = vand.u32 4294901760, %v8301_v19 }
 0x305   : > { %2821 = vmatmul.f32.gmra.mxu0 %v7984_v44  ;;  %4000 = vmatpush.msrb.mxu1 %v8223_v47  ;;  %v8640_v44 = vand.u32 4294901760, %v3282_v10  ;;  %v11417_v47 = vand.u32 4294901760, %v8327_v40  ;;  %v11419_v40 = vand.u32 4294901760, %v8379_v16 }
 0x306   : > { %v8626_v36 = vadd.f32 %v2714_v4, %v2587_v59  ;;  %3881 = vmatpush.msrb.mxu0 %v11415_v55  ;;  %v3156_v4 = vadd.f32 %v8633_v58, %v2399_v31  ;;  %v11418_v59 = vand.u32 4294901760, %v8353_v26  ;;  %v11421_v26 = vand.u32 4294901760, %v8431_v38 }
 0x307   : > { %4002 = vmatpush.msrb.mxu1 %v8247_v48  ;;  %4097 = vmatpush.msrb.mxu2 %v8640_v44  ;;  %v11423_v38 = vand.u32 4294901760, %v8457_v15 }
 0x308   : > { %3050 = vmatmul.f32.gmra.mxu2 %v8002_v7  ;;  %3885 = vmatpush.msrb.mxu0 %v11416_v11  ;;  %v11429_v11 = vld [vmem:[#allocation29_spill] sm:$0xff] }
 0x309   : > { %3138 = vmatmul.f32.gmra.mxu3 %v8002_v7  ;;  %v8654_v0 = vpop.f32.mrf.mxu1  ;;  %4004 = vmatpush.msrb.mxu1 %v8269_v25  ;;  %v3188_v25 = vmax.f32 %v3156_v4, 0.0  ;;  %v11430_v35 = vand.u32 4294901760, %v11429_v11  ;;  %v11432_v4 = vld [vmem:[#allocation10_spill] sm:$0xff] }
 0x30a   : > { %v8648_v34 = vpop.f32.mrf.mxu0  ;;  %3889 = vmatpush.msrb.mxu0 %v11417_v47 }
 0x30b   : > { %v2594_v19 = vpop.f32.mrf.mxu2  ;;  %4006 = vmatpush.msrb.mxu1 %v8297_v3  ;;  %v2319_v3 = vadd.f32 %v8331_v24, %v8123_v18 }
 0x30c   : > { %v2595_v7 = vadd.f32 %v2594_v19, %v8070_v33  ;;  %v2718_v48 = vpop.f32.mrf.mxu3  ;;  %3893 = vmatpush.msrb.mxu0 %v11418_v59  ;;  %2944 = vmatmul.f32.gmra.mxu1 %v8030_v21  ;;  %v8669_v33 = vsub.f32 %v3282_v10, %v8640_v44  ;;  %v3158_v21 = vadd.f32 %v8633_v58, %v2403_v52  ;;  %v11435_v59 = vld [vmem:[#allocation87_spill] sm:$0xff]  ;;  %v11436_v52 = vand.u32 4294901760, %v8561_v54 }
 0x30d   : > { %2826 = vmatmul.f32.gmra.mxu0 %v8014_v1  ;;  %4008 = vmatpush.msrb.mxu1 %v8323_v22  ;;  %v11420_v1 = vand.u32 4294901760, %v8405_v13  ;;  %v8684_v22 = vand.u32 4294901760, %v3188_v25  ;;  %v2407_v32 = vadd.f32 %v8336_v50, %v2319_v3  ;;  %v3276_v54 = vld [vmem:[%s10856_s5 + $0x1c0] sm:$0xff] }
 0x30e   : > { %v8663_v12 = vadd.f32 %v2718_v48, %v2595_v7  ;;  %3897 = vmatpush.msrb.mxu0 %v11419_v40  ;;  %v10947_v14 = vand.u32 4294901760, %v8669_v33  ;;  %v3190_v17 = vmax.f32 %v3158_v21, 0.0  ;;  %v11434_v7 = vld [vmem:[#allocation37_spill] sm:$0xff]  ;;  %v11438_v21 = vand.u32 4294901760, %v8581_v60 }
 0x30f   : > { %4010 = vmatpush.msrb.mxu1 %v8349_v45  ;;  %11422 = vst [vmem:[#allocation17_spill] sm:$0xff] %v8684_v22  ;;  %v8779_v60 = vand.u32 4294901760, %v3276_v54 }
 0x310   : > { %3054 = vmatmul.f32.gmra.mxu2 %v8032_v57  ;;  %3901 = vmatpush.msrb.mxu0 %v11420_v1  ;;  %v4260_v41 = vsub.f32 %v8669_v33, %v10947_v14  ;;  %v11437_v1 = vld [vmem:[#allocation13_spill] sm:$0xff] }
 0x311   : > { %3142 = vmatmul.f32.gmra.mxu3 %v8032_v57  ;;  %v8686_v16 = vpop.f32.mrf.mxu1  ;;  %v3280_v57 = vld [vmem:[%s10856_s5 + $0x1e0] sm:$0xff]  ;;  %4012 = vmatpush.msrb.mxu1 %v8375_v30 }
 0x312   : > { %v8680_v62 = vpop.f32.mrf.mxu0  ;;  %3905 = vmatpush.msrb.mxu0 %v11421_v26  ;;  %v8694_v24 = vand.u32 4294901760, %v3280_v57  ;;  %v4261_v15 = vand.u32 4294901760, %v4260_v41  ;;  %v11439_v26 = vld [vmem:[#allocation45_spill] sm:$0xff]  ;;  %v11443_v41 = vld [vmem:[#allocation31_spill] sm:$0xff] }
 0x313   : > { %v2602_v13 = vpop.f32.mrf.mxu2  ;;  %4014 = vmatpush.msrb.mxu1 %v8401_v5  ;;  %v8723_v5 = vand.u32 4294901760, %v3190_v17 }
 0x314   : > { %v2603_v18 = vadd.f32 %v2602_v13, %v8084_v46  ;;  %v2722_v45 = vpop.f32.mrf.mxu3  ;;  %3909 = vmatpush.msrb.mxu0 %v11423_v38  ;;  %2950 = vmatmul.f32.gmra.mxu1 %v8055_v53  ;;  %v8709_v46 = vsub.f32 %v3188_v25, %v8684_v22  ;;  %v8717_v50 = vsub.f32 %v3280_v57, %v8694_v24  ;;  %v3278_v53 = vld [vmem:[%s10856_s5 + $0x1d0] sm:$0xff]  ;;  %v11442_v38 = vand.u32 4294901760, %v8595_v2 }
 0x315   : > { %2831 = vmatmul.f32.gmra.mxu0 %v8042_v9  ;;  %4099 = vmatpush.msrb.mxu2 %v8694_v24  ;;  %v11425_v9 = vand.u32 4294901760, %v8483_v37  ;;  %11426 = vst [vmem:[#allocation18_spill] sm:$0xff] %v8723_v5  ;;  %v2323_v37 = vadd.f32 %v8357_v28, %v8132_v56  ;;  %v8751_v19 = vsub.f32 %v3190_v17, %v8723_v5  ;;  %v11444_v17 = vld [vmem:[#allocation23_spill] sm:$0xff] }
 0x316   : > { %v8704_v30 = vadd.f32 %v2722_v45, %v2603_v18  ;;  %11424 = vst [vmem:[#allocation52_spill] sm:$0xff] %v8709_v46  ;;  %4016 = vmatpush.msrb.mxu1 %v8427_v29  ;;  %v3160_v29 = vadd.f32 %v8633_v58, %v2407_v32  ;;  %4262 = vmatpush.msrb.mxu3 %v4261_v15  ;;  %v10946_v10 = vand.u32 4294901760, %v8717_v50  ;;  %v11445_v15 = vld [vmem:[#allocation22_spill] sm:$0xff] }
 0x317   : > { %3913 = vmatpush.msrb.mxu0 %v11425_v9  ;;  %11433 = vst [vmem:[#allocation56_spill] sm:$0xff] %v8751_v19  ;;  %v8777_v45 = vand.u32 4294901760, %v8751_v19  ;;  %v2327_v32 = vadd.f32 %v11444_v17, %v11443_v41 }
 0x318   : > { %3058 = vmatmul.f32.gmra.mxu2 %v8057_v61  ;;  %4018 = vmatpush.msrb.mxu1 %v8453_v39  ;;  %v8737_v39 = vand.u32 4294901760, %v8709_v46  ;;  %v4266_v47 = vsub.f32 %v8717_v50, %v10946_v10 }
 0x319   : > { %3146 = vmatmul.f32.gmra.mxu3 %v8057_v61  ;;  %v8730_v61 = vand.u32 4294901760, %v3278_v53  ;;  %3917 = vmatpush.msrb.mxu0 %v11427_v51  ;;  %v8734_v55 = vpop.f32.mrf.mxu1  ;;  %11441 = vst [vmem:[#allocation49_spill] sm:$0xff] %v8777_v45 }
 0x31a   : > { %v8728_v23 = vpop.f32.mrf.mxu0  ;;  %11428 = vst [vmem:[#allocation19_spill] sm:$0xff] %v8737_v39  ;;  %4020 = vmatpush.msrb.mxu1 %v8479_v27  ;;  %v3192_v27 = vmax.f32 %v3160_v29, 0.0  ;;  %v3325_v40 = vsub.f32 %v8709_v46, %v8737_v39  ;;  %v4267_v25 = vand.u32 4294901760, %v4266_v47 }
 0x31b   : > { %v2610_v31 = vpop.f32.mrf.mxu2  ;;  %4101 = vmatpush.msrb.mxu2 %v8730_v61  ;;  %3921 = vmatpush.msrb.mxu0 %v11430_v35  ;;  %v8767_v3 = vsub.f32 %v3278_v53, %v8730_v61  ;;  %v11448_v35 = vld [vmem:[#allocation38_spill] sm:$0xff] }
 0x31c   : > { %v2611_v56 = vadd.f32 %v2610_v31, %v8096_v6  ;;  %v2726_v28 = vpop.f32.mrf.mxu3  ;;  %4022 = vmatpush.msrb.mxu1 %v11432_v4  ;;  %v2411_v6 = vadd.f32 %v11434_v7, %v2323_v37  ;;  %v8773_v13 = vand.u32 4294901760, %v3192_v27  ;;  %4268 = vmatpush.msrb.mxu3 %v4267_v25  ;;  %v8786_v37 = vand.u32 4294901760, %v3325_v40  ;;  %v3274_v7 = vld [vmem:[%s10856_s5 + $0x1b0] sm:$0xff] }
 0x31d   : > { %2836 = vmatmul.f32.gmra.mxu0 %v11431_v8  ;;  %2956 = vmatmul.f32.gmra.mxu1 %v11435_v59  ;;  %v10945_v51 = vand.u32 4294901760, %v8767_v3  ;;  %v2415_v8 = vadd.f32 %v11448_v35, %v2327_v32  ;;  %v8824_v25 = vand.u32 4294901760, %v3274_v7 }
 0x31e   : > { %v8754_v48 = vadd.f32 %v2726_v28, %v2611_v56  ;;  %3925 = vmatpush.msrb.mxu0 %v11436_v52  ;;  %4024 = vmatpush.msrb.mxu1 %v11437_v1  ;;  %11440 = vst [vmem:[#allocation47_spill] sm:$0xff] %v8773_v13  ;;  %v3162_v57 = vadd.f32 %v8633_v58, %v2411_v6 }
 0x31f   : > { %11446 = vst [vmem:[#allocation59_spill] sm:$0xff] %v8786_v37  ;;  %4103 = vmatpush.msrb.mxu2 %v8779_v60  ;;  %v4272_v2 = vsub.f32 %v8767_v3, %v10945_v51  ;;  %v8797_v28 = vsub.f32 %v3192_v27, %v8773_v13  ;;  %v8811_v27 = vsub.f32 %v3276_v54, %v8779_v60  ;;  %v11453_v54 = vld [vmem:[#allocation39_spill] sm:$0xff] }
 0x320   : > { %3662 = vmatmul.f32.vlgmr.msra.gmra.mxu2 %v8709_v46  ;;  %3929 = vmatpush.msrb.mxu0 %v11438_v21  ;;  %v3194_v11 = vmax.f32 %v3162_v57, 0.0  ;;  %v3164_v1 = vadd.f32 %v8633_v58, %v2415_v8  ;;  %v11452_v21 = vld [vmem:[#allocation51_spill] sm:$0xff]  ;;  %v11454_v57 = vld [vmem:[#allocation36_spill] sm:$0xff] }
 0x321   : > { %3776 = vmatmul.f32.vlgmr.msra.gmra.mxu3 %v8737_v39  ;;  %4026 = vmatpush.msrb.mxu1 %v11439_v26  ;;  %v2867_v53 = vpop.f32.mrf.mxu1  ;;  %11447 = vst [vmem:[#allocation50_spill] sm:$0xff] %v8797_v28  ;;  %v4273_v4 = vand.u32 4294901760, %v4272_v2  ;;  %v8822_v40 = vand.u32 4294901760, %v8797_v28  ;;  %v2331_v26 = vadd.f32 %v11453_v54, %v11452_v21  ;;  %v10943_v17 = vand.u32 4294901760, %v8811_v27 }
 0x322   : > { %v2762_v18 = vpop.f32.mrf.mxu0  ;;  %3933 = vmatpush.msrb.mxu0 %v11442_v38  ;;  %v8817_v6 = vand.u32 4294901760, %v3194_v11  ;;  %4105 = vmatpush.msrb.mxu2 %v8824_v25 }
 0x323   : > { %v2763_v9 = vadd.f32 %v2762_v18, %v11445_v15  ;;  %v2999_v29 = vpop.f32.mrf.mxu2  ;;  %4028 = vmatpush.msrb.mxu1 %v8568_v43  ;;  %v3333_v43 = vsub.f32 %v8751_v19, %v8777_v45  ;;  %11451 = vst [vmem:[#allocation54_spill] sm:$0xff] %v8822_v40  ;;  %4274 = vmatpush.msrb.mxu3 %v4273_v4  ;;  %v11457_v4 = vld [vmem:[#allocation20_spill] sm:$0xff] }
 0x324   : > { %v3087_v31 = vpop.f32.mrf.mxu3  ;;  %11449 = vst [vmem:[#allocation53_spill] sm:$0xff] %v8817_v6 }
 0x325   : > { %v2868_v56 = vadd.f32 %v2867_v53, %v2763_v9  ;;  %3327 = vmatmul.f32.vlgmr.msra.gmra.mxu0 %v8786_v37  ;;  %4030 = vmatpush.msrb.mxu1 %v8584_v49  ;;  %v8819_v52 = vand.u32 4294901760, %v3333_v43  ;;  %v4278_v9 = vsub.f32 %v8811_v27, %v10943_v17  ;;  %v8841_v53 = vsub.f32 %v3194_v11, %v8817_v6 }
 0x326   : > { %3548 = vmatmul.f32.vlgmr.msra.gmra.mxu1 %v8684_v22  ;;  %4420 = vmatpush.msra.mxu0 %v8669_v33  ;;  %v8853_v11 = vsub.f32 %v3274_v7, %v8824_v25 }
 0x327   : > { %v3000_v47 = vadd.f32 %v2999_v29, %v2868_v56  ;;  %4548 = vmatpush.msra.mxu1 %v8640_v44  ;;  %11450 = vst [vmem:[#allocation63_spill] sm:$0xff] %v8819_v52  ;;  %v3341_v29 = vsub.f32 %v8797_v28, %v8822_v40  ;;  %v11456_v56 = vld [vmem:[#allocation71_spill] sm:$0xff]  ;;  %v4279_v35 = vand.u32 4294901760, %v4278_v9 }
 0x328   : > { %3667 = vmatmul.f32.gmra.mxu2 %v8751_v19  ;;  %4423 = vmatpush.msra.mxu0 %v8717_v50  ;;  %11455 = vst [vmem:[#allocation55_spill] sm:$0xff] %v8841_v53  ;;  %v2419_v2 = vadd.f32 %v11456_v56, %v2331_v26  ;;  %v8863_v26 = vand.u32 4294901760, %v8841_v53  ;;  %v10944_v9 = vand.u32 4294901760, %v8853_v11 }
 0x329   : > { %v8807_v49 = vadd.f32 %v3087_v31, %v3000_v47  ;;  %3782 = vmatmul.f32.gmra.mxu3 %v8777_v45  ;;  %4550 = vmatpush.msra.mxu1 %v8694_v24  ;;  %v2873_v38 = vpop.f32.mrf.mxu1  ;;  %v3196_v31 = vmax.f32 %v3164_v1, 0.0  ;;  %v3272_v47 = vld [vmem:[%s10856_s5 + $0x1a0] sm:$0xff]  ;;  %v8860_v54 = vand.u32 4294901760, %v3341_v29 }
 0x32a   : > { %v2767_v59 = vpop.f32.mrf.mxu0  ;;  %4426 = vmatpush.msra.mxu0 %v8767_v3  ;;  %11460 = vst [vmem:[#allocation58_spill] sm:$0xff] %v8863_v26  ;;  %4280 = vmatpush.msrb.mxu3 %v4279_v35  ;;  %v3166_v7 = vadd.f32 %v8633_v58, %v2419_v2  ;;  %v4284_v2 = vsub.f32 %v8853_v11, %v10944_v9  ;;  %v11466_v9 = vld [vmem:[#allocation42_spill] sm:$0xff] }
 0x32b   : > { %v2768_v18 = vadd.f32 %v2767_v59, %v11454_v57  ;;  %v3003_v41 = vpop.f32.mrf.mxu2  ;;  %4552 = vmatpush.msra.mxu1 %v8730_v61  ;;  %v11458_v59 = vld [vmem:[#allocation40_spill] sm:$0xff]  ;;  %11459 = vst [vmem:[#allocation68_spill] sm:$0xff] %v8860_v54  ;;  %v8865_v57 = vand.u32 4294901760, %v3272_v47 }
 0x32c   : > { %v3091_v32 = vpop.f32.mrf.mxu3  ;;  %4429 = vmatpush.msra.mxu0 %v8811_v27  ;;  %v2335_v1 = vadd.f32 %v11458_v59, %v11457_v4  ;;  %v3349_v4 = vsub.f32 %v8841_v53, %v8863_v26  ;;  %v4285_v17 = vand.u32 4294901760, %v4284_v2 }
 0x32d   : > { %v2874_v15 = vadd.f32 %v2873_v38, %v2768_v18  ;;  %3335 = vmatmul.f32.gmra.mxu0 %v8819_v52  ;;  %4554 = vmatpush.msra.mxu1 %v8779_v60  ;;  %v8867_v18 = vand.u32 4294901760, %v3196_v31  ;;  %v11462_v38 = vld [vmem:[#allocation74_spill] sm:$0xff] }
 0x32e   : > { %3552 = vmatmul.f32.gmra.mxu1 %v8723_v5  ;;  %4432 = vmatpush.msra.mxu0 %v8853_v11 }
 0x32f   : > { %v3004_v43 = vadd.f32 %v3003_v41, %v2874_v15  ;;  %4556 = vmatpush.msra.mxu1 %v8824_v25  ;;  %11461 = vst [vmem:[#allocation60_spill] sm:$0xff] %v8867_v18  ;;  %4107 = vmatpush.msrb.mxu2 %v8865_v57  ;;  %v8884_v59 = vsub.f32 %v3196_v31, %v8867_v18  ;;  %v11465_v31 = vld [vmem:[#allocation32_spill] sm:$0xff] }
 0x330   : > { %3672 = vmatmul.f32.gmra.mxu2 %v8797_v28  ;;  %4286 = vmatpush.msrb.mxu3 %v4285_v17 }
 0x331   : > { %v8849_v8 = vadd.f32 %v3091_v32, %v3004_v43  ;;  %3788 = vmatmul.f32.gmra.mxu3 %v8822_v40  ;;  %v2879_v32 = vpop.f32.mrf.mxu1  ;;  %4558 = vmatpush.msra.mxu1 %v8865_v57  ;;  %v11463_v43 = vld [vmem:[#allocation41_spill] sm:$0xff]  ;;  %11464 = vst [vmem:[#allocation73_spill] sm:$0xff] %v8884_v59  ;;  %v8907_v14 = vand.u32 4294901760, %v8884_v59 }
 0x332   : > { %v2772_v21 = vpop.f32.mrf.mxu0  ;;  %v2423_v35 = vadd.f32 %v11463_v43, %v2335_v1  ;;  %v3270_v1 = vld [vmem:[%s10856_s5 + $0x190] sm:$0xff] }
 0x333   : > { %v2773_v41 = vadd.f32 %v2772_v21, %v11462_v38  ;;  %v3007_v15 = vpop.f32.mrf.mxu2  ;;  %v3198_v21 = vmax.f32 %v3166_v7, 0.0  ;;  %v2339_v7 = vadd.f32 %v11466_v9, %v11465_v31  ;;  %11470 = vst [vmem:[#allocation77_spill] sm:$0xff] %v8907_v14 }
 0x334   : > { %v3095_v29 = vpop.f32.mrf.mxu3  ;;  %v3168_v43 = vadd.f32 %v8633_v58, %v2423_v35 }
 0x335   : > { %v2880_v56 = vadd.f32 %v2879_v32, %v2773_v41  ;;  %3343 = vmatmul.f32.gmra.mxu0 %v8860_v54  ;;  %v8891_v32 = vsub.f32 %v3272_v47, %v8865_v57  ;;  %v8903_v2 = vand.u32 4294901760, %v3198_v21  ;;  %v3357_v54 = vsub.f32 %v8884_v59, %v8907_v14 }
 0x336   : > { %3556 = vmatmul.f32.gmra.mxu1 %v8773_v13  ;;  %v3200_v31 = vmax.f32 %v3168_v43, 0.0 }
 0x337   : > { %v3008_v38 = vadd.f32 %v3007_v15, %v2880_v56  ;;  %v8899_v56 = vand.u32 4294901760, %v3349_v4  ;;  %11468 = vst [vmem:[#allocation65_spill] sm:$0xff] %v8903_v2  ;;  %v10952_v35 = vand.u32 4294901760, %v8891_v32  ;;  %4435 = vmatpush.msra.mxu0 %v8891_v32 }
 0x338   : > { %3677 = vmatmul.f32.gmra.mxu2 %v8841_v53 }
 0x339   : > { %v8887_v41 = vadd.f32 %v3095_v29, %v3008_v38  ;;  %3794 = vmatmul.f32.gmra.mxu3 %v8863_v26  ;;  %11467 = vst [vmem:[#allocation62_spill] sm:$0xff] %v8899_v56  ;;  %v8901_v29 = vand.u32 4294901760, %v3270_v1  ;;  %v11469_v38 = vld [vmem:[#allocation66_spill] sm:$0xff]  ;;  %v2885_v51 = vpop.f32.mrf.mxu1  ;;  %v4290_v4 = vsub.f32 %v8891_v32, %v10952_v35  ;;  %v8920_v26 = vsub.f32 %v3198_v21, %v8903_v2 }
 0x33a   : > { %v2777_v15 = vpop.f32.mrf.mxu0  ;;  %v8934_v21 = vand.u32 4294901760, %v3200_v31 }
 0x33b   : > { %v2778_v47 = vadd.f32 %v2777_v15, %v11469_v38  ;;  %v3011_v10 = vpop.f32.mrf.mxu2  ;;  %4109 = vmatpush.msrb.mxu2 %v8901_v29  ;;  %4560 = vmatpush.msra.mxu1 %v8901_v29  ;;  %v11471_v15 = vld [vmem:[#allocation43_spill] sm:$0xff]  ;;  %11472 = vst [vmem:[#allocation67_spill] sm:$0xff] %v8920_v26  ;;  %v4291_v40 = vand.u32 4294901760, %v4290_v4  ;;  %v8929_v43 = vsub.f32 %v3270_v1, %v8901_v29 }
 0x33c   : > { %v3099_v9 = vpop.f32.mrf.mxu3  ;;  %v2427_v38 = vadd.f32 %v11471_v15, %v2339_v7  ;;  %v3268_v7 = vld [vmem:[%s10856_s5 + $0x180] sm:$0xff]  ;;  %11473 = vst [vmem:[#allocation70_spill] sm:$0xff] %v8934_v21 }
 0x33d   : > { %v2886_v17 = vadd.f32 %v2885_v51, %v2778_v47  ;;  %3351 = vmatmul.f32.gmra.mxu0 %v8899_v56  ;;  %v11474_v47 = vld [vmem:[#allocation64_spill] sm:$0xff]  ;;  %4292 = vmatpush.msrb.mxu3 %v4291_v40  ;;  %v8945_v56 = vand.u32 4294901760, %v8920_v26  ;;  %v10960_v28 = vand.u32 4294901760, %v8929_v43 }
 0x33e   : > { %3560 = vmatmul.f32.gmra.mxu1 %v8817_v6  ;;  %4438 = vmatpush.msra.mxu0 %v8929_v43 }
 0x33f   : > { %v3012_v53 = vadd.f32 %v3011_v10, %v2886_v17  ;;  %v3170_v10 = vadd.f32 %v8633_v58, %v2427_v38  ;;  %v11475_v17 = vld [vmem:[#allocation9_spill] sm:$0xff]  ;;  %11478 = vst [vmem:[#allocation72_spill] sm:$0xff] %v8945_v56  ;;  %v3365_v45 = vsub.f32 %v8920_v26, %v8945_v56 }
 0x340   : > { %3682 = vmatmul.f32.gmra.mxu2 %v8884_v59  ;;  %v2343_v4 = vadd.f32 %v11475_v17, %v11474_v47  ;;  %v8942_v59 = vand.u32 4294901760, %v3357_v54  ;;  %v4296_v54 = vsub.f32 %v8929_v43, %v10960_v28  ;;  %v8956_v47 = vsub.f32 %v3200_v31, %v8934_v21  ;;  %v3266_v31 = vld [vmem:[%s10856_s5 + $0x170] sm:$0xff] }
 0x341   : > { %v8925_v51 = vadd.f32 %v3099_v9, %v3012_v53  ;;  %3800 = vmatmul.f32.gmra.mxu3 %v8907_v14  ;;  %v8939_v53 = vand.u32 4294901760, %v3268_v7  ;;  %v11476_v9 = vld [vmem:[#allocation78_spill] sm:$0xff]  ;;  %v2891_v14 = vpop.f32.mrf.mxu1  ;;  %v3202_v17 = vmax.f32 %v3170_v10, 0.0 }
 0x342   : > { %v2782_v15 = vpop.f32.mrf.mxu0  ;;  %11477 = vst [vmem:[#allocation81_spill] sm:$0xff] %v8942_v59  ;;  %v4297_v19 = vand.u32 4294901760, %v4296_v54  ;;  %v11485_v54 = vld [vmem:[#allocation11_spill] sm:$0xff] }
 0x343   : > { %v2783_v35 = vadd.f32 %v2782_v15, %v11476_v9  ;;  %v3015_v1 = vpop.f32.mrf.mxu2  ;;  %4111 = vmatpush.msrb.mxu2 %v8939_v53  ;;  %4562 = vmatpush.msra.mxu1 %v8939_v53  ;;  %11479 = vst [vmem:[#allocation75_spill] sm:$0xff] %v8956_v47  ;;  %v11480_v15 = vld [vmem:[#allocation44_spill] sm:$0xff]  ;;  %v8972_v10 = vand.u32 4294901760, %v3202_v17 }
 0x344   : > { %v3103_v38 = vpop.f32.mrf.mxu3  ;;  %v2431_v9 = vadd.f32 %v11480_v15, %v2343_v4  ;;  %4298 = vmatpush.msrb.mxu3 %v4297_v19 }
 0x345   : > { %v2892_v40 = vadd.f32 %v2891_v14, %v2783_v35  ;;  %3359 = vmatmul.f32.gmra.mxu0 %v8942_v59  ;;  %v8967_v35 = vsub.f32 %v3268_v7, %v8939_v53  ;;  %11482 = vst [vmem:[#allocation76_spill] sm:$0xff] %v8972_v10  ;;  %v11486_v7 = vld [vmem:[#allocation24_spill] sm:$0xff]  ;;  %v8983_v59 = vand.u32 4294901760, %v3365_v45 }
 0x346   : > { %3564 = vmatmul.f32.gmra.mxu1 %v8867_v18  ;;  %v3172_v4 = vadd.f32 %v8633_v58, %v2431_v9 }
 0x347   : > { %v3016_v52 = vadd.f32 %v3015_v1, %v2892_v40  ;;  %v8976_v40 = vand.u32 4294901760, %v8956_v47  ;;  %11487 = vst [vmem:[#allocation80_spill] sm:$0xff] %v8983_v59  ;;  %v10969_v37 = vand.u32 4294901760, %v8967_v35  ;;  %4441 = vmatpush.msra.mxu0 %v8967_v35 }
 0x348   : > { %3687 = vmatmul.f32.gmra.mxu2 %v8920_v26  ;;  %v3204_v45 = vmax.f32 %v3172_v4, 0.0 }
 0x349   : > { %v8963_v14 = vadd.f32 %v3103_v38, %v3016_v52  ;;  %3806 = vmatmul.f32.gmra.mxu3 %v8945_v56  ;;  %11483 = vst [vmem:[#allocation79_spill] sm:$0xff] %v8976_v40  ;;  %v8978_v52 = vand.u32 4294901760, %v3266_v31  ;;  %v11484_v38 = vld [vmem:[#allocation33_spill] sm:$0xff]  ;;  %v2897_v56 = vpop.f32.mrf.mxu1 }
 0x34a   : > { %v2787_v1 = vpop.f32.mrf.mxu0  ;;  %v2347_v15 = vadd.f32 %v11485_v54, %v11484_v38  ;;  %v8994_v38 = vsub.f32 %v3202_v17, %v8972_v10  ;;  %v3373_v54 = vsub.f32 %v8956_v47, %v8976_v40  ;;  %v3264_v17 = vld [vmem:[%s10856_s5 + $0x160] sm:$0xff]  ;;  %v9010_v4 = vand.u32 4294901760, %v3204_v45 }
 0x34b   : > { %11481 = vst [vmem:[#allocation85_spill] sm:$0xff] %v8963_v14  ;;  %v2788_v28 = vadd.f32 %v2787_v1, %v11486_v7  ;;  %v3019_v26 = vpop.f32.mrf.mxu2  ;;  %4113 = vmatpush.msrb.mxu2 %v8978_v52  ;;  %4564 = vmatpush.msra.mxu1 %v8978_v52  ;;  %v4302_v1 = vsub.f32 %v8967_v35, %v10969_v37  ;;  %v11489_v7 = vld [vmem:[#allocation28_spill] sm:$0xff] }
 0x34c   : > { %v3107_v9 = vpop.f32.mrf.mxu3  ;;  %11488 = vst [vmem:[#allocation82_spill] sm:$0xff] %v8994_v38  ;;  %v2435_v39 = vadd.f32 %v11489_v7, %v2347_v15 }
 0x34d   : > { %v2898_v19 = vadd.f32 %v2897_v56, %v2788_v28  ;;  %3367 = vmatmul.f32.gmra.mxu0 %v8983_v59  ;;  %v4303_v18 = vand.u32 4294901760, %v4302_v1  ;;  %v9005_v56 = vsub.f32 %v3266_v31, %v8978_v52  ;;  %11491 = vst [vmem:[#allocation84_spill] sm:$0xff] %v9010_v4  ;;  %v9012_v59 = vand.u32 4294901760, %v3373_v54  ;;  %v11495_v31 = vld [vmem:[#allocation14_spill] sm:$0xff]  ;;  %v11496_v1 = vld [vmem:[#allocation25_spill] sm:$0xff] }
 0x34e   : > { %3568 = vmatmul.f32.gmra.mxu1 %v8903_v2  ;;  %v3174_v15 = vadd.f32 %v8633_v58, %v2435_v39 }
 0x34f   : > { %v3020_v46 = vadd.f32 %v3019_v26, %v2898_v19  ;;  %11492 = vst [vmem:[#allocation29_spill] sm:$0xff] %v9012_v59  ;;  %v9015_v26 = vand.u32 4294901760, %v8994_v38  ;;  %4304 = vmatpush.msrb.mxu3 %v4303_v18  ;;  %v10982_v2 = vand.u32 4294901760, %v9005_v56  ;;  %4444 = vmatpush.msra.mxu0 %v9005_v56 }
 0x350   : > { %3692 = vmatmul.f32.gmra.mxu2 %v8956_v47 }
 0x351   : > { %v9001_v28 = vadd.f32 %v3107_v9, %v3020_v46  ;;  %3812 = vmatmul.f32.gmra.mxu3 %v8976_v40  ;;  %11493 = vst [vmem:[#allocation86_spill] sm:$0xff] %v9015_v26  ;;  %v9017_v46 = vand.u32 4294901760, %v3264_v17  ;;  %v11494_v9 = vld [vmem:[#allocation57_spill] sm:$0xff]  ;;  %v2903_v40 = vpop.f32.mrf.mxu1  ;;  %v4308_v39 = vsub.f32 %v9005_v56, %v10982_v2 }
 0x352   : > { %v2792_v37 = vpop.f32.mrf.mxu0  ;;  %v2351_v19 = vadd.f32 %v11495_v31, %v11494_v9  ;;  %v3381_v9 = vsub.f32 %v8994_v38, %v9015_v26  ;;  %v3206_v31 = vmax.f32 %v3174_v15, 0.0  ;;  %v3262_v15 = vld [vmem:[%s10856_s5 + $0x150] sm:$0xff] }
 0x353   : > { %11490 = vst [vmem:[#allocation83_spill] sm:$0xff] %v9001_v28  ;;  %v2793_v7 = vadd.f32 %v2792_v37, %v11496_v1  ;;  %v3023_v47 = vpop.f32.mrf.mxu2  ;;  %4115 = vmatpush.msrb.mxu2 %v9017_v46  ;;  %4566 = vmatpush.msra.mxu1 %v9017_v46  ;;  %v9032_v37 = vsub.f32 %v3204_v45, %v9010_v4  ;;  %v11498_v1 = vld [vmem:[#allocation15_spill] sm:$0xff]  ;;  %v4309_v28 = vand.u32 4294901760, %v4308_v39  ;;  %v11505_v39 = vld [vmem:[#allocation26_spill] sm:$0xff] }
 0x354   : > { %v3111_v54 = vpop.f32.mrf.mxu3  ;;  %v2439_v6 = vadd.f32 %v11498_v1, %v2351_v19  ;;  %v9045_v45 = vsub.f32 %v3264_v17, %v9017_v46  ;;  %v9050_v19 = vand.u32 4294901760, %v3381_v9 }
 0x355   : > { %v2904_v18 = vadd.f32 %v2903_v40, %v2793_v7  ;;  %3375 = vmatmul.f32.gmra.mxu0 %v9012_v59  ;;  %11497 = vst [vmem:[#allocation10_spill] sm:$0xff] %v9032_v37  ;;  %v11499_v40 = vld [vmem:[#allocation21_spill] sm:$0xff]  ;;  %v11500_v7 = vld [vmem:[#allocation46_spill] sm:$0xff]  ;;  %4310 = vmatpush.msrb.mxu3 %v4309_v28  ;;  %v11506_v28 = vld [vmem:[#allocation48_spill] sm:$0xff] }
 0x356   : > { %3572 = vmatmul.f32.gmra.mxu1 %v8934_v21  ;;  %v2355_v59 = vadd.f32 %v11500_v7, %v11499_v40  ;;  %11502 = vst [vmem:[#allocation87_spill] sm:$0xff] %v9050_v19  ;;  %v10987_v7 = vand.u32 4294901760, %v9045_v45  ;;  %4447 = vmatpush.msra.mxu0 %v9045_v45 }
 0x357   : > { %v3024_v13 = vadd.f32 %v3023_v47, %v2904_v18  ;;  %v9053_v47 = vand.u32 4294901760, %v9032_v37  ;;  %v9055_v18 = vand.u32 4294901760, %v3262_v15 }
 0x358   : > { %3697 = vmatmul.f32.gmra.mxu2 %v8994_v38 }
 0x359   : > { %v9041_v5 = vadd.f32 %v3111_v54, %v3024_v13  ;;  %3818 = vmatmul.f32.gmra.mxu3 %v9015_v26  ;;  %11503 = vst [vmem:[#allocation13_spill] sm:$0xff] %v9053_v47  ;;  %v9057_v13 = vand.u32 4294901760, %v3206_v31  ;;  %v3176_v54 = vadd.f32 %v8633_v58, %v2439_v6  ;;  %v2909_v1 = vpop.f32.mrf.mxu1  ;;  %4117 = vmatpush.msrb.mxu2 %v9055_v18 }
 0x35a   : > { %v2797_v2 = vpop.f32.mrf.mxu0  ;;  %4568 = vmatpush.msra.mxu1 %v9055_v18  ;;  %v2443_v26 = vadd.f32 %v11506_v28, %v2355_v59  ;;  %v4314_v6 = vsub.f32 %v9045_v45, %v10987_v7  ;;  %v3260_v28 = vld [vmem:[%s10856_s5 + $0x140] sm:$0xff] }
 0x35b   : > { %11501 = vst [vmem:[#allocation37_spill] sm:$0xff] %v9041_v5  ;;  %v2798_v17 = vadd.f32 %v2797_v2, %v11505_v39  ;;  %v3027_v40 = vpop.f32.mrf.mxu2  ;;  %v3389_v2 = vsub.f32 %v9032_v37, %v9053_v47  ;;  %v9074_v39 = vsub.f32 %v3206_v31, %v9057_v13  ;;  %v3208_v21 = vmax.f32 %v3176_v54, 0.0  ;;  %v11509_v31 = vld [vmem:[#allocation34_spill] sm:$0xff] }
 0x35c   : > { %11504 = vst [vmem:[#allocation45_spill] sm:$0xff] %v9057_v13  ;;  %v3115_v9 = vpop.f32.mrf.mxu3  ;;  %v4315_v14 = vand.u32 4294901760, %v4314_v6  ;;  %v3178_v59 = vadd.f32 %v8633_v58, %v2443_v26  ;;  %v2359_v54 = vadd.f32 %v8614_v42, %v11509_v31  ;;  %v9091_v6 = vand.u32 4294901760, %v3260_v28  ;;  %v11512_v26 = vld [vmem:[#allocation27_spill] sm:$0xff] }
 0x35d   : > { %v2910_v38 = vadd.f32 %v2909_v1, %v2798_v17  ;;  %3383 = vmatmul.f32.gmra.mxu0 %v9050_v19  ;;  %11507 = vst [vmem:[#allocation31_spill] sm:$0xff] %v9074_v39  ;;  %v9082_v1 = vsub.f32 %v3262_v15, %v9055_v18 }
 0x35e   : > { %3576 = vmatmul.f32.gmra.mxu1 %v8972_v10  ;;  %4316 = vmatpush.msrb.mxu3 %v4315_v14  ;;  %v3210_v14 = vmax.f32 %v3178_v59, 0.0 }
 0x35f   : > { %v3028_v5 = vadd.f32 %v3027_v40, %v2910_v38  ;;  %v9089_v40 = vand.u32 4294901760, %v3389_v2  ;;  %4450 = vmatpush.msra.mxu0 %v9082_v1  ;;  %4119 = vmatpush.msrb.mxu2 %v9091_v6 }
 0x360   : > { %3702 = vmatmul.f32.gmra.mxu2 %v9032_v37  ;;  %v10993_v37 = vand.u32 4294901760, %v9082_v1  ;;  %4570 = vmatpush.msra.mxu1 %v9091_v6 }
 0x361   : > { %v9078_v17 = vadd.f32 %v3115_v9, %v3028_v5  ;;  %3824 = vmatmul.f32.gmra.mxu3 %v9053_v47  ;;  %11510 = vst [vmem:[#allocation22_spill] sm:$0xff] %v9089_v40  ;;  %v9093_v5 = vand.u32 4294901760, %v3208_v21  ;;  %v2915_v7 = vpop.f32.mrf.mxu1  ;;  %v9097_v47 = vand.u32 4294901760, %v9074_v39 }
 0x362   : > { %v2802_v38 = vpop.f32.mrf.mxu0  ;;  %v4320_v31 = vsub.f32 %v9082_v1, %v10993_v37 }
 0x363   : > { %11508 = vst [vmem:[#allocation23_spill] sm:$0xff] %v9078_v17  ;;  %v2803_v9 = vadd.f32 %v2802_v38, %v11512_v26  ;;  %v3031_v15 = vpop.f32.mrf.mxu2  ;;  %v2447_v38 = vadd.f32 %v8618_v63, %v2359_v54  ;;  %v9110_v26 = vsub.f32 %v3208_v21, %v9093_v5  ;;  %v3397_v10 = vsub.f32 %v9074_v39, %v9097_v47  ;;  %v3258_v21 = vld [vmem:[%s10856_s5 + $0x130] sm:$0xff] }
 0x364   : > { %11511 = vst [vmem:[#allocation38_spill] sm:$0xff] %v9093_v5  ;;  %v3119_v42 = vpop.f32.mrf.mxu3  ;;  %v4321_v17 = vand.u32 4294901760, %v4320_v31  ;;  %v9121_v63 = vsub.f32 %v3260_v28, %v9091_v6  ;;  %v9129_v31 = vand.u32 4294901760, %v3258_v21 }
 0x365   : > { %11513 = vst [vmem:[#allocation51_spill] sm:$0xff] %v9097_v47  ;;  %v2916_v2 = vadd.f32 %v2915_v7, %v2803_v9  ;;  %3391 = vmatmul.f32.gmra.mxu0 %v9089_v40  ;;  %v9115_v7 = vand.u32 4294901760, %v3210_v14  ;;  %v3180_v54 = vadd.f32 %v8633_v58, %v2447_v38  ;;  %v11517_v9 = vld [vmem:[#allocation69_spill] sm:$0xff]  ;;  %v9135_v28 = vand.u32 4294901760, %v9110_v26 }
 0x366   : > { %3580 = vmatmul.f32.gmra.mxu1 %v9010_v4  ;;  %11514 = vst [vmem:[#allocation39_spill] sm:$0xff] %v9110_v26  ;;  %4322 = vmatpush.msrb.mxu3 %v4321_v17  ;;  %v10999_v40 = vand.u32 4294901760, %v9121_v63 }
 0x367   : > { %v3032_v19 = vadd.f32 %v3031_v15, %v2916_v2  ;;  %11515 = vst [vmem:[#allocation36_spill] sm:$0xff] %v9115_v7  ;;  %v2363_v15 = vadd.f32 %v8648_v34, %v11517_v9  ;;  %4453 = vmatpush.msra.mxu0 %v9121_v63  ;;  %4121 = vmatpush.msrb.mxu2 %v9129_v31  ;;  %v3212_v9 = vmax.f32 %v3180_v54, 0.0 }
 0x368   : > { %3707 = vmatmul.f32.gmra.mxu2 %v9074_v39  ;;  %v9132_v39 = vand.u32 4294901760, %v3397_v10  ;;  %11520 = vst [vmem:[#allocation40_spill] sm:$0xff] %v9135_v28  ;;  %4572 = vmatpush.msra.mxu1 %v9129_v31  ;;  %v9142_v34 = vsub.f32 %v3210_v14, %v9115_v7  ;;  %v4326_v10 = vsub.f32 %v9121_v63, %v10999_v40 }
 0x369   : > { %v9117_v59 = vadd.f32 %v3119_v42, %v3032_v19  ;;  %3830 = vmatmul.f32.gmra.mxu3 %v9097_v47  ;;  %v11518_v19 = vld [vmem:[#allocation12_spill] sm:$0xff]  ;;  %v2921_v37 = vpop.f32.mrf.mxu1  ;;  %v3405_v4 = vsub.f32 %v9110_v26, %v9135_v28  ;;  %v9160_v54 = vsub.f32 %v3258_v21, %v9129_v31 }
 0x36a   : > { %v2807_v2 = vpop.f32.mrf.mxu0  ;;  %11519 = vst [vmem:[#allocation20_spill] sm:$0xff] %v9132_v39 }
 0x36b   : > { %11516 = vst [vmem:[#allocation71_spill] sm:$0xff] %v9117_v59  ;;  %v2808_v42 = vadd.f32 %v2807_v2, %v11518_v19  ;;  %v3035_v47 = vpop.f32.mrf.mxu2  ;;  %v2451_v2 = vadd.f32 %v8654_v0, %v2363_v15  ;;  %v4327_v59 = vand.u32 4294901760, %v4326_v10  ;;  %v3256_v0 = vld [vmem:[%s10856_s5 + $0x120] sm:$0xff]  ;;  %4456 = vmatpush.msra.mxu0 %v9160_v54 }
 0x36c   : > { %v3123_v38 = vpop.f32.mrf.mxu3  ;;  %11521 = vst [vmem:[#allocation74_spill] sm:$0xff] %v9142_v34 }
 0x36d   : > { %v2922_v17 = vadd.f32 %v2921_v37, %v2808_v42  ;;  %3399 = vmatmul.f32.gmra.mxu0 %v9132_v39  ;;  %v9157_v37 = vand.u32 4294901760, %v9142_v34  ;;  %v9168_v15 = vadd.f32 %v8633_v58, %v2451_v2  ;;  %4328 = vmatpush.msrb.mxu3 %v4327_v59  ;;  %v11006_v39 = vand.u32 4294901760, %v9160_v54  ;;  %v3254_v59 = vld [vmem:[%s10856_s5 + $0x110] sm:$0xff] }
 0x36e   : > { %3584 = vmatmul.f32.gmra.mxu1 %v9057_v13 }
 0x36f   : > { %v3036_v19 = vadd.f32 %v3035_v47, %v2922_v17  ;;  %11523 = vst [vmem:[#allocation32_spill] sm:$0xff] %v9157_v37  ;;  %v9165_v47 = vand.u32 4294901760, %v3212_v9  ;;  %v11526_v17 = vld [vmem:[#allocation35_spill] sm:$0xff]  ;;  %v4332_v2 = vsub.f32 %v9160_v54, %v11006_v39 }
 0x370   : > { %3712 = vmatmul.f32.gmra.mxu2 %v9110_v26  ;;  %v2367_v10 = vadd.f32 %v8680_v62, %v11526_v17  ;;  %v9175_v26 = vand.u32 4294901760, %v3405_v4  ;;  %v3413_v4 = vsub.f32 %v9142_v34, %v9157_v37 }
 0x371   : > { %v9153_v14 = vadd.f32 %v3123_v38, %v3036_v19  ;;  %3836 = vmatmul.f32.gmra.mxu3 %v9135_v28  ;;  %11524 = vst [vmem:[#allocation42_spill] sm:$0xff] %v9165_v47  ;;  %v9170_v38 = vand.u32 4294901760, %v3256_v0  ;;  %v11527_v19 = vld [vmem:[#allocation30_spill] sm:$0xff]  ;;  %v2927_v21 = vpop.f32.mrf.mxu1  ;;  %v9194_v17 = vsub.f32 %v3212_v9, %v9165_v47  ;;  %v4333_v39 = vand.u32 4294901760, %v4332_v2  ;;  %v11535_v2 = vld [vmem:[#allocation61_spill] sm:$0xff] }
 0x372   : > { %v2812_v42 = vpop.f32.mrf.mxu0  ;;  %11528 = vst [vmem:[#allocation43_spill] sm:$0xff] %v9175_v26 }
 0x373   : > { %11522 = vst [vmem:[#allocation41_spill] sm:$0xff] %v9153_v14  ;;  %v2813_v40 = vadd.f32 %v2812_v42, %v11527_v19  ;;  %v3039_v28 = vpop.f32.mrf.mxu2  ;;  %4123 = vmatpush.msrb.mxu2 %v9170_v38  ;;  %4574 = vmatpush.msra.mxu1 %v9170_v38  ;;  %v9191_v42 = vsub.f32 %v3256_v0, %v9170_v38  ;;  %v3214_v19 = vmax.f32 %v9168_v15, 0.0 }
 0x374   : > { %11525 = vst [vmem:[#allocation66_spill] sm:$0xff] %v9170_v38  ;;  %v3127_v13 = vpop.f32.mrf.mxu3  ;;  %4334 = vmatpush.msrb.mxu3 %v4333_v39 }
 0x375   : > { %v2928_v62 = vadd.f32 %v2927_v21, %v2813_v40  ;;  %3407 = vmatmul.f32.gmra.mxu0 %v9175_v26  ;;  %11529 = vst [vmem:[#allocation64_spill] sm:$0xff] %v9194_v17  ;;  %v9198_v40 = vand.u32 4294901760, %v3254_v59  ;;  %v3252_v21 = vld [vmem:[%s10856_s5 + $0x100] sm:$0xff]  ;;  %v2455_v26 = vadd.f32 %v8686_v16, %v2367_v10  ;;  %v11009_v0 = vand.u32 4294901760, %v9191_v42 }
 0x376   : > { %3588 = vmatmul.f32.gmra.mxu1 %v9093_v5  ;;  %4459 = vmatpush.msra.mxu0 %v9191_v42  ;;  %v9210_v15 = vand.u32 4294901760, %v3252_v21  ;;  %v9216_v16 = vand.u32 4294901760, %v3413_v4  ;;  %v9222_v10 = vand.u32 4294901760, %v3214_v19 }
 0x377   : > { %11530 = vst [vmem:[#allocation9_spill] sm:$0xff] %v9198_v40  ;;  %v3040_v14 = vadd.f32 %v3039_v28, %v2928_v62  ;;  %v9208_v9 = vsub.f32 %v3254_v59, %v9198_v40  ;;  %4576 = vmatpush.msra.mxu1 %v9198_v40  ;;  %v4338_v28 = vsub.f32 %v9191_v42, %v11009_v0  ;;  %v9225_v62 = vand.u32 4294901760, %v9194_v17 }
 0x378   : > { %3717 = vmatmul.f32.gmra.mxu2 %v9142_v34  ;;  %11532 = vst [vmem:[#allocation44_spill] sm:$0xff] %v9216_v16  ;;  %v3184_v4 = vadd.f32 %v8633_v58, %v2455_v26  ;;  %v2371_v0 = vadd.f32 %v8728_v23, %v11535_v2  ;;  %v11537_v26 = vand.u32 4294901760, %v8669_v33  ;;  %v11538_v2 = vand.u32 4294901760, %v8717_v50 }
 0x379   : > { %v9213_v5 = vadd.f32 %v3127_v13, %v3040_v14  ;;  %3842 = vmatmul.f32.gmra.mxu3 %v9157_v37  ;;  %4125 = vmatpush.msrb.mxu2 %v9198_v40  ;;  %11533 = vst [vmem:[#allocation33_spill] sm:$0xff] %v9222_v10  ;;  %v11016_v13 = vand.u32 4294901760, %v9208_v9  ;;  %v9229_v14 = vsub.f32 %v3252_v21, %v9210_v15  ;;  %v11536_v37 = vld [vmem:[#allocation16_spill] sm:$0xff]  ;;  %v4339_v40 = vand.u32 4294901760, %v4338_v28 }
 0x37a   : > { %v2817_v59 = vpop.f32.mrf.mxu0  ;;  %11534 = vst [vmem:[#allocation11_spill] sm:$0xff] %v9225_v62  ;;  %4462 = vmatpush.msra.mxu0 %v9208_v9  ;;  %4578 = vmatpush.msra.mxu1 %v9210_v15  ;;  %v9255_v33 = vsub.f32 %v3214_v19, %v9222_v10  ;;  %v9265_v50 = vperm.slane %v8622_v20, 1  ;;  %v11544_v20 = vand.u32 4294901760, %v8811_v27 }
 0x37b   : > { %11531 = vst [vmem:[#allocation78_spill] sm:$0xff] %v9213_v5  ;;  %v2818_v34 = vadd.f32 %v2817_v59, %v11536_v37  ;;  %v2933_v5 = vpop.f32.mrf.mxu1  ;;  %v3043_v22 = vpop.f32.mrf.mxu2  ;;  %4127 = vmatpush.msrb.mxu2 %v9210_v15  ;;  %v4344_v21 = vsub.f32 %v9208_v9, %v11016_v13  ;;  %v4349_v38 = vand.u32 4294901760, %v9229_v14  ;;  %4340 = vmatpush.msrb.mxu3 %v4339_v40 }
 0x37c   : > { %v3131_v39 = vpop.f32.mrf.mxu3  ;;  %4465 = vmatpush.msra.mxu0 %v9229_v14  ;;  %v3421_v37 = vsub.f32 %v9194_v17, %v9225_v62  ;;  %11539 = vst [vmem:[#allocation24_spill] sm:$0xff] %v9255_v33 }
 0x37d   : > { %4679 = vmatpush.msra.mxu2 %v11537_v26  ;;  %v2934_v23 = vadd.f32 %v2933_v5, %v2818_v34  ;;  %3415 = vmatmul.f32.gmra.mxu0 %v9216_v16  ;;  %v4345_v28 = vand.u32 4294901760, %v4344_v21  ;;  %v4350_v59 = vsub.f32 %v9229_v14, %v4349_v38  ;;  %v3216_v5 = vmax.f32 %v3184_v4, 0.0 }
 0x37e   : > { %3592 = vmatmul.f32.gmra.mxu1 %v9115_v7  ;;  %v2459_v34 = vadd.f32 %v8734_v55, %v2371_v0  ;;  %v11540_v21 = vand.u32 4294901760, %v8767_v3 }
 0x37f   : > { %4683 = vmatpush.msra.mxu2 %v11538_v2  ;;  %v3044_v40 = vadd.f32 %v3043_v22, %v2934_v23  ;;  %4346 = vmatpush.msrb.mxu3 %v4345_v28  ;;  %v4351_v26 = vand.u32 4294901760, %v4350_v59  ;;  %v9267_v2 = vand.u32 4294901760, %v3421_v37  ;;  %v9269_v55 = vand.u32 4294901760, %v3216_v5 }
 0x380   : > { %3722 = vmatmul.f32.gmra.mxu2 %v9194_v17  ;;  %v3186_v22 = vadd.f32 %v8633_v58, %v2459_v34  ;;  %v9274_v23 = vand.u32 4294901760, %v9255_v33  ;;  %v3157_v58 = vadd.f32 %v9265_v50, %v8807_v49  ;;  %v11547_v49 = vand.u32 4294901760, %v8891_v32 }
 0x381   : > { %v9259_v13 = vadd.f32 %v3131_v39, %v3044_v40  ;;  %3848 = vmatmul.f32.gmra.mxu3 %v9225_v62  ;;  %4687 = vmatpush.msra.mxu2 %v11540_v21  ;;  %11541 = vst [vmem:[#allocation28_spill] sm:$0xff] %v9267_v2  ;;  %v9287_v28 = vsub.f32 %v3216_v5, %v9269_v55 }
 0x382   : > { %v2822_v19 = vpop.f32.mrf.mxu0  ;;  %4352 = vmatpush.msrb.mxu3 %v4351_v26  ;;  %11542 = vst [vmem:[#allocation57_spill] sm:$0xff] %v9269_v55  ;;  %v3429_v59 = vsub.f32 %v9255_v33, %v9274_v23 }
 0x383   : > { %v2823_v0 = vadd.f32 %v2822_v19, %v8626_v36  ;;  %v2939_v4 = vpop.f32.mrf.mxu1  ;;  %v3047_v39 = vpop.f32.mrf.mxu2  ;;  %11543 = vst [vmem:[#allocation14_spill] sm:$0xff] %v9274_v23  ;;  %4691 = vmatpush.msra.mxu2 %v11544_v20  ;;  %v11545_v36 = vand.u32 4294901760, %v8853_v11  ;;  %v3189_v11 = vmax.f32 %v3157_v58, 0.0  ;;  %v9305_v19 = vand.u32 4294901760, %v9287_v28 }
 0x384   : > { %4806 = vmatpush.msra.mxu3 %v8640_v44  ;;  %v3135_v3 = vpop.f32.mrf.mxu3  ;;  %11546 = vst [vmem:[#allocation25_spill] sm:$0xff] %v9287_v28  ;;  %v3218_v44 = vmax.f32 %v3186_v22, 0.0  ;;  %v11551_v22 = vand.u32 4294901760, %v8929_v43  ;;  %v11555_v20 = vand.u32 4294901760, %v9005_v56 }
 0x385   : > { %v2940_v37 = vadd.f32 %v2939_v4, %v2823_v0  ;;  %3423 = vmatmul.f32.gmra.mxu0 %v9267_v2  ;;  %4695 = vmatpush.msra.mxu2 %v11545_v36  ;;  %11550 = vst [vmem:[#allocation46_spill] sm:$0xff] %v9305_v19  ;;  %v3159_v4 = vadd.f32 %v9265_v50, %v8849_v8  ;;  %v11556_v8 = vand.u32 4294901760, %v9045_v45 }
 0x386   : > { %4808 = vmatpush.msra.mxu3 %v8694_v24  ;;  %3596 = vmatmul.f32.gmra.mxu1 %v9165_v47  ;;  %v9299_v5 = vand.u32 4294901760, %v3218_v44 }
 0x387   : > { %v3048_v27 = vadd.f32 %v3047_v39, %v2940_v37  ;;  %4699 = vmatpush.msra.mxu2 %v11547_v49 }
 0x388   : > { %4810 = vmatpush.msra.mxu3 %v8730_v61  ;;  %3727 = vmatmul.f32.gmra.mxu2 %v9255_v33  ;;  %11548 = vst [vmem:[#allocation15_spill] sm:$0xff] %v9299_v5  ;;  %v9302_v61 = vand.u32 4294901760, %v3429_v59  ;;  %v9320_v43 = vsub.f32 %v3218_v44, %v9299_v5 }
 0x389   : > { %v9293_v24 = vadd.f32 %v3135_v3, %v3048_v27  ;;  %3854 = vmatmul.f32.gmra.mxu3 %v9274_v23  ;;  %4703 = vmatpush.msra.mxu2 %v11551_v22  ;;  %v3191_v3 = vmax.f32 %v3159_v4, 0.0  ;;  %v11560_v27 = vand.u32 4294901760, %v9082_v1 }
 0x38a   : > { %v2827_v34 = vpop.f32.mrf.mxu0  ;;  %4812 = vmatpush.msra.mxu3 %v8779_v60  ;;  %11549 = vst [vmem:[#allocation21_spill] sm:$0xff] %v9302_v61  ;;  %v11552_v60 = vand.u32 4294901760, %v8967_v35 }
 0x38b   : > { %v2828_v40 = vadd.f32 %v2827_v34, %v8663_v12  ;;  %v2945_v26 = vpop.f32.mrf.mxu1  ;;  %v3051_v21 = vpop.f32.mrf.mxu2  ;;  %v9313_v12 = vand.u32 4294901760, %v3189_v11  ;;  %11554 = vst [vmem:[#allocation48_spill] sm:$0xff] %v9320_v43  ;;  %v9352_v49 = vand.u32 4294901760, %v3191_v3  ;;  %v11563_v34 = vand.u32 4294901760, %v9160_v54 }
 0x38c   : > { %v3139_v32 = vpop.f32.mrf.mxu3  ;;  %4814 = vmatpush.msra.mxu3 %v8824_v25  ;;  %4707 = vmatpush.msra.mxu2 %v11552_v60  ;;  %v3437_v25 = vsub.f32 %v9287_v28, %v9305_v19  ;;  %v3284_v60 = vld [vmem:[%s10857_s6] sm:$0x3] }
 0x38d   : > { %v2946_v0 = vadd.f32 %v2945_v26, %v2828_v40  ;;  %3431 = vmatmul.f32.gmra.mxu0 %v9302_v61  ;;  %11553 = vst [vmem:[#allocation26_spill] sm:$0xff] %v9313_v12 }
 0x38e   : > { %3600 = vmatmul.f32.gmra.mxu1 %v9222_v10  ;;  %4816 = vmatpush.msra.mxu3 %v8865_v57  ;;  %v9334_v57 = vsub.f32 %v3189_v11, %v9313_v12  ;;  %v9338_v44 = vand.u32 4294901760, %v3437_v25  ;;  %v3161_v11 = vadd.f32 %v9265_v50, %v8887_v41  ;;  %v11564_v41 = vand.u32 4294901760, %v9191_v42  ;;  %v11571_v25 = vld [vmem:[#allocation66_spill] sm:$0xff] }
 0x38f   : > { %v3052_v39 = vadd.f32 %v3051_v21, %v2946_v0  ;;  %4711 = vmatpush.msra.mxu2 %v11555_v20  ;;  %v11567_v0 = vand.u32 4294901760, %v9208_v9  ;;  %v9398_v20 = vperm.slane %v3284_v60, 0 }
 0x390   : > { %3732 = vmatmul.f32.gmra.mxu2 %v9287_v28  ;;  %4818 = vmatpush.msra.mxu3 %v8901_v29  ;;  %11557 = vst [vmem:[#allocation34_spill] sm:$0xff] %v9334_v57  ;;  %v9341_v29 = vand.u32 4294901760, %v9320_v43  ;;  %v3193_v40 = vmax.f32 %v3161_v11, 0.0  ;;  %v11576_v11 = vld [vmem:[#allocation85_spill] sm:$0xff] }
 0x391   : > { %v9328_v35 = vadd.f32 %v3139_v32, %v3052_v39  ;;  %3860 = vmatmul.f32.gmra.mxu3 %v9305_v19  ;;  %4715 = vmatpush.msra.mxu2 %v11556_v8  ;;  %11558 = vst [vmem:[#allocation27_spill] sm:$0xff] %v9338_v44 }
 0x392   : > { %v2832_v37 = vpop.f32.mrf.mxu0  ;;  %4820 = vmatpush.msra.mxu3 %v8939_v53  ;;  %11559 = vst [vmem:[#allocation69_spill] sm:$0xff] %v9341_v29  ;;  %v11561_v53 = vand.u32 4294901760, %v9121_v63 }
 0x393   : > { %v2833_v56 = vadd.f32 %v2832_v37, %v8704_v30  ;;  %v2951_v58 = vpop.f32.mrf.mxu1  ;;  %v3055_v36 = vpop.f32.mrf.mxu2  ;;  %4719 = vmatpush.msra.mxu2 %v11560_v27  ;;  %v9350_v30 = vand.u32 4294901760, %v9334_v57 }
 0x394   : > { %v3143_v45 = vpop.f32.mrf.mxu3  ;;  %4822 = vmatpush.msra.mxu3 %v8978_v52  ;;  %v3445_v52 = vsub.f32 %v9320_v43, %v9341_v29 }
 0x395   : > { %v2952_v59 = vadd.f32 %v2951_v58, %v2833_v56  ;;  %3439 = vmatmul.f32.gmra.mxu0 %v9338_v44  ;;  %4723 = vmatpush.msra.mxu2 %v11561_v53  ;;  %11562 = vst [vmem:[#allocation12_spill] sm:$0xff] %v9350_v30  ;;  %v4131_v54 = vsub.f32 %v9334_v57, %v9350_v30 }
 0x396   : > { %3604 = vmatmul.f32.gmra.mxu1 %v9269_v55  ;;  %4824 = vmatpush.msra.mxu3 %v9017_v46  ;;  %v9370_v46 = vsub.f32 %v3191_v3, %v9352_v49  ;;  %v9376_v32 = vand.u32 4294901760, %v3445_v52 }
 0x397   : > { %v3056_v1 = vadd.f32 %v3055_v36, %v2952_v59  ;;  %4727 = vmatpush.msra.mxu2 %v11563_v34  ;;  %v9392_v9 = vand.u32 4294901760, %v4131_v54  ;;  %v11574_v59 = vld [vmem:[#allocation17_spill] sm:$0xff] }
 0x398   : > { %3737 = vmatmul.f32.gmra.mxu2 %v9320_v43  ;;  %4826 = vmatpush.msra.mxu3 %v9055_v18  ;;  %11565 = vst [vmem:[#allocation35_spill] sm:$0xff] %v9370_v46  ;;  %v9395_v39 = vand.u32 4294901760, %v9370_v46 }
 0x399   : > { %v9364_v63 = vadd.f32 %v3143_v45, %v3056_v1  ;;  %3866 = vmatmul.f32.gmra.mxu3 %v9341_v29  ;;  %4731 = vmatpush.msra.mxu2 %v11564_v41  ;;  %11566 = vst [vmem:[#allocation30_spill] sm:$0xff] %v9376_v32  ;;  %v3165_v1 = vadd.f32 %v9265_v50, %v11576_v11 }
 0x39a   : > { %v2837_v26 = vpop.f32.mrf.mxu0  ;;  %4828 = vmatpush.msra.mxu3 %v9091_v6  ;;  %v3163_v6 = vadd.f32 %v9265_v50, %v8925_v51  ;;  %11569 = vst [vmem:[#allocation16_spill] sm:$0xff] %v9392_v9  ;;  %v4139_v37 = vsub.f32 %v9370_v46, %v9395_v39 }
 0x39b   : > { %v2838_v21 = vadd.f32 %v2837_v26, %v8754_v48  ;;  %v2957_v18 = vpop.f32.mrf.mxu1  ;;  %v3059_v22 = vpop.f32.mrf.mxu2  ;;  %4735 = vmatpush.msra.mxu2 %v11567_v0  ;;  %v9387_v48 = vand.u32 4294901760, %v3193_v40  ;;  %11570 = vst [vmem:[#allocation88_spill] sm:$0xff] %v9395_v39  ;;  %v3197_v26 = vmax.f32 %v3165_v1, 0.0 }
 0x39c   : > { %v3147_v42 = vpop.f32.mrf.mxu3  ;;  %4830 = vmatpush.msra.mxu3 %v9129_v31  ;;  %v3195_v8 = vmax.f32 %v3163_v6, 0.0  ;;  %v9418_v52 = vand.u32 4294901760, %v4139_v37 }
 0x39d   : > { %v2958_v4 = vadd.f32 %v2957_v18, %v2838_v21  ;;  %3447 = vmatmul.f32.gmra.mxu0 %v9376_v32  ;;  %4739 = vmatpush.msra.mxu2 %v4349_v38  ;;  %11568 = vst [vmem:[#allocation61_spill] sm:$0xff] %v9387_v48  ;;  %v11572_v38 = vld [vmem:[#allocation9_spill] sm:$0xff]  ;;  %v9406_v51 = vsub.f32 %v3193_v40, %v9387_v48  ;;  %v9434_v6 = vand.u32 4294901760, %v3197_v26 }
 0x39e   : > { %3608 = vmatmul.f32.gmra.mxu1 %v9299_v5  ;;  %4832 = vmatpush.msra.mxu3 %v11571_v25  ;;  %v9413_v53 = vand.u32 4294901760, %v3195_v8  ;;  %11577 = vst [vmem:[#allocation85_spill] sm:$0xff] %v9418_v52  ;;  %v11582_v25 = vld [vmem:[#allocation83_spill] sm:$0xff] }
 0x39f   : > { %v3060_v31 = vadd.f32 %v3059_v22, %v2958_v4  ;;  %11573 = vst [vmem:[#allocation66_spill] sm:$0xff] %v9406_v51  ;;  %v9421_v34 = vand.u32 4294901760, %v9406_v51  ;;  %v11580_v4 = vld [vmem:[#allocation18_spill] sm:$0xff] }
 0x3a0   : > { %4133 = vmatmul.f32.vlgmr.msrb.gmra.mxu2 %v9392_v9  ;;  %4834 = vmatpush.msra.mxu3 %v11572_v38  ;;  %11575 = vst [vmem:[#allocation9_spill] sm:$0xff] %v9413_v53  ;;  %v9428_v40 = vsub.f32 %v3195_v8, %v9413_v53 }
 0x3a1   : > { %v9402_v14 = vadd.f32 %v3147_v42, %v3060_v31  ;;  %4354 = vmatmul.f32.vlgmr.msrb.gmra.mxu3 %v9313_v12  ;;  %11578 = vst [vmem:[#allocation89_spill] sm:$0xff] %v9421_v34  ;;  %v4147_v21 = vsub.f32 %v9406_v51, %v9421_v34  ;;  %v3167_v31 = vadd.f32 %v9265_v50, %v11582_v25 }
 0x3a2   : > { %v3328_v3 = vpop.f32.mrf.mxu0  ;;  %4836 = vmatpush.msra.mxu3 %v9210_v15  ;;  %11579 = vst [vmem:[#allocation90_spill] sm:$0xff] %v9428_v40  ;;  %v9442_v8 = vand.u32 4294901760, %v9428_v40 }
 0x3a3   : > { %v3329_v56 = vadd.f32 %v3328_v3, %v9398_v20  ;;  %v3549_v58 = vpop.f32.mrf.mxu1  ;;  %v3663_v36 = vpop.f32.mrf.mxu2  ;;  %11581 = vst [vmem:[#allocation91_spill] sm:$0xff] %v9434_v6  ;;  %v9439_v38 = vand.u32 4294901760, %v4147_v21  ;;  %v11586_v21 = vld [vmem:[#allocation47_spill] sm:$0xff] }
 0x3a4   : > { %v3777_v27 = vpop.f32.mrf.mxu3  ;;  %11584 = vst [vmem:[#allocation92_spill] sm:$0xff] %v9442_v8 }
 0x3a5   : > { %v3550_v45 = vadd.f32 %v3549_v58, %v3329_v56  ;;  %3935 = vmatmul.f32.vlgmr.msrb.gmra.mxu0 %v11574_v59  ;;  %11583 = vst [vmem:[#allocation83_spill] sm:$0xff] %v9439_v38  ;;  %v9449_v56 = vsub.f32 %v3197_v26, %v9434_v6  ;;  %v3199_v58 = vmax.f32 %v3167_v31, 0.0 }
 0x3a6   : > { %4032 = vmatmul.f32.vlgmr.msrb.gmra.mxu1 %v11574_v59 }
 0x3a7   : > { %v3664_v15 = vadd.f32 %v3663_v36, %v3550_v45  ;;  %11585 = vst [vmem:[#allocation93_spill] sm:$0xff] %v9449_v56 }
 0x3a8   : > { %4141 = vmatmul.f32.gmra.mxu2 %v9418_v52 }
 0x3a9   : > { %v9424_v41 = vadd.f32 %v3777_v27, %v3664_v15  ;;  %4358 = vmatmul.f32.gmra.mxu3 %v9352_v49  ;;  %v4155_v27 = vsub.f32 %v9428_v40, %v9442_v8 }
 0x3aa   : > { %v3336_v54 = vpop.f32.mrf.mxu0 }
 0x3ab   : > { %v3337_v18 = vadd.f32 %v3336_v54, %v9398_v20  ;;  %v3553_v22 = vpop.f32.mrf.mxu1  ;;  %v3668_v0 = vpop.f32.mrf.mxu2  ;;  %v9460_v26 = vand.u32 4294901760, %v4155_v27 }
 0x3ac   : > { %v3783_v42 = vpop.f32.mrf.mxu3 }
 0x3ad   : > { %v3554_v60 = vadd.f32 %v3553_v22, %v3337_v18  ;;  %3939 = vmatmul.f32.gmra.mxu0 %v11580_v4  ;;  %v9455_v18 = vand.u32 4294901760, %v3199_v58  ;;  %v11588_v22 = vld [vmem:[#allocation37_spill] sm:$0xff] }
 0x3ae   : > { %4036 = vmatmul.f32.gmra.mxu1 %v11580_v4  ;;  %11589 = vst [vmem:[#allocation37_spill] sm:$0xff] %v9460_v26 }
 0x3af   : > { %v3669_v3 = vadd.f32 %v3668_v0, %v3554_v60  ;;  %11587 = vst [vmem:[#allocation94_spill] sm:$0xff] %v9455_v18  ;;  %v3169_v0 = vadd.f32 %v9265_v50, %v11588_v22  ;;  %v9470_v31 = vsub.f32 %v3199_v58, %v9455_v18 }
 0x3b0   : > { %4149 = vmatmul.f32.gmra.mxu2 %v9439_v38 }
 0x3b1   : > { %v9445_v37 = vadd.f32 %v3783_v42, %v3669_v3  ;;  %4362 = vmatmul.f32.gmra.mxu3 %v9387_v48  ;;  %v9463_v42 = vand.u32 4294901760, %v9449_v56  ;;  %11591 = vst [vmem:[#allocation96_spill] sm:$0xff] %v9470_v31  ;;  %v3201_v3 = vmax.f32 %v3169_v0, 0.0  ;;  %v9484_v0 = vand.u32 4294901760, %v9470_v31 }
 0x3b2   : > { %v3344_v36 = vpop.f32.mrf.mxu0 }
 0x3b3   : > { %v3345_v45 = vadd.f32 %v3344_v36, %v9398_v20  ;;  %v3557_v11 = vpop.f32.mrf.mxu1  ;;  %v3673_v1 = vpop.f32.mrf.mxu2  ;;  %11590 = vst [vmem:[#allocation95_spill] sm:$0xff] %v9463_v42 }
 0x3b4   : > { %v3789_v15 = vpop.f32.mrf.mxu3  ;;  %11596 = vst [vmem:[#allocation98_spill] sm:$0xff] %v9484_v0 }
 0x3b5   : > { %v3558_v54 = vadd.f32 %v3557_v11, %v3345_v45  ;;  %3943 = vmatmul.f32.gmra.mxu0 %v11586_v21  ;;  %v4163_v45 = vsub.f32 %v9449_v56, %v9463_v42 }
 0x3b6   : > { %4040 = vmatmul.f32.gmra.mxu1 %v11586_v21 }
 0x3b7   : > { %v3674_v60 = vadd.f32 %v3673_v1, %v3558_v54  ;;  %v11592_v54 = vld [vmem:[#allocation53_spill] sm:$0xff]  ;;  %v9481_v58 = vand.u32 4294901760, %v4163_v45 }
 0x3b8   : > { %4157 = vmatmul.f32.gmra.mxu2 %v9460_v26 }
 0x3b9   : > { %v9466_v25 = vadd.f32 %v3789_v15, %v3674_v60  ;;  %4366 = vmatmul.f32.gmra.mxu3 %v9413_v53  ;;  %v9476_v15 = vand.u32 4294901760, %v3201_v3  ;;  %v11594_v60 = vld [vmem:[#allocation23_spill] sm:$0xff] }
 0x3ba   : > { %v3352_v36 = vpop.f32.mrf.mxu0  ;;  %v3171_v26 = vadd.f32 %v9265_v50, %v11594_v60  ;;  %11595 = vst [vmem:[#allocation23_spill] sm:$0xff] %v9481_v58  ;;  %v4171_v60 = vsub.f32 %v9470_v31, %v9484_v0 }
 0x3bb   : > { %v3353_v27 = vadd.f32 %v3352_v36, %v9398_v20  ;;  %v3561_v11 = vpop.f32.mrf.mxu1  ;;  %v3678_v22 = vpop.f32.mrf.mxu2  ;;  %11593 = vst [vmem:[#allocation97_spill] sm:$0xff] %v9476_v15 }
 0x3bc   : > { %v3795_v38 = vpop.f32.mrf.mxu3 }
 0x3bd   : > { %v3562_v1 = vadd.f32 %v3561_v11, %v3353_v27  ;;  %3947 = vmatmul.f32.gmra.mxu0 %v11592_v54  ;;  %v9491_v27 = vsub.f32 %v3201_v3, %v9476_v15  ;;  %v3203_v11 = vmax.f32 %v3171_v26, 0.0  ;;  %v9502_v26 = vand.u32 4294901760, %v4171_v60 }
 0x3be   : > { %4044 = vmatmul.f32.gmra.mxu1 %v11592_v54 }
 0x3bf   : > { %v3679_v52 = vadd.f32 %v3678_v22, %v3562_v1  ;;  %11597 = vst [vmem:[#allocation99_spill] sm:$0xff] %v9491_v27  ;;  %v11598_v1 = vld [vmem:[#allocation60_spill] sm:$0xff]  ;;  %v9505_v3 = vand.u32 4294901760, %v9491_v27 }
 0x3c0   : > { %4165 = vmatmul.f32.gmra.mxu2 %v9481_v58 }
 0x3c1   : > { %v9487_v36 = vadd.f32 %v3795_v38, %v3679_v52  ;;  %4370 = vmatmul.f32.gmra.mxu3 %v9434_v6  ;;  %v9497_v52 = vand.u32 4294901760, %v3203_v11  ;;  %v11600_v38 = vld [vmem:[#allocation71_spill] sm:$0xff]  ;;  %11602 = vst [vmem:[#allocation101_spill] sm:$0xff] %v9505_v3 }
 0x3c2   : > { %v3360_v9 = vpop.f32.mrf.mxu0  ;;  %v3173_v58 = vadd.f32 %v9265_v50, %v11600_v38  ;;  %11601 = vst [vmem:[#allocation71_spill] sm:$0xff] %v9502_v26  ;;  %v4179_v38 = vsub.f32 %v9491_v27, %v9505_v3 }
 0x3c3   : > { %v3361_v45 = vadd.f32 %v3360_v9, %v9398_v20  ;;  %v3565_v32 = vpop.f32.mrf.mxu1  ;;  %v3683_v29 = vpop.f32.mrf.mxu2  ;;  %11599 = vst [vmem:[#allocation100_spill] sm:$0xff] %v9497_v52 }
 0x3c4   : > { %v3801_v43 = vpop.f32.mrf.mxu3 }
 0x3c5   : > { %v3566_v22 = vadd.f32 %v3565_v32, %v3361_v45  ;;  %3951 = vmatmul.f32.gmra.mxu0 %v11598_v1  ;;  %v9512_v32 = vsub.f32 %v3203_v11, %v9497_v52  ;;  %v3205_v45 = vmax.f32 %v3173_v58, 0.0  ;;  %v9523_v58 = vand.u32 4294901760, %v4179_v38 }
 0x3c6   : > { %4048 = vmatmul.f32.gmra.mxu1 %v11598_v1 }
 0x3c7   : > { %v3684_v44 = vadd.f32 %v3683_v29, %v3566_v22  ;;  %11603 = vst [vmem:[#allocation102_spill] sm:$0xff] %v9512_v32  ;;  %v11604_v22 = vld [vmem:[#allocation65_spill] sm:$0xff]  ;;  %v9526_v11 = vand.u32 4294901760, %v9512_v32 }
 0x3c8   : > { %4173 = vmatmul.f32.gmra.mxu2 %v9502_v26 }
 0x3c9   : > { %v9508_v9 = vadd.f32 %v3801_v43, %v3684_v44  ;;  %4374 = vmatmul.f32.gmra.mxu3 %v9455_v18  ;;  %v9518_v43 = vand.u32 4294901760, %v3205_v45  ;;  %v11606_v44 = vld [vmem:[#allocation41_spill] sm:$0xff]  ;;  %11608 = vst [vmem:[#allocation104_spill] sm:$0xff] %v9526_v11 }
 0x3ca   : > { %v3368_v19 = vpop.f32.mrf.mxu0  ;;  %v3175_v26 = vadd.f32 %v9265_v50, %v11606_v44  ;;  %11607 = vst [vmem:[#allocation41_spill] sm:$0xff] %v9523_v58  ;;  %v4187_v44 = vsub.f32 %v9512_v32, %v9526_v11 }
 0x3cb   : > { %v3369_v60 = vadd.f32 %v3368_v19, %v9398_v20  ;;  %v3569_v28 = vpop.f32.mrf.mxu1  ;;  %v3688_v61 = vpop.f32.mrf.mxu2  ;;  %11605 = vst [vmem:[#allocation103_spill] sm:$0xff] %v9518_v43 }
 0x3cc   : > { %v3807_v23 = vpop.f32.mrf.mxu3 }
 0x3cd   : > { %v3570_v29 = vadd.f32 %v3569_v28, %v3369_v60  ;;  %3955 = vmatmul.f32.gmra.mxu0 %v11604_v22  ;;  %v9533_v28 = vsub.f32 %v3205_v45, %v9518_v43  ;;  %v3207_v60 = vmax.f32 %v3175_v26, 0.0  ;;  %v9544_v26 = vand.u32 4294901760, %v4187_v44 }
 0x3ce   : > { %4052 = vmatmul.f32.gmra.mxu1 %v11604_v22 }
 0x3cf   : > { %v3689_v33 = vadd.f32 %v3688_v61, %v3570_v29  ;;  %11609 = vst [vmem:[#allocation105_spill] sm:$0xff] %v9533_v28  ;;  %v11610_v29 = vld [vmem:[#allocation70_spill] sm:$0xff]  ;;  %v9547_v45 = vand.u32 4294901760, %v9533_v28 }
 0x3d0   : > { %4181 = vmatmul.f32.gmra.mxu2 %v9523_v58 }
 0x3d1   : > { %v9529_v19 = vadd.f32 %v3807_v23, %v3689_v33  ;;  %4378 = vmatmul.f32.gmra.mxu3 %v9476_v15  ;;  %v9539_v33 = vand.u32 4294901760, %v3207_v60  ;;  %v11612_v23 = vld [vmem:[#allocation78_spill] sm:$0xff]  ;;  %11614 = vst [vmem:[#allocation107_spill] sm:$0xff] %v9547_v45 }
 0x3d2   : > { %v3376_v2 = vpop.f32.mrf.mxu0  ;;  %v3177_v58 = vadd.f32 %v9265_v50, %v11612_v23  ;;  %11613 = vst [vmem:[#allocation78_spill] sm:$0xff] %v9544_v26  ;;  %v4195_v23 = vsub.f32 %v9533_v28, %v9547_v45 }
 0x3d3   : > { %v3377_v38 = vadd.f32 %v3376_v2, %v9398_v20  ;;  %v3573_v62 = vpop.f32.mrf.mxu1  ;;  %v3693_v17 = vpop.f32.mrf.mxu2  ;;  %11611 = vst [vmem:[#allocation106_spill] sm:$0xff] %v9539_v33 }
 0x3d4   : > { %v3813_v16 = vpop.f32.mrf.mxu3 }
 0x3d5   : > { %v3574_v61 = vadd.f32 %v3573_v62, %v3377_v38  ;;  %3959 = vmatmul.f32.gmra.mxu0 %v11610_v29  ;;  %v9554_v62 = vsub.f32 %v3207_v60, %v9539_v33  ;;  %v3209_v38 = vmax.f32 %v3177_v58, 0.0  ;;  %v9565_v58 = vand.u32 4294901760, %v4195_v23 }
 0x3d6   : > { %4056 = vmatmul.f32.gmra.mxu1 %v11610_v29 }
 0x3d7   : > { %v3694_v22 = vadd.f32 %v3693_v17, %v3574_v61  ;;  %11615 = vst [vmem:[#allocation108_spill] sm:$0xff] %v9554_v62  ;;  %v11616_v61 = vld [vmem:[#allocation76_spill] sm:$0xff]  ;;  %v9568_v60 = vand.u32 4294901760, %v9554_v62 }
 0x3d8   : > { %4189 = vmatmul.f32.gmra.mxu2 %v9544_v26  ;;  %11618 = vst [vmem:[#allocation110_spill] sm:$0xff] %v9565_v58 }
 0x3d9   : > { %v9550_v2 = vadd.f32 %v3813_v16, %v3694_v22  ;;  %4382 = vmatmul.f32.gmra.mxu3 %v9497_v52  ;;  %v9560_v16 = vand.u32 4294901760, %v3209_v38  ;;  %v3179_v22 = vadd.f32 %v9265_v50, %v9259_v13  ;;  %11619 = vst [vmem:[#allocation111_spill] sm:$0xff] %v9568_v60  ;;  %v4203_v13 = vsub.f32 %v9554_v62, %v9568_v60 }
 0x3da   : > { %v3384_v1 = vpop.f32.mrf.mxu0 }
 0x3db   : > { %v3385_v44 = vadd.f32 %v3384_v1, %v9398_v20  ;;  %v3577_v29 = vpop.f32.mrf.mxu1  ;;  %v3698_v54 = vpop.f32.mrf.mxu2  ;;  %11617 = vst [vmem:[#allocation109_spill] sm:$0xff] %v9560_v16 }
 0x3dc   : > { %v3819_v21 = vpop.f32.mrf.mxu3 }
 0x3dd   : > { %v3578_v17 = vadd.f32 %v3577_v29, %v3385_v44  ;;  %3963 = vmatmul.f32.gmra.mxu0 %v11616_v61  ;;  %v9575_v29 = vsub.f32 %v3209_v38, %v9560_v16  ;;  %v3211_v44 = vmax.f32 %v3179_v22, 0.0  ;;  %v9586_v38 = vand.u32 4294901760, %v4203_v13 }
 0x3de   : > { %4060 = vmatmul.f32.gmra.mxu1 %v11616_v61 }
 0x3df   : > { %v3699_v26 = vadd.f32 %v3698_v54, %v3578_v17  ;;  %11620 = vst [vmem:[#allocation112_spill] sm:$0xff] %v9575_v29  ;;  %v11621_v17 = vld [vmem:[#allocation84_spill] sm:$0xff]  ;;  %v9589_v22 = vand.u32 4294901760, %v9575_v29 }
 0x3e0   : > { %4197 = vmatmul.f32.gmra.mxu2 %v9565_v58  ;;  %11623 = vst [vmem:[#allocation114_spill] sm:$0xff] %v9586_v38 }
 0x3e1   : > { %v9571_v1 = vadd.f32 %v3819_v21, %v3699_v26  ;;  %4386 = vmatmul.f32.gmra.mxu3 %v9518_v43  ;;  %v9581_v21 = vand.u32 4294901760, %v3211_v44  ;;  %v3181_v26 = vadd.f32 %v9265_v50, %v9293_v24  ;;  %11624 = vst [vmem:[#allocation115_spill] sm:$0xff] %v9589_v22  ;;  %v4211_v24 = vsub.f32 %v9575_v29, %v9589_v22 }
 0x3e2   : > { %v3392_v4 = vpop.f32.mrf.mxu0 }
 0x3e3   : > { %v3393_v23 = vadd.f32 %v3392_v4, %v9398_v20  ;;  %v3581_v61 = vpop.f32.mrf.mxu1  ;;  %v3703_v59 = vpop.f32.mrf.mxu2  ;;  %11622 = vst [vmem:[#allocation113_spill] sm:$0xff] %v9581_v21 }
 0x3e4   : > { %v3825_v45 = vpop.f32.mrf.mxu3 }
 0x3e5   : > { %v3582_v54 = vadd.f32 %v3581_v61, %v3393_v23  ;;  %3967 = vmatmul.f32.gmra.mxu0 %v11621_v17  ;;  %v9596_v61 = vsub.f32 %v3211_v44, %v9581_v21  ;;  %v3213_v23 = vmax.f32 %v3181_v26, 0.0  ;;  %v9607_v44 = vand.u32 4294901760, %v4211_v24 }
 0x3e6   : > { %4064 = vmatmul.f32.gmra.mxu1 %v11621_v17 }
 0x3e7   : > { %v3704_v58 = vadd.f32 %v3703_v59, %v3582_v54  ;;  %11625 = vst [vmem:[#allocation116_spill] sm:$0xff] %v9596_v61  ;;  %v11626_v54 = vld [vmem:[#allocation45_spill] sm:$0xff]  ;;  %v9610_v26 = vand.u32 4294901760, %v9596_v61 }
 0x3e8   : > { %4205 = vmatmul.f32.gmra.mxu2 %v9586_v38  ;;  %11628 = vst [vmem:[#allocation118_spill] sm:$0xff] %v9607_v44 }
 0x3e9   : > { %v9592_v4 = vadd.f32 %v3825_v45, %v3704_v58  ;;  %4390 = vmatmul.f32.gmra.mxu3 %v9539_v33  ;;  %v9602_v45 = vand.u32 4294901760, %v3213_v23  ;;  %v3183_v58 = vadd.f32 %v9265_v50, %v9328_v35  ;;  %11629 = vst [vmem:[#allocation119_spill] sm:$0xff] %v9610_v26  ;;  %v4219_v35 = vsub.f32 %v9596_v61, %v9610_v26 }
 0x3ea   : > { %v3400_v60 = vpop.f32.mrf.mxu0 }
 0x3eb   : > { %v3401_v13 = vadd.f32 %v3400_v60, %v9398_v20  ;;  %v3585_v17 = vpop.f32.mrf.mxu1  ;;  %v3708_v62 = vpop.f32.mrf.mxu2  ;;  %11627 = vst [vmem:[#allocation117_spill] sm:$0xff] %v9602_v45 }
 0x3ec   : > { %v3831_v28 = vpop.f32.mrf.mxu3 }
 0x3ed   : > { %v3586_v59 = vadd.f32 %v3585_v17, %v3401_v13  ;;  %3971 = vmatmul.f32.gmra.mxu0 %v11626_v54  ;;  %v9617_v17 = vsub.f32 %v3213_v23, %v9602_v45  ;;  %v3215_v13 = vmax.f32 %v3183_v58, 0.0  ;;  %v9628_v23 = vand.u32 4294901760, %v4219_v35 }
 0x3ee   : > { %4068 = vmatmul.f32.gmra.mxu1 %v11626_v54 }
 0x3ef   : > { %v3709_v38 = vadd.f32 %v3708_v62, %v3586_v59  ;;  %11630 = vst [vmem:[#allocation120_spill] sm:$0xff] %v9617_v17  ;;  %v11631_v59 = vld [vmem:[#allocation38_spill] sm:$0xff]  ;;  %v9631_v58 = vand.u32 4294901760, %v9617_v17 }
 0x3f0   : > { %4213 = vmatmul.f32.gmra.mxu2 %v9607_v44  ;;  %11632 = vst [vmem:[#allocation121_spill] sm:$0xff] %v9628_v23 }
 0x3f1   : > { %v9613_v60 = vadd.f32 %v3831_v28, %v3709_v38  ;;  %4394 = vmatmul.f32.gmra.mxu3 %v9560_v16  ;;  %v9623_v28 = vand.u32 4294901760, %v3215_v13  ;;  %v3185_v38 = vadd.f32 %v9265_v50, %v9364_v63  ;;  %11633 = vst [vmem:[#allocation122_spill] sm:$0xff] %v9631_v58  ;;  %v4227_v63 = vsub.f32 %v9617_v17, %v9631_v58 }
 0x3f2   : > { %v3408_v22 = vpop.f32.mrf.mxu0 }
 0x3f3   : > { %v3409_v24 = vadd.f32 %v3408_v22, %v9398_v20  ;;  %v3589_v54 = vpop.f32.mrf.mxu1  ;;  %v3713_v29 = vpop.f32.mrf.mxu2 }
 0x3f4   : > { %v3837_v33 = vpop.f32.mrf.mxu3 }
 0x3f5   : > { %v3590_v62 = vadd.f32 %v3589_v54, %v3409_v24  ;;  %3975 = vmatmul.f32.gmra.mxu0 %v11631_v59  ;;  %v9638_v54 = vsub.f32 %v3215_v13, %v9623_v28  ;;  %v3217_v24 = vmax.f32 %v3185_v38, 0.0  ;;  %v9649_v13 = vand.u32 4294901760, %v4227_v63 }
 0x3f6   : > { %4072 = vmatmul.f32.gmra.mxu1 %v11631_v59 }
 0x3f7   : > { %v3714_v44 = vadd.f32 %v3713_v29, %v3590_v62  ;;  %11634 = vst [vmem:[#allocation123_spill] sm:$0xff] %v9638_v54  ;;  %v9652_v62 = vand.u32 4294901760, %v9638_v54 }
 0x3f8   : > { %4221 = vmatmul.f32.gmra.mxu2 %v9628_v23  ;;  %11636 = vst [vmem:[#allocation125_spill] sm:$0xff] %v9649_v13 }
 0x3f9   : > { %v9634_v22 = vadd.f32 %v3837_v33, %v3714_v44  ;;  %4398 = vmatmul.f32.gmra.mxu3 %v9581_v21  ;;  %v9644_v33 = vand.u32 4294901760, %v3217_v24  ;;  %v3187_v44 = vadd.f32 %v9265_v50, %v9402_v14  ;;  %11637 = vst [vmem:[#allocation126_spill] sm:$0xff] %v9652_v62  ;;  %v4235_v50 = vsub.f32 %v9638_v54, %v9652_v62  ;;  %v3249_v62 = vld [vmem:[%s10856_s5 + $0xe8] sm:$0xff] }
 0x3fa   : > { %v3416_v26 = vpop.f32.mrf.mxu0 }
 0x3fb   : > { %v3417_v35 = vadd.f32 %v3416_v26, %v9398_v20  ;;  %v3593_v59 = vpop.f32.mrf.mxu1  ;;  %v3718_v61 = vpop.f32.mrf.mxu2  ;;  %11635 = vst [vmem:[#allocation124_spill] sm:$0xff] %v9644_v33 }
 0x3fc   : > { %v3843_v16 = vpop.f32.mrf.mxu3 }
 0x3fd   : > { %v3594_v29 = vadd.f32 %v3593_v59, %v3417_v35  ;;  %3979 = vmatmul.f32.gmra.mxu0 %v9115_v7  ;;  %v9659_v59 = vsub.f32 %v3217_v24, %v9644_v33  ;;  %v3219_v35 = vmax.f32 %v3187_v44, 0.0 }
 0x3fe   : > { %4076 = vmatmul.f32.gmra.mxu1 %v9115_v7 }
 0x3ff   : > { %v3719_v38 = vadd.f32 %v3718_v61, %v3594_v29  ;;  %11638 = vst [vmem:[#allocation127_spill] sm:$0xff] %v9659_v59  ;;  %v9668_v29 = vand.u32 4294901760, %v4235_v50  ;;  %v9671_v24 = vand.u32 4294901760, %v9659_v59 }
 0x400   : > { %4229 = vmatmul.f32.gmra.mxu2 %v9649_v13 }
 0x401   : > { %v9655_v26 = vadd.f32 %v3843_v16, %v3719_v38  ;;  %4402 = vmatmul.f32.gmra.mxu3 %v9602_v45  ;;  %v9665_v16 = vand.u32 4294901760, %v3219_v35  ;;  %11640 = vst [vmem:[#allocation129_spill] sm:$0xff] %v9668_v29  ;;  %v4243_v13 = vsub.f32 %v9659_v59, %v9671_v24 }
 0x402   : > { %v3424_v23 = vpop.f32.mrf.mxu0  ;;  %11641 = vst [vmem:[#allocation130_spill] sm:$0xff] %v9671_v24 }
 0x403   : > { %v3425_v14 = vadd.f32 %v3424_v23, %v9398_v20  ;;  %v3597_v63 = vpop.f32.mrf.mxu1  ;;  %v3723_v7 = vpop.f32.mrf.mxu2  ;;  %11639 = vst [vmem:[#allocation128_spill] sm:$0xff] %v9665_v16  ;;  %v3251_v23 = vld [vmem:[%s10856_s5 + $0xf8] sm:$0xff] }
 0x404   : > { %v3849_v58 = vpop.f32.mrf.mxu3  ;;  %v9677_v38 = vand.u32 4294901760, %v3251_v23 }
 0x405   : > { %v3598_v61 = vadd.f32 %v3597_v63, %v3425_v14  ;;  %3983 = vmatmul.f32.gmra.mxu0 %v9165_v47  ;;  %v9683_v63 = vsub.f32 %v3219_v35, %v9665_v16 }
 0x406   : > { %4080 = vmatmul.f32.gmra.mxu1 %v9165_v47  ;;  %4903 = vmatpush.msrb.mxu0 %v9677_v38 }
 0x407   : > { %v3724_v44 = vadd.f32 %v3723_v7, %v3598_v61  ;;  %11642 = vst [vmem:[#allocation131_spill] sm:$0xff] %v9683_v63  ;;  %v9688_v7 = vsub.f32 %v3251_v23, %v9677_v38  ;;  %5354 = vmatpush.msrb.mxu3 %v9677_v38  ;;  %v9697_v23 = vand.u32 4294901760, %v4243_v13  ;;  %v9700_v24 = vand.u32 4294901760, %v9683_v63 }
 0x408   : > { %4237 = vmatmul.f32.gmra.mxu2 %v9668_v29 }
 0x409   : > { %v9679_v14 = vadd.f32 %v3849_v58, %v3724_v44  ;;  %4406 = vmatmul.f32.gmra.mxu3 %v9623_v28  ;;  %5226 = vmatpush.msrb.mxu2 %v9688_v7  ;;  %v11091_v35 = vand.u32 4294901760, %v9688_v7  ;;  %11643 = vst [vmem:[#allocation132_spill] sm:$0xff] %v9697_v23  ;;  %v4251_v54 = vsub.f32 %v9683_v63, %v9700_v24 }
 0x40a   : > { %v3432_v50 = vpop.f32.mrf.mxu0  ;;  %11644 = vst [vmem:[#allocation133_spill] sm:$0xff] %v9700_v24  ;;  %v3247_v24 = vld [vmem:[%s10856_s5 + $0xd8] sm:$0xff] }
 0x40b   : > { %v3433_v61 = vadd.f32 %v3432_v50, %v9398_v20  ;;  %v3601_v58 = vpop.f32.mrf.mxu1  ;;  %v3728_v44 = vpop.f32.mrf.mxu2  ;;  %v5066_v50 = vsub.f32 %v9688_v7, %v11091_v35 }
 0x40c   : > { %v3855_v29 = vpop.f32.mrf.mxu3 }
 0x40d   : > { %v3602_v47 = vadd.f32 %v3601_v58, %v3433_v61  ;;  %3987 = vmatmul.f32.gmra.mxu0 %v9222_v10  ;;  %v5067_v61 = vand.u32 4294901760, %v5066_v50  ;;  %v9709_v58 = vand.u32 4294901760, %v3249_v62 }
 0x40e   : > { %4084 = vmatmul.f32.gmra.mxu1 %v9222_v10 }
 0x40f   : > { %v3729_v59 = vadd.f32 %v3728_v44, %v3602_v47  ;;  %5068 = vmatpush.msrb.mxu1 %v5067_v61  ;;  %v9717_v47 = vsub.f32 %v3249_v62, %v9709_v58  ;;  %4905 = vmatpush.msrb.mxu0 %v9709_v58  ;;  %v9726_v62 = vand.u32 4294901760, %v4251_v54 }
 0x410   : > { %4245 = vmatmul.f32.gmra.mxu2 %v9697_v23  ;;  %5356 = vmatpush.msrb.mxu3 %v9709_v58 }
 0x411   : > { %v9711_v10 = vadd.f32 %v3855_v29, %v3729_v59  ;;  %4410 = vmatmul.f32.gmra.mxu3 %v9644_v33  ;;  %5229 = vmatpush.msrb.mxu2 %v9717_v47  ;;  %v11099_v29 = vand.u32 4294901760, %v9717_v47  ;;  %11645 = vst [vmem:[#allocation134_spill] sm:$0xff] %v9726_v62  ;;  %v9735_v33 = vand.u32 4294901760, %v3247_v24 }
 0x412   : > { %v3440_v13 = vpop.f32.mrf.mxu0 }
 0x413   : > { %v3441_v44 = vadd.f32 %v3440_v13, %v9398_v20  ;;  %v3605_v35 = vpop.f32.mrf.mxu1  ;;  %v3733_v50 = vpop.f32.mrf.mxu2  ;;  %v5072_v61 = vsub.f32 %v9717_v47, %v11099_v29  ;;  %4907 = vmatpush.msrb.mxu0 %v9735_v33  ;;  %5358 = vmatpush.msrb.mxu3 %v9735_v33 }
 0x414   : > { %v3861_v59 = vpop.f32.mrf.mxu3 }
 0x415   : > { %v3606_v23 = vadd.f32 %v3605_v35, %v3441_v44  ;;  %3991 = vmatmul.f32.gmra.mxu0 %v9269_v55  ;;  %v5073_v63 = vand.u32 4294901760, %v5072_v61  ;;  %v9741_v44 = vsub.f32 %v3247_v24, %v9735_v33 }
 0x416   : > { %4088 = vmatmul.f32.gmra.mxu1 %v9269_v55 }
 0x417   : > { %v3734_v13 = vadd.f32 %v3733_v50, %v3606_v23  ;;  %5074 = vmatpush.msrb.mxu1 %v5073_v63  ;;  %5232 = vmatpush.msrb.mxu2 %v9741_v44 }
 0x418   : > { %4253 = vmatmul.f32.gmra.mxu2 %v9726_v62 }
 0x419   : > { %v9737_v35 = vadd.f32 %v3861_v59, %v3734_v13  ;;  %4414 = vmatmul.f32.gmra.mxu3 %v9665_v16  ;;  %v11103_v59 = vand.u32 4294901760, %v9741_v44 }
 0x41a   : > { %v3448_v54 = vpop.f32.mrf.mxu0 }
 0x41b   : > { %v3449_v23 = vadd.f32 %v3448_v54, %v9398_v20  ;;  %v3609_v50 = vpop.f32.mrf.mxu1  ;;  %v3738_v29 = vpop.f32.mrf.mxu2  ;;  %v5078_v24 = vsub.f32 %v9741_v44, %v11103_v59  ;;  %v3245_v20 = vld [vmem:[%s10856_s5 + $0xc8] sm:$0xff] }
 0x41c   : > { %v3867_v61 = vpop.f32.mrf.mxu3  ;;  %v9757_v62 = vand.u32 4294901760, %v3245_v20 }
 0x41d   : > { %v3610_v13 = vadd.f32 %v3609_v50, %v3449_v23  ;;  %3995 = vmatmul.f32.gmra.mxu0 %v9299_v5  ;;  %v5079_v54 = vand.u32 4294901760, %v5078_v24 }
 0x41e   : > { %4092 = vmatmul.f32.gmra.mxu1 %v9299_v5  ;;  %v9763_v50 = vsub.f32 %v3245_v20, %v9757_v62  ;;  %4909 = vmatpush.msrb.mxu0 %v9757_v62 }
 0x41f   : > { %v3739_v63 = vadd.f32 %v3738_v29, %v3610_v13  ;;  %5080 = vmatpush.msrb.mxu1 %v5079_v54  ;;  %5360 = vmatpush.msrb.mxu3 %v9757_v62 }
 0x420   : > { %4741 = vmatmul.f32.vlgmr.msra.gmra.mxu2 %v9313_v12 }
 0x421   : > { %v9759_v55 = vadd.f32 %v3867_v61, %v3739_v63  ;;  %4838 = vmatmul.f32.vlgmr.msra.gmra.mxu3 %v9313_v12  ;;  %5235 = vmatpush.msrb.mxu2 %v9763_v50  ;;  %v11108_v61 = vand.u32 4294901760, %v9763_v50 }
 0x422   : > { %v3936_v23 = vpop.f32.mrf.mxu0 }
 0x423   : > { %v3937_v29 = vadd.f32 %v3936_v23, %v9424_v41  ;;  %v4033_v13 = vpop.f32.mrf.mxu1  ;;  %v4134_v59 = vpop.f32.mrf.mxu2  ;;  %v5084_v20 = vsub.f32 %v9763_v50, %v11108_v61  ;;  %v3243_v41 = vld [vmem:[%s10856_s5 + $0xb8] sm:$0xff] }
 0x424   : > { %v4355_v24 = vpop.f32.mrf.mxu3  ;;  %v9779_v12 = vand.u32 4294901760, %v3243_v41 }
 0x425   : > { %v4034_v63 = vadd.f32 %v4033_v13, %v3937_v29  ;;  %4468 = vmatmul.f32.vlgmr.msra.gmra.mxu0 %v9334_v57  ;;  %v5085_v23 = vand.u32 4294901760, %v5084_v20 }
 0x426   : > { %4582 = vmatmul.f32.vlgmr.msra.gmra.mxu1 %v9350_v30  ;;  %v9785_v13 = vsub.f32 %v3243_v41, %v9779_v12  ;;  %4911 = vmatpush.msrb.mxu0 %v9779_v12 }
 0x427   : > { %v4135_v54 = vadd.f32 %v4134_v59, %v4034_v63  ;;  %5086 = vmatpush.msrb.mxu1 %v5085_v23  ;;  %5362 = vmatpush.msrb.mxu3 %v9779_v12 }
 0x428   : > { %4745 = vmatmul.f32.gmra.mxu2 %v9352_v49 }
 0x429   : > { %v9781_v5 = vadd.f32 %v4355_v24, %v4135_v54  ;;  %4842 = vmatmul.f32.gmra.mxu3 %v9352_v49  ;;  %5238 = vmatpush.msrb.mxu2 %v9785_v13  ;;  %v11111_v24 = vand.u32 4294901760, %v9785_v13 }
 0x42a   : > { %v3940_v29 = vpop.f32.mrf.mxu0 }
 0x42b   : > { %v3941_v59 = vadd.f32 %v3940_v29, %v9445_v37  ;;  %v4037_v63 = vpop.f32.mrf.mxu1  ;;  %v4142_v61 = vpop.f32.mrf.mxu2  ;;  %v5090_v41 = vsub.f32 %v9785_v13, %v11111_v24  ;;  %v3241_v37 = vld [vmem:[%s10856_s5 + $0xa8] sm:$0xff] }
 0x42c   : > { %v4359_v20 = vpop.f32.mrf.mxu3  ;;  %v9801_v30 = vand.u32 4294901760, %v3241_v37 }
 0x42d   : > { %v4038_v54 = vadd.f32 %v4037_v63, %v3941_v59  ;;  %4473 = vmatmul.f32.gmra.mxu0 %v9370_v46  ;;  %v5091_v29 = vand.u32 4294901760, %v5090_v41 }
 0x42e   : > { %4588 = vmatmul.f32.gmra.mxu1 %v9395_v39  ;;  %v9807_v63 = vsub.f32 %v3241_v37, %v9801_v30  ;;  %4913 = vmatpush.msrb.mxu0 %v9801_v30 }
 0x42f   : > { %v4143_v23 = vadd.f32 %v4142_v61, %v4038_v54  ;;  %5092 = vmatpush.msrb.mxu1 %v5091_v29  ;;  %5364 = vmatpush.msrb.mxu3 %v9801_v30 }
 0x430   : > { %4749 = vmatmul.f32.gmra.mxu2 %v9387_v48 }
 0x431   : > { %v9803_v57 = vadd.f32 %v4359_v20, %v4143_v23  ;;  %4846 = vmatmul.f32.gmra.mxu3 %v9387_v48  ;;  %5241 = vmatpush.msrb.mxu2 %v9807_v63  ;;  %v11114_v20 = vand.u32 4294901760, %v9807_v63  ;;  %v11656_v48 = vand.u32 4294901760, %v9688_v7  ;;  %v11657_v7 = vand.u32 4294901760, %v9717_v47 }
 0x432   : > { %v3944_v59 = vpop.f32.mrf.mxu0 }
 0x433   : > { %v3945_v61 = vadd.f32 %v3944_v59, %v9466_v25  ;;  %v4041_v54 = vpop.f32.mrf.mxu1  ;;  %v4150_v24 = vpop.f32.mrf.mxu2  ;;  %v5096_v37 = vsub.f32 %v9807_v63, %v11114_v20  ;;  %v3239_v25 = vld [vmem:[%s10856_s5 + $0x98] sm:$0xff] }
 0x434   : > { %v4363_v41 = vpop.f32.mrf.mxu3  ;;  %v9823_v39 = vand.u32 4294901760, %v3239_v25 }
 0x435   : > { %v4042_v23 = vadd.f32 %v4041_v54, %v3945_v61  ;;  %4478 = vmatmul.f32.gmra.mxu0 %v9406_v51  ;;  %v5097_v59 = vand.u32 4294901760, %v5096_v37 }
 0x436   : > { %4594 = vmatmul.f32.gmra.mxu1 %v9421_v34  ;;  %v9829_v54 = vsub.f32 %v3239_v25, %v9823_v39  ;;  %4915 = vmatpush.msrb.mxu0 %v9823_v39 }
 0x437   : > { %v4151_v29 = vadd.f32 %v4150_v24, %v4042_v23  ;;  %5098 = vmatpush.msrb.mxu1 %v5097_v59  ;;  %5366 = vmatpush.msrb.mxu3 %v9823_v39 }
 0x438   : > { %4753 = vmatmul.f32.gmra.mxu2 %v9413_v53 }
 0x439   : > { %v9825_v46 = vadd.f32 %v4363_v41, %v4151_v29  ;;  %4850 = vmatmul.f32.gmra.mxu3 %v9413_v53  ;;  %5244 = vmatpush.msrb.mxu2 %v9829_v54  ;;  %v11117_v41 = vand.u32 4294901760, %v9829_v54 }
 0x43a   : > { %v3948_v61 = vpop.f32.mrf.mxu0 }
 0x43b   : > { %v3949_v24 = vadd.f32 %v3948_v61, %v9487_v36  ;;  %v4045_v23 = vpop.f32.mrf.mxu1  ;;  %v4158_v20 = vpop.f32.mrf.mxu2  ;;  %v5102_v25 = vsub.f32 %v9829_v54, %v11117_v41  ;;  %v3237_v36 = vld [vmem:[%s10856_s5 + $0x88] sm:$0xff] }
 0x43c   : > { %v4367_v37 = vpop.f32.mrf.mxu3  ;;  %v9845_v34 = vand.u32 4294901760, %v3237_v36 }
 0x43d   : > { %v4046_v29 = vadd.f32 %v4045_v23, %v3949_v24  ;;  %4483 = vmatmul.f32.gmra.mxu0 %v9428_v40  ;;  %v5103_v61 = vand.u32 4294901760, %v5102_v25 }
 0x43e   : > { %4600 = vmatmul.f32.gmra.mxu1 %v9442_v8  ;;  %v9851_v23 = vsub.f32 %v3237_v36, %v9845_v34  ;;  %4917 = vmatpush.msrb.mxu0 %v9845_v34 }
 0x43f   : > { %v4159_v59 = vadd.f32 %v4158_v20, %v4046_v29  ;;  %5104 = vmatpush.msrb.mxu1 %v5103_v61  ;;  %5368 = vmatpush.msrb.mxu3 %v9845_v34 }
 0x440   : > { %4757 = vmatmul.f32.gmra.mxu2 %v9434_v6 }
 0x441   : > { %v9847_v51 = vadd.f32 %v4367_v37, %v4159_v59  ;;  %4854 = vmatmul.f32.gmra.mxu3 %v9434_v6  ;;  %5247 = vmatpush.msrb.mxu2 %v9851_v23  ;;  %v11120_v37 = vand.u32 4294901760, %v9851_v23 }
 0x442   : > { %v3952_v24 = vpop.f32.mrf.mxu0 }
 0x443   : > { %v3953_v20 = vadd.f32 %v3952_v24, %v9508_v9  ;;  %v4049_v29 = vpop.f32.mrf.mxu1  ;;  %v4166_v41 = vpop.f32.mrf.mxu2  ;;  %v5108_v36 = vsub.f32 %v9851_v23, %v11120_v37  ;;  %v3235_v9 = vld [vmem:[%s10856_s5 + $0x78] sm:$0xff] }
 0x444   : > { %v4371_v25 = vpop.f32.mrf.mxu3  ;;  %v9867_v8 = vand.u32 4294901760, %v3235_v9 }
 0x445   : > { %v4050_v59 = vadd.f32 %v4049_v29, %v3953_v20  ;;  %4488 = vmatmul.f32.gmra.mxu0 %v9449_v56  ;;  %v5109_v24 = vand.u32 4294901760, %v5108_v36 }
 0x446   : > { %4606 = vmatmul.f32.gmra.mxu1 %v9463_v42  ;;  %v9873_v29 = vsub.f32 %v3235_v9, %v9867_v8  ;;  %4919 = vmatpush.msrb.mxu0 %v9867_v8 }
 0x447   : > { %v4167_v61 = vadd.f32 %v4166_v41, %v4050_v59  ;;  %5110 = vmatpush.msrb.mxu1 %v5109_v24  ;;  %5370 = vmatpush.msrb.mxu3 %v9867_v8 }
 0x448   : > { %4761 = vmatmul.f32.gmra.mxu2 %v9455_v18 }
 0x449   : > { %v9869_v40 = vadd.f32 %v4371_v25, %v4167_v61  ;;  %4858 = vmatmul.f32.gmra.mxu3 %v9455_v18  ;;  %5250 = vmatpush.msrb.mxu2 %v9873_v29  ;;  %v11123_v25 = vand.u32 4294901760, %v9873_v29 }
 0x44a   : > { %v3956_v20 = vpop.f32.mrf.mxu0 }
 0x44b   : > { %v3957_v41 = vadd.f32 %v3956_v20, %v9529_v19  ;;  %v4053_v59 = vpop.f32.mrf.mxu1  ;;  %v4174_v37 = vpop.f32.mrf.mxu2  ;;  %v5114_v9 = vsub.f32 %v9873_v29, %v11123_v25  ;;  %v3233_v19 = vld [vmem:[%s10856_s5 + $0x68] sm:$0xff] }
 0x44c   : > { %v4375_v36 = vpop.f32.mrf.mxu3  ;;  %v9889_v42 = vand.u32 4294901760, %v3233_v19 }
 0x44d   : > { %v4054_v61 = vadd.f32 %v4053_v59, %v3957_v41  ;;  %4493 = vmatmul.f32.gmra.mxu0 %v9470_v31  ;;  %v5115_v20 = vand.u32 4294901760, %v5114_v9 }
 0x44e   : > { %4612 = vmatmul.f32.gmra.mxu1 %v9484_v0  ;;  %v9895_v59 = vsub.f32 %v3233_v19, %v9889_v42  ;;  %4921 = vmatpush.msrb.mxu0 %v9889_v42 }
 0x44f   : > { %v4175_v24 = vadd.f32 %v4174_v37, %v4054_v61  ;;  %5116 = vmatpush.msrb.mxu1 %v5115_v20  ;;  %5372 = vmatpush.msrb.mxu3 %v9889_v42 }
 0x450   : > { %4765 = vmatmul.f32.gmra.mxu2 %v9476_v15 }
 0x451   : > { %v9891_v56 = vadd.f32 %v4375_v36, %v4175_v24  ;;  %4862 = vmatmul.f32.gmra.mxu3 %v9476_v15  ;;  %5253 = vmatpush.msrb.mxu2 %v9895_v59  ;;  %v11126_v36 = vand.u32 4294901760, %v9895_v59 }
 0x452   : > { %v3960_v41 = vpop.f32.mrf.mxu0 }
 0x453   : > { %v3961_v37 = vadd.f32 %v3960_v41, %v9550_v2  ;;  %v4057_v61 = vpop.f32.mrf.mxu1  ;;  %v4182_v25 = vpop.f32.mrf.mxu2  ;;  %v5120_v19 = vsub.f32 %v9895_v59, %v11126_v36  ;;  %v3231_v2 = vld [vmem:[%s10856_s5 + $0x58] sm:$0xff] }
 0x454   : > { %v4379_v9 = vpop.f32.mrf.mxu3  ;;  %v9911_v0 = vand.u32 4294901760, %v3231_v2 }
 0x455   : > { %v4058_v24 = vadd.f32 %v4057_v61, %v3961_v37  ;;  %4498 = vmatmul.f32.gmra.mxu0 %v9491_v27  ;;  %v5121_v41 = vand.u32 4294901760, %v5120_v19 }
 0x456   : > { %4618 = vmatmul.f32.gmra.mxu1 %v9505_v3  ;;  %v9917_v61 = vsub.f32 %v3231_v2, %v9911_v0  ;;  %4923 = vmatpush.msrb.mxu0 %v9911_v0 }
 0x457   : > { %v4183_v20 = vadd.f32 %v4182_v25, %v4058_v24  ;;  %5122 = vmatpush.msrb.mxu1 %v5121_v41  ;;  %5374 = vmatpush.msrb.mxu3 %v9911_v0 }
 0x458   : > { %4769 = vmatmul.f32.gmra.mxu2 %v9497_v52 }
 0x459   : > { %v9913_v31 = vadd.f32 %v4379_v9, %v4183_v20  ;;  %4866 = vmatmul.f32.gmra.mxu3 %v9497_v52  ;;  %5256 = vmatpush.msrb.mxu2 %v9917_v61  ;;  %v11129_v9 = vand.u32 4294901760, %v9917_v61 }
 0x45a   : > { %v3964_v37 = vpop.f32.mrf.mxu0 }
 0x45b   : > { %v3965_v25 = vadd.f32 %v3964_v37, %v9571_v1  ;;  %v4061_v24 = vpop.f32.mrf.mxu1  ;;  %v4190_v36 = vpop.f32.mrf.mxu2  ;;  %v5126_v2 = vsub.f32 %v9917_v61, %v11129_v9  ;;  %v3229_v1 = vld [vmem:[%s10856_s5 + $0x48] sm:$0xff] }
 0x45c   : > { %v4383_v19 = vpop.f32.mrf.mxu3  ;;  %v9933_v3 = vand.u32 4294901760, %v3229_v1 }
 0x45d   : > { %v4062_v20 = vadd.f32 %v4061_v24, %v3965_v25  ;;  %4503 = vmatmul.f32.gmra.mxu0 %v9512_v32  ;;  %v5127_v37 = vand.u32 4294901760, %v5126_v2 }
 0x45e   : > { %4624 = vmatmul.f32.gmra.mxu1 %v9526_v11  ;;  %v9939_v24 = vsub.f32 %v3229_v1, %v9933_v3  ;;  %4925 = vmatpush.msrb.mxu0 %v9933_v3  ;;  %v11646_v11 = vld [vmem:[#allocation105_spill] sm:$0xff] }
 0x45f   : > { %v4191_v41 = vadd.f32 %v4190_v36, %v4062_v20  ;;  %5128 = vmatpush.msrb.mxu1 %v5127_v37  ;;  %5376 = vmatpush.msrb.mxu3 %v9933_v3  ;;  %v11647_v37 = vld [vmem:[#allocation107_spill] sm:$0xff] }
 0x460   : > { %4773 = vmatmul.f32.gmra.mxu2 %v9518_v43 }
 0x461   : > { %v9935_v27 = vadd.f32 %v4383_v19, %v4191_v41  ;;  %4870 = vmatmul.f32.gmra.mxu3 %v9518_v43  ;;  %5259 = vmatpush.msrb.mxu2 %v9939_v24  ;;  %v11138_v19 = vand.u32 4294901760, %v9939_v24 }
 0x462   : > { %v3968_v25 = vpop.f32.mrf.mxu0 }
 0x463   : > { %v3969_v36 = vadd.f32 %v3968_v25, %v9592_v4  ;;  %v4065_v20 = vpop.f32.mrf.mxu1  ;;  %v4198_v9 = vpop.f32.mrf.mxu2  ;;  %v5132_v1 = vsub.f32 %v9939_v24, %v11138_v19  ;;  %v3227_v4 = vld [vmem:[%s10856_s5 + $0x38] sm:$0xff] }
 0x464   : > { %v4387_v2 = vpop.f32.mrf.mxu3  ;;  %v11648_v25 = vld [vmem:[#allocation106_spill] sm:$0xff]  ;;  %v9955_v52 = vand.u32 4294901760, %v3227_v4 }
 0x465   : > { %v4066_v41 = vadd.f32 %v4065_v20, %v3969_v36  ;;  %4508 = vmatmul.f32.gmra.mxu0 %v11646_v11  ;;  %v5133_v43 = vand.u32 4294901760, %v5132_v1 }
 0x466   : > { %4630 = vmatmul.f32.gmra.mxu1 %v11647_v37  ;;  %v9961_v20 = vsub.f32 %v3227_v4, %v9955_v52  ;;  %4927 = vmatpush.msrb.mxu0 %v9955_v52  ;;  %v11649_v37 = vld [vmem:[#allocation108_spill] sm:$0xff] }
 0x467   : > { %v4199_v32 = vadd.f32 %v4198_v9, %v4066_v41  ;;  %5134 = vmatpush.msrb.mxu1 %v5133_v43  ;;  %5378 = vmatpush.msrb.mxu3 %v9955_v52  ;;  %v11650_v43 = vld [vmem:[#allocation111_spill] sm:$0xff] }
 0x468   : > { %4777 = vmatmul.f32.gmra.mxu2 %v11648_v25 }
 0x469   : > { %v9957_v15 = vadd.f32 %v4387_v2, %v4199_v32  ;;  %4874 = vmatmul.f32.gmra.mxu3 %v11648_v25  ;;  %5262 = vmatpush.msrb.mxu2 %v9961_v20  ;;  %v11144_v32 = vand.u32 4294901760, %v9961_v20 }
 0x46a   : > { %v3972_v36 = vpop.f32.mrf.mxu0 }
 0x46b   : > { %v3973_v9 = vadd.f32 %v3972_v36, %v9613_v60  ;;  %v4069_v41 = vpop.f32.mrf.mxu1  ;;  %v4206_v19 = vpop.f32.mrf.mxu2  ;;  %v5138_v4 = vsub.f32 %v9961_v20, %v11144_v32  ;;  %v3225_v60 = vld [vmem:[%s10856_s5 + $0x28] sm:$0xff]  ;;  %v11651_v36 = vld [vmem:[#allocation109_spill] sm:$0xff] }
 0x46c   : > { %v4391_v1 = vpop.f32.mrf.mxu3  ;;  %v9977_v18 = vand.u32 4294901760, %v3225_v60 }
 0x46d   : > { %v4070_v2 = vadd.f32 %v4069_v41, %v3973_v9  ;;  %4513 = vmatmul.f32.gmra.mxu0 %v11649_v37  ;;  %v5139_v25 = vand.u32 4294901760, %v5138_v4 }
 0x46e   : > { %4636 = vmatmul.f32.gmra.mxu1 %v11650_v43  ;;  %v9983_v41 = vsub.f32 %v3225_v60, %v9977_v18  ;;  %4929 = vmatpush.msrb.mxu0 %v9977_v18  ;;  %v11652_v43 = vld [vmem:[#allocation112_spill] sm:$0xff] }
 0x46f   : > { %v4207_v11 = vadd.f32 %v4206_v19, %v4070_v2  ;;  %5140 = vmatpush.msrb.mxu1 %v5139_v25  ;;  %5380 = vmatpush.msrb.mxu3 %v9977_v18  ;;  %v11653_v25 = vld [vmem:[#allocation115_spill] sm:$0xff] }
 0x470   : > { %4781 = vmatmul.f32.gmra.mxu2 %v11651_v36 }
 0x471   : > { %v9979_v6 = vadd.f32 %v4391_v1, %v4207_v11  ;;  %4878 = vmatmul.f32.gmra.mxu3 %v11651_v36  ;;  %5265 = vmatpush.msrb.mxu2 %v9983_v41  ;;  %v11148_v11 = vand.u32 4294901760, %v9983_v41 }
 0x472   : > { %v3976_v9 = vpop.f32.mrf.mxu0 }
 0x473   : > { %v3977_v19 = vadd.f32 %v3976_v9, %v9634_v22  ;;  %v4073_v2 = vpop.f32.mrf.mxu1  ;;  %v4214_v32 = vpop.f32.mrf.mxu2  ;;  %v5144_v60 = vsub.f32 %v9983_v41, %v11148_v11  ;;  %v3223_v22 = vld [vmem:[%s10856_s5 + $0x18] sm:$0xff] }
 0x474   : > { %v4395_v4 = vpop.f32.mrf.mxu3  ;;  %v9999_v36 = vand.u32 4294901760, %v3223_v22 }
 0x475   : > { %v4074_v1 = vadd.f32 %v4073_v2, %v3977_v19  ;;  %4518 = vmatmul.f32.gmra.mxu0 %v11652_v43  ;;  %v5145_v9 = vand.u32 4294901760, %v5144_v60  ;;  %v11655_v43 = vld [vmem:[#allocation119_spill] sm:$0xff] }
 0x476   : > { %4642 = vmatmul.f32.gmra.mxu1 %v11653_v25  ;;  %v10005_v2 = vsub.f32 %v3223_v22, %v9999_v36  ;;  %4931 = vmatpush.msrb.mxu0 %v9999_v36  ;;  %v11654_v25 = vld [vmem:[#allocation116_spill] sm:$0xff] }
 0x477   : > { %v4215_v37 = vadd.f32 %v4214_v32, %v4074_v1  ;;  %5146 = vmatpush.msrb.mxu1 %v5145_v9  ;;  %5382 = vmatpush.msrb.mxu3 %v9999_v36 }
 0x478   : > { %4785 = vmatmul.f32.gmra.mxu2 %v9581_v21  ;;  %v11153_v60 = vand.u32 4294901760, %v10005_v2 }
 0x479   : > { %v10001_v53 = vadd.f32 %v4395_v4, %v4215_v37  ;;  %4882 = vmatmul.f32.gmra.mxu3 %v9581_v21  ;;  %v3221_v37 = vld [vmem:[%s10856_s5 + $0x8] sm:$0xff]  ;;  %5268 = vmatpush.msrb.mxu2 %v10005_v2 }
 0x47a   : > { %v3980_v19 = vpop.f32.mrf.mxu0  ;;  %v10015_v9 = vand.u32 4294901760, %v3221_v37 }
 0x47b   : > { %v3981_v32 = vadd.f32 %v3980_v19, %v9655_v26  ;;  %v4077_v1 = vpop.f32.mrf.mxu1  ;;  %v4222_v11 = vpop.f32.mrf.mxu2  ;;  %v5150_v26 = vsub.f32 %v10005_v2, %v11153_v60 }
 0x47c   : > { %v4399_v4 = vpop.f32.mrf.mxu3  ;;  %v10023_v19 = vsub.f32 %v3221_v37, %v10015_v9  ;;  %4933 = vmatpush.msrb.mxu0 %v10015_v9  ;;  %5384 = vmatpush.msrb.mxu3 %v10015_v9 }
 0x47d   : > { %v4078_v22 = vadd.f32 %v4077_v1, %v3981_v32  ;;  %4523 = vmatmul.f32.gmra.mxu0 %v11654_v25  ;;  %v5151_v32 = vand.u32 4294901760, %v5150_v26 }
 0x47e   : > { %4648 = vmatmul.f32.gmra.mxu1 %v11655_v43  ;;  %5485 = vmatpush.msra.mxu0 %v11656_v48  ;;  %v11156_v1 = vand.u32 4294901760, %v10023_v19 }
 0x47f   : > { %v4223_v21 = vadd.f32 %v4222_v11, %v4078_v22  ;;  %5271 = vmatpush.msrb.mxu2 %v10023_v19  ;;  %5152 = vmatpush.msrb.mxu1 %v5151_v32  ;;  %v11659_v32 = vld [vmem:[#allocation122_spill] sm:$0xff] }
 0x480   : > { %4789 = vmatmul.f32.gmra.mxu2 %v9602_v45  ;;  %v5156_v11 = vsub.f32 %v10023_v19, %v11156_v1  ;;  %5489 = vmatpush.msra.mxu0 %v11657_v7 }
 0x481   : > { %v10031_v43 = vadd.f32 %v4399_v4, %v4223_v21  ;;  %4886 = vmatmul.f32.gmra.mxu3 %v9602_v45  ;;  %v11658_v4 = vand.u32 4294901760, %v9741_v44  ;;  %v11660_v45 = vand.u32 4294901760, %v9763_v50 }
 0x482   : > { %v3984_v37 = vpop.f32.mrf.mxu0  ;;  %v5157_v21 = vand.u32 4294901760, %v5156_v11 }
 0x483   : > { %v3985_v48 = vadd.f32 %v3984_v37, %v9679_v14  ;;  %v4081_v22 = vpop.f32.mrf.mxu1  ;;  %v4230_v26 = vpop.f32.mrf.mxu2  ;;  %5493 = vmatpush.msra.mxu0 %v11658_v4  ;;  %v3283_v14 = vld [vmem:[%s10856_s5 + $0x1f8] sm:$0xff]  ;;  %v11661_v37 = vand.u32 4294901760, %v9785_v13 }
 0x484   : > { %v4403_v60 = vpop.f32.mrf.mxu3  ;;  %5158 = vmatpush.msrb.mxu1 %v5157_v21  ;;  %v10051_v47 = vand.u32 4294901760, %v3283_v14 }
 0x485   : > { %v4082_v25 = vadd.f32 %v4081_v22, %v3985_v48  ;;  %4528 = vmatmul.f32.gmra.mxu0 %v9617_v17  ;;  %v11663_v48 = vld [vmem:[#allocation123_spill] sm:$0xff]  ;;  %v11664_v22 = vld [vmem:[#allocation126_spill] sm:$0xff] }
 0x486   : > { %4654 = vmatmul.f32.gmra.mxu1 %v11659_v32  ;;  %5497 = vmatpush.msra.mxu0 %v11660_v45  ;;  %v10061_v50 = vsub.f32 %v3283_v14, %v10051_v47  ;;  %v11667_v14 = vand.u32 4294901760, %v9851_v23  ;;  %v11668_v23 = vand.u32 4294901760, %v9873_v29  ;;  %v3279_v29 = vld [vmem:[%s10856_s5 + $0x1d8] sm:$0xff] }
 0x487   : > { %v4231_v1 = vadd.f32 %v4230_v26, %v4082_v25  ;;  %5612 = vmatpush.msra.mxu1 %v9677_v38  ;;  %5709 = vmatpush.msra.mxu2 %v10051_v47  ;;  %v11662_v38 = vand.u32 4294901760, %v9807_v63  ;;  %v3281_v63 = vld [vmem:[%s10856_s5 + $0x1e8] sm:$0xff] }
 0x488   : > { %4793 = vmatmul.f32.gmra.mxu2 %v9623_v28  ;;  %5501 = vmatpush.msra.mxu0 %v11661_v37  ;;  %v10081_v4 = vand.u32 4294901760, %v3281_v63  ;;  %v11737_v32 = vand.u32 4294901760, %v10061_v50 }
 0x489   : > { %v10054_v44 = vadd.f32 %v4403_v60, %v4231_v1  ;;  %4890 = vmatmul.f32.gmra.mxu3 %v9623_v28  ;;  %5614 = vmatpush.msra.mxu1 %v9709_v58  ;;  %v11164_v1 = vand.u32 4294901760, %v10061_v50 }
 0x48a   : > { %v3988_v45 = vpop.f32.mrf.mxu0  ;;  %5505 = vmatpush.msra.mxu0 %v11662_v38  ;;  %5711 = vmatpush.msra.mxu2 %v10081_v4 }
 0x48b   : > { %v3989_v25 = vadd.f32 %v3988_v45, %v9711_v10  ;;  %v4085_v11 = vpop.f32.mrf.mxu1  ;;  %v4238_v7 = vpop.f32.mrf.mxu2  ;;  %5616 = vmatpush.msra.mxu1 %v9735_v33  ;;  %v5872_v58 = vsub.f32 %v10061_v50, %v11164_v1  ;;  %v11665_v10 = vand.u32 4294901760, %v9829_v54  ;;  %v11666_v33 = vld [vmem:[#allocation124_spill] sm:$0xff] }
 0x48c   : > { %v4407_v60 = vpop.f32.mrf.mxu3 }
 0x48d   : > { %v4086_v13 = vadd.f32 %v4085_v11, %v3989_v25  ;;  %4533 = vmatmul.f32.gmra.mxu0 %v11663_v48  ;;  %5618 = vmatpush.msra.mxu1 %v9757_v62  ;;  %v5873_v21 = vand.u32 4294901760, %v5872_v58  ;;  %v10092_v11 = vsub.f32 %v3281_v63, %v10081_v4  ;;  %v11736_v48 = vld [vmem:[#allocation32_spill] sm:$0xff] }
 0x48e   : > { %4660 = vmatmul.f32.gmra.mxu1 %v11664_v22  ;;  %5509 = vmatpush.msra.mxu0 %v11665_v10  ;;  %v10111_v10 = vand.u32 4294901760, %v3279_v29  ;;  %v11733_v22 = vld [vmem:[#allocation38_spill] sm:$0xff] }
 0x48f   : > { %v4239_v26 = vadd.f32 %v4238_v7, %v4086_v13  ;;  %5620 = vmatpush.msra.mxu1 %v9779_v12  ;;  %5874 = vmatpush.msra.mxu3 %v5873_v21  ;;  %v11163_v12 = vand.u32 4294901760, %v10092_v11  ;;  %v11670_v13 = vld [vmem:[#allocation130_spill] sm:$0xff]  ;;  %v11673_v21 = vand.u32 4294901760, %v9939_v24 }
 0x490   : > { %4797 = vmatmul.f32.gmra.mxu2 %v11666_v33  ;;  %5513 = vmatpush.msra.mxu0 %v11667_v14 }
 0x491   : > { %v10085_v37 = vadd.f32 %v4407_v60, %v4239_v26  ;;  %4894 = vmatmul.f32.gmra.mxu3 %v11666_v33  ;;  %5622 = vmatpush.msra.mxu1 %v9801_v30  ;;  %v11669_v60 = vld [vmem:[#allocation127_spill] sm:$0xff]  ;;  %v5878_v30 = vsub.f32 %v10092_v11, %v11163_v12 }
 0x492   : > { %v3992_v54 = vpop.f32.mrf.mxu0  ;;  %5517 = vmatpush.msra.mxu0 %v11668_v23  ;;  %5713 = vmatpush.msra.mxu2 %v10111_v10  ;;  %v11677_v23 = vand.u32 4294901760, %v9983_v41 }
 0x493   : > { %v3993_v62 = vadd.f32 %v3992_v54, %v9737_v35  ;;  %v4089_v45 = vpop.f32.mrf.mxu1  ;;  %v4246_v25 = vpop.f32.mrf.mxu2  ;;  %5624 = vmatpush.msra.mxu1 %v9823_v39  ;;  %v11671_v35 = vand.u32 4294901760, %v9895_v59  ;;  %v11672_v39 = vand.u32 4294901760, %v9917_v61  ;;  %v5879_v26 = vand.u32 4294901760, %v5878_v30 }
 0x494   : > { %v4411_v7 = vpop.f32.mrf.mxu3  ;;  %v10124_v61 = vsub.f32 %v3279_v29, %v10111_v10 }
 0x495   : > { %v4090_v38 = vadd.f32 %v4089_v45, %v3993_v62  ;;  %4538 = vmatmul.f32.gmra.mxu0 %v11669_v60  ;;  %5626 = vmatpush.msra.mxu1 %v9845_v34  ;;  %v11674_v45 = vand.u32 4294901760, %v9961_v20  ;;  %v3277_v20 = vld [vmem:[%s10856_s5 + $0x1c8] sm:$0xff] }
 0x496   : > { %4666 = vmatmul.f32.gmra.mxu1 %v11670_v13  ;;  %5521 = vmatpush.msra.mxu0 %v11671_v35  ;;  %v11162_v24 = vand.u32 4294901760, %v10124_v61  ;;  %v10143_v35 = vand.u32 4294901760, %v3277_v20 }
 0x497   : > { %v4247_v58 = vadd.f32 %v4246_v25, %v4090_v38  ;;  %5628 = vmatpush.msra.mxu1 %v9867_v8  ;;  %5880 = vmatpush.msra.mxu3 %v5879_v26  ;;  %v11675_v25 = vld [vmem:[#allocation131_spill] sm:$0xff]  ;;  %v11678_v38 = vld [vmem:[#allocation52_spill] sm:$0xff] }
 0x498   : > { %4801 = vmatmul.f32.gmra.mxu2 %v9665_v16  ;;  %5525 = vmatpush.msra.mxu0 %v11672_v39  ;;  %v11681_v39 = vand.u32 4294901760, %v10023_v19  ;;  %v11683_v19 = vld [vmem:[#allocation17_spill] sm:$0xff] }
 0x499   : > { %v10115_v59 = vadd.f32 %v4411_v7, %v4247_v58  ;;  %4898 = vmatmul.f32.gmra.mxu3 %v9665_v16  ;;  %5630 = vmatpush.msra.mxu1 %v9889_v42  ;;  %v5884_v42 = vsub.f32 %v10124_v61, %v11162_v24  ;;  %v11680_v58 = vld [vmem:[#allocation19_spill] sm:$0xff] }
 0x49a   : > { %v3996_v63 = vpop.f32.mrf.mxu0  ;;  %5529 = vmatpush.msra.mxu0 %v11673_v21  ;;  %5715 = vmatpush.msra.mxu2 %v10143_v35 }
 0x49b   : > { %v3997_v34 = vadd.f32 %v3996_v63, %v9759_v55  ;;  %v4093_v14 = vpop.f32.mrf.mxu1  ;;  %v4254_v54 = vpop.f32.mrf.mxu2  ;;  %5632 = vmatpush.msra.mxu1 %v9911_v0  ;;  %v11676_v55 = vld [vmem:[#allocation133_spill] sm:$0xff]  ;;  %v11679_v0 = vand.u32 4294901760, %v10005_v2  ;;  %v5885_v30 = vand.u32 4294901760, %v5884_v42  ;;  %v10156_v2 = vsub.f32 %v3277_v20, %v10143_v35 }
 0x49c   : > { %v4415_v62 = vpop.f32.mrf.mxu3  ;;  %5533 = vmatpush.msra.mxu0 %v11674_v45 }
 0x49d   : > { %v4094_v8 = vadd.f32 %v4093_v14, %v3997_v34  ;;  %4543 = vmatmul.f32.gmra.mxu0 %v11675_v25  ;;  %5634 = vmatpush.msra.mxu1 %v9933_v3  ;;  %v11682_v14 = vld [vmem:[#allocation59_spill] sm:$0xff] }
 0x49e   : > { %4672 = vmatmul.f32.gmra.mxu1 %v11676_v55  ;;  %5537 = vmatpush.msra.mxu0 %v11677_v23 }
 0x49f   : > { %v4255_v7 = vadd.f32 %v4254_v54, %v4094_v8  ;;  %5636 = vmatpush.msra.mxu1 %v9955_v52  ;;  %5886 = vmatpush.msra.mxu3 %v5885_v30  ;;  %v11160_v52 = vand.u32 4294901760, %v10156_v2  ;;  %v11686_v8 = vld [vmem:[#allocation49_spill] sm:$0xff]  ;;  %v11687_v30 = vld [vmem:[#allocation63_spill] sm:$0xff] }
 0x4a0   : > { %5274 = vmatmul.f32.vlgmr.msrb.gmra.mxu2 %v11678_v38  ;;  %5541 = vmatpush.msra.mxu0 %v11679_v0 }
 0x4a1   : > { %v10147_v41 = vadd.f32 %v4415_v62, %v4255_v7  ;;  %5388 = vmatmul.f32.vlgmr.msrb.gmra.mxu3 %v11680_v58  ;;  %5638 = vmatpush.msra.mxu1 %v9977_v18  ;;  %v5890_v54 = vsub.f32 %v10156_v2, %v11160_v52  ;;  %v3275_v18 = vld [vmem:[%s10856_s5 + $0x1b8] sm:$0xff]  ;;  %v11684_v62 = vld [vmem:[#allocation56_spill] sm:$0xff] }
 0x4a2   : > { %v4469_v29 = vpop.f32.mrf.mxu0  ;;  %5545 = vmatpush.msra.mxu0 %v11681_v39  ;;  %v10172_v45 = vand.u32 4294901760, %v3275_v18  ;;  %v11688_v39 = vld [vmem:[#allocation18_spill] sm:$0xff] }
 0x4a3   : > { %v4470_v3 = vadd.f32 %v4469_v29, %v9781_v5  ;;  %v4583_v26 = vpop.f32.mrf.mxu1  ;;  %v4742_v63 = vpop.f32.mrf.mxu2  ;;  %5640 = vmatpush.msra.mxu1 %v9999_v36  ;;  %v5891_v23 = vand.u32 4294901760, %v5890_v54 }
 0x4a4   : > { %v4839_v21 = vpop.f32.mrf.mxu3  ;;  %5717 = vmatpush.msra.mxu2 %v10172_v45  ;;  %v10183_v38 = vsub.f32 %v3275_v18, %v10172_v45 }
 0x4a5   : > { %v4584_v34 = vadd.f32 %v4583_v26, %v4470_v3  ;;  %4939 = vmatmul.f32.vlgmr.msrb.gmra.mxu0 %v11682_v14  ;;  %5642 = vmatpush.msra.mxu1 %v10015_v9  ;;  %v3273_v26 = vld [vmem:[%s10856_s5 + $0x1a8] sm:$0xff]  ;;  %v11691_v14 = vld [vmem:[#allocation54_spill] sm:$0xff] }
 0x4a6   : > { %5160 = vmatmul.f32.vlgmr.msrb.gmra.mxu1 %v11683_v19  ;;  %6032 = vmatpush.msrb.mxu0 %v10061_v50  ;;  %v11159_v29 = vand.u32 4294901760, %v10183_v38  ;;  %v11739_v50 = vld [vmem:[#allocation44_spill] sm:$0xff] }
 0x4a7   : > { %v4743_v5 = vadd.f32 %v4742_v63, %v4584_v34  ;;  %6160 = vmatpush.msrb.mxu1 %v10051_v47  ;;  %5892 = vmatpush.msra.mxu3 %v5891_v23  ;;  %v11689_v63 = vld [vmem:[#allocation50_spill] sm:$0xff] }
 0x4a8   : > { %5279 = vmatmul.f32.gmra.mxu2 %v11684_v62  ;;  %6035 = vmatpush.msrb.mxu0 %v10092_v11  ;;  %v5896_v3 = vsub.f32 %v10183_v38, %v11159_v29 }
 0x4a9   : > { %v10175_v36 = vadd.f32 %v4839_v21, %v4743_v5  ;;  %5394 = vmatmul.f32.gmra.mxu3 %v11686_v8  ;;  %6162 = vmatpush.msrb.mxu1 %v10081_v4  ;;  %v10199_v21 = vand.u32 4294901760, %v3273_v26 }
 0x4aa   : > { %v4474_v7 = vpop.f32.mrf.mxu0  ;;  %6038 = vmatpush.msrb.mxu0 %v10124_v61  ;;  %v5897_v5 = vand.u32 4294901760, %v5896_v3 }
 0x4ab   : > { %11685 = vst [vmem:[#allocation52_spill] sm:$0xff] %v10175_v36  ;;  %v4475_v9 = vadd.f32 %v4474_v7, %v9803_v57  ;;  %v4589_v42 = vpop.f32.mrf.mxu1  ;;  %v4746_v20 = vpop.f32.mrf.mxu2  ;;  %6164 = vmatpush.msrb.mxu1 %v10111_v10  ;;  %5719 = vmatpush.msra.mxu2 %v10199_v21  ;;  %v10209_v23 = vsub.f32 %v3273_v26, %v10199_v21 }
 0x4ac   : > { %v4843_v0 = vpop.f32.mrf.mxu3  ;;  %6041 = vmatpush.msrb.mxu0 %v10156_v2  ;;  %5898 = vmatpush.msra.mxu3 %v5897_v5 }
 0x4ad   : > { %v4590_v58 = vadd.f32 %v4589_v42, %v4475_v9  ;;  %4947 = vmatmul.f32.gmra.mxu0 %v11687_v30  ;;  %6166 = vmatpush.msrb.mxu1 %v10143_v35  ;;  %v11692_v42 = vld [vmem:[#allocation68_spill] sm:$0xff]  ;;  %v3271_v30 = vld [vmem:[%s10856_s5 + $0x198] sm:$0xff] }
 0x4ae   : > { %5164 = vmatmul.f32.gmra.mxu1 %v11688_v39  ;;  %6044 = vmatpush.msrb.mxu0 %v10183_v38  ;;  %v10223_v3 = vand.u32 4294901760, %v3271_v30 }
 0x4af   : > { %v4747_v57 = vadd.f32 %v4746_v20, %v4590_v58  ;;  %6168 = vmatpush.msrb.mxu1 %v10172_v45  ;;  %v11158_v20 = vand.u32 4294901760, %v10209_v23 }
 0x4b0   : > { %5284 = vmatmul.f32.gmra.mxu2 %v11689_v63  ;;  %6047 = vmatpush.msrb.mxu0 %v10209_v23  ;;  %v11696_v63 = vld [vmem:[#allocation58_spill] sm:$0xff] }
 0x4b1   : > { %v10202_v34 = vadd.f32 %v4843_v0, %v4747_v57  ;;  %5400 = vmatmul.f32.gmra.mxu3 %v11691_v14  ;;  %6170 = vmatpush.msrb.mxu1 %v10199_v21  ;;  %v11693_v0 = vld [vmem:[#allocation47_spill] sm:$0xff] }
 0x4b2   : > { %v4479_v54 = vpop.f32.mrf.mxu0  ;;  %v11694_v57 = vld [vmem:[#allocation55_spill] sm:$0xff]  ;;  %5721 = vmatpush.msra.mxu2 %v10223_v3 }
 0x4b3   : > { %11690 = vst [vmem:[#allocation19_spill] sm:$0xff] %v10202_v34  ;;  %v4480_v18 = vadd.f32 %v4479_v54, %v9825_v46  ;;  %v4595_v62 = vpop.f32.mrf.mxu1  ;;  %v4750_v8 = vpop.f32.mrf.mxu2  ;;  %v5902_v46 = vsub.f32 %v10209_v23, %v11158_v20  ;;  %6172 = vmatpush.msrb.mxu1 %v10223_v3 }
 0x4b4   : > { %v4847_v7 = vpop.f32.mrf.mxu3 }
 0x4b5   : > { %v4596_v9 = vadd.f32 %v4595_v62, %v4480_v18  ;;  %4955 = vmatmul.f32.gmra.mxu0 %v11692_v42  ;;  %v5903_v14 = vand.u32 4294901760, %v5902_v46  ;;  %v11698_v46 = vld [vmem:[#allocation53_spill] sm:$0xff] }
 0x4b6   : > { %5168 = vmatmul.f32.gmra.mxu1 %v11693_v0 }
 0x4b7   : > { %v4751_v58 = vadd.f32 %v4750_v8, %v4596_v9  ;;  %5904 = vmatpush.msra.mxu3 %v5903_v14  ;;  %v10232_v8 = vsub.f32 %v3271_v30, %v10223_v3  ;;  %v3269_v30 = vld [vmem:[%s10856_s5 + $0x188] sm:$0xff] }
 0x4b8   : > { %5289 = vmatmul.f32.gmra.mxu2 %v11694_v57  ;;  %v10245_v14 = vand.u32 4294901760, %v3269_v30 }
 0x4b9   : > { %v10225_v26 = vadd.f32 %v4847_v7, %v4751_v58  ;;  %5406 = vmatmul.f32.gmra.mxu3 %v11696_v63  ;;  %v11697_v7 = vld [vmem:[#allocation62_spill] sm:$0xff]  ;;  %v11157_v58 = vand.u32 4294901760, %v10232_v8  ;;  %6050 = vmatpush.msrb.mxu0 %v10232_v8  ;;  %v11699_v63 = vld [vmem:[#allocation73_spill] sm:$0xff] }
 0x4ba   : > { %v4484_v5 = vpop.f32.mrf.mxu0  ;;  %5723 = vmatpush.msra.mxu2 %v10245_v14  ;;  %6174 = vmatpush.msrb.mxu1 %v10245_v14  ;;  %v10254_v20 = vsub.f32 %v3269_v30, %v10245_v14  ;;  %v3267_v30 = vld [vmem:[%s10856_s5 + $0x178] sm:$0xff] }
 0x4bb   : > { %11695 = vst [vmem:[#allocation59_spill] sm:$0xff] %v10225_v26  ;;  %v4485_v54 = vadd.f32 %v4484_v5, %v9847_v51  ;;  %v4601_v18 = vpop.f32.mrf.mxu1  ;;  %v4754_v62 = vpop.f32.mrf.mxu2  ;;  %v5908_v51 = vsub.f32 %v10232_v8, %v11157_v58 }
 0x4bc   : > { %v4851_v9 = vpop.f32.mrf.mxu3  ;;  %6053 = vmatpush.msrb.mxu0 %v10254_v20 }
 0x4bd   : > { %v4602_v42 = vadd.f32 %v4601_v18, %v4485_v54  ;;  %4963 = vmatmul.f32.gmra.mxu0 %v11697_v7  ;;  %v11701_v54 = vld [vmem:[#allocation77_spill] sm:$0xff]  ;;  %v5909_v18 = vand.u32 4294901760, %v5908_v51  ;;  %v11703_v51 = vld [vmem:[#allocation60_spill] sm:$0xff] }
 0x4be   : > { %5172 = vmatmul.f32.gmra.mxu1 %v11698_v46 }
 0x4bf   : > { %v4755_v57 = vadd.f32 %v4754_v62, %v4602_v42  ;;  %5910 = vmatpush.msra.mxu3 %v5909_v18  ;;  %v11704_v18 = vld [vmem:[#allocation67_spill] sm:$0xff] }
 0x4c0   : > { %5294 = vmatmul.f32.gmra.mxu2 %v11699_v63 }
 0x4c1   : > { %v10247_v5 = vadd.f32 %v4851_v9, %v4755_v57  ;;  %5412 = vmatmul.f32.gmra.mxu3 %v11701_v54  ;;  %v11702_v9 = vld [vmem:[#allocation81_spill] sm:$0xff]  ;;  %v11161_v57 = vand.u32 4294901760, %v10254_v20 }
 0x4c2   : > { %v4489_v7 = vpop.f32.mrf.mxu0 }
 0x4c3   : > { %11700 = vst [vmem:[#allocation17_spill] sm:$0xff] %v10247_v5  ;;  %v4490_v62 = vadd.f32 %v4489_v7, %v9869_v40  ;;  %v4607_v42 = vpop.f32.mrf.mxu1  ;;  %v4758_v58 = vpop.f32.mrf.mxu2  ;;  %v5914_v40 = vsub.f32 %v10254_v20, %v11161_v57  ;;  %v10267_v7 = vand.u32 4294901760, %v3267_v30 }
 0x4c4   : > { %v4855_v63 = vpop.f32.mrf.mxu3 }
 0x4c5   : > { %v4608_v29 = vadd.f32 %v4607_v42, %v4490_v62  ;;  %4971 = vmatmul.f32.gmra.mxu0 %v11702_v9  ;;  %v11706_v42 = vld [vmem:[#allocation72_spill] sm:$0xff]  ;;  %v5915_v9 = vand.u32 4294901760, %v5914_v40  ;;  %5725 = vmatpush.msra.mxu2 %v10267_v7  ;;  %v10276_v24 = vsub.f32 %v3267_v30, %v10267_v7  ;;  %v11708_v40 = vld [vmem:[#allocation65_spill] sm:$0xff]  ;;  %v11709_v30 = vld [vmem:[#allocation75_spill] sm:$0xff] }
 0x4c6   : > { %5176 = vmatmul.f32.gmra.mxu1 %v11703_v51 }
 0x4c7   : > { %v4759_v54 = vadd.f32 %v4758_v58, %v4608_v29  ;;  %6176 = vmatpush.msrb.mxu1 %v10267_v7  ;;  %5916 = vmatpush.msra.mxu3 %v5915_v9 }
 0x4c8   : > { %5299 = vmatmul.f32.gmra.mxu2 %v11704_v18  ;;  %6056 = vmatpush.msrb.mxu0 %v10276_v24 }
 0x4c9   : > { %v10269_v62 = vadd.f32 %v4855_v63, %v4759_v54  ;;  %5418 = vmatmul.f32.gmra.mxu3 %v11706_v42  ;;  %v11707_v63 = vld [vmem:[#allocation80_spill] sm:$0xff]  ;;  %v11165_v54 = vand.u32 4294901760, %v10276_v24 }
 0x4ca   : > { %v4494_v52 = vpop.f32.mrf.mxu0 }
 0x4cb   : > { %11705 = vst [vmem:[#allocation56_spill] sm:$0xff] %v10269_v62  ;;  %v4495_v29 = vadd.f32 %v4494_v52, %v9891_v56  ;;  %v4613_v58 = vpop.f32.mrf.mxu1  ;;  %v4762_v57 = vpop.f32.mrf.mxu2  ;;  %v5920_v56 = vsub.f32 %v10276_v24, %v11165_v54  ;;  %v3265_v52 = vld [vmem:[%s10856_s5 + $0x168] sm:$0xff] }
 0x4cc   : > { %v4859_v18 = vpop.f32.mrf.mxu3  ;;  %v10289_v9 = vand.u32 4294901760, %v3265_v52 }
 0x4cd   : > { %v4614_v12 = vadd.f32 %v4613_v58, %v4495_v29  ;;  %4979 = vmatmul.f32.gmra.mxu0 %v11707_v63  ;;  %v11711_v58 = vld [vmem:[#allocation79_spill] sm:$0xff]  ;;  %v5921_v63 = vand.u32 4294901760, %v5920_v56  ;;  %v11713_v56 = vld [vmem:[#allocation70_spill] sm:$0xff] }
 0x4ce   : > { %5180 = vmatmul.f32.gmra.mxu1 %v11708_v40  ;;  %5727 = vmatpush.msra.mxu2 %v10289_v9  ;;  %v10298_v62 = vsub.f32 %v3265_v52, %v10289_v9  ;;  %v11714_v52 = vld [vmem:[#allocation82_spill] sm:$0xff] }
 0x4cf   : > { %v4763_v42 = vadd.f32 %v4762_v57, %v4614_v12  ;;  %6178 = vmatpush.msrb.mxu1 %v10289_v9  ;;  %5922 = vmatpush.msra.mxu3 %v5921_v63 }
 0x4d0   : > { %5304 = vmatmul.f32.gmra.mxu2 %v11709_v30  ;;  %6059 = vmatpush.msrb.mxu0 %v10298_v62 }
 0x4d1   : > { %v10291_v29 = vadd.f32 %v4859_v18, %v4763_v42  ;;  %5424 = vmatmul.f32.gmra.mxu3 %v11711_v58  ;;  %v11712_v18 = vld [vmem:[#allocation29_spill] sm:$0xff]  ;;  %v11166_v42 = vand.u32 4294901760, %v10298_v62 }
 0x4d2   : > { %v4499_v1 = vpop.f32.mrf.mxu0 }
 0x4d3   : > { %11710 = vst [vmem:[#allocation49_spill] sm:$0xff] %v10291_v29  ;;  %v4500_v12 = vadd.f32 %v4499_v1, %v9913_v31  ;;  %v4619_v57 = vpop.f32.mrf.mxu1  ;;  %v4766_v54 = vpop.f32.mrf.mxu2  ;;  %v5926_v31 = vsub.f32 %v10298_v62, %v11166_v42  ;;  %v3263_v1 = vld [vmem:[%s10856_s5 + $0x158] sm:$0xff] }
 0x4d4   : > { %v4863_v30 = vpop.f32.mrf.mxu3  ;;  %v10311_v63 = vand.u32 4294901760, %v3263_v1 }
 0x4d5   : > { %v4620_v5 = vadd.f32 %v4619_v57, %v4500_v12  ;;  %4987 = vmatmul.f32.gmra.mxu0 %v11712_v18  ;;  %v11716_v57 = vld [vmem:[#allocation86_spill] sm:$0xff]  ;;  %v5927_v18 = vand.u32 4294901760, %v5926_v31  ;;  %v11718_v31 = vld [vmem:[#allocation76_spill] sm:$0xff] }
 0x4d6   : > { %5184 = vmatmul.f32.gmra.mxu1 %v11713_v56  ;;  %5729 = vmatpush.msra.mxu2 %v10311_v63  ;;  %v10320_v26 = vsub.f32 %v3263_v1, %v10311_v63  ;;  %v11719_v1 = vld [vmem:[#allocation10_spill] sm:$0xff] }
 0x4d7   : > { %v4767_v58 = vadd.f32 %v4766_v54, %v4620_v5  ;;  %6180 = vmatpush.msrb.mxu1 %v10311_v63  ;;  %5928 = vmatpush.msra.mxu3 %v5927_v18 }
 0x4d8   : > { %5309 = vmatmul.f32.gmra.mxu2 %v11714_v52  ;;  %6062 = vmatpush.msrb.mxu0 %v10320_v26 }
 0x4d9   : > { %v10313_v12 = vadd.f32 %v4863_v30, %v4767_v58  ;;  %5430 = vmatmul.f32.gmra.mxu3 %v11716_v57  ;;  %v11717_v30 = vld [vmem:[#allocation87_spill] sm:$0xff]  ;;  %v11167_v58 = vand.u32 4294901760, %v10320_v26 }
 0x4da   : > { %v4504_v29 = vpop.f32.mrf.mxu0 }
 0x4db   : > { %11715 = vst [vmem:[#allocation63_spill] sm:$0xff] %v10313_v12  ;;  %v4505_v5 = vadd.f32 %v4504_v29, %v9935_v27  ;;  %v4625_v54 = vpop.f32.mrf.mxu1  ;;  %v4770_v42 = vpop.f32.mrf.mxu2  ;;  %v5932_v27 = vsub.f32 %v10320_v26, %v11167_v58  ;;  %v3261_v29 = vld [vmem:[%s10856_s5 + $0x148] sm:$0xff] }
 0x4dc   : > { %v4867_v52 = vpop.f32.mrf.mxu3  ;;  %v10333_v18 = vand.u32 4294901760, %v3261_v29 }
 0x4dd   : > { %v4626_v34 = vadd.f32 %v4625_v54, %v4505_v5  ;;  %4995 = vmatmul.f32.gmra.mxu0 %v11717_v30  ;;  %v11721_v54 = vld [vmem:[#allocation13_spill] sm:$0xff]  ;;  %v5933_v30 = vand.u32 4294901760, %v5932_v27  ;;  %v11723_v27 = vld [vmem:[#allocation84_spill] sm:$0xff] }
 0x4de   : > { %5188 = vmatmul.f32.gmra.mxu1 %v11718_v31  ;;  %5731 = vmatpush.msra.mxu2 %v10333_v18  ;;  %v10342_v36 = vsub.f32 %v3261_v29, %v10333_v18  ;;  %v11724_v29 = vld [vmem:[#allocation31_spill] sm:$0xff] }
 0x4df   : > { %v4771_v57 = vadd.f32 %v4770_v42, %v4626_v34  ;;  %6182 = vmatpush.msrb.mxu1 %v10333_v18  ;;  %5934 = vmatpush.msra.mxu3 %v5933_v30 }
 0x4e0   : > { %5314 = vmatmul.f32.gmra.mxu2 %v11719_v1  ;;  %6065 = vmatpush.msrb.mxu0 %v10342_v36 }
 0x4e1   : > { %v10335_v5 = vadd.f32 %v4867_v52, %v4771_v57  ;;  %5436 = vmatmul.f32.gmra.mxu3 %v11721_v54  ;;  %v11722_v52 = vld [vmem:[#allocation22_spill] sm:$0xff]  ;;  %v11168_v57 = vand.u32 4294901760, %v10342_v36 }
 0x4e2   : > { %v4509_v12 = vpop.f32.mrf.mxu0 }
 0x4e3   : > { %11720 = vst [vmem:[#allocation18_spill] sm:$0xff] %v10335_v5  ;;  %v4510_v34 = vadd.f32 %v4509_v12, %v9957_v15  ;;  %v4631_v42 = vpop.f32.mrf.mxu1  ;;  %v4774_v58 = vpop.f32.mrf.mxu2  ;;  %v5938_v15 = vsub.f32 %v10342_v36, %v11168_v57  ;;  %v3259_v12 = vld [vmem:[%s10856_s5 + $0x138] sm:$0xff] }
 0x4e4   : > { %v4871_v1 = vpop.f32.mrf.mxu3  ;;  %v10355_v30 = vand.u32 4294901760, %v3259_v12 }
 0x4e5   : > { %v4632_v55 = vadd.f32 %v4631_v42, %v4510_v34  ;;  %5003 = vmatmul.f32.gmra.mxu0 %v11722_v52  ;;  %v11726_v42 = vld [vmem:[#allocation51_spill] sm:$0xff]  ;;  %v5939_v52 = vand.u32 4294901760, %v5938_v15  ;;  %v11728_v15 = vld [vmem:[#allocation45_spill] sm:$0xff] }
 0x4e6   : > { %5192 = vmatmul.f32.gmra.mxu1 %v11723_v27  ;;  %5733 = vmatpush.msra.mxu2 %v10355_v30  ;;  %v10364_v25 = vsub.f32 %v3259_v12, %v10355_v30  ;;  %v11729_v12 = vld [vmem:[#allocation39_spill] sm:$0xff] }
 0x4e7   : > { %v4775_v54 = vadd.f32 %v4774_v58, %v4632_v55  ;;  %6184 = vmatpush.msrb.mxu1 %v10355_v30  ;;  %5940 = vmatpush.msra.mxu3 %v5939_v52 }
 0x4e8   : > { %5319 = vmatmul.f32.gmra.mxu2 %v11724_v29  ;;  %6068 = vmatpush.msrb.mxu0 %v10364_v25 }
 0x4e9   : > { %v10357_v34 = vadd.f32 %v4871_v1, %v4775_v54  ;;  %5442 = vmatmul.f32.gmra.mxu3 %v11726_v42  ;;  %v11727_v1 = vld [vmem:[#allocation20_spill] sm:$0xff]  ;;  %v11169_v54 = vand.u32 4294901760, %v10364_v25 }
 0x4ea   : > { %v4514_v5 = vpop.f32.mrf.mxu0 }
 0x4eb   : > { %11725 = vst [vmem:[#allocation50_spill] sm:$0xff] %v10357_v34  ;;  %v4515_v55 = vadd.f32 %v4514_v5, %v9979_v6  ;;  %v4637_v58 = vpop.f32.mrf.mxu1  ;;  %v4778_v57 = vpop.f32.mrf.mxu2  ;;  %v5944_v6 = vsub.f32 %v10364_v25, %v11169_v54  ;;  %v3257_v5 = vld [vmem:[%s10856_s5 + $0x128] sm:$0xff] }
 0x4ec   : > { %v4875_v29 = vpop.f32.mrf.mxu3  ;;  %v10377_v52 = vand.u32 4294901760, %v3257_v5 }
 0x4ed   : > { %v4638_v13 = vadd.f32 %v4637_v58, %v4515_v55  ;;  %5011 = vmatmul.f32.gmra.mxu0 %v11727_v1  ;;  %v11731_v58 = vld [vmem:[#allocation40_spill] sm:$0xff]  ;;  %v5945_v1 = vand.u32 4294901760, %v5944_v6  ;;  %v11732_v6 = vld [vmem:[#allocation43_spill] sm:$0xff] }
 0x4ee   : > { %5196 = vmatmul.f32.gmra.mxu1 %v11728_v15  ;;  %5735 = vmatpush.msra.mxu2 %v10377_v52  ;;  %v10386_v60 = vsub.f32 %v3257_v5, %v10377_v52 }
 0x4ef   : > { %v4779_v42 = vadd.f32 %v4778_v57, %v4638_v13  ;;  %6186 = vmatpush.msrb.mxu1 %v10377_v52  ;;  %5946 = vmatpush.msra.mxu3 %v5945_v1 }
 0x4f0   : > { %5324 = vmatmul.f32.gmra.mxu2 %v11729_v12  ;;  %6071 = vmatpush.msrb.mxu0 %v10386_v60 }
 0x4f1   : > { %v10379_v55 = vadd.f32 %v4875_v29, %v4779_v42  ;;  %5448 = vmatmul.f32.gmra.mxu3 %v11731_v58  ;;  %v3255_v29 = vld [vmem:[%s10856_s5 + $0x118] sm:$0xff]  ;;  %v11170_v58 = vand.u32 4294901760, %v10386_v60 }
 0x4f2   : > { %v4519_v34 = vpop.f32.mrf.mxu0 }
 0x4f3   : > { %11730 = vst [vmem:[#allocation54_spill] sm:$0xff] %v10379_v55  ;;  %v4520_v13 = vadd.f32 %v4519_v34, %v10001_v53  ;;  %v4643_v57 = vpop.f32.mrf.mxu1  ;;  %v4782_v54 = vpop.f32.mrf.mxu2  ;;  %v10393_v55 = vand.u32 4294901760, %v3255_v29  ;;  %v3253_v53 = vld [vmem:[%s10856_s5 + $0x108] sm:$0xff]  ;;  %v5950_v5 = vsub.f32 %v10386_v60, %v11170_v58 }
 0x4f4   : > { %v4879_v12 = vpop.f32.mrf.mxu3 }
 0x4f5   : > { %v4644_v42 = vadd.f32 %v4643_v57, %v4520_v13  ;;  %5019 = vmatmul.f32.gmra.mxu0 %v11732_v6  ;;  %5737 = vmatpush.msra.mxu2 %v10393_v55  ;;  %v10405_v1 = vsub.f32 %v3255_v29, %v10393_v55  ;;  %v10407_v13 = vand.u32 4294901760, %v3253_v53  ;;  %v11734_v57 = vld [vmem:[#allocation74_spill] sm:$0xff] }
 0x4f6   : > { %5200 = vmatmul.f32.gmra.mxu1 %v11733_v22 }
 0x4f7   : > { %v4783_v34 = vadd.f32 %v4782_v54, %v4644_v42  ;;  %6188 = vmatpush.msrb.mxu1 %v10393_v55  ;;  %v5951_v54 = vand.u32 4294901760, %v5950_v5  ;;  %v11171_v42 = vand.u32 4294901760, %v10405_v1  ;;  %5739 = vmatpush.msra.mxu2 %v10407_v13  ;;  %v10417_v58 = vsub.f32 %v3253_v53, %v10407_v13 }
 0x4f8   : > { %5329 = vmatmul.f32.gmra.mxu2 %v11734_v57  ;;  %6074 = vmatpush.msrb.mxu0 %v10405_v1 }
 0x4f9   : > { %v10411_v6 = vadd.f32 %v4879_v12, %v4783_v34  ;;  %5454 = vmatmul.f32.gmra.mxu3 %v11736_v48  ;;  %6291 = vmatpush.msrb.mxu2 %v11737_v32  ;;  %v5956_v48 = vsub.f32 %v10405_v1, %v11171_v42  ;;  %v11175_v5 = vand.u32 4294901760, %v10417_v58  ;;  %v11741_v42 = vand.u32 4294901760, %v10124_v61 }
 0x4fa   : > { %v4524_v29 = vpop.f32.mrf.mxu0  ;;  %5952 = vmatpush.msra.mxu3 %v5951_v54  ;;  %6190 = vmatpush.msrb.mxu1 %v10407_v13  ;;  %v11745_v61 = vand.u32 4294901760, %v10183_v38  ;;  %v11750_v38 = vld [vmem:[#allocation14_spill] sm:$0xff] }
 0x4fb   : > { %11735 = vst [vmem:[#allocation68_spill] sm:$0xff] %v10411_v6  ;;  %v4525_v57 = vadd.f32 %v4524_v29, %v10031_v43  ;;  %v4649_v12 = vpop.f32.mrf.mxu1  ;;  %v4786_v34 = vpop.f32.mrf.mxu2  ;;  %v11738_v6 = vand.u32 4294901760, %v10092_v11  ;;  %6077 = vmatpush.msrb.mxu0 %v10417_v58  ;;  %v5957_v43 = vand.u32 4294901760, %v5956_v48  ;;  %v5962_v54 = vsub.f32 %v10417_v58, %v11175_v5  ;;  %v11740_v29 = vld [vmem:[#allocation36_spill] sm:$0xff] }
 0x4fc   : > { %v4883_v53 = vpop.f32.mrf.mxu3  ;;  %v11742_v11 = vld [vmem:[#allocation64_spill] sm:$0xff] }
 0x4fd   : > { %6295 = vmatpush.msrb.mxu2 %v11738_v6  ;;  %v4650_v32 = vadd.f32 %v4649_v12, %v4525_v57  ;;  %5027 = vmatmul.f32.gmra.mxu0 %v11739_v50  ;;  %v5963_v16 = vand.u32 4294901760, %v5962_v54  ;;  %v11743_v57 = vld [vmem:[#allocation11_spill] sm:$0xff]  ;;  %v11744_v12 = vand.u32 4294901760, %v10156_v2  ;;  %v11748_v2 = vand.u32 4294901760, %v10209_v23 }
 0x4fe   : > { %5204 = vmatmul.f32.gmra.mxu1 %v11740_v29  ;;  %5958 = vmatpush.msra.mxu3 %v5957_v43 }
 0x4ff   : > { %6299 = vmatpush.msrb.mxu2 %v11741_v42  ;;  %v4787_v17 = vadd.f32 %v4786_v34, %v4650_v32 }
 0x500   : > { %5334 = vmatmul.f32.gmra.mxu2 %v11742_v11  ;;  %5964 = vmatpush.msra.mxu3 %v5963_v16  ;;  %v11753_v11 = vld [vmem:[#allocation21_spill] sm:$0xff] }
 0x501   : > { %v10439_v6 = vadd.f32 %v4883_v53, %v4787_v17  ;;  %5460 = vmatmul.f32.gmra.mxu3 %v11743_v57  ;;  %6303 = vmatpush.msrb.mxu2 %v11744_v12  ;;  %v11746_v17 = vld [vmem:[#allocation28_spill] sm:$0xff]  ;;  %v11747_v53 = vld [vmem:[#allocation42_spill] sm:$0xff]  ;;  %v11754_v57 = vand.u32 4294901760, %v10276_v24  ;;  %v11757_v12 = vld [vmem:[#allocation25_spill] sm:$0xff] }
 0x502   : > { %v4529_v48 = vpop.f32.mrf.mxu0  ;;  %6418 = vmatpush.msrb.mxu3 %v10051_v47 }
 0x503   : > { %v4530_v50 = vadd.f32 %v4529_v48, %v10054_v44  ;;  %v4655_v5 = vpop.f32.mrf.mxu1  ;;  %v4790_v33 = vpop.f32.mrf.mxu2  ;;  %6307 = vmatpush.msrb.mxu2 %v11745_v61  ;;  %v11749_v44 = vld [vmem:[#allocation24_spill] sm:$0xff]  ;;  %v11759_v48 = vand.u32 4294901760, %v10320_v26  ;;  %v11763_v26 = vld [vmem:[#allocation57_spill] sm:$0xff] }
 0x504   : > { %v4887_v42 = vpop.f32.mrf.mxu3  ;;  %6420 = vmatpush.msrb.mxu3 %v10081_v4 }
 0x505   : > { %v4656_v34 = vadd.f32 %v4655_v5, %v4530_v50  ;;  %5035 = vmatmul.f32.gmra.mxu0 %v11746_v17  ;;  %6311 = vmatpush.msrb.mxu2 %v11748_v2  ;;  %v11751_v5 = vand.u32 4294901760, %v10232_v8  ;;  %v11755_v8 = vld [vmem:[#allocation33_spill] sm:$0xff]  ;;  %v11762_v17 = vand.u32 4294901760, %v10364_v25  ;;  %v11765_v2 = vld [vmem:[#allocation48_spill] sm:$0xff] }
 0x506   : > { %5208 = vmatmul.f32.gmra.mxu1 %v11747_v53  ;;  %6422 = vmatpush.msrb.mxu3 %v10111_v10 }
 0x507   : > { %v4791_v16 = vadd.f32 %v4790_v33, %v4656_v34  ;;  %6315 = vmatpush.msrb.mxu2 %v11751_v5  ;;  %v11752_v33 = vand.u32 4294901760, %v10254_v20  ;;  %v11761_v34 = vld [vmem:[#allocation27_spill] sm:$0xff] }
 0x508   : > { %5339 = vmatmul.f32.gmra.mxu2 %v11749_v44  ;;  %6424 = vmatpush.msrb.mxu3 %v10143_v35 }
 0x509   : > { %v10455_v47 = vadd.f32 %v4887_v42, %v4791_v16  ;;  %5466 = vmatmul.f32.gmra.mxu3 %v11750_v38  ;;  %6319 = vmatpush.msrb.mxu2 %v11752_v33  ;;  %v11767_v16 = vand.u32 4294901760, %v10405_v1 }
 0x50a   : > { %v4534_v32 = vpop.f32.mrf.mxu0  ;;  %6426 = vmatpush.msrb.mxu3 %v10172_v45  ;;  %v11758_v45 = vld [vmem:[#allocation46_spill] sm:$0xff] }
 0x50b   : > { %v4535_v4 = vadd.f32 %v4534_v32, %v10085_v37  ;;  %v4661_v43 = vpop.f32.mrf.mxu1  ;;  %v4794_v23 = vpop.f32.mrf.mxu2  ;;  %6323 = vmatpush.msrb.mxu2 %v11754_v57  ;;  %v11756_v37 = vand.u32 4294901760, %v10298_v62  ;;  %v11760_v62 = vand.u32 4294901760, %v10342_v36  ;;  %v11769_v32 = vld [vmem:[#allocation30_spill] sm:$0xff] }
 0x50c   : > { %v4891_v10 = vpop.f32.mrf.mxu3  ;;  %6428 = vmatpush.msrb.mxu3 %v10199_v21 }
 0x50d   : > { %v4662_v54 = vadd.f32 %v4661_v43, %v4535_v4  ;;  %5043 = vmatmul.f32.gmra.mxu0 %v11753_v11  ;;  %6327 = vmatpush.msrb.mxu2 %v11756_v37  ;;  %v11770_v4 = vld [vmem:[#allocation15_spill] sm:$0xff]  ;;  %v11771_v43 = vld [vmem:[#allocation16_spill] sm:$0xff] }
 0x50e   : > { %5212 = vmatmul.f32.gmra.mxu1 %v11755_v8  ;;  %6430 = vmatpush.msrb.mxu3 %v10223_v3 }
 0x50f   : > { %v4795_v35 = vadd.f32 %v4794_v23, %v4662_v54  ;;  %6331 = vmatpush.msrb.mxu2 %v11759_v48 }
 0x510   : > { %5344 = vmatmul.f32.gmra.mxu2 %v11757_v12  ;;  %6432 = vmatpush.msrb.mxu3 %v10245_v14 }
 0x511   : > { %v10474_v20 = vadd.f32 %v4891_v10, %v4795_v35  ;;  %5472 = vmatmul.f32.gmra.mxu3 %v11758_v45  ;;  %6335 = vmatpush.msrb.mxu2 %v11760_v62  ;;  %v11773_v35 = vld [vmem:[#allocation85_spill] sm:$0xff] }
 0x512   : > { %v4539_v24 = vpop.f32.mrf.mxu0  ;;  %6434 = vmatpush.msrb.mxu3 %v10267_v7  ;;  %v11766_v7 = vld [vmem:[#allocation69_spill] sm:$0xff] }
 0x513   : > { %v4540_v21 = vadd.f32 %v4539_v24, %v10115_v59  ;;  %v4667_v50 = vpop.f32.mrf.mxu1  ;;  %v4798_v61 = vpop.f32.mrf.mxu2  ;;  %6339 = vmatpush.msrb.mxu2 %v11762_v17  ;;  %v11764_v59 = vand.u32 4294901760, %v10386_v60  ;;  %v11768_v60 = vand.u32 4294901760, %v10417_v58 }
 0x514   : > { %v4895_v42 = vpop.f32.mrf.mxu3  ;;  %6436 = vmatpush.msrb.mxu3 %v10289_v9 }
 0x515   : > { %v4668_v3 = vadd.f32 %v4667_v50, %v4540_v21  ;;  %5051 = vmatmul.f32.gmra.mxu0 %v11761_v34  ;;  %6343 = vmatpush.msrb.mxu2 %v11764_v59 }
 0x516   : > { %5216 = vmatmul.f32.gmra.mxu1 %v11763_v26  ;;  %6438 = vmatpush.msrb.mxu3 %v10311_v63 }
 0x517   : > { %v4799_v14 = vadd.f32 %v4798_v61, %v4668_v3  ;;  %6347 = vmatpush.msrb.mxu2 %v11767_v16  ;;  %v11775_v61 = vld [vmem:[#allocation61_spill] sm:$0xff] }
 0x518   : > { %5349 = vmatmul.f32.gmra.mxu2 %v11765_v2  ;;  %6440 = vmatpush.msrb.mxu3 %v10333_v18 }
 0x519   : > { %v10493_v36 = vadd.f32 %v4895_v42, %v4799_v14  ;;  %5478 = vmatmul.f32.gmra.mxu3 %v11766_v7  ;;  %6351 = vmatpush.msrb.mxu2 %v11768_v60  ;;  %v11777_v7 = vld [vmem:[#allocation9_spill] sm:$0xff] }
 0x51a   : > { %v4544_v25 = vpop.f32.mrf.mxu0  ;;  %6442 = vmatpush.msrb.mxu3 %v10355_v30  ;;  %v11772_v30 = vld [vmem:[#allocation26_spill] sm:$0xff] }
 0x51b   : > { %v4545_v9 = vadd.f32 %v4544_v25, %v10147_v41  ;;  %v4673_v44 = vpop.f32.mrf.mxu1  ;;  %v4802_v38 = vpop.f32.mrf.mxu2  ;;  %v6806_v41 = vld [vmem:[%s10857_s6] sm:$0x3] }
 0x51c   : > { %v4899_v5 = vpop.f32.mrf.mxu3  ;;  %6444 = vmatpush.msrb.mxu3 %v10377_v52  ;;  %v10509_v18 = vperm.slane %v6806_v41, 1 }
 0x51d   : > { %v4674_v63 = vadd.f32 %v4673_v44, %v4545_v9  ;;  %5059 = vmatmul.f32.gmra.mxu0 %v11769_v32  ;;  %v11779_v32 = vld [vmem:[#allocation91_spill] sm:$0xff] }
 0x51e   : > { %5220 = vmatmul.f32.gmra.mxu1 %v11770_v4  ;;  %6446 = vmatpush.msrb.mxu3 %v10393_v55 }
 0x51f   : > { %v4803_v1 = vadd.f32 %v4802_v38, %v4674_v63 }
 0x520   : > { %5745 = vmatmul.f32.vlgmr.msra.gmra.mxu2 %v11771_v43  ;;  %6448 = vmatpush.msrb.mxu3 %v10407_v13 }
 0x521   : > { %v10513_v58 = vadd.f32 %v4899_v5, %v4803_v1  ;;  %5966 = vmatmul.f32.vlgmr.msra.gmra.mxu3 %v11772_v30 }
 0x522   : > { %v4940_v23 = vpop.f32.mrf.mxu0 }
 0x523   : > { %v4941_v52 = vadd.f32 %v4940_v23, %v10509_v18  ;;  %v5161_v33 = vpop.f32.mrf.mxu1  ;;  %v5275_v10 = vpop.f32.mrf.mxu2 }
 0x524   : > { %v5389_v54 = vpop.f32.mrf.mxu3 }
 0x525   : > { %v5162_v11 = vadd.f32 %v5161_v33, %v4941_v52  ;;  %5547 = vmatmul.f32.vlgmr.msra.gmra.mxu0 %v11683_v19 }
 0x526   : > { %5644 = vmatmul.f32.vlgmr.msra.gmra.mxu1 %v11683_v19  ;;  %v11774_v19 = vld [vmem:[#allocation83_spill] sm:$0xff] }
 0x527   : > { %v5276_v57 = vadd.f32 %v5275_v10, %v5162_v11  ;;  %v11781_v11 = vld [vmem:[#allocation94_spill] sm:$0xff] }
 0x528   : > { %5753 = vmatmul.f32.gmra.mxu2 %v11773_v35 }
 0x529   : > { %v10521_v55 = vadd.f32 %v5389_v54, %v5276_v57  ;;  %5970 = vmatmul.f32.gmra.mxu3 %v9352_v49 }
 0x52a   : > { %v4948_v37 = vpop.f32.mrf.mxu0 }
 0x52b   : > { %v4949_v13 = vadd.f32 %v4948_v37, %v10509_v18  ;;  %v5165_v12 = vpop.f32.mrf.mxu1  ;;  %v5280_v45 = vpop.f32.mrf.mxu2 }
 0x52c   : > { %v5395_v48 = vpop.f32.mrf.mxu3 }
 0x52d   : > { %v5166_v24 = vadd.f32 %v5165_v12, %v4949_v13  ;;  %5551 = vmatmul.f32.gmra.mxu0 %v11688_v39 }
 0x52e   : > { %5648 = vmatmul.f32.gmra.mxu1 %v11688_v39  ;;  %v11776_v39 = vld [vmem:[#allocation37_spill] sm:$0xff] }
 0x52f   : > { %v5281_v21 = vadd.f32 %v5280_v45, %v5166_v24 }
 0x530   : > { %5761 = vmatmul.f32.gmra.mxu2 %v11774_v19 }
 0x531   : > { %v10528_v50 = vadd.f32 %v5395_v48, %v5281_v21  ;;  %5974 = vmatmul.f32.gmra.mxu3 %v11775_v61  ;;  %v11783_v21 = vld [vmem:[#allocation97_spill] sm:$0xff] }
 0x532   : > { %v4956_v62 = vpop.f32.mrf.mxu0 }
 0x533   : > { %v4957_v42 = vadd.f32 %v4956_v62, %v10509_v18  ;;  %v5169_v3 = vpop.f32.mrf.mxu1  ;;  %v5285_v34 = vpop.f32.mrf.mxu2 }
 0x534   : > { %v5401_v17 = vpop.f32.mrf.mxu3 }
 0x535   : > { %v5170_v14 = vadd.f32 %v5169_v3, %v4957_v42  ;;  %5555 = vmatmul.f32.gmra.mxu0 %v11693_v0 }
 0x536   : > { %5652 = vmatmul.f32.gmra.mxu1 %v11693_v0  ;;  %v11778_v0 = vld [vmem:[#allocation23_spill] sm:$0xff] }
 0x537   : > { %v5286_v59 = vadd.f32 %v5285_v34, %v5170_v14 }
 0x538   : > { %5769 = vmatmul.f32.gmra.mxu2 %v11776_v39  ;;  %v11785_v39 = vld [vmem:[#allocation100_spill] sm:$0xff] }
 0x539   : > { %v10535_v2 = vadd.f32 %v5401_v17, %v5286_v59  ;;  %5978 = vmatmul.f32.gmra.mxu3 %v11777_v7 }
 0x53a   : > { %v4964_v16 = vpop.f32.mrf.mxu0 }
 0x53b   : > { %v4965_v25 = vadd.f32 %v4964_v16, %v10509_v18  ;;  %v5173_v9 = vpop.f32.mrf.mxu1  ;;  %v5290_v44 = vpop.f32.mrf.mxu2 }
 0x53c   : > { %v5407_v38 = vpop.f32.mrf.mxu3 }
 0x53d   : > { %v5174_v60 = vadd.f32 %v5173_v9, %v4965_v25  ;;  %5559 = vmatmul.f32.gmra.mxu0 %v11698_v46 }
 0x53e   : > { %5656 = vmatmul.f32.gmra.mxu1 %v11698_v46  ;;  %v11780_v46 = vld [vmem:[#allocation71_spill] sm:$0xff] }
 0x53f   : > { %v5291_v5 = vadd.f32 %v5290_v44, %v5174_v60 }
 0x540   : > { %5777 = vmatmul.f32.gmra.mxu2 %v11778_v0 }
 0x541   : > { %v10542_v63 = vadd.f32 %v5407_v38, %v5291_v5  ;;  %5982 = vmatmul.f32.gmra.mxu3 %v11779_v32 }
 0x542   : > { %v4972_v1 = vpop.f32.mrf.mxu0 }
 0x543   : > { %v4973_v41 = vadd.f32 %v4972_v1, %v10509_v18  ;;  %v5177_v43 = vpop.f32.mrf.mxu1  ;;  %v5295_v23 = vpop.f32.mrf.mxu2  ;;  %v11787_v1 = vld [vmem:[#allocation103_spill] sm:$0xff] }
 0x544   : > { %v5413_v52 = vpop.f32.mrf.mxu3 }
 0x545   : > { %v5178_v33 = vadd.f32 %v5177_v43, %v4973_v41  ;;  %5563 = vmatmul.f32.gmra.mxu0 %v11703_v51 }
 0x546   : > { %5660 = vmatmul.f32.gmra.mxu1 %v11703_v51  ;;  %v11782_v51 = vld [vmem:[#allocation41_spill] sm:$0xff] }
 0x547   : > { %v5296_v10 = vadd.f32 %v5295_v23, %v5178_v33 }
 0x548   : > { %5785 = vmatmul.f32.gmra.mxu2 %v11780_v46 }
 0x549   : > { %v10549_v54 = vadd.f32 %v5413_v52, %v5296_v10  ;;  %5986 = vmatmul.f32.gmra.mxu3 %v11781_v11 }
 0x54a   : > { %v4980_v57 = vpop.f32.mrf.mxu0 }
 0x54b   : > { %v4981_v35 = vadd.f32 %v4980_v57, %v10509_v18  ;;  %v5181_v37 = vpop.f32.mrf.mxu1  ;;  %v5300_v13 = vpop.f32.mrf.mxu2 }
 0x54c   : > { %v5419_v12 = vpop.f32.mrf.mxu3 }
 0x54d   : > { %v5182_v45 = vadd.f32 %v5181_v37, %v4981_v35  ;;  %5567 = vmatmul.f32.gmra.mxu0 %v11708_v40  ;;  %v11789_v35 = vld [vmem:[#allocation106_spill] sm:$0xff] }
 0x54e   : > { %5664 = vmatmul.f32.gmra.mxu1 %v11708_v40  ;;  %v11784_v40 = vld [vmem:[#allocation78_spill] sm:$0xff] }
 0x54f   : > { %v5301_v48 = vadd.f32 %v5300_v13, %v5182_v45 }
 0x550   : > { %5793 = vmatmul.f32.gmra.mxu2 %v11782_v51 }
 0x551   : > { %v10556_v24 = vadd.f32 %v5419_v12, %v5301_v48  ;;  %5990 = vmatmul.f32.gmra.mxu3 %v11783_v21 }
 0x552   : > { %v4988_v19 = vpop.f32.mrf.mxu0 }
 0x553   : > { %v4989_v62 = vadd.f32 %v4988_v19, %v10509_v18  ;;  %v5185_v42 = vpop.f32.mrf.mxu1  ;;  %v5305_v3 = vpop.f32.mrf.mxu2 }
 0x554   : > { %v5425_v34 = vpop.f32.mrf.mxu3 }
 0x555   : > { %v5186_v17 = vadd.f32 %v5185_v42, %v4989_v62  ;;  %5571 = vmatmul.f32.gmra.mxu0 %v11713_v56  ;;  %v11791_v42 = vld [vmem:[#allocation109_spill] sm:$0xff] }
 0x556   : > { %5668 = vmatmul.f32.gmra.mxu1 %v11713_v56  ;;  %v11786_v56 = vld [vmem:[#allocation110_spill] sm:$0xff] }
 0x557   : > { %v5306_v14 = vadd.f32 %v5305_v3, %v5186_v17 }
 0x558   : > { %5801 = vmatmul.f32.gmra.mxu2 %v11784_v40 }
 0x559   : > { %v10563_v59 = vadd.f32 %v5425_v34, %v5306_v14  ;;  %5994 = vmatmul.f32.gmra.mxu3 %v11785_v39 }
 0x55a   : > { %v4996_v16 = vpop.f32.mrf.mxu0 }
 0x55b   : > { %v4997_v25 = vadd.f32 %v4996_v16, %v10509_v18  ;;  %v5189_v9 = vpop.f32.mrf.mxu1  ;;  %v5310_v44 = vpop.f32.mrf.mxu2 }
 0x55c   : > { %v5431_v38 = vpop.f32.mrf.mxu3 }
 0x55d   : > { %v5190_v60 = vadd.f32 %v5189_v9, %v4997_v25  ;;  %5575 = vmatmul.f32.gmra.mxu0 %v11718_v31 }
 0x55e   : > { %5672 = vmatmul.f32.gmra.mxu1 %v11718_v31  ;;  %v11788_v31 = vld [vmem:[#allocation114_spill] sm:$0xff] }
 0x55f   : > { %v5311_v5 = vadd.f32 %v5310_v44, %v5190_v60  ;;  %v11793_v44 = vld [vmem:[#allocation113_spill] sm:$0xff] }
 0x560   : > { %5809 = vmatmul.f32.gmra.mxu2 %v11786_v56 }
 0x561   : > { %v10570_v0 = vadd.f32 %v5431_v38, %v5311_v5  ;;  %5998 = vmatmul.f32.gmra.mxu3 %v11787_v1 }
 0x562   : > { %v5004_v41 = vpop.f32.mrf.mxu0 }
 0x563   : > { %v5005_v43 = vadd.f32 %v5004_v41, %v10509_v18  ;;  %v5193_v23 = vpop.f32.mrf.mxu1  ;;  %v5315_v52 = vpop.f32.mrf.mxu2 }
 0x564   : > { %v5437_v33 = vpop.f32.mrf.mxu3 }
 0x565   : > { %v5194_v10 = vadd.f32 %v5193_v23, %v5005_v43  ;;  %5579 = vmatmul.f32.gmra.mxu0 %v11723_v27 }
 0x566   : > { %5676 = vmatmul.f32.gmra.mxu1 %v11723_v27  ;;  %v11790_v27 = vld [vmem:[#allocation118_spill] sm:$0xff] }
 0x567   : > { %v5316_v46 = vadd.f32 %v5315_v52, %v5194_v10 }
 0x568   : > { %5817 = vmatmul.f32.gmra.mxu2 %v11788_v31 }
 0x569   : > { %v10577_v57 = vadd.f32 %v5437_v33, %v5316_v46  ;;  %6002 = vmatmul.f32.gmra.mxu3 %v11789_v35  ;;  %v11795_v33 = vld [vmem:[#allocation117_spill] sm:$0xff] }
 0x56a   : > { %v5012_v37 = vpop.f32.mrf.mxu0 }
 0x56b   : > { %v5013_v13 = vadd.f32 %v5012_v37, %v10509_v18  ;;  %v5197_v12 = vpop.f32.mrf.mxu1  ;;  %v5320_v45 = vpop.f32.mrf.mxu2 }
 0x56c   : > { %v5443_v48 = vpop.f32.mrf.mxu3 }
 0x56d   : > { %v5198_v51 = vadd.f32 %v5197_v12, %v5013_v13  ;;  %5583 = vmatmul.f32.gmra.mxu0 %v11728_v15 }
 0x56e   : > { %5680 = vmatmul.f32.gmra.mxu1 %v11728_v15  ;;  %v11792_v15 = vld [vmem:[#allocation121_spill] sm:$0xff] }
 0x56f   : > { %v5321_v19 = vadd.f32 %v5320_v45, %v5198_v51 }
 0x570   : > { %5825 = vmatmul.f32.gmra.mxu2 %v11790_v27 }
 0x571   : > { %v10584_v62 = vadd.f32 %v5443_v48, %v5321_v19  ;;  %6006 = vmatmul.f32.gmra.mxu3 %v11791_v42 }
 0x572   : > { %v5020_v3 = vpop.f32.mrf.mxu0 }
 0x573   : > { %v5021_v34 = vadd.f32 %v5020_v3, %v10509_v18  ;;  %v5201_v17 = vpop.f32.mrf.mxu1  ;;  %v5325_v14 = vpop.f32.mrf.mxu2 }
 0x574   : > { %v5449_v40 = vpop.f32.mrf.mxu3 }
 0x575   : > { %v5202_v16 = vadd.f32 %v5201_v17, %v5021_v34  ;;  %5587 = vmatmul.f32.gmra.mxu0 %v11733_v22 }
 0x576   : > { %5684 = vmatmul.f32.gmra.mxu1 %v11733_v22  ;;  %v11794_v22 = vld [vmem:[#allocation125_spill] sm:$0xff] }
 0x577   : > { %v5326_v25 = vadd.f32 %v5325_v14, %v5202_v16  ;;  %v11798_v16 = vld [vmem:[#allocation124_spill] sm:$0xff] }
 0x578   : > { %5833 = vmatmul.f32.gmra.mxu2 %v11792_v15 }
 0x579   : > { %v10591_v9 = vadd.f32 %v5449_v40, %v5326_v25  ;;  %6010 = vmatmul.f32.gmra.mxu3 %v11793_v44 }
 0x57a   : > { %v5028_v38 = vpop.f32.mrf.mxu0 }
 0x57b   : > { %v5029_v60 = vadd.f32 %v5028_v38, %v10509_v18  ;;  %v5205_v5 = vpop.f32.mrf.mxu1  ;;  %v5330_v56 = vpop.f32.mrf.mxu2 }
 0x57c   : > { %v5455_v41 = vpop.f32.mrf.mxu3 }
 0x57d   : > { %v5206_v43 = vadd.f32 %v5205_v5, %v5029_v60  ;;  %5591 = vmatmul.f32.gmra.mxu0 %v11740_v29 }
 0x57e   : > { %5688 = vmatmul.f32.gmra.mxu1 %v11740_v29  ;;  %v11796_v29 = vld [vmem:[#allocation129_spill] sm:$0xff] }
 0x57f   : > { %v5331_v23 = vadd.f32 %v5330_v56, %v5206_v43 }
 0x580   : > { %5841 = vmatmul.f32.gmra.mxu2 %v11794_v22 }
 0x581   : > { %v10598_v52 = vadd.f32 %v5455_v41, %v5331_v23  ;;  %6014 = vmatmul.f32.gmra.mxu3 %v11795_v33  ;;  %v11800_v23 = vld [vmem:[#allocation128_spill] sm:$0xff] }
 0x582   : > { %v5036_v10 = vpop.f32.mrf.mxu0 }
 0x583   : > { %v5037_v46 = vadd.f32 %v5036_v10, %v10509_v18  ;;  %v5209_v31 = vpop.f32.mrf.mxu1  ;;  %v5335_v37 = vpop.f32.mrf.mxu2 }
 0x584   : > { %v5461_v13 = vpop.f32.mrf.mxu3 }
 0x585   : > { %v5210_v12 = vadd.f32 %v5209_v31, %v5037_v46  ;;  %5595 = vmatmul.f32.gmra.mxu0 %v11747_v53 }
 0x586   : > { %5692 = vmatmul.f32.gmra.mxu1 %v11747_v53  ;;  %v11797_v53 = vld [vmem:[#allocation132_spill] sm:$0xff] }
 0x587   : > { %v5336_v45 = vadd.f32 %v5335_v37, %v5210_v12 }
 0x588   : > { %5849 = vmatmul.f32.gmra.mxu2 %v11796_v29 }
 0x589   : > { %v10605_v48 = vadd.f32 %v5461_v13, %v5336_v45  ;;  %6018 = vmatmul.f32.gmra.mxu3 %v9623_v28 }
 0x58a   : > { %v5044_v51 = vpop.f32.mrf.mxu0 }
 0x58b   : > { %v5045_v19 = vadd.f32 %v5044_v51, %v10509_v18  ;;  %v5213_v27 = vpop.f32.mrf.mxu1  ;;  %v5340_v3 = vpop.f32.mrf.mxu2 }
 0x58c   : > { %v5467_v34 = vpop.f32.mrf.mxu3 }
 0x58d   : > { %v5214_v17 = vadd.f32 %v5213_v27, %v5045_v19  ;;  %5599 = vmatmul.f32.gmra.mxu0 %v11755_v8 }
 0x58e   : > { %5696 = vmatmul.f32.gmra.mxu1 %v11755_v8  ;;  %v11799_v8 = vld [vmem:[#allocation134_spill] sm:$0xff] }
 0x58f   : > { %v5341_v14 = vadd.f32 %v5340_v3, %v5214_v17  ;;  %v11801_v3 = vld [vmem:[#allocation34_spill] sm:$0xff] }
 0x590   : > { %5857 = vmatmul.f32.gmra.mxu2 %v11797_v53 }
 0x591   : > { %v10612_v40 = vadd.f32 %v5467_v34, %v5341_v14  ;;  %6022 = vmatmul.f32.gmra.mxu3 %v11798_v16  ;;  %v11802_v34 = vld [vmem:[#allocation12_spill] sm:$0xff] }
 0x592   : > { %v5052_v25 = vpop.f32.mrf.mxu0 }
 0x593   : > { %v5053_v15 = vadd.f32 %v5052_v25, %v10509_v18  ;;  %v5217_v38 = vpop.f32.mrf.mxu1  ;;  %v5345_v60 = vpop.f32.mrf.mxu2 }
 0x594   : > { %v5473_v5 = vpop.f32.mrf.mxu3 }
 0x595   : > { %v5218_v56 = vadd.f32 %v5217_v38, %v5053_v15  ;;  %5603 = vmatmul.f32.gmra.mxu0 %v11763_v26  ;;  %v11803_v38 = vld [vmem:[#allocation35_spill] sm:$0xff] }
 0x596   : > { %5700 = vmatmul.f32.gmra.mxu1 %v11763_v26 }
 0x597   : > { %v5346_v41 = vadd.f32 %v5345_v60, %v5218_v56  ;;  %v11804_v60 = vld [vmem:[#allocation88_spill] sm:$0xff] }
 0x598   : > { %5865 = vmatmul.f32.gmra.mxu2 %v11799_v8 }
 0x599   : > { %v10619_v43 = vadd.f32 %v5473_v5, %v5346_v41  ;;  %6026 = vmatmul.f32.gmra.mxu3 %v11800_v23 }
 0x59a   : > { %v5060_v22 = vpop.f32.mrf.mxu0 }
 0x59b   : > { %v5061_v10 = vadd.f32 %v5060_v22, %v10509_v18  ;;  %v5221_v46 = vpop.f32.mrf.mxu1  ;;  %v5350_v31 = vpop.f32.mrf.mxu2 }
 0x59c   : > { %v5479_v37 = vpop.f32.mrf.mxu3 }
 0x59d   : > { %v5222_v13 = vadd.f32 %v5221_v46, %v5061_v10  ;;  %5607 = vmatmul.f32.gmra.mxu0 %v11770_v4  ;;  %v11805_v46 = vld [vmem:[#allocation66_spill] sm:$0xff] }
 0x59e   : > { %5704 = vmatmul.f32.gmra.mxu1 %v11770_v4 }
 0x59f   : > { %v5351_v12 = vadd.f32 %v5350_v31, %v5222_v13  ;;  %v11806_v31 = vld [vmem:[#allocation89_spill] sm:$0xff] }
 0x5a0   : > { %6353 = vmatmul.f32.vlgmr.msrb.gmra.mxu2 %v11772_v30 }
 0x5a1   : > { %v10626_v26 = vadd.f32 %v5479_v37, %v5351_v12  ;;  %6450 = vmatmul.f32.vlgmr.msrb.gmra.mxu3 %v11772_v30 }
 0x5a2   : > { %v5548_v45 = vpop.f32.mrf.mxu0 }
 0x5a3   : > { %v5549_v29 = vadd.f32 %v5548_v45, %v10521_v55  ;;  %v5645_v51 = vpop.f32.mrf.mxu1  ;;  %v5746_v18 = vpop.f32.mrf.mxu2 }
 0x5a4   : > { %v5967_v19 = vpop.f32.mrf.mxu3 }
 0x5a5   : > { %v5646_v27 = vadd.f32 %v5645_v51, %v5549_v29  ;;  %6080 = vmatmul.f32.vlgmr.msrb.gmra.mxu0 %v11801_v3 }
 0x5a6   : > { %6194 = vmatmul.f32.vlgmr.msrb.gmra.mxu1 %v11802_v34 }
 0x5a7   : > { %v5747_v17 = vadd.f32 %v5746_v18, %v5646_v27  ;;  %v11807_v18 = vld [vmem:[#allocation90_spill] sm:$0xff] }
 0x5a8   : > { %6357 = vmatmul.f32.gmra.mxu2 %v9352_v49 }
 0x5a9   : > { %v10633_v4 = vadd.f32 %v5967_v19, %v5747_v17  ;;  %6454 = vmatmul.f32.gmra.mxu3 %v9352_v49  ;;  %v11808_v19 = vld [vmem:[#allocation92_spill] sm:$0xff] }
 0x5aa   : > { %v5552_v14 = vpop.f32.mrf.mxu0 }
 0x5ab   : > { %v5553_v30 = vadd.f32 %v5552_v14, %v10528_v50  ;;  %v5649_v53 = vpop.f32.mrf.mxu1  ;;  %v5754_v55 = vpop.f32.mrf.mxu2 }
 0x5ac   : > { %v5971_v25 = vpop.f32.mrf.mxu3 }
 0x5ad   : > { %v5650_v15 = vadd.f32 %v5649_v53, %v5553_v30  ;;  %6085 = vmatmul.f32.gmra.mxu0 %v11803_v38  ;;  %v11809_v53 = vld [vmem:[#allocation93_spill] sm:$0xff] }
 0x5ae   : > { %6200 = vmatmul.f32.gmra.mxu1 %v11804_v60 }
 0x5af   : > { %v5755_v5 = vadd.f32 %v5754_v55, %v5650_v15  ;;  %v11810_v55 = vld [vmem:[#allocation95_spill] sm:$0xff] }
 0x5b0   : > { %6361 = vmatmul.f32.gmra.mxu2 %v11775_v61 }
 0x5b1   : > { %v10640_v56 = vadd.f32 %v5971_v25, %v5755_v5  ;;  %6458 = vmatmul.f32.gmra.mxu3 %v11775_v61 }
 0x5b2   : > { %v5556_v41 = vpop.f32.mrf.mxu0 }
 0x5b3   : > { %v5557_v49 = vadd.f32 %v5556_v41, %v10535_v2  ;;  %v5653_v8 = vpop.f32.mrf.mxu1  ;;  %v5762_v50 = vpop.f32.mrf.mxu2 }
 0x5b4   : > { %v5975_v22 = vpop.f32.mrf.mxu3 }
 0x5b5   : > { %v5654_v10 = vadd.f32 %v5653_v8, %v5557_v49  ;;  %6090 = vmatmul.f32.gmra.mxu0 %v11805_v46  ;;  %v11811_v49 = vld [vmem:[#allocation96_spill] sm:$0xff]  ;;  %v11812_v8 = vld [vmem:[#allocation98_spill] sm:$0xff] }
 0x5b6   : > { %6206 = vmatmul.f32.gmra.mxu1 %v11806_v31 }
 0x5b7   : > { %v5763_v37 = vadd.f32 %v5762_v50, %v5654_v10 }
 0x5b8   : > { %6365 = vmatmul.f32.gmra.mxu2 %v11777_v7 }
 0x5b9   : > { %v10647_v13 = vadd.f32 %v5975_v22, %v5763_v37  ;;  %6462 = vmatmul.f32.gmra.mxu3 %v11777_v7 }
 0x5ba   : > { %v5560_v12 = vpop.f32.mrf.mxu0 }
 0x5bb   : > { %v5561_v61 = vadd.f32 %v5560_v12, %v10542_v63  ;;  %v5657_v45 = vpop.f32.mrf.mxu1  ;;  %v5770_v2 = vpop.f32.mrf.mxu2  ;;  %v11813_v12 = vld [vmem:[#allocation99_spill] sm:$0xff] }
 0x5bc   : > { %v5979_v29 = vpop.f32.mrf.mxu3 }
 0x5bd   : > { %v5658_v51 = vadd.f32 %v5657_v45, %v5561_v61  ;;  %6095 = vmatmul.f32.gmra.mxu0 %v11807_v18  ;;  %v11814_v61 = vld [vmem:[#allocation101_spill] sm:$0xff] }
 0x5be   : > { %6212 = vmatmul.f32.gmra.mxu1 %v11808_v19 }
 0x5bf   : > { %v5771_v27 = vadd.f32 %v5770_v2, %v5658_v51 }
 0x5c0   : > { %6369 = vmatmul.f32.gmra.mxu2 %v11779_v32 }
 0x5c1   : > { %v10654_v3 = vadd.f32 %v5979_v29, %v5771_v27  ;;  %6466 = vmatmul.f32.gmra.mxu3 %v11779_v32  ;;  %v11815_v27 = vld [vmem:[#allocation102_spill] sm:$0xff] }
 0x5c2   : > { %v5564_v34 = vpop.f32.mrf.mxu0 }
 0x5c3   : > { %v5565_v7 = vadd.f32 %v5564_v34, %v10549_v54  ;;  %v5661_v17 = vpop.f32.mrf.mxu1  ;;  %v5778_v63 = vpop.f32.mrf.mxu2  ;;  %v11816_v34 = vld [vmem:[#allocation104_spill] sm:$0xff] }
 0x5c4   : > { %v5983_v14 = vpop.f32.mrf.mxu3 }
 0x5c5   : > { %v5662_v30 = vadd.f32 %v5661_v17, %v5565_v7  ;;  %6100 = vmatmul.f32.gmra.mxu0 %v11809_v53 }
 0x5c6   : > { %6218 = vmatmul.f32.gmra.mxu1 %v11810_v55  ;;  %v11817_v55 = vld [vmem:[#allocation105_spill] sm:$0xff] }
 0x5c7   : > { %v5779_v25 = vadd.f32 %v5778_v63, %v5662_v30 }
 0x5c8   : > { %6373 = vmatmul.f32.gmra.mxu2 %v11781_v11 }
 0x5c9   : > { %v10661_v15 = vadd.f32 %v5983_v14, %v5779_v25  ;;  %6470 = vmatmul.f32.gmra.mxu3 %v11781_v11  ;;  %v11818_v25 = vld [vmem:[#allocation107_spill] sm:$0xff] }
 0x5ca   : > { %v5568_v38 = vpop.f32.mrf.mxu0 }
 0x5cb   : > { %v5569_v32 = vadd.f32 %v5568_v38, %v10556_v24  ;;  %v5665_v60 = vpop.f32.mrf.mxu1  ;;  %v5786_v54 = vpop.f32.mrf.mxu2 }
 0x5cc   : > { %v5987_v5 = vpop.f32.mrf.mxu3 }
 0x5cd   : > { %v5666_v41 = vadd.f32 %v5665_v60, %v5569_v32  ;;  %6105 = vmatmul.f32.gmra.mxu0 %v11811_v49  ;;  %v11819_v49 = vld [vmem:[#allocation108_spill] sm:$0xff] }
 0x5ce   : > { %6224 = vmatmul.f32.gmra.mxu1 %v11812_v8  ;;  %v11820_v8 = vld [vmem:[#allocation111_spill] sm:$0xff] }
 0x5cf   : > { %v5787_v50 = vadd.f32 %v5786_v54, %v5666_v41 }
 0x5d0   : > { %6377 = vmatmul.f32.gmra.mxu2 %v11783_v21 }
 0x5d1   : > { %v10668_v22 = vadd.f32 %v5987_v5, %v5787_v50  ;;  %6474 = vmatmul.f32.gmra.mxu3 %v11783_v21 }
 0x5d2   : > { %v5572_v10 = vpop.f32.mrf.mxu0 }
 0x5d3   : > { %v5573_v11 = vadd.f32 %v5572_v10, %v10563_v59  ;;  %v5669_v46 = vpop.f32.mrf.mxu1  ;;  %v5794_v24 = vpop.f32.mrf.mxu2 }
 0x5d4   : > { %v5991_v31 = vpop.f32.mrf.mxu3 }
 0x5d5   : > { %v5670_v37 = vadd.f32 %v5669_v46, %v5573_v11  ;;  %6110 = vmatmul.f32.gmra.mxu0 %v11813_v12  ;;  %v11822_v12 = vld [vmem:[#allocation115_spill] sm:$0xff] }
 0x5d6   : > { %6230 = vmatmul.f32.gmra.mxu1 %v11814_v61 }
 0x5d7   : > { %v5795_v45 = vadd.f32 %v5794_v24, %v5670_v37  ;;  %v11821_v37 = vld [vmem:[#allocation112_spill] sm:$0xff] }
 0x5d8   : > { %6381 = vmatmul.f32.gmra.mxu2 %v11785_v39 }
 0x5d9   : > { %v10675_v2 = vadd.f32 %v5991_v31, %v5795_v45  ;;  %6478 = vmatmul.f32.gmra.mxu3 %v11785_v39 }
 0x5da   : > { %v5576_v29 = vpop.f32.mrf.mxu0 }
 0x5db   : > { %v5577_v21 = vadd.f32 %v5576_v29, %v10570_v0  ;;  %v5673_v51 = vpop.f32.mrf.mxu1  ;;  %v5802_v59 = vpop.f32.mrf.mxu2 }
 0x5dc   : > { %v5995_v18 = vpop.f32.mrf.mxu3 }
 0x5dd   : > { %v5674_v19 = vadd.f32 %v5673_v51, %v5577_v21  ;;  %6115 = vmatmul.f32.gmra.mxu0 %v11815_v27 }
 0x5de   : > { %6236 = vmatmul.f32.gmra.mxu1 %v11816_v34 }
 0x5df   : > { %v5803_v7 = vadd.f32 %v5802_v59, %v5674_v19  ;;  %v11824_v19 = vld [vmem:[#allocation119_spill] sm:$0xff] }
 0x5e0   : > { %6385 = vmatmul.f32.gmra.mxu2 %v11787_v1 }
 0x5e1   : > { %v10682_v17 = vadd.f32 %v5995_v18, %v5803_v7  ;;  %6482 = vmatmul.f32.gmra.mxu3 %v11787_v1  ;;  %v11823_v18 = vld [vmem:[#allocation116_spill] sm:$0xff] }
 0x5e2   : > { %v5580_v63 = vpop.f32.mrf.mxu0 }
 0x5e3   : > { %v5581_v39 = vadd.f32 %v5580_v63, %v10577_v57  ;;  %v5677_v14 = vpop.f32.mrf.mxu1  ;;  %v5810_v0 = vpop.f32.mrf.mxu2 }
 0x5e4   : > { %v5999_v30 = vpop.f32.mrf.mxu3 }
 0x5e5   : > { %v5678_v53 = vadd.f32 %v5677_v14, %v5581_v39  ;;  %6120 = vmatmul.f32.gmra.mxu0 %v11817_v55 }
 0x5e6   : > { %6242 = vmatmul.f32.gmra.mxu1 %v11818_v25 }
 0x5e7   : > { %v5811_v38 = vadd.f32 %v5810_v0, %v5678_v53  ;;  %v11825_v0 = vld [vmem:[#allocation120_spill] sm:$0xff] }
 0x5e8   : > { %6389 = vmatmul.f32.gmra.mxu2 %v11789_v35 }
 0x5e9   : > { %v10689_v32 = vadd.f32 %v5999_v30, %v5811_v38  ;;  %6486 = vmatmul.f32.gmra.mxu3 %v11789_v35  ;;  %v11826_v30 = vld [vmem:[#allocation122_spill] sm:$0xff] }
 0x5ea   : > { %v5584_v60 = vpop.f32.mrf.mxu0 }
 0x5eb   : > { %v5585_v1 = vadd.f32 %v5584_v60, %v10584_v62  ;;  %v5681_v54 = vpop.f32.mrf.mxu1  ;;  %v5818_v57 = vpop.f32.mrf.mxu2 }
 0x5ec   : > { %v6003_v5 = vpop.f32.mrf.mxu3 }
 0x5ed   : > { %v5682_v41 = vadd.f32 %v5681_v54, %v5585_v1  ;;  %6125 = vmatmul.f32.gmra.mxu0 %v11819_v49  ;;  %v11827_v54 = vld [vmem:[#allocation123_spill] sm:$0xff] }
 0x5ee   : > { %6248 = vmatmul.f32.gmra.mxu1 %v11820_v8 }
 0x5ef   : > { %v5819_v50 = vadd.f32 %v5818_v57, %v5682_v41  ;;  %v11828_v57 = vld [vmem:[#allocation126_spill] sm:$0xff] }
 0x5f0   : > { %6393 = vmatmul.f32.gmra.mxu2 %v11791_v42 }
 0x5f1   : > { %v10696_v10 = vadd.f32 %v6003_v5, %v5819_v50  ;;  %6490 = vmatmul.f32.gmra.mxu3 %v11791_v42 }
 0x5f2   : > { %v5588_v11 = vpop.f32.mrf.mxu0 }
 0x5f3   : > { %v5589_v35 = vadd.f32 %v5588_v11, %v10591_v9  ;;  %v5685_v46 = vpop.f32.mrf.mxu1  ;;  %v5826_v62 = vpop.f32.mrf.mxu2 }
 0x5f4   : > { %v6007_v24 = vpop.f32.mrf.mxu3 }
 0x5f5   : > { %v5686_v31 = vadd.f32 %v5685_v46, %v5589_v35  ;;  %6130 = vmatmul.f32.gmra.mxu0 %v11821_v37  ;;  %v11829_v35 = vld [vmem:[#allocation127_spill] sm:$0xff]  ;;  %v11830_v46 = vld [vmem:[#allocation130_spill] sm:$0xff] }
 0x5f6   : > { %6254 = vmatmul.f32.gmra.mxu1 %v11822_v12 }
 0x5f7   : > { %v5827_v61 = vadd.f32 %v5826_v62, %v5686_v31 }
 0x5f8   : > { %6397 = vmatmul.f32.gmra.mxu2 %v11793_v44 }
 0x5f9   : > { %v10703_v45 = vadd.f32 %v6007_v24, %v5827_v61  ;;  %6494 = vmatmul.f32.gmra.mxu3 %v11793_v44 }
 0x5fa   : > { %v5592_v29 = vpop.f32.mrf.mxu0 }
 0x5fb   : > { %v5593_v42 = vadd.f32 %v5592_v29, %v10598_v52  ;;  %v5689_v21 = vpop.f32.mrf.mxu1  ;;  %v5834_v9 = vpop.f32.mrf.mxu2  ;;  %v11831_v29 = vld [vmem:[#allocation131_spill] sm:$0xff] }
 0x5fc   : > { %v6011_v51 = vpop.f32.mrf.mxu3 }
 0x5fd   : > { %v5690_v59 = vadd.f32 %v5689_v21, %v5593_v42  ;;  %6135 = vmatmul.f32.gmra.mxu0 %v11823_v18  ;;  %v11832_v42 = vld [vmem:[#allocation133_spill] sm:$0xff] }
 0x5fe   : > { %6260 = vmatmul.f32.gmra.mxu1 %v11824_v19 }
 0x5ff   : > { %v5835_v27 = vadd.f32 %v5834_v9, %v5690_v59 }
 0x600   : > { %6401 = vmatmul.f32.gmra.mxu2 %v11795_v33 }
 0x601   : > { %v10710_v34 = vadd.f32 %v6011_v51, %v5835_v27  ;;  %6498 = vmatmul.f32.gmra.mxu3 %v11795_v33 }
 0x602   : > { %v5596_v7 = vpop.f32.mrf.mxu0 }
 0x603   : > { %v5597_v44 = vadd.f32 %v5596_v7, %v10605_v48  ;;  %v5693_v63 = vpop.f32.mrf.mxu1  ;;  %v5842_v52 = vpop.f32.mrf.mxu2 }
 0x604   : > { %v6015_v39 = vpop.f32.mrf.mxu3 }
 0x605   : > { %v5694_v14 = vadd.f32 %v5693_v63, %v5597_v44  ;;  %6140 = vmatmul.f32.gmra.mxu0 %v11825_v0  ;;  %v11833_v44 = vld [vmem:[#allocation52_spill] sm:$0xff] }
 0x606   : > { %6266 = vmatmul.f32.gmra.mxu1 %v11826_v30  ;;  %v6514_v63 = vmax.f32 %v11833_v44, 0.0 }
 0x607   : > { %v5843_v53 = vadd.f32 %v5842_v52, %v5694_v14 }
 0x608   : > { %6405 = vmatmul.f32.gmra.mxu2 %v9623_v28 }
 0x609   : > { %v10717_v55 = vadd.f32 %v6015_v39, %v5843_v53  ;;  %6502 = vmatmul.f32.gmra.mxu3 %v9623_v28 }
 0x60a   : > { %v5600_v25 = vpop.f32.mrf.mxu0 }
 0x60b   : > { %v5601_v33 = vadd.f32 %v5600_v25, %v10612_v40  ;;  %v5697_v38 = vpop.f32.mrf.mxu1  ;;  %v5850_v48 = vpop.f32.mrf.mxu2 }
 0x60c   : > { %v6019_v60 = vpop.f32.mrf.mxu3 }
 0x60d   : > { %v5698_v1 = vadd.f32 %v5697_v38, %v5601_v33  ;;  %6145 = vmatmul.f32.gmra.mxu0 %v11827_v54 }
 0x60e   : > { %6272 = vmatmul.f32.gmra.mxu1 %v11828_v57  ;;  %v11834_v57 = vld [vmem:[#allocation19_spill] sm:$0xff] }
 0x60f   : > { %v5851_v5 = vadd.f32 %v5850_v48, %v5698_v1 }
 0x610   : > { %6409 = vmatmul.f32.gmra.mxu2 %v11798_v16 }
 0x611   : > { %v10724_v41 = vadd.f32 %v6019_v60, %v5851_v5  ;;  %6506 = vmatmul.f32.gmra.mxu3 %v11798_v16  ;;  %v6516_v5 = vmax.f32 %v11834_v57, 0.0 }
 0x612   : > { %v5604_v49 = vpop.f32.mrf.mxu0 }
 0x613   : > { %v5605_v28 = vadd.f32 %v5604_v49, %v10619_v43  ;;  %v5701_v8 = vpop.f32.mrf.mxu1  ;;  %v5858_v40 = vpop.f32.mrf.mxu2 }
 0x614   : > { %v6023_v50 = vpop.f32.mrf.mxu3 }
 0x615   : > { %v5702_v11 = vadd.f32 %v5701_v8, %v5605_v28  ;;  %6150 = vmatmul.f32.gmra.mxu0 %v11829_v35 }
 0x616   : > { %6278 = vmatmul.f32.gmra.mxu1 %v11830_v46 }
 0x617   : > { %v5859_v62 = vadd.f32 %v5858_v40, %v5702_v11 }
 0x618   : > { %6413 = vmatmul.f32.gmra.mxu2 %v11800_v23 }
 0x619   : > { %v10731_v24 = vadd.f32 %v6023_v50, %v5859_v62  ;;  %6510 = vmatmul.f32.gmra.mxu3 %v11800_v23 }
 0x61a   : > { %v5608_v31 = vpop.f32.mrf.mxu0 }
 0x61b   : > { %v5609_v16 = vadd.f32 %v5608_v31, %v10626_v26  ;;  %v5705_v37 = vpop.f32.mrf.mxu1  ;;  %v5866_v43 = vpop.f32.mrf.mxu2  ;;  %v6546_v26 = vld [vmem:[%s10858_s7] sm:$0x3] }
 0x61c   : > { %v6027_v12 = vpop.f32.mrf.mxu3  ;;  %v10744_v39 = vperm.slane %v6546_v26, 1  ;;  %v10746_v14 = vperm.slane %v6546_v26, 0  ;;  %v11836_v26 = vld [vmem:[#allocation17_spill] sm:$0xff] }
 0x61d   : > { %v5706_v61 = vadd.f32 %v5705_v37, %v5609_v16  ;;  %6155 = vmatmul.f32.gmra.mxu0 %v11831_v29  ;;  %v11835_v37 = vld [vmem:[#allocation59_spill] sm:$0xff] }
 0x61e   : > { %6284 = vmatmul.f32.gmra.mxu1 %v11832_v42  ;;  %v6552_v48 = vmul.f32 %v10746_v14, %v6514_v63  ;;  %v6554_v62 = vmul.f32 %v10746_v14, %v6516_v5 }
 0x61f   : > { %v5867_v21 = vadd.f32 %v5866_v43, %v5706_v61  ;;  %v6518_v43 = vmax.f32 %v11835_v37, 0.0 }
 0x621   : > { %v10737_v9 = vadd.f32 %v6027_v12, %v5867_v21 }
 0x622   : > { %v6081_v51 = vpop.f32.mrf.mxu0 }
 0x623   : > { %v6082_v59 = vadd.f32 %v6081_v51, %v10633_v4  ;;  %v6195_v18 = vpop.f32.mrf.mxu1  ;;  %v6354_v19 = vpop.f32.mrf.mxu2 }
 0x624   : > { %v6451_v23 = vpop.f32.mrf.mxu3 }
 0x625   : > { %v6196_v27 = vadd.f32 %v6195_v18, %v6082_v59  ;;  %v6556_v18 = vmul.f32 %v10746_v14, %v6518_v43 }
 0x627   : > { %v6355_v7 = vadd.f32 %v6354_v19, %v6196_v27 }
 0x629   : > { %v6452_v52 = vadd.f32 %v6451_v23, %v6355_v7  ;;  %v6520_v7 = vmax.f32 %v11836_v26, 0.0 }
 0x62a   : > { %v6086_v0 = vpop.f32.mrf.mxu0 }
 0x62b   : > { %v6515_v30 = vmax.f32 %v6452_v52, 0.0  ;;  %v6087_v4 = vadd.f32 %v6086_v0, %v10640_v56  ;;  %v6201_v53 = vpop.f32.mrf.mxu1  ;;  %v6358_v25 = vpop.f32.mrf.mxu2 }
 0x62c   : > { %v6455_v33 = vpop.f32.mrf.mxu3 }
 0x62d   : > { %v6202_v38 = vadd.f32 %v6201_v53, %v6087_v4  ;;  %v6553_v60 = vmul.f32 %v10744_v39, %v6515_v30 }
 0x62f   : > { %v6359_v1 = vadd.f32 %v6358_v25, %v6202_v38  ;;  %v6584_v54 = vadd.f32 %v6553_v60, %v6552_v48  ;;  %v11837_v60 = vld [vmem:[#allocation56_spill] sm:$0xff] }
 0x631   : > { %v6456_v49 = vadd.f32 %v6455_v33, %v6359_v1  ;;  %6585 = vadd.xlane.f32.xlu0 %v6584_v54  ;;  %v6558_v33 = vmul.f32 %v10746_v14, %v6520_v7  ;;  %v6522_v1 = vmax.f32 %v11837_v60, 0.0 }
 0x632   : > { %v6091_v28 = vpop.f32.mrf.mxu0 }
 0x633   : > { %v6517_v8 = vmax.f32 %v6456_v49, 0.0  ;;  %v6092_v40 = vadd.f32 %v6091_v28, %v10647_v13  ;;  %v6207_v50 = vpop.f32.mrf.mxu1  ;;  %v6362_v56 = vpop.f32.mrf.mxu2 }
 0x634   : > { %v6459_v11 = vpop.f32.mrf.mxu3 }
 0x635   : > { %v6555_v35 = vmul.f32 %v10744_v39, %v6517_v8  ;;  %v6208_v46 = vadd.f32 %v6207_v50, %v6092_v40  ;;  %v6560_v50 = vmul.f32 %v10746_v14, %v6522_v1 }
 0x637   : > { %v6363_v31 = vadd.f32 %v6362_v56, %v6208_v46  ;;  %v6587_v16 = vadd.f32 %v6555_v35, %v6554_v62  ;;  %v11838_v46 = vld [vmem:[#allocation49_spill] sm:$0xff] }
 0x638   : > { %v6524_v62 = vmax.f32 %v11838_v46, 0.0 }
 0x639   : > { %v6460_v12 = vadd.f32 %v6459_v11, %v6363_v31  ;;  %6588 = vadd.xlane.f32.xlu0 %v6587_v16 }
 0x63a   : > { %v6096_v61 = vpop.f32.mrf.mxu0 }
 0x63b   : > { %v6519_v29 = vmax.f32 %v6460_v12, 0.0  ;;  %v6097_v42 = vadd.f32 %v6096_v61, %v10654_v3  ;;  %v6213_v21 = vpop.f32.mrf.mxu1  ;;  %v6366_v13 = vpop.f32.mrf.mxu2 }
 0x63c   : > { %v6463_v51 = vpop.f32.mrf.mxu3 }
 0x63d   : > { %v6214_v59 = vadd.f32 %v6213_v21, %v6097_v42  ;;  %v6557_v19 = vmul.f32 %v10744_v39, %v6519_v29  ;;  %v6562_v21 = vmul.f32 %v10746_v14, %v6524_v62 }
 0x63f   : > { %v6367_v23 = vadd.f32 %v6366_v13, %v6214_v59  ;;  %v6590_v27 = vadd.f32 %v6557_v19, %v6556_v18  ;;  %v11839_v59 = vld [vmem:[#allocation63_spill] sm:$0xff] }
 0x640   : > { %v6526_v18 = vmax.f32 %v11839_v59, 0.0 }
 0x641   : > { %v6464_v44 = vadd.f32 %v6463_v51, %v6367_v23  ;;  %6591 = vadd.xlane.f32.xlu1 %v6590_v27 }
 0x642   : > { %v6101_v63 = vpop.f32.mrf.mxu0 }
 0x643   : > { %v6521_v52 = vmax.f32 %v6464_v44, 0.0  ;;  %v6102_v0 = vadd.f32 %v6101_v63, %v10661_v15  ;;  %v6219_v30 = vpop.f32.mrf.mxu1  ;;  %v6370_v3 = vpop.f32.mrf.mxu2 }
 0x644   : > { %v6467_v4 = vpop.f32.mrf.mxu3 }
 0x645   : > { %v6559_v53 = vmul.f32 %v10744_v39, %v6521_v52  ;;  %v6220_v25 = vadd.f32 %v6219_v30, %v6102_v0  ;;  %v6564_v0 = vmul.f32 %v10746_v14, %v6526_v18 }
 0x647   : > { %v6371_v38 = vadd.f32 %v6370_v3, %v6220_v25  ;;  %v6593_v48 = vadd.f32 %v6559_v53, %v6558_v33 }
 0x649   : > { %v6468_v54 = vadd.f32 %v6467_v4, %v6371_v38  ;;  %6594 = vadd.xlane.f32.xlu1 %v6593_v48  ;;  %v11840_v4 = vld [vmem:[#allocation18_spill] sm:$0xff] }
 0x64a   : > { %v6106_v57 = vpop.f32.mrf.mxu0  ;;  %v6528_v53 = vmax.f32 %v11840_v4, 0.0 }
 0x64b   : > { %v6523_v5 = vmax.f32 %v6468_v54, 0.0  ;;  %v6107_v49 = vadd.f32 %v6106_v57, %v10668_v22  ;;  %v6225_v28 = vpop.f32.mrf.mxu1  ;;  %v6374_v15 = vpop.f32.mrf.mxu2 }
 0x64c   : > { %v6471_v8 = vpop.f32.mrf.mxu3 }
 0x64d   : > { %v6226_v40 = vadd.f32 %v6225_v28, %v6107_v49  ;;  %v6561_v56 = vmul.f32 %v10744_v39, %v6523_v5  ;;  %v6566_v5 = vmul.f32 %v10746_v14, %v6528_v53 }
 0x64f   : > { %v6375_v11 = vadd.f32 %v6374_v15, %v6226_v40  ;;  %v6596_v35 = vadd.f32 %v6561_v56, %v6560_v50  ;;  %v11841_v15 = vld [vmem:[#allocation50_spill] sm:$0xff] }
 0x651   : > { %v6472_v31 = vadd.f32 %v6471_v8, %v6375_v11  ;;  %6597 = vadd.xlane.f32.xlu2 %v6596_v35  ;;  %v6530_v8 = vmax.f32 %v11841_v15, 0.0 }
 0x652   : > { %v6111_v16 = vpop.f32.mrf.mxu0 }
 0x653   : > { %v6525_v37 = vmax.f32 %v6472_v31, 0.0  ;;  %v6112_v43 = vadd.f32 %v6111_v16, %v10675_v2  ;;  %v6231_v12 = vpop.f32.mrf.mxu1  ;;  %v6378_v22 = vpop.f32.mrf.mxu2  ;;  %v6568_v16 = vmul.f32 %v10746_v14, %v6530_v8 }
 0x654   : > { %v6475_v61 = vpop.f32.mrf.mxu3 }
 0x655   : > { %v6563_v29 = vmul.f32 %v10744_v39, %v6525_v37  ;;  %v6232_v42 = vadd.f32 %v6231_v12, %v6112_v43  ;;  %v11842_v12 = vld [vmem:[#allocation54_spill] sm:$0xff] }
 0x657   : > { %v6379_v13 = vadd.f32 %v6378_v22, %v6232_v42  ;;  %v6599_v51 = vadd.f32 %v6563_v29, %v6562_v21  ;;  %v6532_v22 = vmax.f32 %v11842_v12, 0.0 }
 0x659   : > { %v6476_v19 = vadd.f32 %v6475_v61, %v6379_v13  ;;  %6600 = vadd.xlane.f32.xlu2 %v6599_v51 }
 0x65a   : > { %v6116_v23 = vpop.f32.mrf.mxu0 }
 0x65b   : > { %v6527_v27 = vmax.f32 %v6476_v19, 0.0  ;;  %v6117_v26 = vadd.f32 %v6116_v23, %v10682_v17  ;;  %v6237_v7 = vpop.f32.mrf.mxu1  ;;  %v6382_v2 = vpop.f32.mrf.mxu2  ;;  %v6570_v19 = vmul.f32 %v10746_v14, %v6532_v22 }
 0x65c   : > { %v6479_v44 = vpop.f32.mrf.mxu3 }
 0x65d   : > { %v6565_v63 = vmul.f32 %v10744_v39, %v6527_v27  ;;  %v6238_v52 = vadd.f32 %v6237_v7, %v6117_v26  ;;  %v11843_v26 = vld [vmem:[#allocation68_spill] sm:$0xff] }
 0x65e   : > { %v6534_v7 = vmax.f32 %v11843_v26, 0.0 }
 0x65f   : > { %v6383_v30 = vadd.f32 %v6382_v2, %v6238_v52  ;;  %v6602_v3 = vadd.f32 %v6565_v63, %v6564_v0 }
 0x660   : > { %v6572_v53 = vmul.f32 %v10746_v14, %v6534_v7 }
 0x661   : > { %v6480_v25 = vadd.f32 %v6479_v44, %v6383_v30  ;;  %6603 = vadd.xlane.f32.xlu0 %v6602_v3 }
 0x662   : > { %v6121_v33 = vpop.f32.mrf.mxu0 }
 0x663   : > { %v6529_v38 = vmax.f32 %v6480_v25, 0.0  ;;  %v6122_v48 = vadd.f32 %v6121_v33, %v10689_v32  ;;  %v6243_v60 = vpop.f32.mrf.mxu1  ;;  %v6386_v17 = vpop.f32.mrf.mxu2 }
 0x664   : > { %v6483_v1 = vpop.f32.mrf.mxu3 }
 0x665   : > { %v6567_v54 = vmul.f32 %v10744_v39, %v6529_v38  ;;  %v6244_v57 = vadd.f32 %v6243_v60, %v6122_v48  ;;  %v6536_v38 = vmax.f32 %v10439_v6, 0.0 }
 0x667   : > { %v6387_v49 = vadd.f32 %v6386_v17, %v6244_v57  ;;  %v6605_v28 = vadd.f32 %v6567_v54, %v6566_v5 }
 0x669   : > { %v6484_v40 = vadd.f32 %v6483_v1, %v6387_v49  ;;  %6606 = vadd.xlane.f32.xlu1 %v6605_v28  ;;  %v6574_v28 = vmul.f32 %v10746_v14, %v6536_v38 }
 0x66a   : > { %v6126_v50 = vpop.f32.mrf.mxu0 }
 0x66b   : > { %v6531_v56 = vmax.f32 %v6484_v40, 0.0  ;;  %v6127_v11 = vadd.f32 %v6126_v50, %v10696_v10  ;;  %v6249_v35 = vpop.f32.mrf.mxu1  ;;  %v6390_v32 = vpop.f32.mrf.mxu2  ;;  %v6538_v40 = vmax.f32 %v10455_v47, 0.0 }
 0x66c   : > { %v6487_v46 = vpop.f32.mrf.mxu3 }
 0x66d   : > { %v6569_v62 = vmul.f32 %v10744_v39, %v6531_v56  ;;  %v6250_v31 = vadd.f32 %v6249_v35, %v6127_v11 }
 0x66f   : > { %v6391_v37 = vadd.f32 %v6390_v32, %v6250_v31  ;;  %v6608_v43 = vadd.f32 %v6569_v62, %v6568_v16  ;;  %v6576_v31 = vmul.f32 %v10746_v14, %v6538_v40 }
 0x671   : > { %v6488_v61 = vadd.f32 %v6487_v46, %v6391_v37  ;;  %6609 = vadd.xlane.f32.xlu2 %v6608_v43  ;;  %v6540_v43 = vmax.f32 %v10474_v20, 0.0 }
 0x672   : > { %v6131_v29 = vpop.f32.mrf.mxu0 }
 0x673   : > { %v6533_v42 = vmax.f32 %v6488_v61, 0.0  ;;  %v6132_v21 = vadd.f32 %v6131_v29, %v10703_v45  ;;  %v6255_v13 = vpop.f32.mrf.mxu1  ;;  %v6394_v10 = vpop.f32.mrf.mxu2 }
 0x674   : > { %v6491_v51 = vpop.f32.mrf.mxu3 }
 0x675   : > { %v6571_v59 = vmul.f32 %v10744_v39, %v6533_v42  ;;  %v6256_v18 = vadd.f32 %v6255_v13, %v6132_v21  ;;  %v6578_v13 = vmul.f32 %v10746_v14, %v6540_v43 }
 0x677   : > { %v6395_v23 = vadd.f32 %v6394_v10, %v6256_v18  ;;  %v6611_v27 = vadd.f32 %v6571_v59, %v6570_v19  ;;  %v6542_v18 = vmax.f32 %v10493_v36, 0.0 }
 0x679   : > { %v6492_v2 = vadd.f32 %v6491_v51, %v6395_v23  ;;  %6612 = vadd.xlane.f32.xlu0 %v6611_v27 }
 0x67a   : > { %v6136_v44 = vpop.f32.mrf.mxu0 }
 0x67b   : > { %v6535_v63 = vmax.f32 %v6492_v2, 0.0  ;;  %v6137_v52 = vadd.f32 %v6136_v44, %v10710_v34  ;;  %v6261_v0 = vpop.f32.mrf.mxu1  ;;  %v6398_v45 = vpop.f32.mrf.mxu2  ;;  %v6580_v2 = vmul.f32 %v10746_v14, %v6542_v18 }
 0x67c   : > { %v6495_v30 = vpop.f32.mrf.mxu3 }
 0x67d   : > { %v6573_v3 = vmul.f32 %v10744_v39, %v6535_v63  ;;  %v6262_v4 = vadd.f32 %v6261_v0, %v6137_v52 }
 0x67f   : > { %v6399_v25 = vadd.f32 %v6398_v45, %v6262_v4  ;;  %v6614_v33 = vadd.f32 %v6573_v3, %v6572_v53  ;;  %v6544_v45 = vmax.f32 %v10513_v58, 0.0 }
 0x681   : > { %v6496_v48 = vadd.f32 %v6495_v30, %v6399_v25  ;;  %6615 = vadd.xlane.f32.xlu1 %v6614_v33  ;;  %v6805_v30 = vld [vmem:[#allocation2] ss:$0 sm:$0xff]  ;;  %v6582_v58 = vmul.f32 %v10746_v14, %v6544_v45 }
 0x682   : > { %v6141_v60 = vpop.f32.mrf.mxu0 }
 0x683   : > { %v6537_v17 = vmax.f32 %v6496_v48, 0.0  ;;  %v6142_v1 = vadd.f32 %v6141_v60, %v10717_v55  ;;  %v6267_v54 = vpop.f32.mrf.mxu1  ;;  %v6402_v34 = vpop.f32.mrf.mxu2 }
 0x684   : > { %v6499_v57 = vpop.f32.mrf.mxu3 }
 0x685   : > { %v6575_v5 = vmul.f32 %v10744_v39, %v6537_v17  ;;  %v6268_v49 = vadd.f32 %v6267_v54, %v6142_v1 }
 0x687   : > { %v6403_v15 = vadd.f32 %v6402_v34, %v6268_v49  ;;  %v6617_v8 = vadd.f32 %v6575_v5, %v6574_v28 }
 0x689   : > { %v6500_v50 = vadd.f32 %v6499_v57, %v6403_v15  ;;  %6618 = vadd.xlane.f32.xlu2 %v6617_v8 }
 0x68a   : > { %v6146_v6 = vpop.f32.mrf.mxu0 }
 0x68b   : > { %v6539_v56 = vmax.f32 %v6500_v50, 0.0  ;;  %v6147_v11 = vadd.f32 %v6146_v6, %v10724_v41  ;;  %v6273_v35 = vpop.f32.mrf.mxu1  ;;  %v6406_v55 = vpop.f32.mrf.mxu2 }
 0x68c   : > { %v6503_v32 = vpop.f32.mrf.mxu3 }
 0x68d   : > { %v6577_v46 = vmul.f32 %v10744_v39, %v6539_v56  ;;  %v6274_v62 = vadd.f32 %v6273_v35, %v6147_v11 }
 0x68f   : > { %v6407_v16 = vadd.f32 %v6406_v55, %v6274_v62  ;;  %v6620_v37 = vadd.f32 %v6577_v46, %v6576_v31 }
 0x691   : > { %v6504_v12 = vadd.f32 %v6503_v32, %v6407_v16  ;;  %6621 = vadd.xlane.f32.xlu0 %v6620_v37 }
 0x692   : > { %v6151_v47 = vpop.f32.mrf.mxu0 }
 0x693   : > { %v6541_v22 = vmax.f32 %v6504_v12, 0.0  ;;  %v6152_v61 = vadd.f32 %v6151_v47, %v10731_v24  ;;  %v6279_v29 = vpop.f32.mrf.mxu1  ;;  %v6410_v41 = vpop.f32.mrf.mxu2 }
 0x694   : > { %v6507_v10 = vpop.f32.mrf.mxu3 }
 0x695   : > { %v6579_v42 = vmul.f32 %v10744_v39, %v6541_v22  ;;  %v6280_v21 = vadd.f32 %v6279_v29, %v6152_v61 }
 0x697   : > { %v6411_v51 = vadd.f32 %v6410_v41, %v6280_v21  ;;  %v6623_v59 = vadd.f32 %v6579_v42, %v6578_v13 }
 0x699   : > { %v6508_v19 = vadd.f32 %v6507_v10, %v6411_v51  ;;  %6624 = vadd.xlane.f32.xlu1 %v6623_v59 }
 0x69a   : > { %v6156_v20 = vpop.f32.mrf.mxu0 }
 0x69b   : > { %v6543_v23 = vmax.f32 %v6508_v19, 0.0  ;;  %v6157_v27 = vadd.f32 %v6156_v20, %v10737_v9  ;;  %v6285_v24 = vpop.f32.mrf.mxu1  ;;  %v6414_v44 = vpop.f32.mrf.mxu2 }
 0x69c   : > { %v6511_v0 = vpop.f32.mrf.mxu3 }
 0x69d   : > { %v6581_v26 = vmul.f32 %v10744_v39, %v6543_v23  ;;  %v6286_v7 = vadd.f32 %v6285_v24, %v6157_v27 }
 0x69f   : > { %v6415_v63 = vadd.f32 %v6414_v44, %v6286_v7  ;;  %v6626_v52 = vadd.f32 %v6581_v26, %v6580_v2 }
 0x6a1   : > { %v6512_v36 = vadd.f32 %v6511_v0, %v6415_v63  ;;  %6627 = vadd.xlane.f32.xlu2 %v6626_v52 }
 0x6a3   : > { %v6545_v3 = vmax.f32 %v6512_v36, 0.0 }
 0x6a4   : > { %v6586_v9 = vpop.xlane.xlu0 %6585 }
 0x6a5   : > { %v6583_v4 = vmul.f32 %v10744_v39, %v6545_v3  ;;  %v6636_v53 = vadd.f32 %v6805_v30, %v6586_v9 }
 0x6a7   : > { %6653 = vst.msk [vmem:[%s10812_s8] sm:$0xff] %vm6652_vm4, %v6636_v53  ;;  %v6629_v25 = vadd.f32 %v6583_v4, %v6582_v58 }
 0x6a9   : > { %6630 = vadd.xlane.f32.xlu0 %v6629_v25 }
 0x6ac   : > { %v6589_v33 = vpop.xlane.xlu0 %6588 }
 0x6ad   : > { %v6637_v38 = vadd.f32 %v6805_v30, %v6589_v33 }
 0x6af   : > { %6654 = vst.msk [vmem:[%s10812_s8 + $0x8] sm:$0xff] %vm6652_vm4, %v6637_v38 }
 0x6b4   : > { %v6592_v48 = vpop.xlane.xlu1 %6591 }
 0x6b5   : > { %v6638_v60 = vadd.f32 %v6805_v30, %v6592_v48 }
 0x6b7   : > { %6655 = vst.msk [vmem:[%s10812_s8 + $0x10] sm:$0xff] %vm6652_vm4, %v6638_v60 }
 0x6bc   : > { %v6595_v39 = vpop.xlane.xlu1 %6594 }
 0x6bd   : > { %v6639_v17 = vadd.f32 %v6805_v30, %v6595_v39 }
 0x6bf   : > { %6656 = vst.msk [vmem:[%s10812_s8 + $0x18] sm:$0xff] %vm6652_vm4, %v6639_v17 }
 0x6c4   : > { %v6598_v14 = vpop.xlane.xlu2 %6597 }
 0x6c5   : > { %v6640_v1 = vadd.f32 %v6805_v30, %v6598_v14 }
 0x6c7   : > { %6657 = vst.msk [vmem:[%s10812_s8 + $0x20] sm:$0xff] %vm6652_vm4, %v6640_v1 }
 0x6cc   : > { %v6601_v54 = vpop.xlane.xlu2 %6600 }
 0x6cd   : > { %v6641_v34 = vadd.f32 %v6805_v30, %v6601_v54 }
 0x6cf   : > { %6658 = vst.msk [vmem:[%s10812_s8 + $0x28] sm:$0xff] %vm6652_vm4, %v6641_v34 }
 0x6d4   : > { %v6604_v57 = vpop.xlane.xlu0 %6603 }
 0x6d5   : > { %v6642_v5 = vadd.f32 %v6805_v30, %v6604_v57 }
 0x6d7   : > { %6659 = vst.msk [vmem:[%s10812_s8 + $0x30] sm:$0xff] %vm6652_vm4, %v6642_v5 }
 0x6dc   : > { %v6607_v49 = vpop.xlane.xlu1 %6606 }
 0x6dd   : > { %v6643_v28 = vadd.f32 %v6805_v30, %v6607_v49 }
 0x6df   : > { %6660 = vst.msk [vmem:[%s10812_s8 + $0x38] sm:$0xff] %vm6652_vm4, %v6643_v28 }
 0x6e4   : > { %v6610_v15 = vpop.xlane.xlu2 %6609 }
 0x6e5   : > { %v6644_v8 = vadd.f32 %v6805_v30, %v6610_v15 }
 0x6e7   : > { %6661 = vst.msk [vmem:[%s10812_s8 + $0x40] sm:$0xff] %vm6652_vm4, %v6644_v8 }
 0x6ec   : > { %v6613_v40 = vpop.xlane.xlu0 %6612 }
 0x6ed   : > { %v6645_v50 = vadd.f32 %v6805_v30, %v6613_v40 }
 0x6ef   : > { %6662 = vst.msk [vmem:[%s10812_s8 + $0x48] sm:$0xff] %vm6652_vm4, %v6645_v50 }
 0x6f4   : > { %v6616_v6 = vpop.xlane.xlu1 %6615 }
 0x6f5   : > { %v6646_v56 = vadd.f32 %v6805_v30, %v6616_v6 }
 0x6f7   : > { %6663 = vst.msk [vmem:[%s10812_s8 + $0x50] sm:$0xff] %vm6652_vm4, %v6646_v56 }
 0x6fc   : > { %v6619_v11 = vpop.xlane.xlu2 %6618 }
 0x6fd   : > { %v6647_v35 = vadd.f32 %v6805_v30, %v6619_v11 }
 0x6ff   : > { %6664 = vst.msk [vmem:[%s10812_s8 + $0x58] sm:$0xff] %vm6652_vm4, %v6647_v35 }
 0x704   : > { %v6622_v55 = vpop.xlane.xlu0 %6621 }
 0x705   : > { %v6648_v32 = vadd.f32 %v6805_v30, %v6622_v55 }
 0x707   : > { %6665 = vst.msk [vmem:[%s10812_s8 + $0x60] sm:$0xff] %vm6652_vm4, %v6648_v32 }
 0x70c   : > { %v6625_v46 = vpop.xlane.xlu1 %6624 }
 0x70d   : > { %v6649_v62 = vadd.f32 %v6805_v30, %v6625_v46 }
 0x70f   : > { %6666 = vst.msk [vmem:[%s10812_s8 + $0x68] sm:$0xff] %vm6652_vm4, %v6649_v62 }
 0x714   : > { %v6628_v31 = vpop.xlane.xlu2 %6627 }
 0x715   : > { %v6650_v16 = vadd.f32 %v6805_v30, %v6628_v31 }
 0x717   : > { %6667 = vst.msk [vmem:[%s10812_s8 + $0x70] sm:$0xff] %vm6652_vm4, %v6650_v16 }
 0x71c   : > { %v6631_v37 = vpop.xlane.xlu0 %6630 }
 0x71d   : > { %v6651_v43 = vadd.f32 %v6805_v30, %v6631_v37 }
 0x71f   : > { %6668 = vst.msk [vmem:[%s10812_s8 + $0x78] sm:$0xff] %vm6652_vm4, %v6651_v43 }
 0x720 PF: > { %s23_s11 = sadd.s32 1, %s6881_s11  }
 0x721   : > { %p20_p7 = scmp.ge.s32.totalorder %s23_s11, 4  }
 0x723   :  { %22 = sbr.rel (!%p20_p7) target bundleno = 5 (0x5), region = 98 }
 0x728   :  { %6691 = vsyncpa [#allocation4], 1 }
 0x729   :  { %6693 = vsyncpa [#allocation4 + $0x1], 1 }
 0x72a   :  { %6694 = vsyncpa [#allocation6], 1 }

</bundles_post_ra>
